<compile_context>
chip_gen: v6e
topology: v6e:2x2x1
jax: 0.10.0
libtpu: 0.0.40
codegen_flags: <defaults>
</compile_context>

<pallas_src>
import jax
import jax.numpy as jnp
from jax.experimental import pallas as pl
from jax.experimental.pallas import tpu as pltpu

IN_FEATURES = 64 * 64 * 3   # 12288
HIDDEN = 512
OUT = 1
TK = 4096                   # K-tile for the fc1 reduction (12288 / 4096 = 3 grid steps)


def _disc_kernel(x_ref, w1_ref, b1_ref, w2_ref, b2_ref, out_ref, acc_ref):
    """Grid axis 0 walks the fc1 reduction dimension (K). acc_ref holds the
    (B, HIDDEN) f32 partial matmul result across K-steps; the epilogue (bias,
    LeakyReLU(0.1), fc2, sigmoid) runs on the last step."""
    k = pl.program_id(0)

    @pl.when(k == 0)
    def _():
        acc_ref[...] = jnp.zeros_like(acc_ref)

    # fc1 partial: (B, TK) @ (TK, HIDDEN), accumulated in f32 on the MXU.
    acc_ref[...] += jnp.dot(x_ref[...], w1_ref[...],
                            preferred_element_type=jnp.float32)

    @pl.when(k == pl.num_programs(0) - 1)
    def _():
        h = acc_ref[...] + b1_ref[...]                       # fc1 bias
        h = jnp.where(h > 0, h, jnp.float32(0.1) * h)        # LeakyReLU(0.1)
        logits = jnp.dot(h, w2_ref[...],
                         preferred_element_type=jnp.float32) + b2_ref[...]
        out_ref[...] = jax.nn.sigmoid(logits).astype(out_ref.dtype)


def discriminator_forward(x, w1t, b1, w2, b2):
    """x: (B, 3, 64, 64) f32 (NCHW). w1t: (12288, 512) = fc1.weight.T, b1: (1, 512),
    w2: (512, 1) = fc2.weight.T, b2: (1, 1). Returns (B, 1) f32."""
    B = x.shape[0]
    x_flat = x.reshape(B, -1)                                # (B, 12288), NCHW row-major
    assert x_flat.shape[1] == IN_FEATURES
    n_k = IN_FEATURES // TK

    return pl.pallas_call(
        _disc_kernel,
        out_shape=jax.ShapeDtypeStruct((B, OUT), jnp.float32),
        grid_spec=pltpu.PrefetchScalarGridSpec(
            num_scalar_prefetch=0,
            grid=(n_k,),
            in_specs=[
                pl.BlockSpec((B, TK), lambda k: (0, k)),          # x tile
                pl.BlockSpec((TK, HIDDEN), lambda k: (k, 0)),     # fc1 weight tile (streamed)
                pl.BlockSpec((1, HIDDEN), lambda k: (0, 0)),      # fc1 bias (resident)
                pl.BlockSpec((HIDDEN, OUT), lambda k: (0, 0)),    # fc2 weight (resident)
                pl.BlockSpec((1, OUT), lambda k: (0, 0)),         # fc2 bias (resident)
            ],
            out_specs=pl.BlockSpec((B, OUT), lambda k: (0, 0)),
            scratch_shapes=[pltpu.VMEM((B, HIDDEN), jnp.float32)],
        ),
        compiler_params=pltpu.CompilerParams(
            dimension_semantics=("arbitrary",),      # reduction axis
            vmem_limit_bytes=32 * 1024 * 1024,       # 2 x 8 MiB double-buffered w1 tile + residents
        ),
    )(x_flat, w1t, b1, w2, b2)


def _init_params(key):
    """Deterministic init mimicking PyTorch nn.Linear defaults (U(-1/sqrt(fan_in), +1/sqrt(fan_in)))."""
    k1, k2, k3, k4 = jax.random.split(key, 4)
    bound1 = 1.0 / jnp.sqrt(jnp.float32(IN_FEATURES))
    bound2 = 1.0 / jnp.sqrt(jnp.float32(HIDDEN))
    # Stored pre-transposed: (in, out) so the kernel does x @ W directly.
    w1t = jax.random.uniform(k1, (IN_FEATURES, HIDDEN), jnp.float32, -bound1, bound1)
    b1 = jax.random.uniform(k2, (1, HIDDEN), jnp.float32, -bound1, bound1)
    w2 = jax.random.uniform(k3, (HIDDEN, OUT), jnp.float32, -bound2, bound2)
    b2 = jax.random.uniform(k4, (1, OUT), jnp.float32, -bound2, bound2)
    return w1t, b1, w2, b2


if __name__ == "__main__":
    key = jax.random.PRNGKey(0)
    k_x, k_p = jax.random.split(key)

    B = 2
    x = jax.random.normal(k_x, (B, 3, 64, 64), jnp.float32)   # NCHW, like PyTorch
    w1t, b1, w2, b2 = _init_params(k_p)

    out = discriminator_forward(x, w1t, b1, w2, b2)
    out = jax.block_until_ready(out)
    assert out.shape == (B, 1)

    # Reference: full-f32 math (identical to the kernel's f32 streaming + f32 accumulation).
    h32 = x.reshape(B, -1) @ w1t + b1
    h32 = jnp.where(h32 > 0, h32, 0.1 * h32)
    ref_f32 = jax.nn.sigmoid(h32 @ w2 + b2)
    assert jnp.allclose(out, ref_f32, atol=1e-5, rtol=1e-5), (out, ref_f32)

    print("KERNEL_OK")
</pallas_src>

<mosaic_0001>
module attributes {stable_mosaic.version = 11 : i64} {
  func.func @_disc_kernel(%arg0: i32, %arg1: memref<2x4096xf32, #tpu.memory_space<vmem>>, %arg2: memref<4096x512xf32, #tpu.memory_space<vmem>>, %arg3: memref<1x512xf32, #tpu.memory_space<vmem>>, %arg4: memref<512x1xf32, #tpu.memory_space<vmem>>, %arg5: memref<1x1xf32, #tpu.memory_space<vmem>>, %arg6: memref<2x1xf32, #tpu.memory_space<vmem>>, %arg7: memref<2x512xf32, #tpu.memory_space<vmem>>) attributes {dimension_semantics = [#tpu.dimension_semantics<arbitrary>], iteration_bounds = array<i64: 3>, scalar_prefetch = 0 : i64, scratch_operands = 1 : i64, tpu.core_type = #tpu.core_type<tc>, window_params = [{transform_indices = @transform_0, window_bounds = array<i64: 2, 4096>}, {transform_indices = @transform_1, window_bounds = array<i64: 4096, 512>}, {pipeline_mode = #tpu.pipeline_mode<synchronous>, transform_indices = @transform_2, window_bounds = array<i64: 1, 512>}, {pipeline_mode = #tpu.pipeline_mode<synchronous>, transform_indices = @transform_3, window_bounds = array<i64: 512, 1>}, {pipeline_mode = #tpu.pipeline_mode<synchronous>, transform_indices = @transform_4, window_bounds = array<i64: 1, 1>}, {pipeline_mode = #tpu.pipeline_mode<synchronous>, transform_indices = @transform_5, window_bounds = array<i64: 2, 1>}]} {
    %c0_i32 = arith.constant 0 : i32
    %0 = arith.cmpi eq, %arg0, %c0_i32 : i32
    %1 = arith.extui %0 : i1 to i32
    %c0_i32_0 = arith.constant 0 : i32
    %2 = arith.cmpi ne, %1, %c0_i32_0 : i32
    scf.if %2 {
      %cst_9 = arith.constant 0.000000e+00 : f32
      %12 = vector.broadcast %cst_9 : f32 to vector<2x512xf32>
      %c0_10 = arith.constant 0 : index
      %c0_11 = arith.constant 0 : index
      %13 = vector.load %arg7[%c0_10, %c0_11] : memref<2x512xf32, #tpu.memory_space<vmem>>, vector<2x512xf32>
      tpu.vector_store %arg7[%c0_10, %c0_11], %12 {strides = array<i32>} : memref<2x512xf32, #tpu.memory_space<vmem>>, vector<2x512xf32>,
    } else {
    }
    %c0 = arith.constant 0 : index
    %c0_1 = arith.constant 0 : index
    %3 = vector.load %arg7[%c0, %c0_1] : memref<2x512xf32, #tpu.memory_space<vmem>>, vector<2x512xf32>
    %c0_2 = arith.constant 0 : index
    %c0_3 = arith.constant 0 : index
    %4 = vector.load %arg1[%c0_2, %c0_3] : memref<2x4096xf32, #tpu.memory_space<vmem>>, vector<2x4096xf32>
    %c0_4 = arith.constant 0 : index
    %c0_5 = arith.constant 0 : index
    %5 = vector.load %arg2[%c0_4, %c0_5] : memref<4096x512xf32, #tpu.memory_space<vmem>>, vector<4096x512xf32>
    %cst = arith.constant dense<0.000000e+00> : vector<2x512xf32>
    %6 = tpu.matmul %4, %5, %cst {dimension_numbers = #tpu.dot_dimension_numbers<[1], [0], [0], [1], [0, 0, 1, 1], [], []>} : vector<2x4096xf32>, vector<4096x512xf32>, vector<2x512xf32> -> vector<2x512xf32>
    %7 = arith.addf %3, %6 : vector<2x512xf32>
    %c0_6 = arith.constant 0 : index
    %c0_7 = arith.constant 0 : index
    %8 = vector.load %arg7[%c0_6, %c0_7] : memref<2x512xf32, #tpu.memory_space<vmem>>, vector<2x512xf32>
    tpu.vector_store %arg7[%c0_6, %c0_7], %7 {strides = array<i32>} : memref<2x512xf32, #tpu.memory_space<vmem>>, vector<2x512xf32>,
    %c2_i32 = arith.constant 2 : i32
    %9 = arith.cmpi eq, %arg0, %c2_i32 : i32
    %10 = arith.extui %9 : i1 to i32
    %c0_i32_8 = arith.constant 0 : i32
    %11 = arith.cmpi ne, %10, %c0_i32_8 : i32
    scf.if %11 {
      %c0_9 = arith.constant 0 : index
      %c0_10 = arith.constant 0 : index
      %12 = vector.load %arg7[%c0_9, %c0_10] : memref<2x512xf32, #tpu.memory_space<vmem>>, vector<2x512xf32>
      %c0_11 = arith.constant 0 : index
      %c0_12 = arith.constant 0 : index
      %13 = vector.load %arg3[%c0_11, %c0_12] : memref<1x512xf32, #tpu.memory_space<vmem>>, vector<1x512xf32>
      %14 = vector.broadcast %13 : vector<1x512xf32> to vector<2x512xf32>
      %15 = arith.addf %12, %14 : vector<2x512xf32>
      %cst_13 = arith.constant 0.000000e+00 : f32
      %16 = vector.broadcast %cst_13 : f32 to vector<2x512xf32>
      %17 = arith.cmpf ogt, %15, %16 : vector<2x512xf32>
      %cst_14 = arith.constant 1.000000e-01 : f32
      %18 = vector.broadcast %cst_14 : f32 to vector<2x512xf32>
      %19 = arith.mulf %18, %15 : vector<2x512xf32>
      %20 = arith.select %17, %15, %19 : vector<2x512xi1>, vector<2x512xf32>
      %c0_15 = arith.constant 0 : index
      %c0_16 = arith.constant 0 : index
      %21 = vector.load %arg4[%c0_15, %c0_16] : memref<512x1xf32, #tpu.memory_space<vmem>>, vector<512x1xf32>
      %cst_17 = arith.constant dense<0.000000e+00> : vector<2x1xf32>
      %22 = tpu.matmul %20, %21, %cst_17 {dimension_numbers = #tpu.dot_dimension_numbers<[1], [0], [0], [1], [0, 0, 1, 1], [], []>} : vector<2x512xf32>, vector<512x1xf32>, vector<2x1xf32> -> vector<2x1xf32>
      %c0_18 = arith.constant 0 : index
      %c0_19 = arith.constant 0 : index
      %23 = vector.load %arg5[%c0_18, %c0_19] : memref<1x1xf32, #tpu.memory_space<vmem>>, vector<1x1xf32>
      %24 = vector.broadcast %23 : vector<1x1xf32> to vector<2x1xf32>
      %25 = arith.addf %22, %24 : vector<2x1xf32>
      %26 = arith.negf %25 : vector<2x1xf32>
      %27 = math.exp %26 : vector<2x1xf32>
      %cst_20 = arith.constant 1.000000e+00 : f32
      %28 = vector.broadcast %cst_20 : f32 to vector<2x1xf32>
      %29 = arith.addf %28, %27 : vector<2x1xf32>
      %30 = arith.divf %28, %29 : vector<2x1xf32>
      %c0_21 = arith.constant 0 : index
      %c0_22 = arith.constant 0 : index
      %31 = vector.load %arg6[%c0_21, %c0_22] : memref<2x1xf32, #tpu.memory_space<vmem>>, vector<2x1xf32>
      tpu.vector_store %arg6[%c0_21, %c0_22], %30 {strides = array<i32>} : memref<2x1xf32, #tpu.memory_space<vmem>>, vector<2x1xf32>,
    } else {
    }
    return
  }
  func.func @transform_0(%arg0: i32) -> (i32, i32) {
    %c0_i32 = arith.constant 0 : i32
    %c0_i32_0 = arith.constant 0 : i32
    return %c0_i32, %arg0 : i32, i32
  }
  func.func @transform_1(%arg0: i32) -> (i32, i32) {
    %c0_i32 = arith.constant 0 : i32
    %c0_i32_0 = arith.constant 0 : i32
    return %arg0, %c0_i32 : i32, i32
  }
  func.func @transform_2(%arg0: i32) -> (i32, i32) {
    %c0_i32 = arith.constant 0 : i32
    %c0_i32_0 = arith.constant 0 : i32
    %c0_i32_1 = arith.constant 0 : i32
    return %c0_i32, %c0_i32_0 : i32, i32
  }
  func.func @transform_3(%arg0: i32) -> (i32, i32) {
    %c0_i32 = arith.constant 0 : i32
    %c0_i32_0 = arith.constant 0 : i32
    %c0_i32_1 = arith.constant 0 : i32
    return %c0_i32, %c0_i32_0 : i32, i32
  }
  func.func @transform_4(%arg0: i32) -> (i32, i32) {
    %c0_i32 = arith.constant 0 : i32
    %c0_i32_0 = arith.constant 0 : i32
    %c0_i32_1 = arith.constant 0 : i32
    return %c0_i32, %c0_i32_0 : i32, i32
  }
  func.func @transform_5(%arg0: i32) -> (i32, i32) {
    %c0_i32 = arith.constant 0 : i32
    %c0_i32_0 = arith.constant 0 : i32
    %c0_i32_1 = arith.constant 0 : i32
    return %c0_i32, %c0_i32_0 : i32, i32
  }
}

</mosaic_0001>

<bundles_post_ra>
// kernel: tpu_custom_call.1
= control target key start
LH: loop header
LB: loop body
LE: loop exit
PB: predicated region body
PF: predicated region fallthrough
CT: control target
= control target key end

     0   :  { %s8171_s0 = inlined_call_operand.hbm [shape: f32[2,12288], index: 0, kind: input, shape index: {}]   ;;  %s8172_s1 = inlined_call_operand.hbm [shape: f32[12288,512], index: 1, kind: input, shape index: {}]   ;;  %s8173_s2 = inlined_call_operand.hbm [shape: f32[1,512], index: 2, kind: input, shape index: {}]   ;;  %s8174_s3 = inlined_call_operand.vmem [shape: f32[512,1], index: 3, kind: input, shape index: {}]   ;;  %s8175_s4 = inlined_call_operand.<no memory space> [shape: f32[1,1], index: 4, kind: input, shape index: {}]   ;;  %s8176_s5 = inlined_call_operand.vmem [shape: f32[2,1], index: 5, kind: output, shape index: {}]  }
   0x1   :  { %v10_v0 = vstv %s8175_s4 }
   0x2   :  { %11 = vst [vmem:[#allocation3] sm:$0x1] %v10_v0 }
   0x3   :  { %12 = vsyncpa [#allocation5], 0 }
   0x4   :  { %14 = vsyncpa [#allocation5 + $0x1], 0 }
   0x5   :  { %15 = vsyncpa [#allocation7], 0 }
   0x6   :  { %17 = vsyncpa [#allocation7 + $0x1], 0  ;;  %s5507_s20 = smov 0   ;;  %s5509_s21 = smov 0  }
   0x7   :  { %s5511_s22 = smov 0   ;;  %s5513_s23 = smov 0  }
   0x8 LB: > { %s5526_s4 = sadd.s32 4294967295, %s5465_s23   ;;  %s5529_s24 = sadd.s32 1, %s5465_s23   ;;  %s5465_s23 = sphi %s5513_s23, %s8190_s23   ;;  %s5461_s22 = sphi %s5511_s22, %s8189_s22   ;;  %s5457_s21 = sphi %s5509_s21, %s8188_s21   ;;  %s5453_s20 = sphi %s5507_s20, %s8187_s20  }
   0x9   : > { %s27_s25 = ssub.s32 %s5465_s23, %s5529_s24  ;;  %s30_s26 = sadd.s32 1, %s5461_s22 }
   0xa   : > { %p28_p0 = scmp.eq.s32.totalorder %s27_s25, 0  ;;  %p37_p1 = scmp.ne.s32.totalorder %s5461_s22, %s5457_s21 }
   0xb   : > { %p43_p2 = scmp.ne.s32.totalorder %s5457_s21, %s5453_s20  ;;  %p44_p3 = scmp.eq.s32.totalorder %s5526_s4, 0 }
   0xc   : > { %s5539_s27 = scalar_select %p28_p0, %s5461_s22, %s30_s26  }
   0xd   : > { %p5543_p4 = por %p44_p3, %p43_p2  ;;  %p5177_p5 = scmp.ge.s32.totalorder %s5465_s23, 1 }
   0xe   : > { %p164_p6 = scmp.lt.s32.totalorder %s5465_s23, 4  ;;  %s5467_s30 = smov [#allocation8]  }
   0xf   : > { %s8179_s28 = scalar_select %p5543_p4, 1, 0 }
  0x10   : > { %p5550_p8 = pnand %p5177_p5, %p164_p6  ;;  %s177_s6 = sshll.u32 %s5467_s30, 4  ;;  %s178_s6 = int_to_ptr.vmem [resolvable:$true] %s177_s6 }
  0x11   : > { %p38_p9 = scmp.eq.s32.totalorder %s5465_s23, 0  ;;  %s5566_s8 = sand.u32 1, %s5461_s22  }
  0x12   : > { %s8180_s29 = scalar_select %p5550_p8, 1, 0 }
  0x13   : > { %p5278_p10 = pneg %p5550_p8  ;;  %p5561_p12 = por %p38_p9, %p37_p1 }
  0x14   : > { %s5180_s9 = sshll.u32 %s5566_s8, 6  ;;  %s5197_s10 = sshll.u32 %s5465_s23, 10 }
  0x15   : > { %p5279_p13 = pnand %p5278_p10, %p44_p3  ;;  %s5352_s11 = scalar_lea.vmem %s178_s6, 64 }
  0x16   : > { %p5353_p2 = scmp.ne.s32.totalorder %s178_s6, %s5352_s11  ;;  %p5360_p7 = scmp.lt.s32.totalorder %s178_s6, %s178_s6 }
  0x17   : > { %p5343_p0 = pneg %p5279_p13  ;;  %p5361_p4 = scmp.lt.s32.totalorder %s5352_s11, %s5352_s11 }
  0x19   : > { %p5355_p5 = pnand %p5353_p2, %p5343_p0  ;;  %p5362_p11 = por %p5361_p4, %p5360_p7 }
  0x1b   : > { %p5356_p6 = pneg %p5355_p5 }
  0x1d   : > { %p5363_p8 = pnand %p5362_p11, %p5356_p6 }
  0x1f   : > { %5366 = shalt.err (!%p5363_p8)
}
  0x20   : > { %5281 = dma.hbm_to_vmem [thread:$0]  (!%p5279_p13), %s8173_s2, 64, %s178_s6, [#allocation7]  }
  0x21   : > { %s5578_s16 = scalar_lea.hbm %s8171_s0, %s5197_s10  ;;  %s198_s17 = scalar_lea.vmem [#allocation4], %s5180_s9 }
  0x22   : > { %s206_s18 = sshll.u32 %s198_s17, 4  ;;  %p8182_p1 = scmp.lt.s32.totalorder %s5465_s23, 3  ;;  %s5580_s18 = int_to_ptr.vmem [resolvable:$true] %s206_s18 }
  0x23   : > { %s5183_s20 = sshll.u32 %s5566_s8, 14  ;;  %s213_s25 = sand.u32 1, %s5465_s23  }
  0x24   : > { %p5586_p4 = pnand %p8182_p1, %p5561_p12  ;;  %s195_s26 = scalar_lea.sflag [#allocation5], %s5566_s8 }
  0x25   : > { %s5367_s30 = scalar_lea.hbm %s5578_s16, 1024  ;;  %s5372_s9 = scalar_lea.hbm %s8171_s0, 3072 }
  0x26   : > { %p5368_p7 = scmp.ne.s32.totalorder %s5578_s16, %s5367_s30  ;;  %p5369_p8 = pneg %p5586_p4 }
  0x27   : > { %p5373_p11 = scmp.lt.s32.totalorder %s5578_s16, %s8171_s0  ;;  %p5374_p12 = scmp.lt.s32.totalorder %s5372_s9, %s5367_s30 }
  0x28   : > { %p5370_p9 = pnand %p5369_p8, %p5368_p7 }
  0x29   : > { %p5375_p13 = por %p5374_p12, %p5373_p11 }
  0x2a   : > { %p5371_p10 = pneg %p5370_p9 }
  0x2c   : > { %p5376_p0 = pnand %p5375_p13, %p5371_p10 }
  0x2e   : > { %5379 = shalt.err (!%p5376_p0)
}
  0x2f   : > { %s5380_s12 = scalar_lea.vmem %s5580_s18, 1024  ;;  %s5468_s13 = smov [#allocation4]  }
  0x30   : > { %p5381_p2 = scmp.ne.s32.totalorder %s5580_s18, %s5380_s12  ;;  %s5385_s14 = sshll.u32 %s5468_s13, 4  ;;  %s5386_s14 = int_to_ptr.vmem [resolvable:$false] %s5385_s14 }
  0x31   : > { %s5387_s15 = scalar_lea.vmem %s5386_s14, 2048  ;;  %p5388_p1 = scmp.lt.s32.totalorder %s5580_s18, %s5386_s14 }
  0x32   : > { %p5383_p5 = pnand %p5381_p2, %p5369_p8  ;;  %p5389_p7 = scmp.lt.s32.totalorder %s5387_s15, %s5380_s12 }
  0x34   : > { %p5384_p6 = pneg %p5383_p5  ;;  %p5390_p9 = por %p5389_p7, %p5388_p1 }
  0x36   : > { %p5391_p11 = pnand %p5390_p9, %p5384_p6 }
  0x38   : > { %5394 = shalt.err (!%p5391_p11)
}
  0x39   : > { %5285 = dma.hbm_to_vmem [thread:$0]  (!%p5586_p4), %s5578_s16, 1024, %s5580_s18, %s195_s26  }
  0x3a   : > { %s217_s17 = scalar_lea.vmem [#allocation6], %s5183_s20  ;;  %s5199_s6 = sshll.u32 %s5465_s23, 18 }
  0x3b   : > { %s225_s30 = sshll.u32 %s217_s17, 4  ;;  %s5625_s10 = scalar_lea.hbm %s8172_s1, %s5199_s6  ;;  %s5619_s30 = int_to_ptr.vmem [resolvable:$true] %s225_s30 }
  0x3c   : > { %s5629_s11 = scalar_lea.sflag [#allocation7], %s213_s25  ;;  %s5395_s12 = scalar_lea.hbm %s5625_s10, 262144 }
  0x3d   : > { %p5396_p10 = scmp.ne.s32.totalorder %s5625_s10, %s5395_s12  ;;  %s5400_s18 = scalar_lea.hbm %s8172_s1, 786432 }
  0x3e   : > { %p5401_p0 = scmp.lt.s32.totalorder %s5625_s10, %s8172_s1  ;;  %p5402_p2 = scmp.lt.s32.totalorder %s5400_s18, %s5395_s12 }
  0x3f   : > { %p5398_p12 = pnand %p5396_p10, %p5369_p8 }
  0x40   : > { %p5403_p5 = por %p5402_p2, %p5401_p0 }
  0x41   : > { %p5399_p13 = pneg %p5398_p12 }
  0x43   : > { %p5404_p6 = pnand %p5403_p5, %p5399_p13 }
  0x45   : > { %5407 = shalt.err (!%p5404_p6)
}
  0x46   : > { %s5408_s23 = scalar_lea.vmem %s5619_s30, 262144  ;;  %s5469_s25 = smov [#allocation6]  }
  0x47   : > { %p5409_p1 = scmp.ne.s32.totalorder %s5619_s30, %s5408_s23  ;;  %s5413_s13 = sshll.u32 %s5469_s25, 4  ;;  %s5414_s13 = int_to_ptr.vmem [resolvable:$false] %s5413_s13 }
  0x48   : > { %s5415_s14 = scalar_lea.vmem %s5414_s13, 524288  ;;  %p5416_p11 = scmp.lt.s32.totalorder %s5619_s30, %s5414_s13 }
  0x49   : > { %p5411_p7 = pnand %p5409_p1, %p5369_p8  ;;  %p5417_p10 = scmp.lt.s32.totalorder %s5415_s14, %s5408_s23 }
  0x4b   : > { %p5412_p9 = pneg %p5411_p7  ;;  %p5418_p12 = por %p5417_p10, %p5416_p11 }
  0x4d   : > { %p5419_p0 = pnand %p5418_p12, %p5412_p9 }
  0x4f   : > { %5422 = shalt.err (!%p5419_p0)
}
  0x50   : > { %s5470_s15 = smov 512   ;;  %s5471_s17 = smov 32  }
  0x51   : > { %5288 = dma.hbm_to_vmem [thread:$0]  (!%p5586_p4), %s5625_s10, 262144, %s5619_s30, %s5629_s11, %s5470_s15, %s5470_s15, %s5471_s17  }
  0x52   : > { %p8184_p8 = scmp.ne.s32.totalorder %s8180_s29, 0 }
  0x53   : > { %s239_s6 = sand.u32 (!%p8184_p8), 1, %s5457_s21   ;;  %p8185_p13 = scmp.ne.s32.totalorder (!%p8184_p8), %s8179_s28, 0 }
  0x54   : > { %237 = sbr.rel (%p8184_p8) target bundleno = 1638 (0x666), region = 40  ;;  %s5188_s7 = sshll.u32 (!%p8184_p8), %s239_s6, 6 }
  0x55   : > { %s240_s9 = scalar_lea.sflag (!%p8184_p8), [#allocation5], %s239_s6  ;;  %s5657_s12 = scalar_lea.vmem (!%p8184_p8), [#allocation4], %s5188_s7 }
  0x59   : > { %5440 = dma.done.wait (%p8185_p13), %s240_s9, 1024  }
  0x5a   : > { %5442 = vsyncadd (%p8185_p13), %s240_s9, 4294966272  ;;  %s248_s8 = sand.u32 1, %s5526_s4   ;;  %s5189_s19 = sshll.u32 %s239_s6, 14 }
  0x5b   : > { %s249_s30 = scalar_lea.sflag [#allocation7], %s248_s8  ;;  %s5664_s10 = scalar_lea.vmem [#allocation6], %s5189_s19 }
  0x5c   : > { %5444 = dma.done.wait (%p8185_p13), %s249_s30, 262144  }
  0x5d   : > { %5446 = vsyncadd (%p8185_p13), %s249_s30, 4294705152 }
  0x5e   : > { %5448 = dma.done.wait (%p44_p3), [#allocation7], 64  }
  0x5f   : > { %5450 = vsyncadd (%p44_p3), [#allocation7], 4294967232  ;;  %p8186_p4 = scmp.ne.s32.totalorder %s5526_s4, 0 }
  0x61   : > { %288 = sbr.rel (%p8186_p4) target bundleno = 104 (0x68), region = 56 }
  0x66   : > { %v5472_v1 = vmov 0.0  }
  0x67   : > { %289 = vst [vmem:[#allocation2] sm:$0xff] %v5472_v1 }
  0x68 PF: > { %v360_v2 = vld [vmem:[%s5664_s10 + $0x1e8] sm:$0xff]  ;;  %v359_v4 = vld [vmem:[%s5664_s10 + $0x1e0] sm:$0xff]  ;;  %p5192_p3 = scmp.ne.s32.totalorder %s5526_s4, 2 }
  0x69   : > { %v488_v3 = vld [vmem:[%s5664_s10 + $0x5e8] sm:$0xff]  ;;  %2523 = vmatprep.subr.mxu0 %v360_v2  ;;  %v487_v5 = vld [vmem:[%s5664_s10 + $0x5e0] sm:$0xff] }
  0x6a   : > { %2594 = vmatprep.subr.mxu1 %v488_v3  ;;  %v356_v6 = vld [vmem:[%s5664_s10 + $0x1c8] sm:$0xff]  ;;  %2524 = vmatpush1.msra.mxu0 %v359_v4  ;;  %v355_v8 = vld [vmem:[%s5664_s10 + $0x1c0] sm:$0xff] }
  0x6b   : > { %v484_v7 = vld [vmem:[%s5664_s10 + $0x5c8] sm:$0xff]  ;;  %2595 = vmatpush1.msra.mxu1 %v487_v5  ;;  %v483_v9 = vld [vmem:[%s5664_s10 + $0x5c0] sm:$0xff]  ;;  %2525 = vmatprep.subr.mxu0 %v356_v6 }
  0x6c   : > { %v352_v10 = vld [vmem:[%s5664_s10 + $0x1a8] sm:$0xff]  ;;  %2596 = vmatprep.subr.mxu1 %v484_v7  ;;  %v351_v12 = vld [vmem:[%s5664_s10 + $0x1a0] sm:$0xff]  ;;  %2526 = vmatpush1.msra.mxu0 %v355_v8 }
  0x6d   : > { %v480_v11 = vld [vmem:[%s5664_s10 + $0x5a8] sm:$0xff]  ;;  %v479_v13 = vld [vmem:[%s5664_s10 + $0x5a0] sm:$0xff]  ;;  %2597 = vmatpush1.msra.mxu1 %v483_v9  ;;  %2527 = vmatprep.subr.mxu0 %v352_v10 }
  0x6e   : > { %v348_v14 = vld [vmem:[%s5664_s10 + $0x188] sm:$0xff]  ;;  %2598 = vmatprep.subr.mxu1 %v480_v11  ;;  %v347_v16 = vld [vmem:[%s5664_s10 + $0x180] sm:$0xff]  ;;  %2528 = vmatpush1.msra.mxu0 %v351_v12 }
  0x6f   : > { %v476_v15 = vld [vmem:[%s5664_s10 + $0x588] sm:$0xff]  ;;  %v475_v17 = vld [vmem:[%s5664_s10 + $0x580] sm:$0xff]  ;;  %2599 = vmatpush1.msra.mxu1 %v479_v13  ;;  %2529 = vmatprep.subr.mxu0 %v348_v14 }
  0x70   : > { %v344_v18 = vld [vmem:[%s5664_s10 + $0x168] sm:$0xff]  ;;  %2600 = vmatprep.subr.mxu1 %v476_v15  ;;  %v343_v20 = vld [vmem:[%s5664_s10 + $0x160] sm:$0xff]  ;;  %2530 = vmatpush1.msra.mxu0 %v347_v16 }
  0x71   : > { %v472_v19 = vld [vmem:[%s5664_s10 + $0x568] sm:$0xff]  ;;  %v471_v21 = vld [vmem:[%s5664_s10 + $0x560] sm:$0xff]  ;;  %2601 = vmatpush1.msra.mxu1 %v475_v17  ;;  %2531 = vmatprep.subr.mxu0 %v344_v18 }
  0x72   : > { %v340_v22 = vld [vmem:[%s5664_s10 + $0x148] sm:$0xff]  ;;  %2602 = vmatprep.subr.mxu1 %v472_v19  ;;  %v339_v24 = vld [vmem:[%s5664_s10 + $0x140] sm:$0xff]  ;;  %2532 = vmatpush1.msra.mxu0 %v343_v20 }
  0x73   : > { %v468_v23 = vld [vmem:[%s5664_s10 + $0x548] sm:$0xff]  ;;  %v467_v25 = vld [vmem:[%s5664_s10 + $0x540] sm:$0xff]  ;;  %2603 = vmatpush1.msra.mxu1 %v471_v21  ;;  %2533 = vmatprep.subr.mxu0 %v340_v22 }
  0x74   : > { %v336_v26 = vld [vmem:[%s5664_s10 + $0x128] sm:$0xff]  ;;  %2604 = vmatprep.subr.mxu1 %v468_v23  ;;  %v335_v28 = vld [vmem:[%s5664_s10 + $0x120] sm:$0xff]  ;;  %2534 = vmatpush1.msra.mxu0 %v339_v24 }
  0x75   : > { %v464_v27 = vld [vmem:[%s5664_s10 + $0x528] sm:$0xff]  ;;  %v463_v29 = vld [vmem:[%s5664_s10 + $0x520] sm:$0xff]  ;;  %2605 = vmatpush1.msra.mxu1 %v467_v25  ;;  %2535 = vmatprep.subr.mxu0 %v336_v26 }
  0x76   : > { %v332_v30 = vld [vmem:[%s5664_s10 + $0x108] sm:$0xff]  ;;  %2606 = vmatprep.subr.mxu1 %v464_v27  ;;  %v331_v32 = vld [vmem:[%s5664_s10 + $0x100] sm:$0xff]  ;;  %2536 = vmatpush1.msra.mxu0 %v335_v28 }
  0x77   : > { %v460_v31 = vld [vmem:[%s5664_s10 + $0x508] sm:$0xff]  ;;  %v459_v33 = vld [vmem:[%s5664_s10 + $0x500] sm:$0xff]  ;;  %2607 = vmatpush1.msra.mxu1 %v463_v29  ;;  %2537 = vmatprep.subr.mxu0 %v332_v30 }
  0x78   : > { %v328_v34 = vld [vmem:[%s5664_s10 + $0xe8] sm:$0xff]  ;;  %2608 = vmatprep.subr.mxu1 %v460_v31  ;;  %v327_v36 = vld [vmem:[%s5664_s10 + $0xe0] sm:$0xff]  ;;  %2538 = vmatpush1.msra.mxu0 %v331_v32  ;;  %v5473_v32 = vmov 1983009808  }
  0x79   : > { %v456_v35 = vld [vmem:[%s5664_s10 + $0x4e8] sm:$0xff]  ;;  %v455_v37 = vld [vmem:[%s5664_s10 + $0x4e0] sm:$0xff]  ;;  %2609 = vmatpush1.msra.mxu1 %v459_v33  ;;  %2539 = vmatprep.subr.mxu0 %v328_v34  ;;  %v2357_v33 = vunpack.c.l.s4 %v5473_v32  ;;  %v2359_v34 = vlaneseq }
  0x7a   : > { %v324_v38 = vld [vmem:[%s5664_s10 + $0xc8] sm:$0xff]  ;;  %2610 = vmatprep.subr.mxu1 %v456_v35  ;;  %v323_v40 = vld [vmem:[%s5664_s10 + $0xc0] sm:$0xff]  ;;  %2540 = vmatpush1.msra.mxu0 %v327_v36 }
  0x7b   : > { %v452_v39 = vld [vmem:[%s5664_s10 + $0x4c8] sm:$0xff]  ;;  %v451_v41 = vld [vmem:[%s5664_s10 + $0x4c0] sm:$0xff]  ;;  %2611 = vmatpush1.msra.mxu1 %v455_v37  ;;  %2541 = vmatprep.subr.mxu0 %v324_v38 }
  0x7c   : > { %v320_v42 = vld [vmem:[%s5664_s10 + $0xa8] sm:$0xff]  ;;  %2612 = vmatprep.subr.mxu1 %v452_v39  ;;  %v319_v44 = vld [vmem:[%s5664_s10 + $0xa0] sm:$0xff]  ;;  %2542 = vmatpush1.msra.mxu0 %v323_v40 }
  0x7d   : > { %v448_v43 = vld [vmem:[%s5664_s10 + $0x4a8] sm:$0xff]  ;;  %v447_v45 = vld [vmem:[%s5664_s10 + $0x4a0] sm:$0xff]  ;;  %2613 = vmatpush1.msra.mxu1 %v451_v41  ;;  %2543 = vmatprep.subr.mxu0 %v320_v42 }
  0x7e   : > { %v316_v46 = vld [vmem:[%s5664_s10 + $0x88] sm:$0xff]  ;;  %2614 = vmatprep.subr.mxu1 %v448_v43  ;;  %v315_v48 = vld [vmem:[%s5664_s10 + $0x80] sm:$0xff]  ;;  %2544 = vmatpush1.msra.mxu0 %v319_v44  ;;  %v2358_v43 = vunpack.c.0.s8 %v2357_v33  ;;  %v5778_v44 = vshrl.u32 %v2359_v34, 7 }
  0x7f   : > { %v444_v47 = vld [vmem:[%s5664_s10 + $0x488] sm:$0xff]  ;;  %v443_v49 = vld [vmem:[%s5664_s10 + $0x480] sm:$0xff]  ;;  %2615 = vmatpush1.msra.mxu1 %v447_v45  ;;  %2545 = vmatprep.subr.mxu0 %v316_v46 }
  0x80   : > { %v312_v50 = vld [vmem:[%s5664_s10 + $0x68] sm:$0xff]  ;;  %2616 = vmatprep.subr.mxu1 %v444_v47  ;;  %v311_v52 = vld [vmem:[%s5664_s10 + $0x60] sm:$0xff]  ;;  %2546 = vmatpush1.msra.mxu0 %v315_v48 }
  0x81   : > { %v440_v51 = vld [vmem:[%s5664_s10 + $0x468] sm:$0xff]  ;;  %v439_v53 = vld [vmem:[%s5664_s10 + $0x460] sm:$0xff]  ;;  %2617 = vmatpush1.msra.mxu1 %v443_v49  ;;  %2547 = vmatprep.subr.mxu0 %v312_v50 }
  0x82   : > { %v308_v54 = vld [vmem:[%s5664_s10 + $0x48] sm:$0xff]  ;;  %2618 = vmatprep.subr.mxu1 %v440_v51  ;;  %v307_v56 = vld [vmem:[%s5664_s10 + $0x40] sm:$0xff]  ;;  %2548 = vmatpush1.msra.mxu0 %v311_v52 }
  0x83   : > { %v436_v55 = vld [vmem:[%s5664_s10 + $0x448] sm:$0xff]  ;;  %v435_v57 = vld [vmem:[%s5664_s10 + $0x440] sm:$0xff]  ;;  %2619 = vmatpush1.msra.mxu1 %v439_v53  ;;  %2549 = vmatprep.subr.mxu0 %v308_v54  ;;  %v5790_v54 = vsub.s32 %v2358_v43, %v5778_v44 }
  0x84   : > { %v304_v58 = vld [vmem:[%s5664_s10 + $0x28] sm:$0xff]  ;;  %2620 = vmatprep.subr.mxu1 %v436_v55  ;;  %v303_v60 = vld [vmem:[%s5664_s10 + $0x20] sm:$0xff]  ;;  %2550 = vmatpush1.msra.mxu0 %v307_v56 }
  0x85   : > { %v432_v59 = vld [vmem:[%s5664_s10 + $0x428] sm:$0xff]  ;;  %v431_v61 = vld [vmem:[%s5664_s10 + $0x420] sm:$0xff]  ;;  %2621 = vmatpush1.msra.mxu1 %v435_v57  ;;  %2551 = vmatprep.subr.mxu0 %v304_v58 }
  0x86   : > { %v300_v62 = vld [vmem:[%s5664_s10 + $0x8] sm:$0xff]  ;;  %2622 = vmatprep.subr.mxu1 %v432_v59  ;;  %v299_v0 = vld [vmem:[%s5664_s10] sm:$0xff]  ;;  %2552 = vmatpush1.msra.mxu0 %v303_v60 }
  0x87   : > { %v428_v63 = vld [vmem:[%s5664_s10 + $0x408] sm:$0xff]  ;;  %v427_v1 = vld [vmem:[%s5664_s10 + $0x400] sm:$0xff]  ;;  %2623 = vmatpush1.msra.mxu1 %v431_v61  ;;  %2553 = vmatprep.subr.mxu0 %v300_v62 }
  0x88   : > { %v424_v2 = vld [vmem:[%s5664_s10 + $0x3e8] sm:$0xff]  ;;  %2624 = vmatprep.subr.mxu1 %v428_v63  ;;  %v423_v4 = vld [vmem:[%s5664_s10 + $0x3e0] sm:$0xff]  ;;  %2554 = vmatpush1.msra.mxu0 %v299_v0 }
  0x89   : > { %v552_v3 = vld [vmem:[%s5664_s10 + $0x7e8] sm:$0xff]  ;;  %v551_v5 = vld [vmem:[%s5664_s10 + $0x7e0] sm:$0xff]  ;;  %2625 = vmatpush1.msra.mxu1 %v427_v1  ;;  %2555 = vmatprep.subr.mxu0 %v424_v2 }
  0x8a   : > { %v420_v6 = vld [vmem:[%s5664_s10 + $0x3c8] sm:$0xff]  ;;  %2626 = vmatprep.subr.mxu1 %v552_v3  ;;  %v419_v8 = vld [vmem:[%s5664_s10 + $0x3c0] sm:$0xff]  ;;  %2556 = vmatpush2.msra.mxu0 %v423_v4 }
  0x8b   : > { %v548_v7 = vld [vmem:[%s5664_s10 + $0x7c8] sm:$0xff]  ;;  %v547_v9 = vld [vmem:[%s5664_s10 + $0x7c0] sm:$0xff]  ;;  %2627 = vmatpush2.msra.mxu1 %v551_v5  ;;  %2557 = vmatprep.subr.mxu0 %v420_v6 }
  0x8c   : > { %v416_v10 = vld [vmem:[%s5664_s10 + $0x3a8] sm:$0xff]  ;;  %2628 = vmatprep.subr.mxu1 %v548_v7  ;;  %v415_v12 = vld [vmem:[%s5664_s10 + $0x3a0] sm:$0xff]  ;;  %2558 = vmatpush2.msra.mxu0 %v419_v8 }
  0x8d   : > { %v544_v11 = vld [vmem:[%s5664_s10 + $0x7a8] sm:$0xff]  ;;  %v543_v13 = vld [vmem:[%s5664_s10 + $0x7a0] sm:$0xff]  ;;  %2629 = vmatpush2.msra.mxu1 %v547_v9  ;;  %2559 = vmatprep.subr.mxu0 %v416_v10 }
  0x8e   : > { %v412_v14 = vld [vmem:[%s5664_s10 + $0x388] sm:$0xff]  ;;  %2630 = vmatprep.subr.mxu1 %v544_v11  ;;  %v411_v16 = vld [vmem:[%s5664_s10 + $0x380] sm:$0xff]  ;;  %2560 = vmatpush2.msra.mxu0 %v415_v12 }
  0x8f   : > { %v540_v15 = vld [vmem:[%s5664_s10 + $0x788] sm:$0xff]  ;;  %v539_v17 = vld [vmem:[%s5664_s10 + $0x780] sm:$0xff]  ;;  %2631 = vmatpush2.msra.mxu1 %v543_v13  ;;  %2561 = vmatprep.subr.mxu0 %v412_v14 }
  0x90   : > { %v408_v18 = vld [vmem:[%s5664_s10 + $0x368] sm:$0xff]  ;;  %2632 = vmatprep.subr.mxu1 %v540_v15  ;;  %v407_v20 = vld [vmem:[%s5664_s10 + $0x360] sm:$0xff]  ;;  %2562 = vmatpush2.msra.mxu0 %v411_v16 }
  0x91   : > { %v536_v19 = vld [vmem:[%s5664_s10 + $0x768] sm:$0xff]  ;;  %v535_v21 = vld [vmem:[%s5664_s10 + $0x760] sm:$0xff]  ;;  %2633 = vmatpush2.msra.mxu1 %v539_v17  ;;  %2563 = vmatprep.subr.mxu0 %v408_v18 }
  0x92   : > { %v404_v22 = vld [vmem:[%s5664_s10 + $0x348] sm:$0xff]  ;;  %2634 = vmatprep.subr.mxu1 %v536_v19  ;;  %v403_v24 = vld [vmem:[%s5664_s10 + $0x340] sm:$0xff]  ;;  %2564 = vmatpush2.msra.mxu0 %v407_v20 }
  0x93   : > { %v532_v23 = vld [vmem:[%s5664_s10 + $0x748] sm:$0xff]  ;;  %v531_v25 = vld [vmem:[%s5664_s10 + $0x740] sm:$0xff]  ;;  %2635 = vmatpush2.msra.mxu1 %v535_v21  ;;  %2565 = vmatprep.subr.mxu0 %v404_v22 }
  0x94   : > { %v400_v26 = vld [vmem:[%s5664_s10 + $0x328] sm:$0xff]  ;;  %2636 = vmatprep.subr.mxu1 %v532_v23  ;;  %v399_v28 = vld [vmem:[%s5664_s10 + $0x320] sm:$0xff]  ;;  %2566 = vmatpush2.msra.mxu0 %v403_v24 }
  0x95   : > { %v528_v27 = vld [vmem:[%s5664_s10 + $0x728] sm:$0xff]  ;;  %v527_v29 = vld [vmem:[%s5664_s10 + $0x720] sm:$0xff]  ;;  %2637 = vmatpush2.msra.mxu1 %v531_v25  ;;  %2567 = vmatprep.subr.mxu0 %v400_v26 }
  0x96   : > { %v396_v30 = vld [vmem:[%s5664_s10 + $0x308] sm:$0xff]  ;;  %2638 = vmatprep.subr.mxu1 %v528_v27  ;;  %v395_v35 = vld [vmem:[%s5664_s10 + $0x300] sm:$0xff]  ;;  %2568 = vmatpush2.msra.mxu0 %v399_v28 }
  0x97   : > { %v524_v31 = vld [vmem:[%s5664_s10 + $0x708] sm:$0xff]  ;;  %v523_v36 = vld [vmem:[%s5664_s10 + $0x700] sm:$0xff]  ;;  %2639 = vmatpush2.msra.mxu1 %v527_v29  ;;  %2569 = vmatprep.subr.mxu0 %v396_v30 }
  0x98   : > { %v392_v37 = vld [vmem:[%s5664_s10 + $0x2e8] sm:$0xff]  ;;  %2640 = vmatprep.subr.mxu1 %v524_v31  ;;  %v391_v39 = vld [vmem:[%s5664_s10 + $0x2e0] sm:$0xff]  ;;  %2570 = vmatpush2.msra.mxu0 %v395_v35 }
  0x99   : > { %v520_v38 = vld [vmem:[%s5664_s10 + $0x6e8] sm:$0xff]  ;;  %v519_v40 = vld [vmem:[%s5664_s10 + $0x6e0] sm:$0xff]  ;;  %2641 = vmatpush2.msra.mxu1 %v523_v36  ;;  %2571 = vmatprep.subr.mxu0 %v392_v37 }
  0x9a   : > { %v388_v41 = vld [vmem:[%s5664_s10 + $0x2c8] sm:$0xff]  ;;  %2642 = vmatprep.subr.mxu1 %v520_v38  ;;  %v387_v45 = vld [vmem:[%s5664_s10 + $0x2c0] sm:$0xff]  ;;  %2572 = vmatpush2.msra.mxu0 %v391_v39 }
  0x9b   : > { %v516_v42 = vld [vmem:[%s5664_s10 + $0x6c8] sm:$0xff]  ;;  %v515_v46 = vld [vmem:[%s5664_s10 + $0x6c0] sm:$0xff]  ;;  %2643 = vmatpush2.msra.mxu1 %v519_v40  ;;  %2573 = vmatprep.subr.mxu0 %v388_v41 }
  0x9c   : > { %v384_v47 = vld [vmem:[%s5664_s10 + $0x2a8] sm:$0xff]  ;;  %v291_v49 = vld [vmem:[%s5657_s12] sm:$0xff]  ;;  %2644 = vmatprep.subr.mxu1 %v516_v42  ;;  %2574 = vmatpush2.msra.mxu0 %v387_v45 }
  0x9d   : > { %v512_v48 = vld [vmem:[%s5664_s10 + $0x6a8] sm:$0xff]  ;;  %v383_v50 = vld [vmem:[%s5664_s10 + $0x2a0] sm:$0xff]  ;;  %2645 = vmatpush2.msra.mxu1 %v515_v46  ;;  %2575 = vmatprep.subr.mxu0 %v384_v47  ;;  %v2355_v57 = vcombine.high %v291_v49, %v291_v49  ;;  %v5801_v0 = vrot.slane %v291_v49, %v5790_v54 }
  0x9e   : > { %v511_v51 = vld [vmem:[%s5664_s10 + $0x6a0] sm:$0xff]  ;;  %v380_v52 = vld [vmem:[%s5664_s10 + $0x288] sm:$0xff]  ;;  %2646 = vmatprep.subr.mxu1 %v512_v48  ;;  %2576 = vmatpush2.msra.mxu0 %v383_v50 }
  0x9f   : > { %v508_v53 = vld [vmem:[%s5664_s10 + $0x688] sm:$0xff]  ;;  %v379_v55 = vld [vmem:[%s5664_s10 + $0x280] sm:$0xff]  ;;  %2647 = vmatpush2.msra.mxu1 %v511_v51  ;;  %2577 = vmatprep.subr.mxu0 %v380_v52  ;;  %v5806_v3 = vrot.slane %v2355_v57, %v5790_v54  ;;  %v5816_v10 = vcombine.high %v5801_v0, %v5801_v0 }
  0xa0   : > { %v507_v56 = vld [vmem:[%s5664_s10 + $0x680] sm:$0xff]  ;;  %v376_v58 = vld [vmem:[%s5664_s10 + $0x268] sm:$0xff]  ;;  %2648 = vmatprep.subr.mxu1 %v508_v53  ;;  %2578 = vmatpush2.msra.mxu0 %v379_v55 }
  0xa1   : > { %v504_v59 = vld [vmem:[%s5664_s10 + $0x668] sm:$0xff]  ;;  %v375_v60 = vld [vmem:[%s5664_s10 + $0x260] sm:$0xff]  ;;  %2649 = vmatpush2.msra.mxu1 %v507_v56  ;;  %2579 = vmatprep.subr.mxu0 %v376_v58  ;;  %v5821_v12 = vcombine.high %v5806_v3, %v5806_v3 }
  0xa2   : > { %v503_v61 = vld [vmem:[%s5664_s10 + $0x660] sm:$0xff]  ;;  %v372_v62 = vld [vmem:[%s5664_s10 + $0x248] sm:$0xff]  ;;  %2650 = vmatprep.subr.mxu1 %v504_v59  ;;  %2580 = vmatpush2.msra.mxu0 %v375_v60 }
  0xa3   : > { %v500_v63 = vld [vmem:[%s5664_s10 + $0x648] sm:$0xff]  ;;  %v371_v1 = vld [vmem:[%s5664_s10 + $0x240] sm:$0xff]  ;;  %2651 = vmatpush2.msra.mxu1 %v503_v61  ;;  %2581 = vmatprep.subr.mxu0 %v372_v62 }
  0xa4   : > { %v499_v2 = vld [vmem:[%s5664_s10 + $0x640] sm:$0xff]  ;;  %v368_v4 = vld [vmem:[%s5664_s10 + $0x228] sm:$0xff]  ;;  %2652 = vmatprep.subr.mxu1 %v500_v63  ;;  %2582 = vmatpush2.msra.mxu0 %v371_v1 }
  0xa5   : > { %v496_v5 = vld [vmem:[%s5664_s10 + $0x628] sm:$0xff]  ;;  %v367_v6 = vld [vmem:[%s5664_s10 + $0x220] sm:$0xff]  ;;  %2653 = vmatpush2.msra.mxu1 %v499_v2  ;;  %2583 = vmatprep.subr.mxu0 %v368_v4 }
  0xa6   : > { %v495_v7 = vld [vmem:[%s5664_s10 + $0x620] sm:$0xff]  ;;  %v364_v8 = vld [vmem:[%s5664_s10 + $0x208] sm:$0xff]  ;;  %2654 = vmatprep.subr.mxu1 %v496_v5  ;;  %2584 = vmatpush2.msra.mxu0 %v367_v6 }
  0xa7   : > { %v492_v9 = vld [vmem:[%s5664_s10 + $0x608] sm:$0xff]  ;;  %v363_v11 = vld [vmem:[%s5664_s10 + $0x200] sm:$0xff]  ;;  %2655 = vmatpush2.msra.mxu1 %v495_v7  ;;  %2585 = vmatprep.subr.mxu0 %v364_v8 }
  0xa8   : > { %v491_v13 = vld [vmem:[%s5664_s10 + $0x600] sm:$0xff]  ;;  %2656 = vmatprep.subr.mxu1 %v492_v9  ;;  %2586 = vmatpush2.msra.mxu0 %v363_v11  ;;  %v616_v14 = vld [vmem:[%s5664_s10 + $0x9e8] sm:$0xff] }
  0xa9   : > { %2587 = vmatprep.mubr.f32.mxu0 %v5816_v10  ;;  %v744_v15 = vld [vmem:[%s5664_s10 + $0xde8] sm:$0xff]  ;;  %2657 = vmatpush2.msra.mxu1 %v491_v13  ;;  %v615_v16 = vld [vmem:[%s5664_s10 + $0x9e0] sm:$0xff] }
  0xaa   : > { %2658 = vmatprep.mubr.f32.mxu1 %v5821_v12  ;;  %v743_v17 = vld [vmem:[%s5664_s10 + $0xde0] sm:$0xff]  ;;  %2588 = vmatmul.mubr.f32.vlgmr.msra.gmra.mxu0 %v5801_v0  ;;  %v612_v18 = vld [vmem:[%s5664_s10 + $0x9c8] sm:$0xff] }
  0xab   : > { %2659 = vmatmul.mubr.f32.vlgmr.msra.gmra.mxu1 %v5806_v3  ;;  %v740_v19 = vld [vmem:[%s5664_s10 + $0xdc8] sm:$0xff]  ;;  %2665 = vmatprep.subr.mxu0 %v616_v14  ;;  %v611_v20 = vld [vmem:[%s5664_s10 + $0x9c0] sm:$0xff] }
  0xac   : > { %2736 = vmatprep.subr.mxu1 %v744_v15  ;;  %v739_v21 = vld [vmem:[%s5664_s10 + $0xdc0] sm:$0xff]  ;;  %2666 = vmatpush1.msra.mxu0 %v615_v16  ;;  %v608_v22 = vld [vmem:[%s5664_s10 + $0x9a8] sm:$0xff] }
  0xad   : > { %2737 = vmatpush1.msra.mxu1 %v743_v17  ;;  %v736_v23 = vld [vmem:[%s5664_s10 + $0xda8] sm:$0xff]  ;;  %2667 = vmatprep.subr.mxu0 %v612_v18  ;;  %v607_v24 = vld [vmem:[%s5664_s10 + $0x9a0] sm:$0xff] }
  0xae   : > { %2738 = vmatprep.subr.mxu1 %v740_v19  ;;  %v735_v25 = vld [vmem:[%s5664_s10 + $0xda0] sm:$0xff]  ;;  %2668 = vmatpush1.msra.mxu0 %v611_v20  ;;  %v604_v26 = vld [vmem:[%s5664_s10 + $0x988] sm:$0xff] }
  0xaf   : > { %2739 = vmatpush1.msra.mxu1 %v739_v21  ;;  %v732_v27 = vld [vmem:[%s5664_s10 + $0xd88] sm:$0xff]  ;;  %2669 = vmatprep.subr.mxu0 %v608_v22  ;;  %v603_v28 = vld [vmem:[%s5664_s10 + $0x980] sm:$0xff] }
  0xb0   : > { %2740 = vmatprep.subr.mxu1 %v736_v23  ;;  %v731_v29 = vld [vmem:[%s5664_s10 + $0xd80] sm:$0xff]  ;;  %2670 = vmatpush1.msra.mxu0 %v607_v24  ;;  %v600_v30 = vld [vmem:[%s5664_s10 + $0x968] sm:$0xff] }
  0xb1   : > { %2741 = vmatpush1.msra.mxu1 %v735_v25  ;;  %v728_v31 = vld [vmem:[%s5664_s10 + $0xd68] sm:$0xff]  ;;  %2671 = vmatprep.subr.mxu0 %v604_v26  ;;  %v599_v32 = vld [vmem:[%s5664_s10 + $0x960] sm:$0xff] }
  0xb2   : > { %2742 = vmatprep.subr.mxu1 %v732_v27  ;;  %v727_v33 = vld [vmem:[%s5664_s10 + $0xd60] sm:$0xff]  ;;  %2672 = vmatpush1.msra.mxu0 %v603_v28  ;;  %v596_v34 = vld [vmem:[%s5664_s10 + $0x948] sm:$0xff] }
  0xb3   : > { %2743 = vmatpush1.msra.mxu1 %v731_v29  ;;  %v724_v35 = vld [vmem:[%s5664_s10 + $0xd48] sm:$0xff]  ;;  %2673 = vmatprep.subr.mxu0 %v600_v30  ;;  %v595_v36 = vld [vmem:[%s5664_s10 + $0x940] sm:$0xff] }
  0xb4   : > { %2744 = vmatprep.subr.mxu1 %v728_v31  ;;  %v723_v37 = vld [vmem:[%s5664_s10 + $0xd40] sm:$0xff]  ;;  %2674 = vmatpush1.msra.mxu0 %v599_v32  ;;  %v592_v38 = vld [vmem:[%s5664_s10 + $0x928] sm:$0xff] }
  0xb5   : > { %2745 = vmatpush1.msra.mxu1 %v727_v33  ;;  %v720_v39 = vld [vmem:[%s5664_s10 + $0xd28] sm:$0xff]  ;;  %2675 = vmatprep.subr.mxu0 %v596_v34  ;;  %v591_v40 = vld [vmem:[%s5664_s10 + $0x920] sm:$0xff] }
  0xb6   : > { %2746 = vmatprep.subr.mxu1 %v724_v35  ;;  %v719_v41 = vld [vmem:[%s5664_s10 + $0xd20] sm:$0xff]  ;;  %2676 = vmatpush1.msra.mxu0 %v595_v36  ;;  %v588_v42 = vld [vmem:[%s5664_s10 + $0x908] sm:$0xff] }
  0xb7   : > { %2747 = vmatpush1.msra.mxu1 %v723_v37  ;;  %v716_v43 = vld [vmem:[%s5664_s10 + $0xd08] sm:$0xff]  ;;  %2677 = vmatprep.subr.mxu0 %v592_v38  ;;  %v587_v45 = vld [vmem:[%s5664_s10 + $0x900] sm:$0xff] }
  0xb8   : > { %2748 = vmatprep.subr.mxu1 %v720_v39  ;;  %v715_v46 = vld [vmem:[%s5664_s10 + $0xd00] sm:$0xff]  ;;  %2678 = vmatpush1.msra.mxu0 %v591_v40  ;;  %v584_v47 = vld [vmem:[%s5664_s10 + $0x8e8] sm:$0xff] }
  0xb9   : > { %2749 = vmatpush1.msra.mxu1 %v719_v41  ;;  %v712_v48 = vld [vmem:[%s5664_s10 + $0xce8] sm:$0xff]  ;;  %2679 = vmatprep.subr.mxu0 %v588_v42  ;;  %v583_v49 = vld [vmem:[%s5664_s10 + $0x8e0] sm:$0xff] }
  0xba   : > { %2750 = vmatprep.subr.mxu1 %v716_v43  ;;  %v711_v50 = vld [vmem:[%s5664_s10 + $0xce0] sm:$0xff]  ;;  %2680 = vmatpush1.msra.mxu0 %v587_v45  ;;  %v580_v51 = vld [vmem:[%s5664_s10 + $0x8c8] sm:$0xff] }
  0xbb   : > { %2751 = vmatpush1.msra.mxu1 %v715_v46  ;;  %v708_v52 = vld [vmem:[%s5664_s10 + $0xcc8] sm:$0xff]  ;;  %2681 = vmatprep.subr.mxu0 %v584_v47  ;;  %v579_v53 = vld [vmem:[%s5664_s10 + $0x8c0] sm:$0xff] }
  0xbc   : > { %2752 = vmatprep.subr.mxu1 %v712_v48  ;;  %v707_v55 = vld [vmem:[%s5664_s10 + $0xcc0] sm:$0xff]  ;;  %2682 = vmatpush1.msra.mxu0 %v583_v49  ;;  %v576_v56 = vld [vmem:[%s5664_s10 + $0x8a8] sm:$0xff] }
  0xbd   : > { %2753 = vmatpush1.msra.mxu1 %v711_v50  ;;  %v704_v57 = vld [vmem:[%s5664_s10 + $0xca8] sm:$0xff]  ;;  %2683 = vmatprep.subr.mxu0 %v580_v51  ;;  %v575_v58 = vld [vmem:[%s5664_s10 + $0x8a0] sm:$0xff] }
  0xbe   : > { %2754 = vmatprep.subr.mxu1 %v708_v52  ;;  %v703_v59 = vld [vmem:[%s5664_s10 + $0xca0] sm:$0xff]  ;;  %2684 = vmatpush1.msra.mxu0 %v579_v53  ;;  %v572_v60 = vld [vmem:[%s5664_s10 + $0x888] sm:$0xff] }
  0xbf   : > { %2755 = vmatpush1.msra.mxu1 %v707_v55  ;;  %v700_v61 = vld [vmem:[%s5664_s10 + $0xc88] sm:$0xff]  ;;  %2685 = vmatprep.subr.mxu0 %v576_v56  ;;  %v571_v62 = vld [vmem:[%s5664_s10 + $0x880] sm:$0xff] }
  0xc0   : > { %2756 = vmatprep.subr.mxu1 %v704_v57  ;;  %v699_v63 = vld [vmem:[%s5664_s10 + $0xc80] sm:$0xff]  ;;  %2686 = vmatpush1.msra.mxu0 %v575_v58  ;;  %v568_v1 = vld [vmem:[%s5664_s10 + $0x868] sm:$0xff] }
  0xc1   : > { %2757 = vmatpush1.msra.mxu1 %v703_v59  ;;  %v696_v2 = vld [vmem:[%s5664_s10 + $0xc68] sm:$0xff]  ;;  %2687 = vmatprep.subr.mxu0 %v572_v60  ;;  %v567_v4 = vld [vmem:[%s5664_s10 + $0x860] sm:$0xff] }
  0xc2   : > { %2758 = vmatprep.subr.mxu1 %v700_v61  ;;  %v695_v5 = vld [vmem:[%s5664_s10 + $0xc60] sm:$0xff]  ;;  %2688 = vmatpush1.msra.mxu0 %v571_v62  ;;  %v564_v6 = vld [vmem:[%s5664_s10 + $0x848] sm:$0xff] }
  0xc3   : > { %2759 = vmatpush1.msra.mxu1 %v699_v63  ;;  %v692_v7 = vld [vmem:[%s5664_s10 + $0xc48] sm:$0xff]  ;;  %2689 = vmatprep.subr.mxu0 %v568_v1  ;;  %v563_v8 = vld [vmem:[%s5664_s10 + $0x840] sm:$0xff] }
  0xc4   : > { %2760 = vmatprep.subr.mxu1 %v696_v2  ;;  %v691_v9 = vld [vmem:[%s5664_s10 + $0xc40] sm:$0xff]  ;;  %2690 = vmatpush1.msra.mxu0 %v567_v4  ;;  %v560_v11 = vld [vmem:[%s5664_s10 + $0x828] sm:$0xff] }
  0xc5   : > { %2761 = vmatpush1.msra.mxu1 %v695_v5  ;;  %v688_v13 = vld [vmem:[%s5664_s10 + $0xc28] sm:$0xff]  ;;  %2691 = vmatprep.subr.mxu0 %v564_v6  ;;  %v559_v14 = vld [vmem:[%s5664_s10 + $0x820] sm:$0xff] }
  0xc6   : > { %2762 = vmatprep.subr.mxu1 %v692_v7  ;;  %v687_v15 = vld [vmem:[%s5664_s10 + $0xc20] sm:$0xff]  ;;  %2692 = vmatpush1.msra.mxu0 %v563_v8  ;;  %v556_v16 = vld [vmem:[%s5664_s10 + $0x808] sm:$0xff] }
  0xc7   : > { %2763 = vmatpush1.msra.mxu1 %v691_v9  ;;  %v684_v17 = vld [vmem:[%s5664_s10 + $0xc08] sm:$0xff]  ;;  %2693 = vmatprep.subr.mxu0 %v560_v11  ;;  %v555_v18 = vld [vmem:[%s5664_s10 + $0x800] sm:$0xff] }
  0xc8   : > { %2764 = vmatprep.subr.mxu1 %v688_v13  ;;  %v683_v19 = vld [vmem:[%s5664_s10 + $0xc00] sm:$0xff]  ;;  %2694 = vmatpush1.msra.mxu0 %v559_v14  ;;  %v680_v20 = vld [vmem:[%s5664_s10 + $0xbe8] sm:$0xff] }
  0xc9   : > { %2765 = vmatpush1.msra.mxu1 %v687_v15  ;;  %v808_v21 = vld [vmem:[%s5664_s10 + $0xfe8] sm:$0xff]  ;;  %2695 = vmatprep.subr.mxu0 %v556_v16  ;;  %v679_v22 = vld [vmem:[%s5664_s10 + $0xbe0] sm:$0xff] }
  0xca   : > { %2766 = vmatprep.subr.mxu1 %v684_v17  ;;  %v807_v23 = vld [vmem:[%s5664_s10 + $0xfe0] sm:$0xff]  ;;  %2696 = vmatpush1.msra.mxu0 %v555_v18  ;;  %v676_v24 = vld [vmem:[%s5664_s10 + $0xbc8] sm:$0xff] }
  0xcb   : > { %2767 = vmatpush1.msra.mxu1 %v683_v19  ;;  %v804_v25 = vld [vmem:[%s5664_s10 + $0xfc8] sm:$0xff]  ;;  %2697 = vmatprep.subr.mxu0 %v680_v20  ;;  %v675_v26 = vld [vmem:[%s5664_s10 + $0xbc0] sm:$0xff] }
  0xcc   : > { %2768 = vmatprep.subr.mxu1 %v808_v21  ;;  %v803_v27 = vld [vmem:[%s5664_s10 + $0xfc0] sm:$0xff]  ;;  %2698 = vmatpush2.msra.mxu0 %v679_v22  ;;  %v672_v28 = vld [vmem:[%s5664_s10 + $0xba8] sm:$0xff] }
  0xcd   : > { %2769 = vmatpush2.msra.mxu1 %v807_v23  ;;  %v800_v29 = vld [vmem:[%s5664_s10 + $0xfa8] sm:$0xff]  ;;  %2699 = vmatprep.subr.mxu0 %v676_v24  ;;  %v671_v30 = vld [vmem:[%s5664_s10 + $0xba0] sm:$0xff] }
  0xce   : > { %2770 = vmatprep.subr.mxu1 %v804_v25  ;;  %v799_v31 = vld [vmem:[%s5664_s10 + $0xfa0] sm:$0xff]  ;;  %2700 = vmatpush2.msra.mxu0 %v675_v26  ;;  %v668_v32 = vld [vmem:[%s5664_s10 + $0xb88] sm:$0xff] }
  0xcf   : > { %2771 = vmatpush2.msra.mxu1 %v803_v27  ;;  %v796_v33 = vld [vmem:[%s5664_s10 + $0xf88] sm:$0xff]  ;;  %2701 = vmatprep.subr.mxu0 %v672_v28  ;;  %v667_v34 = vld [vmem:[%s5664_s10 + $0xb80] sm:$0xff] }
  0xd0   : > { %2772 = vmatprep.subr.mxu1 %v800_v29  ;;  %v795_v35 = vld [vmem:[%s5664_s10 + $0xf80] sm:$0xff]  ;;  %2702 = vmatpush2.msra.mxu0 %v671_v30  ;;  %v664_v36 = vld [vmem:[%s5664_s10 + $0xb68] sm:$0xff] }
  0xd1   : > { %2773 = vmatpush2.msra.mxu1 %v799_v31  ;;  %v792_v37 = vld [vmem:[%s5664_s10 + $0xf68] sm:$0xff]  ;;  %2703 = vmatprep.subr.mxu0 %v668_v32  ;;  %v663_v38 = vld [vmem:[%s5664_s10 + $0xb60] sm:$0xff] }
  0xd2   : > { %2774 = vmatprep.subr.mxu1 %v796_v33  ;;  %v791_v39 = vld [vmem:[%s5664_s10 + $0xf60] sm:$0xff]  ;;  %2704 = vmatpush2.msra.mxu0 %v667_v34  ;;  %v660_v40 = vld [vmem:[%s5664_s10 + $0xb48] sm:$0xff] }
  0xd3   : > { %2775 = vmatpush2.msra.mxu1 %v795_v35  ;;  %v788_v41 = vld [vmem:[%s5664_s10 + $0xf48] sm:$0xff]  ;;  %2705 = vmatprep.subr.mxu0 %v664_v36  ;;  %v659_v42 = vld [vmem:[%s5664_s10 + $0xb40] sm:$0xff] }
  0xd4   : > { %2776 = vmatprep.subr.mxu1 %v792_v37  ;;  %v787_v43 = vld [vmem:[%s5664_s10 + $0xf40] sm:$0xff]  ;;  %2706 = vmatpush2.msra.mxu0 %v663_v38  ;;  %v656_v45 = vld [vmem:[%s5664_s10 + $0xb28] sm:$0xff] }
  0xd5   : > { %2777 = vmatpush2.msra.mxu1 %v791_v39  ;;  %v784_v46 = vld [vmem:[%s5664_s10 + $0xf28] sm:$0xff]  ;;  %2707 = vmatprep.subr.mxu0 %v660_v40  ;;  %v655_v47 = vld [vmem:[%s5664_s10 + $0xb20] sm:$0xff] }
  0xd6   : > { %2778 = vmatprep.subr.mxu1 %v788_v41  ;;  %v783_v48 = vld [vmem:[%s5664_s10 + $0xf20] sm:$0xff]  ;;  %2708 = vmatpush2.msra.mxu0 %v659_v42  ;;  %v652_v49 = vld [vmem:[%s5664_s10 + $0xb08] sm:$0xff] }
  0xd7   : > { %2779 = vmatpush2.msra.mxu1 %v787_v43  ;;  %v780_v50 = vld [vmem:[%s5664_s10 + $0xf08] sm:$0xff]  ;;  %2709 = vmatprep.subr.mxu0 %v656_v45  ;;  %v651_v51 = vld [vmem:[%s5664_s10 + $0xb00] sm:$0xff] }
  0xd8   : > { %2780 = vmatprep.subr.mxu1 %v784_v46  ;;  %v779_v52 = vld [vmem:[%s5664_s10 + $0xf00] sm:$0xff]  ;;  %2710 = vmatpush2.msra.mxu0 %v655_v47  ;;  %v648_v53 = vld [vmem:[%s5664_s10 + $0xae8] sm:$0xff] }
  0xd9   : > { %2781 = vmatpush2.msra.mxu1 %v783_v48  ;;  %v776_v55 = vld [vmem:[%s5664_s10 + $0xee8] sm:$0xff]  ;;  %2711 = vmatprep.subr.mxu0 %v652_v49  ;;  %v647_v56 = vld [vmem:[%s5664_s10 + $0xae0] sm:$0xff] }
  0xda   : > { %2782 = vmatprep.subr.mxu1 %v780_v50  ;;  %v775_v57 = vld [vmem:[%s5664_s10 + $0xee0] sm:$0xff]  ;;  %2712 = vmatpush2.msra.mxu0 %v651_v51  ;;  %v644_v58 = vld [vmem:[%s5664_s10 + $0xac8] sm:$0xff] }
  0xdb   : > { %2783 = vmatpush2.msra.mxu1 %v779_v52  ;;  %v772_v59 = vld [vmem:[%s5664_s10 + $0xec8] sm:$0xff]  ;;  %2713 = vmatprep.subr.mxu0 %v648_v53  ;;  %v643_v60 = vld [vmem:[%s5664_s10 + $0xac0] sm:$0xff] }
  0xdc   : > { %2784 = vmatprep.subr.mxu1 %v776_v55  ;;  %v771_v61 = vld [vmem:[%s5664_s10 + $0xec0] sm:$0xff]  ;;  %2714 = vmatpush2.msra.mxu0 %v647_v56  ;;  %v640_v62 = vld [vmem:[%s5664_s10 + $0xaa8] sm:$0xff] }
  0xdd   : > { %2785 = vmatpush2.msra.mxu1 %v775_v57  ;;  %v768_v63 = vld [vmem:[%s5664_s10 + $0xea8] sm:$0xff]  ;;  %2715 = vmatprep.subr.mxu0 %v644_v58  ;;  %v639_v1 = vld [vmem:[%s5664_s10 + $0xaa0] sm:$0xff] }
  0xde   : > { %2786 = vmatprep.subr.mxu1 %v772_v59  ;;  %v767_v2 = vld [vmem:[%s5664_s10 + $0xea0] sm:$0xff]  ;;  %v292_v4 = vld [vmem:[%s5657_s12 + $0x8] sm:$0xff]  ;;  %2716 = vmatpush2.msra.mxu0 %v643_v60 }
  0xdf   : > { %2787 = vmatpush2.msra.mxu1 %v771_v61  ;;  %v636_v5 = vld [vmem:[%s5664_s10 + $0xa88] sm:$0xff]  ;;  %2717 = vmatprep.subr.mxu0 %v640_v62  ;;  %v635_v7 = vld [vmem:[%s5664_s10 + $0xa80] sm:$0xff]  ;;  %v2372_v13 = vcombine.high %v292_v4, %v292_v4  ;;  %v5948_v18 = vrot.slane %v292_v4, %v5790_v54 }
  0xe0   : > { %v764_v6 = vld [vmem:[%s5664_s10 + $0xe88] sm:$0xff]  ;;  %2788 = vmatprep.subr.mxu1 %v768_v63  ;;  %v763_v8 = vld [vmem:[%s5664_s10 + $0xe80] sm:$0xff]  ;;  %2718 = vmatpush2.msra.mxu0 %v639_v1 }
  0xe1   : > { %2789 = vmatpush2.msra.mxu1 %v767_v2  ;;  %v632_v9 = vld [vmem:[%s5664_s10 + $0xa68] sm:$0xff]  ;;  %2719 = vmatprep.subr.mxu0 %v636_v5  ;;  %v631_v14 = vld [vmem:[%s5664_s10 + $0xa60] sm:$0xff]  ;;  %v5955_v23 = vrot.slane %v2372_v13, %v5790_v54  ;;  %v5963_v28 = vcombine.high %v5948_v18, %v5948_v18 }
  0xe2   : > { %v760_v11 = vld [vmem:[%s5664_s10 + $0xe68] sm:$0xff]  ;;  %2790 = vmatprep.subr.mxu1 %v764_v6  ;;  %v759_v15 = vld [vmem:[%s5664_s10 + $0xe60] sm:$0xff]  ;;  %2720 = vmatpush2.msra.mxu0 %v635_v7 }
  0xe3   : > { %2791 = vmatpush2.msra.mxu1 %v763_v8  ;;  %v628_v16 = vld [vmem:[%s5664_s10 + $0xa48] sm:$0xff]  ;;  %2721 = vmatprep.subr.mxu0 %v632_v9  ;;  %v627_v19 = vld [vmem:[%s5664_s10 + $0xa40] sm:$0xff]  ;;  %v5969_v31 = vcombine.high %v5955_v23, %v5955_v23 }
  0xe4   : > { %v756_v17 = vld [vmem:[%s5664_s10 + $0xe48] sm:$0xff]  ;;  %2792 = vmatprep.subr.mxu1 %v760_v11  ;;  %v755_v20 = vld [vmem:[%s5664_s10 + $0xe40] sm:$0xff]  ;;  %2722 = vmatpush2.msra.mxu0 %v631_v14 }
  0xe5   : > { %2793 = vmatpush2.msra.mxu1 %v759_v15  ;;  %v624_v21 = vld [vmem:[%s5664_s10 + $0xa28] sm:$0xff]  ;;  %2723 = vmatprep.subr.mxu0 %v628_v16  ;;  %v623_v24 = vld [vmem:[%s5664_s10 + $0xa20] sm:$0xff] }
  0xe6   : > { %v752_v22 = vld [vmem:[%s5664_s10 + $0xe28] sm:$0xff]  ;;  %2794 = vmatprep.subr.mxu1 %v756_v17  ;;  %v751_v25 = vld [vmem:[%s5664_s10 + $0xe20] sm:$0xff]  ;;  %2724 = vmatpush2.msra.mxu0 %v627_v19 }
  0xe7   : > { %2795 = vmatpush2.msra.mxu1 %v755_v20  ;;  %v620_v26 = vld [vmem:[%s5664_s10 + $0xa08] sm:$0xff]  ;;  %2725 = vmatprep.subr.mxu0 %v624_v21  ;;  %v619_v29 = vld [vmem:[%s5664_s10 + $0xa00] sm:$0xff] }
  0xe8   : > { %v748_v27 = vld [vmem:[%s5664_s10 + $0xe08] sm:$0xff]  ;;  %2796 = vmatprep.subr.mxu1 %v752_v22  ;;  %2726 = vmatpush2.msra.mxu0 %v623_v24  ;;  %v747_v30 = vld [vmem:[%s5664_s10 + $0xe00] sm:$0xff] }
  0xe9   : > { %2797 = vmatpush2.msra.mxu1 %v751_v25  ;;  %2727 = vmatprep.subr.mxu0 %v620_v26  ;;  %v872_v32 = vld [vmem:[%s5664_s10 + $0x11e8] sm:$0xff]  ;;  %v871_v34 = vld [vmem:[%s5664_s10 + $0x11e0] sm:$0xff] }
  0xea   : > { %2798 = vmatprep.subr.mxu1 %v748_v27  ;;  %2728 = vmatpush2.msra.mxu0 %v619_v29  ;;  %v1000_v33 = vld [vmem:[%s5664_s10 + $0x15e8] sm:$0xff]  ;;  %v999_v35 = vld [vmem:[%s5664_s10 + $0x15e0] sm:$0xff] }
  0xeb   : > { %2729 = vmatprep.mubr.f32.mxu0 %v5963_v28  ;;  %2799 = vmatpush2.msra.mxu1 %v747_v30  ;;  %v868_v36 = vld [vmem:[%s5664_s10 + $0x11c8] sm:$0xff]  ;;  %v867_v38 = vld [vmem:[%s5664_s10 + $0x11c0] sm:$0xff] }
  0xec   : > { %2730 = vmatmul.mubr.f32.vlgmr.msra.gmra.mxu0 %v5948_v18  ;;  %2800 = vmatprep.mubr.f32.mxu1 %v5969_v31  ;;  %v996_v37 = vld [vmem:[%s5664_s10 + $0x15c8] sm:$0xff]  ;;  %v995_v39 = vld [vmem:[%s5664_s10 + $0x15c0] sm:$0xff] }
  0xed   : > { %2807 = vmatprep.subr.mxu0 %v872_v32  ;;  %2878 = vmatprep.subr.mxu1 %v1000_v33  ;;  %v864_v40 = vld [vmem:[%s5664_s10 + $0x11a8] sm:$0xff]  ;;  %v863_v42 = vld [vmem:[%s5664_s10 + $0x11a0] sm:$0xff] }
  0xee   : > { %2801 = vmatmul.mubr.f32.vlgmr.msra.gmra.mxu1 %v5955_v23  ;;  %2808 = vmatpush1.msra.mxu0 %v871_v34  ;;  %v992_v41 = vld [vmem:[%s5664_s10 + $0x15a8] sm:$0xff]  ;;  %v991_v43 = vld [vmem:[%s5664_s10 + $0x15a0] sm:$0xff] }
  0xef   : > { %2879 = vmatpush1.msra.mxu1 %v999_v35  ;;  %2809 = vmatprep.subr.mxu0 %v868_v36  ;;  %v860_v45 = vld [vmem:[%s5664_s10 + $0x1188] sm:$0xff]  ;;  %v859_v47 = vld [vmem:[%s5664_s10 + $0x1180] sm:$0xff] }
  0xf0   : > { %2880 = vmatprep.subr.mxu1 %v996_v37  ;;  %2810 = vmatpush1.msra.mxu0 %v867_v38  ;;  %v988_v46 = vld [vmem:[%s5664_s10 + $0x1588] sm:$0xff]  ;;  %v987_v48 = vld [vmem:[%s5664_s10 + $0x1580] sm:$0xff] }
  0xf1   : > { %2881 = vmatpush1.msra.mxu1 %v995_v39  ;;  %2811 = vmatprep.subr.mxu0 %v864_v40  ;;  %v856_v49 = vld [vmem:[%s5664_s10 + $0x1168] sm:$0xff]  ;;  %v855_v51 = vld [vmem:[%s5664_s10 + $0x1160] sm:$0xff] }
  0xf2   : > { %2882 = vmatprep.subr.mxu1 %v992_v41  ;;  %2812 = vmatpush1.msra.mxu0 %v863_v42  ;;  %v984_v50 = vld [vmem:[%s5664_s10 + $0x1568] sm:$0xff]  ;;  %v983_v52 = vld [vmem:[%s5664_s10 + $0x1560] sm:$0xff] }
  0xf3   : > { %2883 = vmatpush1.msra.mxu1 %v991_v43  ;;  %2813 = vmatprep.subr.mxu0 %v860_v45  ;;  %v852_v53 = vld [vmem:[%s5664_s10 + $0x1148] sm:$0xff]  ;;  %v851_v56 = vld [vmem:[%s5664_s10 + $0x1140] sm:$0xff] }
  0xf4   : > { %2884 = vmatprep.subr.mxu1 %v988_v46  ;;  %2814 = vmatpush1.msra.mxu0 %v859_v47  ;;  %v980_v55 = vld [vmem:[%s5664_s10 + $0x1548] sm:$0xff]  ;;  %v979_v57 = vld [vmem:[%s5664_s10 + $0x1540] sm:$0xff] }
  0xf5   : > { %2885 = vmatpush1.msra.mxu1 %v987_v48  ;;  %2815 = vmatprep.subr.mxu0 %v856_v49  ;;  %v848_v58 = vld [vmem:[%s5664_s10 + $0x1128] sm:$0xff]  ;;  %v847_v60 = vld [vmem:[%s5664_s10 + $0x1120] sm:$0xff] }
  0xf6   : > { %2886 = vmatprep.subr.mxu1 %v984_v50  ;;  %2816 = vmatpush1.msra.mxu0 %v855_v51  ;;  %v976_v59 = vld [vmem:[%s5664_s10 + $0x1528] sm:$0xff]  ;;  %v975_v61 = vld [vmem:[%s5664_s10 + $0x1520] sm:$0xff] }
  0xf7   : > { %2887 = vmatpush1.msra.mxu1 %v983_v52  ;;  %2817 = vmatprep.subr.mxu0 %v852_v53  ;;  %v844_v62 = vld [vmem:[%s5664_s10 + $0x1108] sm:$0xff]  ;;  %v843_v1 = vld [vmem:[%s5664_s10 + $0x1100] sm:$0xff] }
  0xf8   : > { %2888 = vmatprep.subr.mxu1 %v980_v55  ;;  %2818 = vmatpush1.msra.mxu0 %v851_v56  ;;  %v972_v63 = vld [vmem:[%s5664_s10 + $0x1508] sm:$0xff]  ;;  %v971_v2 = vld [vmem:[%s5664_s10 + $0x1500] sm:$0xff] }
  0xf9   : > { %2889 = vmatpush1.msra.mxu1 %v979_v57  ;;  %2819 = vmatprep.subr.mxu0 %v848_v58  ;;  %v840_v4 = vld [vmem:[%s5664_s10 + $0x10e8] sm:$0xff]  ;;  %v839_v6 = vld [vmem:[%s5664_s10 + $0x10e0] sm:$0xff] }
  0xfa   : > { %2890 = vmatprep.subr.mxu1 %v976_v59  ;;  %2820 = vmatpush1.msra.mxu0 %v847_v60  ;;  %v968_v5 = vld [vmem:[%s5664_s10 + $0x14e8] sm:$0xff]  ;;  %v967_v7 = vld [vmem:[%s5664_s10 + $0x14e0] sm:$0xff] }
  0xfb   : > { %2891 = vmatpush1.msra.mxu1 %v975_v61  ;;  %2821 = vmatprep.subr.mxu0 %v844_v62  ;;  %v836_v8 = vld [vmem:[%s5664_s10 + $0x10c8] sm:$0xff]  ;;  %v835_v11 = vld [vmem:[%s5664_s10 + $0x10c0] sm:$0xff] }
  0xfc   : > { %2892 = vmatprep.subr.mxu1 %v972_v63  ;;  %2822 = vmatpush1.msra.mxu0 %v843_v1  ;;  %v964_v9 = vld [vmem:[%s5664_s10 + $0x14c8] sm:$0xff]  ;;  %v963_v13 = vld [vmem:[%s5664_s10 + $0x14c0] sm:$0xff] }
  0xfd   : > { %2893 = vmatpush1.msra.mxu1 %v971_v2  ;;  %2823 = vmatprep.subr.mxu0 %v840_v4  ;;  %v832_v14 = vld [vmem:[%s5664_s10 + $0x10a8] sm:$0xff]  ;;  %v831_v16 = vld [vmem:[%s5664_s10 + $0x10a0] sm:$0xff] }
  0xfe   : > { %2894 = vmatprep.subr.mxu1 %v968_v5  ;;  %2824 = vmatpush1.msra.mxu0 %v839_v6  ;;  %v960_v15 = vld [vmem:[%s5664_s10 + $0x14a8] sm:$0xff]  ;;  %v959_v17 = vld [vmem:[%s5664_s10 + $0x14a0] sm:$0xff] }
  0xff   : > { %2895 = vmatpush1.msra.mxu1 %v967_v7  ;;  %2825 = vmatprep.subr.mxu0 %v836_v8  ;;  %v828_v19 = vld [vmem:[%s5664_s10 + $0x1088] sm:$0xff]  ;;  %v827_v21 = vld [vmem:[%s5664_s10 + $0x1080] sm:$0xff] }
 0x100   : > { %2896 = vmatprep.subr.mxu1 %v964_v9  ;;  %2826 = vmatpush1.msra.mxu0 %v835_v11  ;;  %v956_v20 = vld [vmem:[%s5664_s10 + $0x1488] sm:$0xff]  ;;  %v955_v22 = vld [vmem:[%s5664_s10 + $0x1480] sm:$0xff] }
 0x101   : > { %2897 = vmatpush1.msra.mxu1 %v963_v13  ;;  %2827 = vmatprep.subr.mxu0 %v832_v14  ;;  %v824_v24 = vld [vmem:[%s5664_s10 + $0x1068] sm:$0xff]  ;;  %v823_v26 = vld [vmem:[%s5664_s10 + $0x1060] sm:$0xff] }
 0x102   : > { %2898 = vmatprep.subr.mxu1 %v960_v15  ;;  %2828 = vmatpush1.msra.mxu0 %v831_v16  ;;  %v952_v25 = vld [vmem:[%s5664_s10 + $0x1468] sm:$0xff]  ;;  %v951_v27 = vld [vmem:[%s5664_s10 + $0x1460] sm:$0xff] }
 0x103   : > { %2899 = vmatpush1.msra.mxu1 %v959_v17  ;;  %2829 = vmatprep.subr.mxu0 %v828_v19  ;;  %v820_v29 = vld [vmem:[%s5664_s10 + $0x1048] sm:$0xff]  ;;  %v819_v32 = vld [vmem:[%s5664_s10 + $0x1040] sm:$0xff] }
 0x104   : > { %2900 = vmatprep.subr.mxu1 %v956_v20  ;;  %2830 = vmatpush1.msra.mxu0 %v827_v21  ;;  %v948_v30 = vld [vmem:[%s5664_s10 + $0x1448] sm:$0xff]  ;;  %v947_v33 = vld [vmem:[%s5664_s10 + $0x1440] sm:$0xff] }
 0x105   : > { %2901 = vmatpush1.msra.mxu1 %v955_v22  ;;  %2831 = vmatprep.subr.mxu0 %v824_v24  ;;  %v816_v34 = vld [vmem:[%s5664_s10 + $0x1028] sm:$0xff]  ;;  %v815_v36 = vld [vmem:[%s5664_s10 + $0x1020] sm:$0xff] }
 0x106   : > { %2902 = vmatprep.subr.mxu1 %v952_v25  ;;  %2832 = vmatpush1.msra.mxu0 %v823_v26  ;;  %v944_v35 = vld [vmem:[%s5664_s10 + $0x1428] sm:$0xff]  ;;  %v943_v37 = vld [vmem:[%s5664_s10 + $0x1420] sm:$0xff] }
 0x107   : > { %2903 = vmatpush1.msra.mxu1 %v951_v27  ;;  %2833 = vmatprep.subr.mxu0 %v820_v29  ;;  %v812_v38 = vld [vmem:[%s5664_s10 + $0x1008] sm:$0xff]  ;;  %v811_v40 = vld [vmem:[%s5664_s10 + $0x1000] sm:$0xff] }
 0x108   : > { %2904 = vmatprep.subr.mxu1 %v948_v30  ;;  %2834 = vmatpush1.msra.mxu0 %v819_v32  ;;  %v940_v39 = vld [vmem:[%s5664_s10 + $0x1408] sm:$0xff]  ;;  %v939_v41 = vld [vmem:[%s5664_s10 + $0x1400] sm:$0xff]  ;;  %v293_v32 = vld [vmem:[%s5657_s12 + $0x10] sm:$0xff] }
 0x109   : > { %2905 = vmatpush1.msra.mxu1 %v947_v33  ;;  %2835 = vmatprep.subr.mxu0 %v816_v34  ;;  %v936_v42 = vld [vmem:[%s5664_s10 + $0x13e8] sm:$0xff]  ;;  %v935_v45 = vld [vmem:[%s5664_s10 + $0x13e0] sm:$0xff] }
 0x10a   : > { %2906 = vmatprep.subr.mxu1 %v944_v35  ;;  %2836 = vmatpush1.msra.mxu0 %v815_v36  ;;  %v1064_v43 = vld [vmem:[%s5664_s10 + $0x17e8] sm:$0xff]  ;;  %v1063_v46 = vld [vmem:[%s5664_s10 + $0x17e0] sm:$0xff] }
 0x10b   : > { %2907 = vmatpush1.msra.mxu1 %v943_v37  ;;  %2837 = vmatprep.subr.mxu0 %v812_v38  ;;  %v932_v47 = vld [vmem:[%s5664_s10 + $0x13c8] sm:$0xff]  ;;  %v931_v49 = vld [vmem:[%s5664_s10 + $0x13c0] sm:$0xff] }
 0x10c   : > { %2908 = vmatprep.subr.mxu1 %v940_v39  ;;  %2838 = vmatpush1.msra.mxu0 %v811_v40  ;;  %v1060_v48 = vld [vmem:[%s5664_s10 + $0x17c8] sm:$0xff]  ;;  %v1059_v50 = vld [vmem:[%s5664_s10 + $0x17c0] sm:$0xff]  ;;  %v2389_v39 = vcombine.high %v293_v32, %v293_v32 }
 0x10d   : > { %2909 = vmatpush1.msra.mxu1 %v939_v41  ;;  %2839 = vmatprep.subr.mxu0 %v936_v42  ;;  %v928_v51 = vld [vmem:[%s5664_s10 + $0x13a8] sm:$0xff]  ;;  %v927_v53 = vld [vmem:[%s5664_s10 + $0x13a0] sm:$0xff] }
 0x10e   : > { %2910 = vmatprep.subr.mxu1 %v1064_v43  ;;  %2840 = vmatpush2.msra.mxu0 %v935_v45  ;;  %v1056_v52 = vld [vmem:[%s5664_s10 + $0x17a8] sm:$0xff]  ;;  %v1055_v55 = vld [vmem:[%s5664_s10 + $0x17a0] sm:$0xff]  ;;  %v6095_v45 = vrot.slane %v293_v32, %v5790_v54 }
 0x10f   : > { %2911 = vmatpush2.msra.mxu1 %v1063_v46  ;;  %2841 = vmatprep.subr.mxu0 %v932_v47  ;;  %v924_v56 = vld [vmem:[%s5664_s10 + $0x1388] sm:$0xff]  ;;  %v923_v58 = vld [vmem:[%s5664_s10 + $0x1380] sm:$0xff] }
 0x110   : > { %2912 = vmatprep.subr.mxu1 %v1060_v48  ;;  %2842 = vmatpush2.msra.mxu0 %v931_v49  ;;  %v1052_v57 = vld [vmem:[%s5664_s10 + $0x1788] sm:$0xff]  ;;  %v1051_v59 = vld [vmem:[%s5664_s10 + $0x1780] sm:$0xff] }
 0x111   : > { %2913 = vmatpush2.msra.mxu1 %v1059_v50  ;;  %2843 = vmatprep.subr.mxu0 %v928_v51  ;;  %v920_v60 = vld [vmem:[%s5664_s10 + $0x1368] sm:$0xff]  ;;  %v919_v62 = vld [vmem:[%s5664_s10 + $0x1360] sm:$0xff]  ;;  %v6102_v50 = vrot.slane %v2389_v39, %v5790_v54 }
 0x112   : > { %2914 = vmatprep.subr.mxu1 %v1056_v52  ;;  %2844 = vmatpush2.msra.mxu0 %v927_v53  ;;  %v1048_v61 = vld [vmem:[%s5664_s10 + $0x1768] sm:$0xff]  ;;  %v1047_v63 = vld [vmem:[%s5664_s10 + $0x1760] sm:$0xff] }
 0x113   : > { %2915 = vmatpush2.msra.mxu1 %v1055_v55  ;;  %2845 = vmatprep.subr.mxu0 %v924_v56  ;;  %v916_v1 = vld [vmem:[%s5664_s10 + $0x1348] sm:$0xff]  ;;  %v915_v4 = vld [vmem:[%s5664_s10 + $0x1340] sm:$0xff]  ;;  %v6110_v56 = vcombine.high %v6095_v45, %v6095_v45 }
 0x114   : > { %2916 = vmatprep.subr.mxu1 %v1052_v57  ;;  %2846 = vmatpush2.msra.mxu0 %v923_v58  ;;  %v1044_v2 = vld [vmem:[%s5664_s10 + $0x1748] sm:$0xff]  ;;  %v1043_v5 = vld [vmem:[%s5664_s10 + $0x1740] sm:$0xff] }
 0x115   : > { %2917 = vmatpush2.msra.mxu1 %v1051_v59  ;;  %2847 = vmatprep.subr.mxu0 %v920_v60  ;;  %v912_v6 = vld [vmem:[%s5664_s10 + $0x1328] sm:$0xff]  ;;  %v911_v8 = vld [vmem:[%s5664_s10 + $0x1320] sm:$0xff]  ;;  %v6116_v59 = vcombine.high %v6102_v50, %v6102_v50 }
 0x116   : > { %2918 = vmatprep.subr.mxu1 %v1048_v61  ;;  %2848 = vmatpush2.msra.mxu0 %v919_v62  ;;  %v1040_v7 = vld [vmem:[%s5664_s10 + $0x1728] sm:$0xff]  ;;  %v1039_v9 = vld [vmem:[%s5664_s10 + $0x1720] sm:$0xff] }
 0x117   : > { %2919 = vmatpush2.msra.mxu1 %v1047_v63  ;;  %2849 = vmatprep.subr.mxu0 %v916_v1  ;;  %v908_v11 = vld [vmem:[%s5664_s10 + $0x1308] sm:$0xff]  ;;  %v907_v14 = vld [vmem:[%s5664_s10 + $0x1300] sm:$0xff] }
 0x118   : > { %2920 = vmatprep.subr.mxu1 %v1044_v2  ;;  %2850 = vmatpush2.msra.mxu0 %v915_v4  ;;  %v1036_v13 = vld [vmem:[%s5664_s10 + $0x1708] sm:$0xff]  ;;  %v1035_v15 = vld [vmem:[%s5664_s10 + $0x1700] sm:$0xff] }
 0x119   : > { %2921 = vmatpush2.msra.mxu1 %v1043_v5  ;;  %2851 = vmatprep.subr.mxu0 %v912_v6  ;;  %v904_v16 = vld [vmem:[%s5664_s10 + $0x12e8] sm:$0xff]  ;;  %v903_v19 = vld [vmem:[%s5664_s10 + $0x12e0] sm:$0xff] }
 0x11a   : > { %2922 = vmatprep.subr.mxu1 %v1040_v7  ;;  %2852 = vmatpush2.msra.mxu0 %v911_v8  ;;  %v1032_v17 = vld [vmem:[%s5664_s10 + $0x16e8] sm:$0xff]  ;;  %v1031_v20 = vld [vmem:[%s5664_s10 + $0x16e0] sm:$0xff] }
 0x11b   : > { %2923 = vmatpush2.msra.mxu1 %v1039_v9  ;;  %2853 = vmatprep.subr.mxu0 %v908_v11  ;;  %v900_v21 = vld [vmem:[%s5664_s10 + $0x12c8] sm:$0xff]  ;;  %v899_v24 = vld [vmem:[%s5664_s10 + $0x12c0] sm:$0xff] }
 0x11c   : > { %2924 = vmatprep.subr.mxu1 %v1036_v13  ;;  %2854 = vmatpush2.msra.mxu0 %v907_v14  ;;  %v1028_v22 = vld [vmem:[%s5664_s10 + $0x16c8] sm:$0xff]  ;;  %v1027_v25 = vld [vmem:[%s5664_s10 + $0x16c0] sm:$0xff] }
 0x11d   : > { %2925 = vmatpush2.msra.mxu1 %v1035_v15  ;;  %2855 = vmatprep.subr.mxu0 %v904_v16  ;;  %v896_v26 = vld [vmem:[%s5664_s10 + $0x12a8] sm:$0xff]  ;;  %v895_v29 = vld [vmem:[%s5664_s10 + $0x12a0] sm:$0xff] }
 0x11e   : > { %2926 = vmatprep.subr.mxu1 %v1032_v17  ;;  %2856 = vmatpush2.msra.mxu0 %v903_v19  ;;  %v1024_v27 = vld [vmem:[%s5664_s10 + $0x16a8] sm:$0xff]  ;;  %v1023_v30 = vld [vmem:[%s5664_s10 + $0x16a0] sm:$0xff] }
 0x11f   : > { %2927 = vmatpush2.msra.mxu1 %v1031_v20  ;;  %2857 = vmatprep.subr.mxu0 %v900_v21  ;;  %v892_v33 = vld [vmem:[%s5664_s10 + $0x1288] sm:$0xff]  ;;  %v891_v35 = vld [vmem:[%s5664_s10 + $0x1280] sm:$0xff] }
 0x120   : > { %2928 = vmatprep.subr.mxu1 %v1028_v22  ;;  %2858 = vmatpush2.msra.mxu0 %v899_v24  ;;  %v1020_v34 = vld [vmem:[%s5664_s10 + $0x1688] sm:$0xff]  ;;  %v1019_v36 = vld [vmem:[%s5664_s10 + $0x1680] sm:$0xff] }
 0x121   : > { %2929 = vmatpush2.msra.mxu1 %v1027_v25  ;;  %2859 = vmatprep.subr.mxu0 %v896_v26  ;;  %v888_v37 = vld [vmem:[%s5664_s10 + $0x1268] sm:$0xff]  ;;  %v887_v40 = vld [vmem:[%s5664_s10 + $0x1260] sm:$0xff] }
 0x122   : > { %2930 = vmatprep.subr.mxu1 %v1024_v27  ;;  %2860 = vmatpush2.msra.mxu0 %v895_v29  ;;  %v1016_v38 = vld [vmem:[%s5664_s10 + $0x1668] sm:$0xff]  ;;  %v1015_v41 = vld [vmem:[%s5664_s10 + $0x1660] sm:$0xff] }
 0x123   : > { %2931 = vmatpush2.msra.mxu1 %v1023_v30  ;;  %2861 = vmatprep.subr.mxu0 %v892_v33  ;;  %v884_v42 = vld [vmem:[%s5664_s10 + $0x1248] sm:$0xff]  ;;  %v883_v46 = vld [vmem:[%s5664_s10 + $0x1240] sm:$0xff] }
 0x124   : > { %2932 = vmatprep.subr.mxu1 %v1020_v34  ;;  %2862 = vmatpush2.msra.mxu0 %v891_v35  ;;  %v1012_v43 = vld [vmem:[%s5664_s10 + $0x1648] sm:$0xff]  ;;  %v1011_v47 = vld [vmem:[%s5664_s10 + $0x1640] sm:$0xff] }
 0x125   : > { %2933 = vmatpush2.msra.mxu1 %v1019_v36  ;;  %2863 = vmatprep.subr.mxu0 %v888_v37  ;;  %v880_v48 = vld [vmem:[%s5664_s10 + $0x1228] sm:$0xff]  ;;  %v879_v51 = vld [vmem:[%s5664_s10 + $0x1220] sm:$0xff] }
 0x126   : > { %2934 = vmatprep.subr.mxu1 %v1016_v38  ;;  %2864 = vmatpush2.msra.mxu0 %v887_v40  ;;  %v1008_v49 = vld [vmem:[%s5664_s10 + $0x1628] sm:$0xff]  ;;  %v1007_v52 = vld [vmem:[%s5664_s10 + $0x1620] sm:$0xff] }
 0x127   : > { %2935 = vmatpush2.msra.mxu1 %v1015_v41  ;;  %2865 = vmatprep.subr.mxu0 %v884_v42  ;;  %v876_v53 = vld [vmem:[%s5664_s10 + $0x1208] sm:$0xff]  ;;  %v875_v57 = vld [vmem:[%s5664_s10 + $0x1200] sm:$0xff] }
 0x128   : > { %2936 = vmatprep.subr.mxu1 %v1012_v43  ;;  %2866 = vmatpush2.msra.mxu0 %v883_v46  ;;  %v1004_v55 = vld [vmem:[%s5664_s10 + $0x1608] sm:$0xff]  ;;  %v1003_v58 = vld [vmem:[%s5664_s10 + $0x1600] sm:$0xff] }
 0x129   : > { %2937 = vmatpush2.msra.mxu1 %v1011_v47  ;;  %2867 = vmatprep.subr.mxu0 %v880_v48  ;;  %v1128_v60 = vld [vmem:[%s5664_s10 + $0x19e8] sm:$0xff]  ;;  %v1127_v62 = vld [vmem:[%s5664_s10 + $0x19e0] sm:$0xff] }
 0x12a   : > { %2938 = vmatprep.subr.mxu1 %v1008_v49  ;;  %2868 = vmatpush2.msra.mxu0 %v879_v51  ;;  %v1256_v61 = vld [vmem:[%s5664_s10 + $0x1de8] sm:$0xff]  ;;  %v1255_v63 = vld [vmem:[%s5664_s10 + $0x1de0] sm:$0xff] }
 0x12b   : > { %2939 = vmatpush2.msra.mxu1 %v1007_v52  ;;  %2869 = vmatprep.subr.mxu0 %v876_v53  ;;  %v1124_v1 = vld [vmem:[%s5664_s10 + $0x19c8] sm:$0xff]  ;;  %v1123_v4 = vld [vmem:[%s5664_s10 + $0x19c0] sm:$0xff] }
 0x12c   : > { %2940 = vmatprep.subr.mxu1 %v1004_v55  ;;  %2870 = vmatpush2.msra.mxu0 %v875_v57  ;;  %v1252_v2 = vld [vmem:[%s5664_s10 + $0x1dc8] sm:$0xff]  ;;  %v1251_v5 = vld [vmem:[%s5664_s10 + $0x1dc0] sm:$0xff] }
 0x12d   : > { %2871 = vmatprep.mubr.f32.mxu0 %v6110_v56  ;;  %2941 = vmatpush2.msra.mxu1 %v1003_v58  ;;  %v1120_v6 = vld [vmem:[%s5664_s10 + $0x19a8] sm:$0xff]  ;;  %v1119_v8 = vld [vmem:[%s5664_s10 + $0x19a0] sm:$0xff] }
 0x12e   : > { %2872 = vmatmul.mubr.f32.vlgmr.msra.gmra.mxu0 %v6095_v45  ;;  %2942 = vmatprep.mubr.f32.mxu1 %v6116_v59  ;;  %v1248_v7 = vld [vmem:[%s5664_s10 + $0x1da8] sm:$0xff]  ;;  %v1247_v9 = vld [vmem:[%s5664_s10 + $0x1da0] sm:$0xff] }
 0x12f   : > { %2949 = vmatprep.subr.mxu0 %v1128_v60  ;;  %3020 = vmatprep.subr.mxu1 %v1256_v61  ;;  %v1116_v11 = vld [vmem:[%s5664_s10 + $0x1988] sm:$0xff]  ;;  %v1115_v14 = vld [vmem:[%s5664_s10 + $0x1980] sm:$0xff] }
 0x130   : > { %2943 = vmatmul.mubr.f32.vlgmr.msra.gmra.mxu1 %v6102_v50  ;;  %2950 = vmatpush1.msra.mxu0 %v1127_v62  ;;  %v1244_v13 = vld [vmem:[%s5664_s10 + $0x1d88] sm:$0xff]  ;;  %v1243_v15 = vld [vmem:[%s5664_s10 + $0x1d80] sm:$0xff] }
 0x131   : > { %3021 = vmatpush1.msra.mxu1 %v1255_v63  ;;  %2951 = vmatprep.subr.mxu0 %v1124_v1  ;;  %v1112_v16 = vld [vmem:[%s5664_s10 + $0x1968] sm:$0xff]  ;;  %v1111_v19 = vld [vmem:[%s5664_s10 + $0x1960] sm:$0xff] }
 0x132   : > { %3022 = vmatprep.subr.mxu1 %v1252_v2  ;;  %2952 = vmatpush1.msra.mxu0 %v1123_v4  ;;  %v1240_v17 = vld [vmem:[%s5664_s10 + $0x1d68] sm:$0xff]  ;;  %v1239_v20 = vld [vmem:[%s5664_s10 + $0x1d60] sm:$0xff] }
 0x133   : > { %3023 = vmatpush1.msra.mxu1 %v1251_v5  ;;  %2953 = vmatprep.subr.mxu0 %v1120_v6  ;;  %v1108_v21 = vld [vmem:[%s5664_s10 + $0x1948] sm:$0xff]  ;;  %v1107_v24 = vld [vmem:[%s5664_s10 + $0x1940] sm:$0xff] }
 0x134   : > { %3024 = vmatprep.subr.mxu1 %v1248_v7  ;;  %2954 = vmatpush1.msra.mxu0 %v1119_v8  ;;  %v1236_v22 = vld [vmem:[%s5664_s10 + $0x1d48] sm:$0xff]  ;;  %v1235_v25 = vld [vmem:[%s5664_s10 + $0x1d40] sm:$0xff] }
 0x135   : > { %3025 = vmatpush1.msra.mxu1 %v1247_v9  ;;  %2955 = vmatprep.subr.mxu0 %v1116_v11  ;;  %v1104_v26 = vld [vmem:[%s5664_s10 + $0x1928] sm:$0xff]  ;;  %v1103_v29 = vld [vmem:[%s5664_s10 + $0x1920] sm:$0xff] }
 0x136   : > { %3026 = vmatprep.subr.mxu1 %v1244_v13  ;;  %2956 = vmatpush1.msra.mxu0 %v1115_v14  ;;  %v1232_v27 = vld [vmem:[%s5664_s10 + $0x1d28] sm:$0xff]  ;;  %v1231_v30 = vld [vmem:[%s5664_s10 + $0x1d20] sm:$0xff] }
 0x137   : > { %3027 = vmatpush1.msra.mxu1 %v1243_v15  ;;  %2957 = vmatprep.subr.mxu0 %v1112_v16  ;;  %v1100_v32 = vld [vmem:[%s5664_s10 + $0x1908] sm:$0xff]  ;;  %v1099_v34 = vld [vmem:[%s5664_s10 + $0x1900] sm:$0xff] }
 0x138   : > { %3028 = vmatprep.subr.mxu1 %v1240_v17  ;;  %2958 = vmatpush1.msra.mxu0 %v1111_v19  ;;  %v1228_v33 = vld [vmem:[%s5664_s10 + $0x1d08] sm:$0xff]  ;;  %v1227_v35 = vld [vmem:[%s5664_s10 + $0x1d00] sm:$0xff] }
 0x139   : > { %3029 = vmatpush1.msra.mxu1 %v1239_v20  ;;  %2959 = vmatprep.subr.mxu0 %v1108_v21  ;;  %v1096_v36 = vld [vmem:[%s5664_s10 + $0x18e8] sm:$0xff]  ;;  %v1095_v38 = vld [vmem:[%s5664_s10 + $0x18e0] sm:$0xff] }
 0x13a   : > { %3030 = vmatprep.subr.mxu1 %v1236_v22  ;;  %2960 = vmatpush1.msra.mxu0 %v1107_v24  ;;  %v1224_v37 = vld [vmem:[%s5664_s10 + $0x1ce8] sm:$0xff]  ;;  %v1223_v39 = vld [vmem:[%s5664_s10 + $0x1ce0] sm:$0xff] }
 0x13b   : > { %3031 = vmatpush1.msra.mxu1 %v1235_v25  ;;  %2961 = vmatprep.subr.mxu0 %v1104_v26  ;;  %v1092_v40 = vld [vmem:[%s5664_s10 + $0x18c8] sm:$0xff]  ;;  %v1091_v42 = vld [vmem:[%s5664_s10 + $0x18c0] sm:$0xff] }
 0x13c   : > { %3032 = vmatprep.subr.mxu1 %v1232_v27  ;;  %2962 = vmatpush1.msra.mxu0 %v1103_v29  ;;  %v1220_v41 = vld [vmem:[%s5664_s10 + $0x1cc8] sm:$0xff]  ;;  %v1219_v43 = vld [vmem:[%s5664_s10 + $0x1cc0] sm:$0xff] }
 0x13d   : > { %3033 = vmatpush1.msra.mxu1 %v1231_v30  ;;  %2963 = vmatprep.subr.mxu0 %v1100_v32  ;;  %v1088_v46 = vld [vmem:[%s5664_s10 + $0x18a8] sm:$0xff]  ;;  %v1087_v48 = vld [vmem:[%s5664_s10 + $0x18a0] sm:$0xff] }
 0x13e   : > { %3034 = vmatprep.subr.mxu1 %v1228_v33  ;;  %2964 = vmatpush1.msra.mxu0 %v1099_v34  ;;  %v1216_v47 = vld [vmem:[%s5664_s10 + $0x1ca8] sm:$0xff]  ;;  %v1215_v49 = vld [vmem:[%s5664_s10 + $0x1ca0] sm:$0xff] }
 0x13f   : > { %3035 = vmatpush1.msra.mxu1 %v1227_v35  ;;  %2965 = vmatprep.subr.mxu0 %v1096_v36  ;;  %v1084_v51 = vld [vmem:[%s5664_s10 + $0x1888] sm:$0xff]  ;;  %v1083_v53 = vld [vmem:[%s5664_s10 + $0x1880] sm:$0xff] }
 0x140   : > { %3036 = vmatprep.subr.mxu1 %v1224_v37  ;;  %2966 = vmatpush1.msra.mxu0 %v1095_v38  ;;  %v1212_v52 = vld [vmem:[%s5664_s10 + $0x1c88] sm:$0xff]  ;;  %v1211_v55 = vld [vmem:[%s5664_s10 + $0x1c80] sm:$0xff] }
 0x141   : > { %3037 = vmatpush1.msra.mxu1 %v1223_v39  ;;  %2967 = vmatprep.subr.mxu0 %v1092_v40  ;;  %v1080_v57 = vld [vmem:[%s5664_s10 + $0x1868] sm:$0xff]  ;;  %v1079_v60 = vld [vmem:[%s5664_s10 + $0x1860] sm:$0xff] }
 0x142   : > { %3038 = vmatprep.subr.mxu1 %v1220_v41  ;;  %2968 = vmatpush1.msra.mxu0 %v1091_v42  ;;  %v1208_v58 = vld [vmem:[%s5664_s10 + $0x1c68] sm:$0xff]  ;;  %v1207_v61 = vld [vmem:[%s5664_s10 + $0x1c60] sm:$0xff] }
 0x143   : > { %3039 = vmatpush1.msra.mxu1 %v1219_v43  ;;  %2969 = vmatprep.subr.mxu0 %v1088_v46  ;;  %v1076_v62 = vld [vmem:[%s5664_s10 + $0x1848] sm:$0xff]  ;;  %v1075_v1 = vld [vmem:[%s5664_s10 + $0x1840] sm:$0xff] }
 0x144   : > { %3040 = vmatprep.subr.mxu1 %v1216_v47  ;;  %2970 = vmatpush1.msra.mxu0 %v1087_v48  ;;  %v1204_v63 = vld [vmem:[%s5664_s10 + $0x1c48] sm:$0xff]  ;;  %v1203_v2 = vld [vmem:[%s5664_s10 + $0x1c40] sm:$0xff] }
 0x145   : > { %3041 = vmatpush1.msra.mxu1 %v1215_v49  ;;  %2971 = vmatprep.subr.mxu0 %v1084_v51  ;;  %v1072_v4 = vld [vmem:[%s5664_s10 + $0x1828] sm:$0xff]  ;;  %v1071_v6 = vld [vmem:[%s5664_s10 + $0x1820] sm:$0xff] }
 0x146   : > { %3042 = vmatprep.subr.mxu1 %v1212_v52  ;;  %2972 = vmatpush1.msra.mxu0 %v1083_v53  ;;  %v1200_v5 = vld [vmem:[%s5664_s10 + $0x1c28] sm:$0xff]  ;;  %v1199_v7 = vld [vmem:[%s5664_s10 + $0x1c20] sm:$0xff] }
 0x147   : > { %3043 = vmatpush1.msra.mxu1 %v1211_v55  ;;  %2973 = vmatprep.subr.mxu0 %v1080_v57  ;;  %v1068_v8 = vld [vmem:[%s5664_s10 + $0x1808] sm:$0xff]  ;;  %v1067_v11 = vld [vmem:[%s5664_s10 + $0x1800] sm:$0xff] }
 0x148   : > { %3044 = vmatprep.subr.mxu1 %v1208_v58  ;;  %2974 = vmatpush1.msra.mxu0 %v1079_v60  ;;  %v1196_v9 = vld [vmem:[%s5664_s10 + $0x1c08] sm:$0xff]  ;;  %v1195_v13 = vld [vmem:[%s5664_s10 + $0x1c00] sm:$0xff] }
 0x149   : > { %3045 = vmatpush1.msra.mxu1 %v1207_v61  ;;  %2975 = vmatprep.subr.mxu0 %v1076_v62  ;;  %v1192_v14 = vld [vmem:[%s5664_s10 + $0x1be8] sm:$0xff]  ;;  %v1191_v16 = vld [vmem:[%s5664_s10 + $0x1be0] sm:$0xff] }
 0x14a   : > { %3046 = vmatprep.subr.mxu1 %v1204_v63  ;;  %2976 = vmatpush1.msra.mxu0 %v1075_v1  ;;  %v1320_v15 = vld [vmem:[%s5664_s10 + $0x1fe8] sm:$0xff]  ;;  %v1319_v17 = vld [vmem:[%s5664_s10 + $0x1fe0] sm:$0xff] }
 0x14b   : > { %3047 = vmatpush1.msra.mxu1 %v1203_v2  ;;  %2977 = vmatprep.subr.mxu0 %v1072_v4  ;;  %v1188_v19 = vld [vmem:[%s5664_s10 + $0x1bc8] sm:$0xff]  ;;  %v1187_v21 = vld [vmem:[%s5664_s10 + $0x1bc0] sm:$0xff] }
 0x14c   : > { %3048 = vmatprep.subr.mxu1 %v1200_v5  ;;  %2978 = vmatpush1.msra.mxu0 %v1071_v6  ;;  %v1316_v20 = vld [vmem:[%s5664_s10 + $0x1fc8] sm:$0xff]  ;;  %v1315_v22 = vld [vmem:[%s5664_s10 + $0x1fc0] sm:$0xff]  ;;  %v294_v6 = vld [vmem:[%s5657_s12 + $0x18] sm:$0xff] }
 0x14d   : > { %3049 = vmatpush1.msra.mxu1 %v1199_v7  ;;  %2979 = vmatprep.subr.mxu0 %v1068_v8  ;;  %v1184_v24 = vld [vmem:[%s5664_s10 + $0x1ba8] sm:$0xff]  ;;  %v1183_v26 = vld [vmem:[%s5664_s10 + $0x1ba0] sm:$0xff] }
 0x14e   : > { %3050 = vmatprep.subr.mxu1 %v1196_v9  ;;  %2980 = vmatpush1.msra.mxu0 %v1067_v11  ;;  %v1312_v25 = vld [vmem:[%s5664_s10 + $0x1fa8] sm:$0xff]  ;;  %v1311_v27 = vld [vmem:[%s5664_s10 + $0x1fa0] sm:$0xff] }
 0x14f   : > { %3051 = vmatpush1.msra.mxu1 %v1195_v13  ;;  %2981 = vmatprep.subr.mxu0 %v1192_v14  ;;  %v1180_v29 = vld [vmem:[%s5664_s10 + $0x1b88] sm:$0xff]  ;;  %v1179_v32 = vld [vmem:[%s5664_s10 + $0x1b80] sm:$0xff] }
 0x150   : > { %3052 = vmatprep.subr.mxu1 %v1320_v15  ;;  %2982 = vmatpush2.msra.mxu0 %v1191_v16  ;;  %v1308_v30 = vld [vmem:[%s5664_s10 + $0x1f88] sm:$0xff]  ;;  %v1307_v33 = vld [vmem:[%s5664_s10 + $0x1f80] sm:$0xff]  ;;  %v2406_v15 = vcombine.high %v294_v6, %v294_v6 }
 0x151   : > { %3053 = vmatpush2.msra.mxu1 %v1319_v17  ;;  %2983 = vmatprep.subr.mxu0 %v1188_v19  ;;  %v1176_v34 = vld [vmem:[%s5664_s10 + $0x1b68] sm:$0xff]  ;;  %v1175_v36 = vld [vmem:[%s5664_s10 + $0x1b60] sm:$0xff] }
 0x152   : > { %3054 = vmatprep.subr.mxu1 %v1316_v20  ;;  %2984 = vmatpush2.msra.mxu0 %v1187_v21  ;;  %v1304_v35 = vld [vmem:[%s5664_s10 + $0x1f68] sm:$0xff]  ;;  %v1303_v37 = vld [vmem:[%s5664_s10 + $0x1f60] sm:$0xff]  ;;  %v6242_v21 = vrot.slane %v294_v6, %v5790_v54 }
 0x153   : > { %3055 = vmatpush2.msra.mxu1 %v1315_v22  ;;  %2985 = vmatprep.subr.mxu0 %v1184_v24  ;;  %v1172_v38 = vld [vmem:[%s5664_s10 + $0x1b48] sm:$0xff]  ;;  %v1171_v40 = vld [vmem:[%s5664_s10 + $0x1b40] sm:$0xff] }
 0x154   : > { %3056 = vmatprep.subr.mxu1 %v1312_v25  ;;  %2986 = vmatpush2.msra.mxu0 %v1183_v26  ;;  %v1300_v39 = vld [vmem:[%s5664_s10 + $0x1f48] sm:$0xff]  ;;  %v1299_v41 = vld [vmem:[%s5664_s10 + $0x1f40] sm:$0xff] }
 0x155   : > { %3057 = vmatpush2.msra.mxu1 %v1311_v27  ;;  %2987 = vmatprep.subr.mxu0 %v1180_v29  ;;  %v1168_v42 = vld [vmem:[%s5664_s10 + $0x1b28] sm:$0xff]  ;;  %v1167_v46 = vld [vmem:[%s5664_s10 + $0x1b20] sm:$0xff]  ;;  %v6249_v27 = vrot.slane %v2406_v15, %v5790_v54 }
 0x156   : > { %3058 = vmatprep.subr.mxu1 %v1308_v30  ;;  %2988 = vmatpush2.msra.mxu0 %v1179_v32  ;;  %v1296_v43 = vld [vmem:[%s5664_s10 + $0x1f28] sm:$0xff]  ;;  %v1295_v47 = vld [vmem:[%s5664_s10 + $0x1f20] sm:$0xff] }
 0x157   : > { %3059 = vmatpush2.msra.mxu1 %v1307_v33  ;;  %2989 = vmatprep.subr.mxu0 %v1176_v34  ;;  %v1164_v48 = vld [vmem:[%s5664_s10 + $0x1b08] sm:$0xff]  ;;  %v1163_v51 = vld [vmem:[%s5664_s10 + $0x1b00] sm:$0xff]  ;;  %v6257_v34 = vcombine.high %v6242_v21, %v6242_v21 }
 0x158   : > { %3060 = vmatprep.subr.mxu1 %v1304_v35  ;;  %2990 = vmatpush2.msra.mxu0 %v1175_v36  ;;  %v1292_v49 = vld [vmem:[%s5664_s10 + $0x1f08] sm:$0xff]  ;;  %v1291_v52 = vld [vmem:[%s5664_s10 + $0x1f00] sm:$0xff] }
 0x159   : > { %3061 = vmatpush2.msra.mxu1 %v1303_v37  ;;  %2991 = vmatprep.subr.mxu0 %v1172_v38  ;;  %v1160_v53 = vld [vmem:[%s5664_s10 + $0x1ae8] sm:$0xff]  ;;  %v1159_v57 = vld [vmem:[%s5664_s10 + $0x1ae0] sm:$0xff]  ;;  %v6263_v37 = vcombine.high %v6249_v27, %v6249_v27 }
 0x15a   : > { %3062 = vmatprep.subr.mxu1 %v1300_v39  ;;  %2992 = vmatpush2.msra.mxu0 %v1171_v40  ;;  %v1288_v55 = vld [vmem:[%s5664_s10 + $0x1ee8] sm:$0xff]  ;;  %v1287_v58 = vld [vmem:[%s5664_s10 + $0x1ee0] sm:$0xff] }
 0x15b   : > { %3063 = vmatpush2.msra.mxu1 %v1299_v41  ;;  %2993 = vmatprep.subr.mxu0 %v1168_v42  ;;  %v1156_v60 = vld [vmem:[%s5664_s10 + $0x1ac8] sm:$0xff]  ;;  %v1155_v62 = vld [vmem:[%s5664_s10 + $0x1ac0] sm:$0xff] }
 0x15c   : > { %3064 = vmatprep.subr.mxu1 %v1296_v43  ;;  %2994 = vmatpush2.msra.mxu0 %v1167_v46  ;;  %v1284_v61 = vld [vmem:[%s5664_s10 + $0x1ec8] sm:$0xff]  ;;  %v1283_v63 = vld [vmem:[%s5664_s10 + $0x1ec0] sm:$0xff] }
 0x15d   : > { %3065 = vmatpush2.msra.mxu1 %v1295_v47  ;;  %2995 = vmatprep.subr.mxu0 %v1164_v48  ;;  %v1152_v1 = vld [vmem:[%s5664_s10 + $0x1aa8] sm:$0xff]  ;;  %v1151_v4 = vld [vmem:[%s5664_s10 + $0x1aa0] sm:$0xff] }
 0x15e   : > { %3066 = vmatprep.subr.mxu1 %v1292_v49  ;;  %2996 = vmatpush2.msra.mxu0 %v1163_v51  ;;  %v1280_v2 = vld [vmem:[%s5664_s10 + $0x1ea8] sm:$0xff]  ;;  %v1279_v5 = vld [vmem:[%s5664_s10 + $0x1ea0] sm:$0xff] }
 0x15f   : > { %3067 = vmatpush2.msra.mxu1 %v1291_v52  ;;  %2997 = vmatprep.subr.mxu0 %v1160_v53  ;;  %v1148_v7 = vld [vmem:[%s5664_s10 + $0x1a88] sm:$0xff]  ;;  %v1147_v9 = vld [vmem:[%s5664_s10 + $0x1a80] sm:$0xff] }
 0x160   : > { %3068 = vmatprep.subr.mxu1 %v1288_v55  ;;  %2998 = vmatpush2.msra.mxu0 %v1159_v57  ;;  %v1276_v8 = vld [vmem:[%s5664_s10 + $0x1e88] sm:$0xff]  ;;  %v1275_v11 = vld [vmem:[%s5664_s10 + $0x1e80] sm:$0xff] }
 0x161   : > { %3069 = vmatpush2.msra.mxu1 %v1287_v58  ;;  %2999 = vmatprep.subr.mxu0 %v1156_v60  ;;  %v1144_v13 = vld [vmem:[%s5664_s10 + $0x1a68] sm:$0xff]  ;;  %v1143_v16 = vld [vmem:[%s5664_s10 + $0x1a60] sm:$0xff] }
 0x162   : > { %3070 = vmatprep.subr.mxu1 %v1284_v61  ;;  %3000 = vmatpush2.msra.mxu0 %v1155_v62  ;;  %v1272_v14 = vld [vmem:[%s5664_s10 + $0x1e68] sm:$0xff]  ;;  %v1271_v17 = vld [vmem:[%s5664_s10 + $0x1e60] sm:$0xff] }
 0x163   : > { %3071 = vmatpush2.msra.mxu1 %v1283_v63  ;;  %3001 = vmatprep.subr.mxu0 %v1152_v1  ;;  %v1140_v19 = vld [vmem:[%s5664_s10 + $0x1a48] sm:$0xff]  ;;  %v1139_v22 = vld [vmem:[%s5664_s10 + $0x1a40] sm:$0xff] }
 0x164   : > { %3072 = vmatprep.subr.mxu1 %v1280_v2  ;;  %3002 = vmatpush2.msra.mxu0 %v1151_v4  ;;  %v1268_v20 = vld [vmem:[%s5664_s10 + $0x1e48] sm:$0xff]  ;;  %v1267_v24 = vld [vmem:[%s5664_s10 + $0x1e40] sm:$0xff] }
 0x165   : > { %3073 = vmatpush2.msra.mxu1 %v1279_v5  ;;  %3003 = vmatprep.subr.mxu0 %v1148_v7  ;;  %v1136_v25 = vld [vmem:[%s5664_s10 + $0x1a28] sm:$0xff]  ;;  %v1135_v29 = vld [vmem:[%s5664_s10 + $0x1a20] sm:$0xff] }
 0x166   : > { %3074 = vmatprep.subr.mxu1 %v1276_v8  ;;  %3004 = vmatpush2.msra.mxu0 %v1147_v9  ;;  %v1264_v26 = vld [vmem:[%s5664_s10 + $0x1e28] sm:$0xff]  ;;  %v1263_v30 = vld [vmem:[%s5664_s10 + $0x1e20] sm:$0xff] }
 0x167   : > { %3075 = vmatpush2.msra.mxu1 %v1275_v11  ;;  %3005 = vmatprep.subr.mxu0 %v1144_v13  ;;  %v1132_v32 = vld [vmem:[%s5664_s10 + $0x1a08] sm:$0xff]  ;;  %v1131_v35 = vld [vmem:[%s5664_s10 + $0x1a00] sm:$0xff] }
 0x168   : > { %3076 = vmatprep.subr.mxu1 %v1272_v14  ;;  %3006 = vmatpush2.msra.mxu0 %v1143_v16  ;;  %v1260_v33 = vld [vmem:[%s5664_s10 + $0x1e08] sm:$0xff]  ;;  %v1259_v36 = vld [vmem:[%s5664_s10 + $0x1e00] sm:$0xff] }
 0x169   : > { %3077 = vmatpush2.msra.mxu1 %v1271_v17  ;;  %3007 = vmatprep.subr.mxu0 %v1140_v19  ;;  %v1384_v38 = vld [vmem:[%s5664_s10 + $0x21e8] sm:$0xff]  ;;  %v1383_v40 = vld [vmem:[%s5664_s10 + $0x21e0] sm:$0xff] }
 0x16a   : > { %3078 = vmatprep.subr.mxu1 %v1268_v20  ;;  %3008 = vmatpush2.msra.mxu0 %v1139_v22  ;;  %v1512_v39 = vld [vmem:[%s5664_s10 + $0x25e8] sm:$0xff]  ;;  %v1511_v41 = vld [vmem:[%s5664_s10 + $0x25e0] sm:$0xff] }
 0x16b   : > { %3079 = vmatpush2.msra.mxu1 %v1267_v24  ;;  %3009 = vmatprep.subr.mxu0 %v1136_v25  ;;  %v1380_v42 = vld [vmem:[%s5664_s10 + $0x21c8] sm:$0xff]  ;;  %v1379_v46 = vld [vmem:[%s5664_s10 + $0x21c0] sm:$0xff] }
 0x16c   : > { %3080 = vmatprep.subr.mxu1 %v1264_v26  ;;  %3010 = vmatpush2.msra.mxu0 %v1135_v29  ;;  %v1508_v43 = vld [vmem:[%s5664_s10 + $0x25c8] sm:$0xff]  ;;  %v1507_v47 = vld [vmem:[%s5664_s10 + $0x25c0] sm:$0xff] }
 0x16d   : > { %3081 = vmatpush2.msra.mxu1 %v1263_v30  ;;  %3011 = vmatprep.subr.mxu0 %v1132_v32  ;;  %v1376_v48 = vld [vmem:[%s5664_s10 + $0x21a8] sm:$0xff]  ;;  %v1375_v51 = vld [vmem:[%s5664_s10 + $0x21a0] sm:$0xff] }
 0x16e   : > { %3082 = vmatprep.subr.mxu1 %v1260_v33  ;;  %3012 = vmatpush2.msra.mxu0 %v1131_v35  ;;  %v1504_v49 = vld [vmem:[%s5664_s10 + $0x25a8] sm:$0xff]  ;;  %v1503_v52 = vld [vmem:[%s5664_s10 + $0x25a0] sm:$0xff] }
 0x16f   : > { %3013 = vmatprep.mubr.f32.mxu0 %v6257_v34  ;;  %3083 = vmatpush2.msra.mxu1 %v1259_v36  ;;  %v1372_v53 = vld [vmem:[%s5664_s10 + $0x2188] sm:$0xff]  ;;  %v1371_v57 = vld [vmem:[%s5664_s10 + $0x2180] sm:$0xff] }
 0x170   : > { %3014 = vmatmul.mubr.f32.vlgmr.msra.gmra.mxu0 %v6242_v21  ;;  %3084 = vmatprep.mubr.f32.mxu1 %v6263_v37  ;;  %v1500_v55 = vld [vmem:[%s5664_s10 + $0x2588] sm:$0xff]  ;;  %v1499_v58 = vld [vmem:[%s5664_s10 + $0x2580] sm:$0xff] }
 0x171   : > { %3091 = vmatprep.subr.mxu0 %v1384_v38  ;;  %3162 = vmatprep.subr.mxu1 %v1512_v39  ;;  %v1368_v60 = vld [vmem:[%s5664_s10 + $0x2168] sm:$0xff]  ;;  %v1367_v62 = vld [vmem:[%s5664_s10 + $0x2160] sm:$0xff] }
 0x172   : > { %3085 = vmatmul.mubr.f32.vlgmr.msra.gmra.mxu1 %v6249_v27  ;;  %3092 = vmatpush1.msra.mxu0 %v1383_v40  ;;  %v1496_v61 = vld [vmem:[%s5664_s10 + $0x2568] sm:$0xff]  ;;  %v1495_v63 = vld [vmem:[%s5664_s10 + $0x2560] sm:$0xff] }
 0x173   : > { %3163 = vmatpush1.msra.mxu1 %v1511_v41  ;;  %3093 = vmatprep.subr.mxu0 %v1380_v42  ;;  %v1364_v1 = vld [vmem:[%s5664_s10 + $0x2148] sm:$0xff]  ;;  %v1363_v4 = vld [vmem:[%s5664_s10 + $0x2140] sm:$0xff] }
 0x174   : > { %3164 = vmatprep.subr.mxu1 %v1508_v43  ;;  %3094 = vmatpush1.msra.mxu0 %v1379_v46  ;;  %v1492_v2 = vld [vmem:[%s5664_s10 + $0x2548] sm:$0xff]  ;;  %v1491_v5 = vld [vmem:[%s5664_s10 + $0x2540] sm:$0xff] }
 0x175   : > { %3165 = vmatpush1.msra.mxu1 %v1507_v47  ;;  %3095 = vmatprep.subr.mxu0 %v1376_v48  ;;  %v1360_v6 = vld [vmem:[%s5664_s10 + $0x2128] sm:$0xff]  ;;  %v1359_v8 = vld [vmem:[%s5664_s10 + $0x2120] sm:$0xff] }
 0x176   : > { %3166 = vmatprep.subr.mxu1 %v1504_v49  ;;  %3096 = vmatpush1.msra.mxu0 %v1375_v51  ;;  %v1488_v7 = vld [vmem:[%s5664_s10 + $0x2528] sm:$0xff]  ;;  %v1487_v9 = vld [vmem:[%s5664_s10 + $0x2520] sm:$0xff] }
 0x177   : > { %3167 = vmatpush1.msra.mxu1 %v1503_v52  ;;  %3097 = vmatprep.subr.mxu0 %v1372_v53  ;;  %v1356_v11 = vld [vmem:[%s5664_s10 + $0x2108] sm:$0xff]  ;;  %v1355_v14 = vld [vmem:[%s5664_s10 + $0x2100] sm:$0xff] }
 0x178   : > { %3168 = vmatprep.subr.mxu1 %v1500_v55  ;;  %3098 = vmatpush1.msra.mxu0 %v1371_v57  ;;  %v1484_v13 = vld [vmem:[%s5664_s10 + $0x2508] sm:$0xff]  ;;  %v1483_v15 = vld [vmem:[%s5664_s10 + $0x2500] sm:$0xff] }
 0x179   : > { %3169 = vmatpush1.msra.mxu1 %v1499_v58  ;;  %3099 = vmatprep.subr.mxu0 %v1368_v60  ;;  %v1352_v16 = vld [vmem:[%s5664_s10 + $0x20e8] sm:$0xff]  ;;  %v1351_v19 = vld [vmem:[%s5664_s10 + $0x20e0] sm:$0xff] }
 0x17a   : > { %3170 = vmatprep.subr.mxu1 %v1496_v61  ;;  %3100 = vmatpush1.msra.mxu0 %v1367_v62  ;;  %v1480_v17 = vld [vmem:[%s5664_s10 + $0x24e8] sm:$0xff]  ;;  %v1479_v20 = vld [vmem:[%s5664_s10 + $0x24e0] sm:$0xff] }
 0x17b   : > { %3171 = vmatpush1.msra.mxu1 %v1495_v63  ;;  %3101 = vmatprep.subr.mxu0 %v1364_v1  ;;  %v1348_v22 = vld [vmem:[%s5664_s10 + $0x20c8] sm:$0xff]  ;;  %v1347_v25 = vld [vmem:[%s5664_s10 + $0x20c0] sm:$0xff] }
 0x17c   : > { %3172 = vmatprep.subr.mxu1 %v1492_v2  ;;  %3102 = vmatpush1.msra.mxu0 %v1363_v4  ;;  %v1476_v24 = vld [vmem:[%s5664_s10 + $0x24c8] sm:$0xff]  ;;  %v1475_v26 = vld [vmem:[%s5664_s10 + $0x24c0] sm:$0xff] }
 0x17d   : > { %3173 = vmatpush1.msra.mxu1 %v1491_v5  ;;  %3103 = vmatprep.subr.mxu0 %v1360_v6  ;;  %v1344_v29 = vld [vmem:[%s5664_s10 + $0x20a8] sm:$0xff]  ;;  %v1343_v32 = vld [vmem:[%s5664_s10 + $0x20a0] sm:$0xff] }
 0x17e   : > { %3174 = vmatprep.subr.mxu1 %v1488_v7  ;;  %3104 = vmatpush1.msra.mxu0 %v1359_v8  ;;  %v1472_v30 = vld [vmem:[%s5664_s10 + $0x24a8] sm:$0xff]  ;;  %v1471_v33 = vld [vmem:[%s5664_s10 + $0x24a0] sm:$0xff] }
 0x17f   : > { %3175 = vmatpush1.msra.mxu1 %v1487_v9  ;;  %3105 = vmatprep.subr.mxu0 %v1356_v11  ;;  %v1340_v35 = vld [vmem:[%s5664_s10 + $0x2088] sm:$0xff]  ;;  %v1339_v38 = vld [vmem:[%s5664_s10 + $0x2080] sm:$0xff] }
 0x180   : > { %3176 = vmatprep.subr.mxu1 %v1484_v13  ;;  %3106 = vmatpush1.msra.mxu0 %v1355_v14  ;;  %v1468_v36 = vld [vmem:[%s5664_s10 + $0x2488] sm:$0xff]  ;;  %v1467_v39 = vld [vmem:[%s5664_s10 + $0x2480] sm:$0xff] }
 0x181   : > { %3177 = vmatpush1.msra.mxu1 %v1483_v15  ;;  %3107 = vmatprep.subr.mxu0 %v1352_v16  ;;  %v1336_v40 = vld [vmem:[%s5664_s10 + $0x2068] sm:$0xff]  ;;  %v1335_v42 = vld [vmem:[%s5664_s10 + $0x2060] sm:$0xff] }
 0x182   : > { %3178 = vmatprep.subr.mxu1 %v1480_v17  ;;  %3108 = vmatpush1.msra.mxu0 %v1351_v19  ;;  %v1464_v41 = vld [vmem:[%s5664_s10 + $0x2468] sm:$0xff]  ;;  %v1463_v43 = vld [vmem:[%s5664_s10 + $0x2460] sm:$0xff] }
 0x183   : > { %3179 = vmatpush1.msra.mxu1 %v1479_v20  ;;  %3109 = vmatprep.subr.mxu0 %v1348_v22  ;;  %v1332_v46 = vld [vmem:[%s5664_s10 + $0x2048] sm:$0xff]  ;;  %v1331_v48 = vld [vmem:[%s5664_s10 + $0x2040] sm:$0xff] }
 0x184   : > { %3180 = vmatprep.subr.mxu1 %v1476_v24  ;;  %3110 = vmatpush1.msra.mxu0 %v1347_v25  ;;  %v1460_v47 = vld [vmem:[%s5664_s10 + $0x2448] sm:$0xff]  ;;  %v1459_v49 = vld [vmem:[%s5664_s10 + $0x2440] sm:$0xff] }
 0x185   : > { %3181 = vmatpush1.msra.mxu1 %v1475_v26  ;;  %3111 = vmatprep.subr.mxu0 %v1344_v29  ;;  %v1328_v51 = vld [vmem:[%s5664_s10 + $0x2028] sm:$0xff]  ;;  %v1327_v53 = vld [vmem:[%s5664_s10 + $0x2020] sm:$0xff] }
 0x186   : > { %3182 = vmatprep.subr.mxu1 %v1472_v30  ;;  %3112 = vmatpush1.msra.mxu0 %v1343_v32  ;;  %v1456_v52 = vld [vmem:[%s5664_s10 + $0x2428] sm:$0xff]  ;;  %v1455_v55 = vld [vmem:[%s5664_s10 + $0x2420] sm:$0xff] }
 0x187   : > { %3183 = vmatpush1.msra.mxu1 %v1471_v33  ;;  %3113 = vmatprep.subr.mxu0 %v1340_v35  ;;  %v1324_v57 = vld [vmem:[%s5664_s10 + $0x2008] sm:$0xff]  ;;  %v1323_v60 = vld [vmem:[%s5664_s10 + $0x2000] sm:$0xff] }
 0x188   : > { %3184 = vmatprep.subr.mxu1 %v1468_v36  ;;  %3114 = vmatpush1.msra.mxu0 %v1339_v38  ;;  %v1452_v58 = vld [vmem:[%s5664_s10 + $0x2408] sm:$0xff]  ;;  %v1451_v61 = vld [vmem:[%s5664_s10 + $0x2400] sm:$0xff] }
 0x189   : > { %3185 = vmatpush1.msra.mxu1 %v1467_v39  ;;  %3115 = vmatprep.subr.mxu0 %v1336_v40  ;;  %v1448_v62 = vld [vmem:[%s5664_s10 + $0x23e8] sm:$0xff]  ;;  %v1447_v1 = vld [vmem:[%s5664_s10 + $0x23e0] sm:$0xff] }
 0x18a   : > { %3186 = vmatprep.subr.mxu1 %v1464_v41  ;;  %3116 = vmatpush1.msra.mxu0 %v1335_v42  ;;  %v1576_v63 = vld [vmem:[%s5664_s10 + $0x27e8] sm:$0xff]  ;;  %v1575_v2 = vld [vmem:[%s5664_s10 + $0x27e0] sm:$0xff] }
 0x18b   : > { %3187 = vmatpush1.msra.mxu1 %v1463_v43  ;;  %3117 = vmatprep.subr.mxu0 %v1332_v46  ;;  %v1444_v4 = vld [vmem:[%s5664_s10 + $0x23c8] sm:$0xff]  ;;  %v1443_v6 = vld [vmem:[%s5664_s10 + $0x23c0] sm:$0xff] }
 0x18c   : > { %3188 = vmatprep.subr.mxu1 %v1460_v47  ;;  %3118 = vmatpush1.msra.mxu0 %v1331_v48  ;;  %v1572_v5 = vld [vmem:[%s5664_s10 + $0x27c8] sm:$0xff]  ;;  %v1571_v7 = vld [vmem:[%s5664_s10 + $0x27c0] sm:$0xff] }
 0x18d   : > { %3189 = vmatpush1.msra.mxu1 %v1459_v49  ;;  %3119 = vmatprep.subr.mxu0 %v1328_v51  ;;  %v1440_v8 = vld [vmem:[%s5664_s10 + $0x23a8] sm:$0xff]  ;;  %v1439_v11 = vld [vmem:[%s5664_s10 + $0x23a0] sm:$0xff] }
 0x18e   : > { %3190 = vmatprep.subr.mxu1 %v1456_v52  ;;  %3120 = vmatpush1.msra.mxu0 %v1327_v53  ;;  %v1568_v9 = vld [vmem:[%s5664_s10 + $0x27a8] sm:$0xff]  ;;  %v1567_v13 = vld [vmem:[%s5664_s10 + $0x27a0] sm:$0xff] }
 0x18f   : > { %3191 = vmatpush1.msra.mxu1 %v1455_v55  ;;  %3121 = vmatprep.subr.mxu0 %v1324_v57  ;;  %v1436_v14 = vld [vmem:[%s5664_s10 + $0x2388] sm:$0xff]  ;;  %v1435_v16 = vld [vmem:[%s5664_s10 + $0x2380] sm:$0xff] }
 0x190   : > { %3192 = vmatprep.subr.mxu1 %v1452_v58  ;;  %3122 = vmatpush1.msra.mxu0 %v1323_v60  ;;  %v1564_v15 = vld [vmem:[%s5664_s10 + $0x2788] sm:$0xff]  ;;  %v1563_v17 = vld [vmem:[%s5664_s10 + $0x2780] sm:$0xff] }
 0x191   : > { %3193 = vmatpush1.msra.mxu1 %v1451_v61  ;;  %3123 = vmatprep.subr.mxu0 %v1448_v62  ;;  %v1432_v19 = vld [vmem:[%s5664_s10 + $0x2368] sm:$0xff]  ;;  %v1431_v22 = vld [vmem:[%s5664_s10 + $0x2360] sm:$0xff] }
 0x192   : > { %3194 = vmatprep.subr.mxu1 %v1576_v63  ;;  %3124 = vmatpush2.msra.mxu0 %v1447_v1  ;;  %v1560_v20 = vld [vmem:[%s5664_s10 + $0x2768] sm:$0xff]  ;;  %v1559_v24 = vld [vmem:[%s5664_s10 + $0x2760] sm:$0xff] }
 0x193   : > { %3195 = vmatpush2.msra.mxu1 %v1575_v2  ;;  %3125 = vmatprep.subr.mxu0 %v1444_v4  ;;  %v1428_v25 = vld [vmem:[%s5664_s10 + $0x2348] sm:$0xff]  ;;  %v1427_v29 = vld [vmem:[%s5664_s10 + $0x2340] sm:$0xff] }
 0x194   : > { %3196 = vmatprep.subr.mxu1 %v1572_v5  ;;  %3126 = vmatpush2.msra.mxu0 %v1443_v6  ;;  %v1556_v26 = vld [vmem:[%s5664_s10 + $0x2748] sm:$0xff]  ;;  %v1555_v30 = vld [vmem:[%s5664_s10 + $0x2740] sm:$0xff] }
 0x195   : > { %3197 = vmatpush2.msra.mxu1 %v1571_v7  ;;  %3127 = vmatprep.subr.mxu0 %v1440_v8  ;;  %v1424_v32 = vld [vmem:[%s5664_s10 + $0x2328] sm:$0xff]  ;;  %v1423_v35 = vld [vmem:[%s5664_s10 + $0x2320] sm:$0xff] }
 0x196   : > { %3198 = vmatprep.subr.mxu1 %v1568_v9  ;;  %3128 = vmatpush2.msra.mxu0 %v1439_v11  ;;  %v1552_v33 = vld [vmem:[%s5664_s10 + $0x2728] sm:$0xff]  ;;  %v1551_v36 = vld [vmem:[%s5664_s10 + $0x2720] sm:$0xff] }
 0x197   : > { %3199 = vmatpush2.msra.mxu1 %v1567_v13  ;;  %3129 = vmatprep.subr.mxu0 %v1436_v14  ;;  %v1420_v38 = vld [vmem:[%s5664_s10 + $0x2308] sm:$0xff]  ;;  %v1419_v40 = vld [vmem:[%s5664_s10 + $0x2300] sm:$0xff] }
 0x198   : > { %3200 = vmatprep.subr.mxu1 %v1564_v15  ;;  %3130 = vmatpush2.msra.mxu0 %v1435_v16  ;;  %v1548_v39 = vld [vmem:[%s5664_s10 + $0x2708] sm:$0xff]  ;;  %v1547_v41 = vld [vmem:[%s5664_s10 + $0x2700] sm:$0xff] }
 0x199   : > { %3201 = vmatpush2.msra.mxu1 %v1563_v17  ;;  %3131 = vmatprep.subr.mxu0 %v1432_v19  ;;  %v1416_v42 = vld [vmem:[%s5664_s10 + $0x22e8] sm:$0xff]  ;;  %v1415_v46 = vld [vmem:[%s5664_s10 + $0x22e0] sm:$0xff] }
 0x19a   : > { %3202 = vmatprep.subr.mxu1 %v1560_v20  ;;  %3132 = vmatpush2.msra.mxu0 %v1431_v22  ;;  %v1544_v43 = vld [vmem:[%s5664_s10 + $0x26e8] sm:$0xff]  ;;  %v1543_v47 = vld [vmem:[%s5664_s10 + $0x26e0] sm:$0xff] }
 0x19b   : > { %3203 = vmatpush2.msra.mxu1 %v1559_v24  ;;  %3133 = vmatprep.subr.mxu0 %v1428_v25  ;;  %v1412_v48 = vld [vmem:[%s5664_s10 + $0x22c8] sm:$0xff]  ;;  %v1411_v51 = vld [vmem:[%s5664_s10 + $0x22c0] sm:$0xff] }
 0x19c   : > { %3204 = vmatprep.subr.mxu1 %v1556_v26  ;;  %3134 = vmatpush2.msra.mxu0 %v1427_v29  ;;  %v1540_v49 = vld [vmem:[%s5664_s10 + $0x26c8] sm:$0xff]  ;;  %v1539_v52 = vld [vmem:[%s5664_s10 + $0x26c0] sm:$0xff] }
 0x19d   : > { %3205 = vmatpush2.msra.mxu1 %v1555_v30  ;;  %3135 = vmatprep.subr.mxu0 %v1424_v32  ;;  %v1408_v53 = vld [vmem:[%s5664_s10 + $0x22a8] sm:$0xff]  ;;  %v1407_v57 = vld [vmem:[%s5664_s10 + $0x22a0] sm:$0xff] }
 0x19e   : > { %3206 = vmatprep.subr.mxu1 %v1552_v33  ;;  %3136 = vmatpush2.msra.mxu0 %v1423_v35  ;;  %v1536_v55 = vld [vmem:[%s5664_s10 + $0x26a8] sm:$0xff]  ;;  %v1535_v58 = vld [vmem:[%s5664_s10 + $0x26a0] sm:$0xff] }
 0x19f   : > { %3207 = vmatpush2.msra.mxu1 %v1551_v36  ;;  %3137 = vmatprep.subr.mxu0 %v1420_v38  ;;  %v295_v60 = vld [vmem:[%s5657_s12 + $0x20] sm:$0xff]  ;;  %v1404_v61 = vld [vmem:[%s5664_s10 + $0x2288] sm:$0xff] }
 0x1a0   : > { %3208 = vmatprep.subr.mxu1 %v1548_v39  ;;  %3138 = vmatpush2.msra.mxu0 %v1419_v40  ;;  %v1532_v62 = vld [vmem:[%s5664_s10 + $0x2688] sm:$0xff]  ;;  %v1403_v63 = vld [vmem:[%s5664_s10 + $0x2280] sm:$0xff]  ;;  %v2423_v5 = vcombine.high %v295_v60, %v295_v60  ;;  %v6389_v11 = vrot.slane %v295_v60, %v5790_v54 }
 0x1a1   : > { %3209 = vmatpush2.msra.mxu1 %v1547_v41  ;;  %3139 = vmatprep.subr.mxu0 %v1416_v42  ;;  %v1531_v1 = vld [vmem:[%s5664_s10 + $0x2680] sm:$0xff]  ;;  %v1400_v2 = vld [vmem:[%s5664_s10 + $0x2268] sm:$0xff] }
 0x1a2   : > { %3210 = vmatprep.subr.mxu1 %v1544_v43  ;;  %3140 = vmatpush2.msra.mxu0 %v1415_v46  ;;  %v1528_v4 = vld [vmem:[%s5664_s10 + $0x2668] sm:$0xff]  ;;  %v1399_v6 = vld [vmem:[%s5664_s10 + $0x2260] sm:$0xff]  ;;  %v6396_v17 = vrot.slane %v2423_v5, %v5790_v54  ;;  %v6404_v25 = vcombine.high %v6389_v11, %v6389_v11 }
 0x1a3   : > { %3211 = vmatpush2.msra.mxu1 %v1543_v47  ;;  %3141 = vmatprep.subr.mxu0 %v1412_v48  ;;  %v1527_v7 = vld [vmem:[%s5664_s10 + $0x2660] sm:$0xff]  ;;  %v1396_v8 = vld [vmem:[%s5664_s10 + $0x2248] sm:$0xff] }
 0x1a4   : > { %3212 = vmatprep.subr.mxu1 %v1540_v49  ;;  %3142 = vmatpush2.msra.mxu0 %v1411_v51  ;;  %v1524_v9 = vld [vmem:[%s5664_s10 + $0x2648] sm:$0xff]  ;;  %v1395_v13 = vld [vmem:[%s5664_s10 + $0x2240] sm:$0xff]  ;;  %v6410_v30 = vcombine.high %v6396_v17, %v6396_v17 }
 0x1a5   : > { %3213 = vmatpush2.msra.mxu1 %v1539_v52  ;;  %3143 = vmatprep.subr.mxu0 %v1408_v53  ;;  %v1523_v14 = vld [vmem:[%s5664_s10 + $0x2640] sm:$0xff]  ;;  %v1392_v15 = vld [vmem:[%s5664_s10 + $0x2228] sm:$0xff] }
 0x1a6   : > { %3214 = vmatprep.subr.mxu1 %v1536_v55  ;;  %3144 = vmatpush2.msra.mxu0 %v1407_v57  ;;  %v1520_v16 = vld [vmem:[%s5664_s10 + $0x2628] sm:$0xff]  ;;  %v1391_v19 = vld [vmem:[%s5664_s10 + $0x2220] sm:$0xff] }
 0x1a7   : > { %3215 = vmatpush2.msra.mxu1 %v1535_v58  ;;  %3145 = vmatprep.subr.mxu0 %v1404_v61  ;;  %v1519_v20 = vld [vmem:[%s5664_s10 + $0x2620] sm:$0xff]  ;;  %v1388_v22 = vld [vmem:[%s5664_s10 + $0x2208] sm:$0xff] }
 0x1a8   : > { %3216 = vmatprep.subr.mxu1 %v1532_v62  ;;  %3146 = vmatpush2.msra.mxu0 %v1403_v63  ;;  %v1516_v24 = vld [vmem:[%s5664_s10 + $0x2608] sm:$0xff]  ;;  %v1387_v26 = vld [vmem:[%s5664_s10 + $0x2200] sm:$0xff] }
 0x1a9   : > { %3217 = vmatpush2.msra.mxu1 %v1531_v1  ;;  %3147 = vmatprep.subr.mxu0 %v1400_v2  ;;  %v1515_v29 = vld [vmem:[%s5664_s10 + $0x2600] sm:$0xff]  ;;  %v1640_v32 = vld [vmem:[%s5664_s10 + $0x29e8] sm:$0xff] }
 0x1aa   : > { %3218 = vmatprep.subr.mxu1 %v1528_v4  ;;  %3148 = vmatpush2.msra.mxu0 %v1399_v6  ;;  %v1768_v33 = vld [vmem:[%s5664_s10 + $0x2de8] sm:$0xff]  ;;  %v1639_v35 = vld [vmem:[%s5664_s10 + $0x29e0] sm:$0xff] }
 0x1ab   : > { %3219 = vmatpush2.msra.mxu1 %v1527_v7  ;;  %3149 = vmatprep.subr.mxu0 %v1396_v8  ;;  %v1767_v36 = vld [vmem:[%s5664_s10 + $0x2de0] sm:$0xff]  ;;  %v1636_v38 = vld [vmem:[%s5664_s10 + $0x29c8] sm:$0xff] }
 0x1ac   : > { %3220 = vmatprep.subr.mxu1 %v1524_v9  ;;  %3150 = vmatpush2.msra.mxu0 %v1395_v13  ;;  %v1764_v39 = vld [vmem:[%s5664_s10 + $0x2dc8] sm:$0xff]  ;;  %v1635_v40 = vld [vmem:[%s5664_s10 + $0x29c0] sm:$0xff] }
 0x1ad   : > { %3221 = vmatpush2.msra.mxu1 %v1523_v14  ;;  %3151 = vmatprep.subr.mxu0 %v1392_v15  ;;  %v1763_v41 = vld [vmem:[%s5664_s10 + $0x2dc0] sm:$0xff]  ;;  %v1632_v42 = vld [vmem:[%s5664_s10 + $0x29a8] sm:$0xff] }
 0x1ae   : > { %3222 = vmatprep.subr.mxu1 %v1520_v16  ;;  %3152 = vmatpush2.msra.mxu0 %v1391_v19  ;;  %v1760_v43 = vld [vmem:[%s5664_s10 + $0x2da8] sm:$0xff]  ;;  %v1631_v46 = vld [vmem:[%s5664_s10 + $0x29a0] sm:$0xff] }
 0x1af   : > { %3223 = vmatpush2.msra.mxu1 %v1519_v20  ;;  %3153 = vmatprep.subr.mxu0 %v1388_v22  ;;  %v1759_v47 = vld [vmem:[%s5664_s10 + $0x2da0] sm:$0xff]  ;;  %v1628_v48 = vld [vmem:[%s5664_s10 + $0x2988] sm:$0xff] }
 0x1b0   : > { %3224 = vmatprep.subr.mxu1 %v1516_v24  ;;  %3154 = vmatpush2.msra.mxu0 %v1387_v26  ;;  %v1756_v49 = vld [vmem:[%s5664_s10 + $0x2d88] sm:$0xff]  ;;  %v1627_v51 = vld [vmem:[%s5664_s10 + $0x2980] sm:$0xff] }
 0x1b1   : > { %3155 = vmatprep.mubr.f32.mxu0 %v6404_v25  ;;  %3225 = vmatpush2.msra.mxu1 %v1515_v29  ;;  %v1755_v52 = vld [vmem:[%s5664_s10 + $0x2d80] sm:$0xff]  ;;  %v1624_v53 = vld [vmem:[%s5664_s10 + $0x2968] sm:$0xff] }
 0x1b2   : > { %3156 = vmatmul.mubr.f32.vlgmr.msra.gmra.mxu0 %v6389_v11  ;;  %3226 = vmatprep.mubr.f32.mxu1 %v6410_v30  ;;  %v1752_v55 = vld [vmem:[%s5664_s10 + $0x2d68] sm:$0xff]  ;;  %v1623_v57 = vld [vmem:[%s5664_s10 + $0x2960] sm:$0xff] }
 0x1b3   : > { %3233 = vmatprep.subr.mxu0 %v1640_v32  ;;  %3304 = vmatprep.subr.mxu1 %v1768_v33  ;;  %v1751_v58 = vld [vmem:[%s5664_s10 + $0x2d60] sm:$0xff]  ;;  %v1620_v60 = vld [vmem:[%s5664_s10 + $0x2948] sm:$0xff] }
 0x1b4   : > { %3227 = vmatmul.mubr.f32.vlgmr.msra.gmra.mxu1 %v6396_v17  ;;  %3234 = vmatpush1.msra.mxu0 %v1639_v35  ;;  %v1748_v61 = vld [vmem:[%s5664_s10 + $0x2d48] sm:$0xff]  ;;  %v1619_v62 = vld [vmem:[%s5664_s10 + $0x2940] sm:$0xff] }
 0x1b5   : > { %3305 = vmatpush1.msra.mxu1 %v1767_v36  ;;  %3235 = vmatprep.subr.mxu0 %v1636_v38  ;;  %v1747_v63 = vld [vmem:[%s5664_s10 + $0x2d40] sm:$0xff]  ;;  %v1616_v1 = vld [vmem:[%s5664_s10 + $0x2928] sm:$0xff] }
 0x1b6   : > { %3306 = vmatprep.subr.mxu1 %v1764_v39  ;;  %3236 = vmatpush1.msra.mxu0 %v1635_v40  ;;  %v1744_v2 = vld [vmem:[%s5664_s10 + $0x2d28] sm:$0xff]  ;;  %v1615_v4 = vld [vmem:[%s5664_s10 + $0x2920] sm:$0xff] }
 0x1b7   : > { %3307 = vmatpush1.msra.mxu1 %v1763_v41  ;;  %3237 = vmatprep.subr.mxu0 %v1632_v42  ;;  %v1743_v5 = vld [vmem:[%s5664_s10 + $0x2d20] sm:$0xff]  ;;  %v1612_v6 = vld [vmem:[%s5664_s10 + $0x2908] sm:$0xff] }
 0x1b8   : > { %3308 = vmatprep.subr.mxu1 %v1760_v43  ;;  %3238 = vmatpush1.msra.mxu0 %v1631_v46  ;;  %v1740_v7 = vld [vmem:[%s5664_s10 + $0x2d08] sm:$0xff]  ;;  %v1611_v8 = vld [vmem:[%s5664_s10 + $0x2900] sm:$0xff] }
 0x1b9   : > { %3309 = vmatpush1.msra.mxu1 %v1759_v47  ;;  %3239 = vmatprep.subr.mxu0 %v1628_v48  ;;  %v1739_v9 = vld [vmem:[%s5664_s10 + $0x2d00] sm:$0xff]  ;;  %v1608_v13 = vld [vmem:[%s5664_s10 + $0x28e8] sm:$0xff] }
 0x1ba   : > { %3310 = vmatprep.subr.mxu1 %v1756_v49  ;;  %3240 = vmatpush1.msra.mxu0 %v1627_v51  ;;  %v1736_v14 = vld [vmem:[%s5664_s10 + $0x2ce8] sm:$0xff]  ;;  %v1607_v15 = vld [vmem:[%s5664_s10 + $0x28e0] sm:$0xff] }
 0x1bb   : > { %3311 = vmatpush1.msra.mxu1 %v1755_v52  ;;  %3241 = vmatprep.subr.mxu0 %v1624_v53  ;;  %v1735_v16 = vld [vmem:[%s5664_s10 + $0x2ce0] sm:$0xff]  ;;  %v1604_v19 = vld [vmem:[%s5664_s10 + $0x28c8] sm:$0xff] }
 0x1bc   : > { %3312 = vmatprep.subr.mxu1 %v1752_v55  ;;  %3242 = vmatpush1.msra.mxu0 %v1623_v57  ;;  %v1732_v20 = vld [vmem:[%s5664_s10 + $0x2cc8] sm:$0xff]  ;;  %v1603_v22 = vld [vmem:[%s5664_s10 + $0x28c0] sm:$0xff] }
 0x1bd   : > { %3313 = vmatpush1.msra.mxu1 %v1751_v58  ;;  %3243 = vmatprep.subr.mxu0 %v1620_v60  ;;  %v1731_v24 = vld [vmem:[%s5664_s10 + $0x2cc0] sm:$0xff]  ;;  %v1600_v26 = vld [vmem:[%s5664_s10 + $0x28a8] sm:$0xff] }
 0x1be   : > { %3314 = vmatprep.subr.mxu1 %v1748_v61  ;;  %3244 = vmatpush1.msra.mxu0 %v1619_v62  ;;  %v1728_v29 = vld [vmem:[%s5664_s10 + $0x2ca8] sm:$0xff]  ;;  %v1599_v32 = vld [vmem:[%s5664_s10 + $0x28a0] sm:$0xff] }
 0x1bf   : > { %3315 = vmatpush1.msra.mxu1 %v1747_v63  ;;  %3245 = vmatprep.subr.mxu0 %v1616_v1  ;;  %v1727_v33 = vld [vmem:[%s5664_s10 + $0x2ca0] sm:$0xff]  ;;  %v1596_v35 = vld [vmem:[%s5664_s10 + $0x2888] sm:$0xff] }
 0x1c0   : > { %3316 = vmatprep.subr.mxu1 %v1744_v2  ;;  %3246 = vmatpush1.msra.mxu0 %v1615_v4  ;;  %v1724_v36 = vld [vmem:[%s5664_s10 + $0x2c88] sm:$0xff]  ;;  %v1595_v38 = vld [vmem:[%s5664_s10 + $0x2880] sm:$0xff] }
 0x1c1   : > { %3317 = vmatpush1.msra.mxu1 %v1743_v5  ;;  %3247 = vmatprep.subr.mxu0 %v1612_v6  ;;  %v1723_v39 = vld [vmem:[%s5664_s10 + $0x2c80] sm:$0xff]  ;;  %v1592_v40 = vld [vmem:[%s5664_s10 + $0x2868] sm:$0xff] }
 0x1c2   : > { %3318 = vmatprep.subr.mxu1 %v1740_v7  ;;  %3248 = vmatpush1.msra.mxu0 %v1611_v8  ;;  %v1720_v41 = vld [vmem:[%s5664_s10 + $0x2c68] sm:$0xff]  ;;  %v1591_v42 = vld [vmem:[%s5664_s10 + $0x2860] sm:$0xff] }
 0x1c3   : > { %3319 = vmatpush1.msra.mxu1 %v1739_v9  ;;  %3249 = vmatprep.subr.mxu0 %v1608_v13  ;;  %v1719_v43 = vld [vmem:[%s5664_s10 + $0x2c60] sm:$0xff]  ;;  %v1588_v46 = vld [vmem:[%s5664_s10 + $0x2848] sm:$0xff] }
 0x1c4   : > { %3320 = vmatprep.subr.mxu1 %v1736_v14  ;;  %3250 = vmatpush1.msra.mxu0 %v1607_v15  ;;  %v1716_v47 = vld [vmem:[%s5664_s10 + $0x2c48] sm:$0xff]  ;;  %v1587_v48 = vld [vmem:[%s5664_s10 + $0x2840] sm:$0xff] }
 0x1c5   : > { %3321 = vmatpush1.msra.mxu1 %v1735_v16  ;;  %3251 = vmatprep.subr.mxu0 %v1604_v19  ;;  %v1715_v49 = vld [vmem:[%s5664_s10 + $0x2c40] sm:$0xff]  ;;  %v1584_v51 = vld [vmem:[%s5664_s10 + $0x2828] sm:$0xff] }
 0x1c6   : > { %3322 = vmatprep.subr.mxu1 %v1732_v20  ;;  %3252 = vmatpush1.msra.mxu0 %v1603_v22  ;;  %v1712_v52 = vld [vmem:[%s5664_s10 + $0x2c28] sm:$0xff]  ;;  %v1583_v53 = vld [vmem:[%s5664_s10 + $0x2820] sm:$0xff] }
 0x1c7   : > { %3323 = vmatpush1.msra.mxu1 %v1731_v24  ;;  %3253 = vmatprep.subr.mxu0 %v1600_v26  ;;  %v1711_v55 = vld [vmem:[%s5664_s10 + $0x2c20] sm:$0xff]  ;;  %v1580_v57 = vld [vmem:[%s5664_s10 + $0x2808] sm:$0xff] }
 0x1c8   : > { %3324 = vmatprep.subr.mxu1 %v1728_v29  ;;  %3254 = vmatpush1.msra.mxu0 %v1599_v32  ;;  %v1708_v58 = vld [vmem:[%s5664_s10 + $0x2c08] sm:$0xff]  ;;  %v1579_v60 = vld [vmem:[%s5664_s10 + $0x2800] sm:$0xff] }
 0x1c9   : > { %3325 = vmatpush1.msra.mxu1 %v1727_v33  ;;  %3255 = vmatprep.subr.mxu0 %v1596_v35  ;;  %v1707_v61 = vld [vmem:[%s5664_s10 + $0x2c00] sm:$0xff]  ;;  %v1704_v62 = vld [vmem:[%s5664_s10 + $0x2be8] sm:$0xff] }
 0x1ca   : > { %3326 = vmatprep.subr.mxu1 %v1724_v36  ;;  %3256 = vmatpush1.msra.mxu0 %v1595_v38  ;;  %v1832_v63 = vld [vmem:[%s5664_s10 + $0x2fe8] sm:$0xff]  ;;  %v1703_v1 = vld [vmem:[%s5664_s10 + $0x2be0] sm:$0xff] }
 0x1cb   : > { %3327 = vmatpush1.msra.mxu1 %v1723_v39  ;;  %3257 = vmatprep.subr.mxu0 %v1592_v40  ;;  %v1831_v2 = vld [vmem:[%s5664_s10 + $0x2fe0] sm:$0xff]  ;;  %v1700_v4 = vld [vmem:[%s5664_s10 + $0x2bc8] sm:$0xff] }
 0x1cc   : > { %3328 = vmatprep.subr.mxu1 %v1720_v41  ;;  %3258 = vmatpush1.msra.mxu0 %v1591_v42  ;;  %v1828_v5 = vld [vmem:[%s5664_s10 + $0x2fc8] sm:$0xff]  ;;  %v1699_v6 = vld [vmem:[%s5664_s10 + $0x2bc0] sm:$0xff] }
 0x1cd   : > { %3329 = vmatpush1.msra.mxu1 %v1719_v43  ;;  %3259 = vmatprep.subr.mxu0 %v1588_v46  ;;  %v1827_v7 = vld [vmem:[%s5664_s10 + $0x2fc0] sm:$0xff]  ;;  %v1696_v8 = vld [vmem:[%s5664_s10 + $0x2ba8] sm:$0xff] }
 0x1ce   : > { %3330 = vmatprep.subr.mxu1 %v1716_v47  ;;  %3260 = vmatpush1.msra.mxu0 %v1587_v48  ;;  %v1824_v9 = vld [vmem:[%s5664_s10 + $0x2fa8] sm:$0xff]  ;;  %v1695_v13 = vld [vmem:[%s5664_s10 + $0x2ba0] sm:$0xff] }
 0x1cf   : > { %3331 = vmatpush1.msra.mxu1 %v1715_v49  ;;  %3261 = vmatprep.subr.mxu0 %v1584_v51  ;;  %v1823_v14 = vld [vmem:[%s5664_s10 + $0x2fa0] sm:$0xff]  ;;  %v1692_v15 = vld [vmem:[%s5664_s10 + $0x2b88] sm:$0xff] }
 0x1d0   : > { %3332 = vmatprep.subr.mxu1 %v1712_v52  ;;  %3262 = vmatpush1.msra.mxu0 %v1583_v53  ;;  %v1820_v16 = vld [vmem:[%s5664_s10 + $0x2f88] sm:$0xff]  ;;  %v1691_v19 = vld [vmem:[%s5664_s10 + $0x2b80] sm:$0xff] }
 0x1d1   : > { %3333 = vmatpush1.msra.mxu1 %v1711_v55  ;;  %3263 = vmatprep.subr.mxu0 %v1580_v57  ;;  %v1819_v20 = vld [vmem:[%s5664_s10 + $0x2f80] sm:$0xff]  ;;  %v1688_v22 = vld [vmem:[%s5664_s10 + $0x2b68] sm:$0xff] }
 0x1d2   : > { %3334 = vmatprep.subr.mxu1 %v1708_v58  ;;  %3264 = vmatpush1.msra.mxu0 %v1579_v60  ;;  %v1816_v24 = vld [vmem:[%s5664_s10 + $0x2f68] sm:$0xff]  ;;  %v1687_v26 = vld [vmem:[%s5664_s10 + $0x2b60] sm:$0xff] }
 0x1d3   : > { %3335 = vmatpush1.msra.mxu1 %v1707_v61  ;;  %3265 = vmatprep.subr.mxu0 %v1704_v62  ;;  %v1815_v29 = vld [vmem:[%s5664_s10 + $0x2f60] sm:$0xff]  ;;  %v1684_v32 = vld [vmem:[%s5664_s10 + $0x2b48] sm:$0xff] }
 0x1d4   : > { %3336 = vmatprep.subr.mxu1 %v1832_v63  ;;  %3266 = vmatpush2.msra.mxu0 %v1703_v1  ;;  %v1812_v33 = vld [vmem:[%s5664_s10 + $0x2f48] sm:$0xff]  ;;  %v1683_v35 = vld [vmem:[%s5664_s10 + $0x2b40] sm:$0xff] }
 0x1d5   : > { %3337 = vmatpush2.msra.mxu1 %v1831_v2  ;;  %3267 = vmatprep.subr.mxu0 %v1700_v4  ;;  %v1811_v36 = vld [vmem:[%s5664_s10 + $0x2f40] sm:$0xff]  ;;  %v1680_v38 = vld [vmem:[%s5664_s10 + $0x2b28] sm:$0xff] }
 0x1d6   : > { %3338 = vmatprep.subr.mxu1 %v1828_v5  ;;  %3268 = vmatpush2.msra.mxu0 %v1699_v6  ;;  %v1808_v39 = vld [vmem:[%s5664_s10 + $0x2f28] sm:$0xff]  ;;  %v1679_v40 = vld [vmem:[%s5664_s10 + $0x2b20] sm:$0xff] }
 0x1d7   : > { %3339 = vmatpush2.msra.mxu1 %v1827_v7  ;;  %3269 = vmatprep.subr.mxu0 %v1696_v8  ;;  %v1807_v41 = vld [vmem:[%s5664_s10 + $0x2f20] sm:$0xff]  ;;  %v1676_v42 = vld [vmem:[%s5664_s10 + $0x2b08] sm:$0xff] }
 0x1d8   : > { %3340 = vmatprep.subr.mxu1 %v1824_v9  ;;  %3270 = vmatpush2.msra.mxu0 %v1695_v13  ;;  %v1804_v43 = vld [vmem:[%s5664_s10 + $0x2f08] sm:$0xff]  ;;  %v1675_v46 = vld [vmem:[%s5664_s10 + $0x2b00] sm:$0xff] }
 0x1d9   : > { %3341 = vmatpush2.msra.mxu1 %v1823_v14  ;;  %3271 = vmatprep.subr.mxu0 %v1692_v15  ;;  %v1803_v47 = vld [vmem:[%s5664_s10 + $0x2f00] sm:$0xff]  ;;  %v1672_v48 = vld [vmem:[%s5664_s10 + $0x2ae8] sm:$0xff] }
 0x1da   : > { %3342 = vmatprep.subr.mxu1 %v1820_v16  ;;  %3272 = vmatpush2.msra.mxu0 %v1691_v19  ;;  %v1800_v49 = vld [vmem:[%s5664_s10 + $0x2ee8] sm:$0xff]  ;;  %v1671_v51 = vld [vmem:[%s5664_s10 + $0x2ae0] sm:$0xff] }
 0x1db   : > { %3343 = vmatpush2.msra.mxu1 %v1819_v20  ;;  %3273 = vmatprep.subr.mxu0 %v1688_v22  ;;  %v1799_v52 = vld [vmem:[%s5664_s10 + $0x2ee0] sm:$0xff]  ;;  %v1668_v53 = vld [vmem:[%s5664_s10 + $0x2ac8] sm:$0xff] }
 0x1dc   : > { %3344 = vmatprep.subr.mxu1 %v1816_v24  ;;  %3274 = vmatpush2.msra.mxu0 %v1687_v26  ;;  %v1796_v55 = vld [vmem:[%s5664_s10 + $0x2ec8] sm:$0xff]  ;;  %v1667_v57 = vld [vmem:[%s5664_s10 + $0x2ac0] sm:$0xff] }
 0x1dd   : > { %3345 = vmatpush2.msra.mxu1 %v1815_v29  ;;  %3275 = vmatprep.subr.mxu0 %v1684_v32  ;;  %v1795_v58 = vld [vmem:[%s5664_s10 + $0x2ec0] sm:$0xff]  ;;  %v1664_v60 = vld [vmem:[%s5664_s10 + $0x2aa8] sm:$0xff] }
 0x1de   : > { %3346 = vmatprep.subr.mxu1 %v1812_v33  ;;  %3276 = vmatpush2.msra.mxu0 %v1683_v35  ;;  %v1792_v61 = vld [vmem:[%s5664_s10 + $0x2ea8] sm:$0xff]  ;;  %v1663_v62 = vld [vmem:[%s5664_s10 + $0x2aa0] sm:$0xff] }
 0x1df   : > { %3347 = vmatpush2.msra.mxu1 %v1811_v36  ;;  %3277 = vmatprep.subr.mxu0 %v1680_v38  ;;  %v1791_v63 = vld [vmem:[%s5664_s10 + $0x2ea0] sm:$0xff]  ;;  %v296_v1 = vld [vmem:[%s5657_s12 + $0x28] sm:$0xff] }
 0x1e0   : > { %3348 = vmatprep.subr.mxu1 %v1808_v39  ;;  %3278 = vmatpush2.msra.mxu0 %v1679_v40  ;;  %v1660_v2 = vld [vmem:[%s5664_s10 + $0x2a88] sm:$0xff]  ;;  %v1659_v5 = vld [vmem:[%s5664_s10 + $0x2a80] sm:$0xff]  ;;  %v2440_v9 = vcombine.high %v296_v1, %v296_v1  ;;  %v6536_v19 = vrot.slane %v296_v1, %v5790_v54 }
 0x1e1   : > { %3349 = vmatpush2.msra.mxu1 %v1807_v41  ;;  %3279 = vmatprep.subr.mxu0 %v1676_v42  ;;  %v1788_v4 = vld [vmem:[%s5664_s10 + $0x2e88] sm:$0xff]  ;;  %v1787_v6 = vld [vmem:[%s5664_s10 + $0x2e80] sm:$0xff] }
 0x1e2   : > { %3350 = vmatprep.subr.mxu1 %v1804_v43  ;;  %3280 = vmatpush2.msra.mxu0 %v1675_v46  ;;  %v1656_v7 = vld [vmem:[%s5664_s10 + $0x2a68] sm:$0xff]  ;;  %v1655_v13 = vld [vmem:[%s5664_s10 + $0x2a60] sm:$0xff]  ;;  %v6543_v29 = vrot.slane %v2440_v9, %v5790_v54  ;;  %v6551_v38 = vcombine.high %v6536_v19, %v6536_v19 }
 0x1e3   : > { %3351 = vmatpush2.msra.mxu1 %v1803_v47  ;;  %3281 = vmatprep.subr.mxu0 %v1672_v48  ;;  %v1784_v8 = vld [vmem:[%s5664_s10 + $0x2e68] sm:$0xff]  ;;  %v1783_v14 = vld [vmem:[%s5664_s10 + $0x2e60] sm:$0xff] }
 0x1e4   : > { %3352 = vmatprep.subr.mxu1 %v1800_v49  ;;  %3282 = vmatpush2.msra.mxu0 %v1671_v51  ;;  %v1652_v15 = vld [vmem:[%s5664_s10 + $0x2a48] sm:$0xff]  ;;  %v1651_v20 = vld [vmem:[%s5664_s10 + $0x2a40] sm:$0xff]  ;;  %v6557_v41 = vcombine.high %v6543_v29, %v6543_v29 }
 0x1e5   : > { %3353 = vmatpush2.msra.mxu1 %v1799_v52  ;;  %3283 = vmatprep.subr.mxu0 %v1668_v53  ;;  %v1780_v16 = vld [vmem:[%s5664_s10 + $0x2e48] sm:$0xff]  ;;  %v1779_v22 = vld [vmem:[%s5664_s10 + $0x2e40] sm:$0xff] }
 0x1e6   : > { %3354 = vmatprep.subr.mxu1 %v1796_v55  ;;  %3284 = vmatpush2.msra.mxu0 %v1667_v57  ;;  %v1648_v24 = vld [vmem:[%s5664_s10 + $0x2a28] sm:$0xff]  ;;  %v1647_v32 = vld [vmem:[%s5664_s10 + $0x2a20] sm:$0xff] }
 0x1e7   : > { %3355 = vmatpush2.msra.mxu1 %v1795_v58  ;;  %3285 = vmatprep.subr.mxu0 %v1664_v60  ;;  %v1776_v26 = vld [vmem:[%s5664_s10 + $0x2e28] sm:$0xff]  ;;  %v1775_v33 = vld [vmem:[%s5664_s10 + $0x2e20] sm:$0xff] }
 0x1e8   : > { %3356 = vmatprep.subr.mxu1 %v1792_v61  ;;  %3286 = vmatpush2.msra.mxu0 %v1663_v62  ;;  %v1644_v35 = vld [vmem:[%s5664_s10 + $0x2a08] sm:$0xff]  ;;  %v1643_v39 = vld [vmem:[%s5664_s10 + $0x2a00] sm:$0xff] }
 0x1e9   : > { %3357 = vmatpush2.msra.mxu1 %v1791_v63  ;;  %3287 = vmatprep.subr.mxu0 %v1660_v2  ;;  %v1772_v36 = vld [vmem:[%s5664_s10 + $0x2e08] sm:$0xff]  ;;  %v1771_v40 = vld [vmem:[%s5664_s10 + $0x2e00] sm:$0xff] }
 0x1ea   : > { %3358 = vmatprep.subr.mxu1 %v1788_v4  ;;  %3288 = vmatpush2.msra.mxu0 %v1659_v5  ;;  %v1896_v42 = vld [vmem:[%s5664_s10 + $0x31e8] sm:$0xff]  ;;  %v1895_v46 = vld [vmem:[%s5664_s10 + $0x31e0] sm:$0xff] }
 0x1eb   : > { %3359 = vmatpush2.msra.mxu1 %v1787_v6  ;;  %3289 = vmatprep.subr.mxu0 %v1656_v7  ;;  %v2024_v43 = vld [vmem:[%s5664_s10 + $0x35e8] sm:$0xff]  ;;  %v2023_v47 = vld [vmem:[%s5664_s10 + $0x35e0] sm:$0xff] }
 0x1ec   : > { %3360 = vmatprep.subr.mxu1 %v1784_v8  ;;  %3290 = vmatpush2.msra.mxu0 %v1655_v13  ;;  %v1892_v48 = vld [vmem:[%s5664_s10 + $0x31c8] sm:$0xff]  ;;  %v1891_v51 = vld [vmem:[%s5664_s10 + $0x31c0] sm:$0xff] }
 0x1ed   : > { %3361 = vmatpush2.msra.mxu1 %v1783_v14  ;;  %3291 = vmatprep.subr.mxu0 %v1652_v15  ;;  %v2020_v49 = vld [vmem:[%s5664_s10 + $0x35c8] sm:$0xff]  ;;  %v2019_v52 = vld [vmem:[%s5664_s10 + $0x35c0] sm:$0xff] }
 0x1ee   : > { %3362 = vmatprep.subr.mxu1 %v1780_v16  ;;  %3292 = vmatpush2.msra.mxu0 %v1651_v20  ;;  %v1888_v53 = vld [vmem:[%s5664_s10 + $0x31a8] sm:$0xff]  ;;  %v1887_v57 = vld [vmem:[%s5664_s10 + $0x31a0] sm:$0xff] }
 0x1ef   : > { %3363 = vmatpush2.msra.mxu1 %v1779_v22  ;;  %3293 = vmatprep.subr.mxu0 %v1648_v24  ;;  %v2016_v55 = vld [vmem:[%s5664_s10 + $0x35a8] sm:$0xff]  ;;  %v2015_v58 = vld [vmem:[%s5664_s10 + $0x35a0] sm:$0xff] }
 0x1f0   : > { %3364 = vmatprep.subr.mxu1 %v1776_v26  ;;  %3294 = vmatpush2.msra.mxu0 %v1647_v32  ;;  %v1884_v60 = vld [vmem:[%s5664_s10 + $0x3188] sm:$0xff]  ;;  %v1883_v62 = vld [vmem:[%s5664_s10 + $0x3180] sm:$0xff] }
 0x1f1   : > { %3365 = vmatpush2.msra.mxu1 %v1775_v33  ;;  %3295 = vmatprep.subr.mxu0 %v1644_v35  ;;  %v2012_v61 = vld [vmem:[%s5664_s10 + $0x3588] sm:$0xff]  ;;  %v2011_v63 = vld [vmem:[%s5664_s10 + $0x3580] sm:$0xff] }
 0x1f2   : > { %3366 = vmatprep.subr.mxu1 %v1772_v36  ;;  %3296 = vmatpush2.msra.mxu0 %v1643_v39  ;;  %v1880_v1 = vld [vmem:[%s5664_s10 + $0x3168] sm:$0xff]  ;;  %v1879_v4 = vld [vmem:[%s5664_s10 + $0x3160] sm:$0xff] }
 0x1f3   : > { %3297 = vmatprep.mubr.f32.mxu0 %v6551_v38  ;;  %3367 = vmatpush2.msra.mxu1 %v1771_v40  ;;  %v2008_v2 = vld [vmem:[%s5664_s10 + $0x3568] sm:$0xff]  ;;  %v2007_v5 = vld [vmem:[%s5664_s10 + $0x3560] sm:$0xff] }
 0x1f4   : > { %3298 = vmatmul.mubr.f32.vlgmr.msra.gmra.mxu0 %v6536_v19  ;;  %3368 = vmatprep.mubr.f32.mxu1 %v6557_v41  ;;  %v1876_v6 = vld [vmem:[%s5664_s10 + $0x3148] sm:$0xff]  ;;  %v1875_v8 = vld [vmem:[%s5664_s10 + $0x3140] sm:$0xff] }
 0x1f5   : > { %3375 = vmatprep.subr.mxu0 %v1896_v42  ;;  %3446 = vmatprep.subr.mxu1 %v2024_v43  ;;  %v2004_v7 = vld [vmem:[%s5664_s10 + $0x3548] sm:$0xff]  ;;  %v2003_v9 = vld [vmem:[%s5664_s10 + $0x3540] sm:$0xff] }
 0x1f6   : > { %3369 = vmatmul.mubr.f32.vlgmr.msra.gmra.mxu1 %v6543_v29  ;;  %3376 = vmatpush1.msra.mxu0 %v1895_v46  ;;  %v1872_v13 = vld [vmem:[%s5664_s10 + $0x3128] sm:$0xff]  ;;  %v1871_v15 = vld [vmem:[%s5664_s10 + $0x3120] sm:$0xff] }
 0x1f7   : > { %3447 = vmatpush1.msra.mxu1 %v2023_v47  ;;  %3377 = vmatprep.subr.mxu0 %v1892_v48  ;;  %v2000_v14 = vld [vmem:[%s5664_s10 + $0x3528] sm:$0xff]  ;;  %v1999_v16 = vld [vmem:[%s5664_s10 + $0x3520] sm:$0xff] }
 0x1f8   : > { %3448 = vmatprep.subr.mxu1 %v2020_v49  ;;  %3378 = vmatpush1.msra.mxu0 %v1891_v51  ;;  %v1868_v20 = vld [vmem:[%s5664_s10 + $0x3108] sm:$0xff]  ;;  %v1867_v24 = vld [vmem:[%s5664_s10 + $0x3100] sm:$0xff] }
 0x1f9   : > { %3449 = vmatpush1.msra.mxu1 %v2019_v52  ;;  %3379 = vmatprep.subr.mxu0 %v1888_v53  ;;  %v1996_v22 = vld [vmem:[%s5664_s10 + $0x3508] sm:$0xff]  ;;  %v1995_v26 = vld [vmem:[%s5664_s10 + $0x3500] sm:$0xff] }
 0x1fa   : > { %3450 = vmatprep.subr.mxu1 %v2016_v55  ;;  %3380 = vmatpush1.msra.mxu0 %v1887_v57  ;;  %v1864_v32 = vld [vmem:[%s5664_s10 + $0x30e8] sm:$0xff]  ;;  %v1863_v35 = vld [vmem:[%s5664_s10 + $0x30e0] sm:$0xff] }
 0x1fb   : > { %3451 = vmatpush1.msra.mxu1 %v2015_v58  ;;  %3381 = vmatprep.subr.mxu0 %v1884_v60  ;;  %v1992_v33 = vld [vmem:[%s5664_s10 + $0x34e8] sm:$0xff]  ;;  %v1991_v36 = vld [vmem:[%s5664_s10 + $0x34e0] sm:$0xff] }
 0x1fc   : > { %3452 = vmatprep.subr.mxu1 %v2012_v61  ;;  %3382 = vmatpush1.msra.mxu0 %v1883_v62  ;;  %v1860_v39 = vld [vmem:[%s5664_s10 + $0x30c8] sm:$0xff]  ;;  %v1859_v42 = vld [vmem:[%s5664_s10 + $0x30c0] sm:$0xff] }
 0x1fd   : > { %3453 = vmatpush1.msra.mxu1 %v2011_v63  ;;  %3383 = vmatprep.subr.mxu0 %v1880_v1  ;;  %v1988_v40 = vld [vmem:[%s5664_s10 + $0x34c8] sm:$0xff]  ;;  %v1987_v43 = vld [vmem:[%s5664_s10 + $0x34c0] sm:$0xff] }
 0x1fe   : > { %3454 = vmatprep.subr.mxu1 %v2008_v2  ;;  %3384 = vmatpush1.msra.mxu0 %v1879_v4  ;;  %v1856_v46 = vld [vmem:[%s5664_s10 + $0x30a8] sm:$0xff]  ;;  %v1855_v48 = vld [vmem:[%s5664_s10 + $0x30a0] sm:$0xff] }
 0x1ff   : > { %3455 = vmatpush1.msra.mxu1 %v2007_v5  ;;  %3385 = vmatprep.subr.mxu0 %v1876_v6  ;;  %v1984_v47 = vld [vmem:[%s5664_s10 + $0x34a8] sm:$0xff]  ;;  %v1983_v49 = vld [vmem:[%s5664_s10 + $0x34a0] sm:$0xff] }
 0x200   : > { %3456 = vmatprep.subr.mxu1 %v2004_v7  ;;  %3386 = vmatpush1.msra.mxu0 %v1875_v8  ;;  %v1852_v51 = vld [vmem:[%s5664_s10 + $0x3088] sm:$0xff]  ;;  %v1851_v53 = vld [vmem:[%s5664_s10 + $0x3080] sm:$0xff] }
 0x201   : > { %3457 = vmatpush1.msra.mxu1 %v2003_v9  ;;  %3387 = vmatprep.subr.mxu0 %v1872_v13  ;;  %v1980_v52 = vld [vmem:[%s5664_s10 + $0x3488] sm:$0xff]  ;;  %v1979_v55 = vld [vmem:[%s5664_s10 + $0x3480] sm:$0xff] }
 0x202   : > { %3458 = vmatprep.subr.mxu1 %v2000_v14  ;;  %3388 = vmatpush1.msra.mxu0 %v1871_v15  ;;  %v1848_v57 = vld [vmem:[%s5664_s10 + $0x3068] sm:$0xff]  ;;  %v1847_v60 = vld [vmem:[%s5664_s10 + $0x3060] sm:$0xff] }
 0x203   : > { %3459 = vmatpush1.msra.mxu1 %v1999_v16  ;;  %3389 = vmatprep.subr.mxu0 %v1868_v20  ;;  %v1976_v58 = vld [vmem:[%s5664_s10 + $0x3468] sm:$0xff]  ;;  %v1975_v61 = vld [vmem:[%s5664_s10 + $0x3460] sm:$0xff] }
 0x204   : > { %3460 = vmatprep.subr.mxu1 %v1996_v22  ;;  %3390 = vmatpush1.msra.mxu0 %v1867_v24  ;;  %v1844_v62 = vld [vmem:[%s5664_s10 + $0x3048] sm:$0xff]  ;;  %v1843_v1 = vld [vmem:[%s5664_s10 + $0x3040] sm:$0xff] }
 0x205   : > { %3461 = vmatpush1.msra.mxu1 %v1995_v26  ;;  %3391 = vmatprep.subr.mxu0 %v1864_v32  ;;  %v1972_v63 = vld [vmem:[%s5664_s10 + $0x3448] sm:$0xff]  ;;  %v1971_v2 = vld [vmem:[%s5664_s10 + $0x3440] sm:$0xff] }
 0x206   : > { %3462 = vmatprep.subr.mxu1 %v1992_v33  ;;  %3392 = vmatpush1.msra.mxu0 %v1863_v35  ;;  %v1840_v4 = vld [vmem:[%s5664_s10 + $0x3028] sm:$0xff]  ;;  %v1839_v6 = vld [vmem:[%s5664_s10 + $0x3020] sm:$0xff] }
 0x207   : > { %3463 = vmatpush1.msra.mxu1 %v1991_v36  ;;  %3393 = vmatprep.subr.mxu0 %v1860_v39  ;;  %v1968_v5 = vld [vmem:[%s5664_s10 + $0x3428] sm:$0xff]  ;;  %v1967_v7 = vld [vmem:[%s5664_s10 + $0x3420] sm:$0xff] }
 0x208   : > { %3464 = vmatprep.subr.mxu1 %v1988_v40  ;;  %3394 = vmatpush1.msra.mxu0 %v1859_v42  ;;  %v1836_v8 = vld [vmem:[%s5664_s10 + $0x3008] sm:$0xff]  ;;  %v1835_v13 = vld [vmem:[%s5664_s10 + $0x3000] sm:$0xff] }
 0x209   : > { %3465 = vmatpush1.msra.mxu1 %v1987_v43  ;;  %3395 = vmatprep.subr.mxu0 %v1856_v46  ;;  %v1964_v9 = vld [vmem:[%s5664_s10 + $0x3408] sm:$0xff]  ;;  %v1963_v14 = vld [vmem:[%s5664_s10 + $0x3400] sm:$0xff] }
 0x20a   : > { %3466 = vmatprep.subr.mxu1 %v1984_v47  ;;  %3396 = vmatpush1.msra.mxu0 %v1855_v48  ;;  %v1960_v15 = vld [vmem:[%s5664_s10 + $0x33e8] sm:$0xff]  ;;  %v1959_v20 = vld [vmem:[%s5664_s10 + $0x33e0] sm:$0xff] }
 0x20b   : > { %3467 = vmatpush1.msra.mxu1 %v1983_v49  ;;  %3397 = vmatprep.subr.mxu0 %v1852_v51  ;;  %v2088_v16 = vld [vmem:[%s5664_s10 + $0x37e8] sm:$0xff]  ;;  %v2087_v22 = vld [vmem:[%s5664_s10 + $0x37e0] sm:$0xff] }
 0x20c   : > { %3468 = vmatprep.subr.mxu1 %v1980_v52  ;;  %3398 = vmatpush1.msra.mxu0 %v1851_v53  ;;  %v1956_v24 = vld [vmem:[%s5664_s10 + $0x33c8] sm:$0xff]  ;;  %v1955_v32 = vld [vmem:[%s5664_s10 + $0x33c0] sm:$0xff] }
 0x20d   : > { %3469 = vmatpush1.msra.mxu1 %v1979_v55  ;;  %3399 = vmatprep.subr.mxu0 %v1848_v57  ;;  %v2084_v26 = vld [vmem:[%s5664_s10 + $0x37c8] sm:$0xff]  ;;  %v2083_v33 = vld [vmem:[%s5664_s10 + $0x37c0] sm:$0xff] }
 0x20e   : > { %3470 = vmatprep.subr.mxu1 %v1976_v58  ;;  %3400 = vmatpush1.msra.mxu0 %v1847_v60  ;;  %v1952_v35 = vld [vmem:[%s5664_s10 + $0x33a8] sm:$0xff]  ;;  %v1951_v39 = vld [vmem:[%s5664_s10 + $0x33a0] sm:$0xff] }
 0x20f   : > { %3471 = vmatpush1.msra.mxu1 %v1975_v61  ;;  %3401 = vmatprep.subr.mxu0 %v1844_v62  ;;  %v2080_v36 = vld [vmem:[%s5664_s10 + $0x37a8] sm:$0xff]  ;;  %v2079_v40 = vld [vmem:[%s5664_s10 + $0x37a0] sm:$0xff] }
 0x210   : > { %3472 = vmatprep.subr.mxu1 %v1972_v63  ;;  %3402 = vmatpush1.msra.mxu0 %v1843_v1  ;;  %v1948_v42 = vld [vmem:[%s5664_s10 + $0x3388] sm:$0xff]  ;;  %v1947_v46 = vld [vmem:[%s5664_s10 + $0x3380] sm:$0xff] }
 0x211   : > { %3473 = vmatpush1.msra.mxu1 %v1971_v2  ;;  %3403 = vmatprep.subr.mxu0 %v1840_v4  ;;  %v2076_v43 = vld [vmem:[%s5664_s10 + $0x3788] sm:$0xff]  ;;  %v2075_v47 = vld [vmem:[%s5664_s10 + $0x3780] sm:$0xff] }
 0x212   : > { %3474 = vmatprep.subr.mxu1 %v1968_v5  ;;  %3404 = vmatpush1.msra.mxu0 %v1839_v6  ;;  %v1944_v48 = vld [vmem:[%s5664_s10 + $0x3368] sm:$0xff]  ;;  %v1943_v51 = vld [vmem:[%s5664_s10 + $0x3360] sm:$0xff] }
 0x213   : > { %3475 = vmatpush1.msra.mxu1 %v1967_v7  ;;  %3405 = vmatprep.subr.mxu0 %v1836_v8  ;;  %v2072_v49 = vld [vmem:[%s5664_s10 + $0x3768] sm:$0xff]  ;;  %v2071_v52 = vld [vmem:[%s5664_s10 + $0x3760] sm:$0xff] }
 0x214   : > { %3476 = vmatprep.subr.mxu1 %v1964_v9  ;;  %3406 = vmatpush1.msra.mxu0 %v1835_v13  ;;  %v1940_v53 = vld [vmem:[%s5664_s10 + $0x3348] sm:$0xff]  ;;  %v1939_v57 = vld [vmem:[%s5664_s10 + $0x3340] sm:$0xff] }
 0x215   : > { %3477 = vmatpush1.msra.mxu1 %v1963_v14  ;;  %3407 = vmatprep.subr.mxu0 %v1960_v15  ;;  %v2068_v55 = vld [vmem:[%s5664_s10 + $0x3748] sm:$0xff]  ;;  %v2067_v58 = vld [vmem:[%s5664_s10 + $0x3740] sm:$0xff] }
 0x216   : > { %3478 = vmatprep.subr.mxu1 %v2088_v16  ;;  %3408 = vmatpush2.msra.mxu0 %v1959_v20  ;;  %v1936_v60 = vld [vmem:[%s5664_s10 + $0x3328] sm:$0xff]  ;;  %v1935_v62 = vld [vmem:[%s5664_s10 + $0x3320] sm:$0xff] }
 0x217   : > { %3479 = vmatpush2.msra.mxu1 %v2087_v22  ;;  %3409 = vmatprep.subr.mxu0 %v1956_v24  ;;  %v2064_v61 = vld [vmem:[%s5664_s10 + $0x3728] sm:$0xff]  ;;  %v2063_v63 = vld [vmem:[%s5664_s10 + $0x3720] sm:$0xff] }
 0x218   : > { %3480 = vmatprep.subr.mxu1 %v2084_v26  ;;  %3410 = vmatpush2.msra.mxu0 %v1955_v32  ;;  %v1932_v1 = vld [vmem:[%s5664_s10 + $0x3308] sm:$0xff]  ;;  %v1931_v4 = vld [vmem:[%s5664_s10 + $0x3300] sm:$0xff]  ;;  %v297_v32 = vld [vmem:[%s5657_s12 + $0x30] sm:$0xff] }
 0x219   : > { %3481 = vmatpush2.msra.mxu1 %v2083_v33  ;;  %3411 = vmatprep.subr.mxu0 %v1952_v35  ;;  %v2060_v2 = vld [vmem:[%s5664_s10 + $0x3708] sm:$0xff]  ;;  %v2059_v5 = vld [vmem:[%s5664_s10 + $0x3700] sm:$0xff] }
 0x21a   : > { %3482 = vmatprep.subr.mxu1 %v2080_v36  ;;  %3412 = vmatpush2.msra.mxu0 %v1951_v39  ;;  %v1928_v6 = vld [vmem:[%s5664_s10 + $0x32e8] sm:$0xff]  ;;  %v1927_v8 = vld [vmem:[%s5664_s10 + $0x32e0] sm:$0xff] }
 0x21b   : > { %3483 = vmatpush2.msra.mxu1 %v2079_v40  ;;  %3413 = vmatprep.subr.mxu0 %v1948_v42  ;;  %v2056_v7 = vld [vmem:[%s5664_s10 + $0x36e8] sm:$0xff]  ;;  %v2055_v9 = vld [vmem:[%s5664_s10 + $0x36e0] sm:$0xff] }
 0x21c   : > { %3484 = vmatprep.subr.mxu1 %v2076_v43  ;;  %3414 = vmatpush2.msra.mxu0 %v1947_v46  ;;  %v1924_v13 = vld [vmem:[%s5664_s10 + $0x32c8] sm:$0xff]  ;;  %v1923_v15 = vld [vmem:[%s5664_s10 + $0x32c0] sm:$0xff]  ;;  %v2457_v43 = vcombine.high %v297_v32, %v297_v32 }
 0x21d   : > { %3485 = vmatpush2.msra.mxu1 %v2075_v47  ;;  %3415 = vmatprep.subr.mxu0 %v1944_v48  ;;  %v2052_v14 = vld [vmem:[%s5664_s10 + $0x36c8] sm:$0xff]  ;;  %v2051_v16 = vld [vmem:[%s5664_s10 + $0x36c0] sm:$0xff] }
 0x21e   : > { %3486 = vmatprep.subr.mxu1 %v2072_v49  ;;  %3416 = vmatpush2.msra.mxu0 %v1943_v51  ;;  %v1920_v20 = vld [vmem:[%s5664_s10 + $0x32a8] sm:$0xff]  ;;  %v1919_v24 = vld [vmem:[%s5664_s10 + $0x32a0] sm:$0xff]  ;;  %v6683_v51 = vrot.slane %v297_v32, %v5790_v54 }
 0x21f   : > { %3487 = vmatpush2.msra.mxu1 %v2071_v52  ;;  %3417 = vmatprep.subr.mxu0 %v1940_v53  ;;  %v2048_v22 = vld [vmem:[%s5664_s10 + $0x36a8] sm:$0xff]  ;;  %v2047_v26 = vld [vmem:[%s5664_s10 + $0x36a0] sm:$0xff] }
 0x220   : > { %3488 = vmatprep.subr.mxu1 %v2068_v55  ;;  %3418 = vmatpush2.msra.mxu0 %v1939_v57  ;;  %v1916_v33 = vld [vmem:[%s5664_s10 + $0x3288] sm:$0xff]  ;;  %v1915_v36 = vld [vmem:[%s5664_s10 + $0x3280] sm:$0xff] }
 0x221   : > { %3489 = vmatpush2.msra.mxu1 %v2067_v58  ;;  %3419 = vmatprep.subr.mxu0 %v1936_v60  ;;  %v2044_v35 = vld [vmem:[%s5664_s10 + $0x3688] sm:$0xff]  ;;  %v2043_v39 = vld [vmem:[%s5664_s10 + $0x3680] sm:$0xff]  ;;  %v6690_v58 = vrot.slane %v2457_v43, %v5790_v54 }
 0x222   : > { %3490 = vmatprep.subr.mxu1 %v2064_v61  ;;  %3420 = vmatpush2.msra.mxu0 %v1935_v62  ;;  %v1912_v40 = vld [vmem:[%s5664_s10 + $0x3268] sm:$0xff]  ;;  %v1911_v46 = vld [vmem:[%s5664_s10 + $0x3260] sm:$0xff] }
 0x223   : > { %3491 = vmatpush2.msra.mxu1 %v2063_v63  ;;  %3421 = vmatprep.subr.mxu0 %v1932_v1  ;;  %v2040_v42 = vld [vmem:[%s5664_s10 + $0x3668] sm:$0xff]  ;;  %v2039_v47 = vld [vmem:[%s5664_s10 + $0x3660] sm:$0xff]  ;;  %v6698_v1 = vcombine.high %v6683_v51, %v6683_v51 }
 0x224   : > { %3492 = vmatprep.subr.mxu1 %v2060_v2  ;;  %3422 = vmatpush2.msra.mxu0 %v1931_v4  ;;  %v1908_v48 = vld [vmem:[%s5664_s10 + $0x3248] sm:$0xff]  ;;  %v1907_v52 = vld [vmem:[%s5664_s10 + $0x3240] sm:$0xff] }
 0x225   : > { %3493 = vmatpush2.msra.mxu1 %v2059_v5  ;;  %3423 = vmatprep.subr.mxu0 %v1928_v6  ;;  %v2036_v49 = vld [vmem:[%s5664_s10 + $0x3648] sm:$0xff]  ;;  %v2035_v53 = vld [vmem:[%s5664_s10 + $0x3640] sm:$0xff]  ;;  %v6704_v5 = vcombine.high %v6690_v58, %v6690_v58 }
 0x226   : > { %3494 = vmatprep.subr.mxu1 %v2056_v7  ;;  %3424 = vmatpush2.msra.mxu0 %v1927_v8  ;;  %v1904_v55 = vld [vmem:[%s5664_s10 + $0x3228] sm:$0xff]  ;;  %v1903_v60 = vld [vmem:[%s5664_s10 + $0x3220] sm:$0xff] }
 0x227   : > { %3495 = vmatpush2.msra.mxu1 %v2055_v9  ;;  %3425 = vmatprep.subr.mxu0 %v1924_v13  ;;  %v2032_v57 = vld [vmem:[%s5664_s10 + $0x3628] sm:$0xff]  ;;  %v2031_v61 = vld [vmem:[%s5664_s10 + $0x3620] sm:$0xff] }
 0x228   : > { %3496 = vmatprep.subr.mxu1 %v2052_v14  ;;  %3426 = vmatpush2.msra.mxu0 %v1923_v15  ;;  %v1900_v62 = vld [vmem:[%s5664_s10 + $0x3208] sm:$0xff]  ;;  %v1899_v2 = vld [vmem:[%s5664_s10 + $0x3200] sm:$0xff] }
 0x229   : > { %3497 = vmatpush2.msra.mxu1 %v2051_v16  ;;  %3427 = vmatprep.subr.mxu0 %v1920_v20  ;;  %v2028_v63 = vld [vmem:[%s5664_s10 + $0x3608] sm:$0xff]  ;;  %v2027_v4 = vld [vmem:[%s5664_s10 + $0x3600] sm:$0xff] }
 0x22a   : > { %3498 = vmatprep.subr.mxu1 %v2048_v22  ;;  %3428 = vmatpush2.msra.mxu0 %v1919_v24  ;;  %v2152_v6 = vld [vmem:[%s5664_s10 + $0x39e8] sm:$0xff]  ;;  %v2151_v8 = vld [vmem:[%s5664_s10 + $0x39e0] sm:$0xff] }
 0x22b   : > { %3499 = vmatpush2.msra.mxu1 %v2047_v26  ;;  %3429 = vmatprep.subr.mxu0 %v1916_v33  ;;  %v2280_v7 = vld [vmem:[%s5664_s10 + $0x3de8] sm:$0xff]  ;;  %v2279_v9 = vld [vmem:[%s5664_s10 + $0x3de0] sm:$0xff] }
 0x22c   : > { %3500 = vmatprep.subr.mxu1 %v2044_v35  ;;  %3430 = vmatpush2.msra.mxu0 %v1915_v36  ;;  %v2148_v13 = vld [vmem:[%s5664_s10 + $0x39c8] sm:$0xff]  ;;  %v2147_v15 = vld [vmem:[%s5664_s10 + $0x39c0] sm:$0xff] }
 0x22d   : > { %3501 = vmatpush2.msra.mxu1 %v2043_v39  ;;  %3431 = vmatprep.subr.mxu0 %v1912_v40  ;;  %v2276_v14 = vld [vmem:[%s5664_s10 + $0x3dc8] sm:$0xff]  ;;  %v2275_v16 = vld [vmem:[%s5664_s10 + $0x3dc0] sm:$0xff] }
 0x22e   : > { %3502 = vmatprep.subr.mxu1 %v2040_v42  ;;  %3432 = vmatpush2.msra.mxu0 %v1911_v46  ;;  %v2144_v20 = vld [vmem:[%s5664_s10 + $0x39a8] sm:$0xff]  ;;  %v2143_v24 = vld [vmem:[%s5664_s10 + $0x39a0] sm:$0xff] }
 0x22f   : > { %3503 = vmatpush2.msra.mxu1 %v2039_v47  ;;  %3433 = vmatprep.subr.mxu0 %v1908_v48  ;;  %v2272_v22 = vld [vmem:[%s5664_s10 + $0x3da8] sm:$0xff]  ;;  %v2271_v26 = vld [vmem:[%s5664_s10 + $0x3da0] sm:$0xff] }
 0x230   : > { %3504 = vmatprep.subr.mxu1 %v2036_v49  ;;  %3434 = vmatpush2.msra.mxu0 %v1907_v52  ;;  %v2140_v32 = vld [vmem:[%s5664_s10 + $0x3988] sm:$0xff]  ;;  %v2139_v35 = vld [vmem:[%s5664_s10 + $0x3980] sm:$0xff] }
 0x231   : > { %3505 = vmatpush2.msra.mxu1 %v2035_v53  ;;  %3435 = vmatprep.subr.mxu0 %v1904_v55  ;;  %v2268_v33 = vld [vmem:[%s5664_s10 + $0x3d88] sm:$0xff]  ;;  %v2267_v36 = vld [vmem:[%s5664_s10 + $0x3d80] sm:$0xff] }
 0x232   : > { %3506 = vmatprep.subr.mxu1 %v2032_v57  ;;  %3436 = vmatpush2.msra.mxu0 %v1903_v60  ;;  %v2136_v39 = vld [vmem:[%s5664_s10 + $0x3968] sm:$0xff]  ;;  %v2135_v42 = vld [vmem:[%s5664_s10 + $0x3960] sm:$0xff] }
 0x233   : > { %3507 = vmatpush2.msra.mxu1 %v2031_v61  ;;  %3437 = vmatprep.subr.mxu0 %v1900_v62  ;;  %v2264_v40 = vld [vmem:[%s5664_s10 + $0x3d68] sm:$0xff]  ;;  %v2263_v43 = vld [vmem:[%s5664_s10 + $0x3d60] sm:$0xff] }
 0x234   : > { %3508 = vmatprep.subr.mxu1 %v2028_v63  ;;  %3438 = vmatpush2.msra.mxu0 %v1899_v2  ;;  %v2132_v46 = vld [vmem:[%s5664_s10 + $0x3948] sm:$0xff]  ;;  %v2131_v48 = vld [vmem:[%s5664_s10 + $0x3940] sm:$0xff] }
 0x235   : > { %3439 = vmatprep.mubr.f32.mxu0 %v6698_v1  ;;  %3509 = vmatpush2.msra.mxu1 %v2027_v4  ;;  %v2260_v47 = vld [vmem:[%s5664_s10 + $0x3d48] sm:$0xff]  ;;  %v2259_v49 = vld [vmem:[%s5664_s10 + $0x3d40] sm:$0xff] }
 0x236   : > { %3440 = vmatmul.mubr.f32.vlgmr.msra.gmra.mxu0 %v6683_v51  ;;  %3510 = vmatprep.mubr.f32.mxu1 %v6704_v5  ;;  %v2128_v52 = vld [vmem:[%s5664_s10 + $0x3928] sm:$0xff]  ;;  %v2127_v55 = vld [vmem:[%s5664_s10 + $0x3920] sm:$0xff] }
 0x237   : > { %3517 = vmatprep.subr.mxu0 %v2152_v6  ;;  %3588 = vmatprep.subr.mxu1 %v2280_v7  ;;  %v2256_v53 = vld [vmem:[%s5664_s10 + $0x3d28] sm:$0xff]  ;;  %v2255_v57 = vld [vmem:[%s5664_s10 + $0x3d20] sm:$0xff] }
 0x238   : > { %3511 = vmatmul.mubr.f32.vlgmr.msra.gmra.mxu1 %v6690_v58  ;;  %3518 = vmatpush1.msra.mxu0 %v2151_v8  ;;  %v2124_v60 = vld [vmem:[%s5664_s10 + $0x3908] sm:$0xff]  ;;  %v2123_v62 = vld [vmem:[%s5664_s10 + $0x3900] sm:$0xff] }
 0x239   : > { %3589 = vmatpush1.msra.mxu1 %v2279_v9  ;;  %3519 = vmatprep.subr.mxu0 %v2148_v13  ;;  %v2252_v61 = vld [vmem:[%s5664_s10 + $0x3d08] sm:$0xff]  ;;  %v2251_v63 = vld [vmem:[%s5664_s10 + $0x3d00] sm:$0xff] }
 0x23a   : > { %3590 = vmatprep.subr.mxu1 %v2276_v14  ;;  %3520 = vmatpush1.msra.mxu0 %v2147_v15  ;;  %v2120_v2 = vld [vmem:[%s5664_s10 + $0x38e8] sm:$0xff]  ;;  %v2119_v6 = vld [vmem:[%s5664_s10 + $0x38e0] sm:$0xff] }
 0x23b   : > { %3591 = vmatpush1.msra.mxu1 %v2275_v16  ;;  %3521 = vmatprep.subr.mxu0 %v2144_v20  ;;  %v2248_v4 = vld [vmem:[%s5664_s10 + $0x3ce8] sm:$0xff]  ;;  %v2247_v7 = vld [vmem:[%s5664_s10 + $0x3ce0] sm:$0xff] }
 0x23c   : > { %3592 = vmatprep.subr.mxu1 %v2272_v22  ;;  %3522 = vmatpush1.msra.mxu0 %v2143_v24  ;;  %v2116_v8 = vld [vmem:[%s5664_s10 + $0x38c8] sm:$0xff]  ;;  %v2115_v13 = vld [vmem:[%s5664_s10 + $0x38c0] sm:$0xff] }
 0x23d   : > { %3593 = vmatpush1.msra.mxu1 %v2271_v26  ;;  %3523 = vmatprep.subr.mxu0 %v2140_v32  ;;  %v2244_v9 = vld [vmem:[%s5664_s10 + $0x3cc8] sm:$0xff]  ;;  %v2243_v14 = vld [vmem:[%s5664_s10 + $0x3cc0] sm:$0xff] }
 0x23e   : > { %3594 = vmatprep.subr.mxu1 %v2268_v33  ;;  %3524 = vmatpush1.msra.mxu0 %v2139_v35  ;;  %v2112_v15 = vld [vmem:[%s5664_s10 + $0x38a8] sm:$0xff]  ;;  %v2111_v20 = vld [vmem:[%s5664_s10 + $0x38a0] sm:$0xff] }
 0x23f   : > { %3595 = vmatpush1.msra.mxu1 %v2267_v36  ;;  %3525 = vmatprep.subr.mxu0 %v2136_v39  ;;  %v2240_v16 = vld [vmem:[%s5664_s10 + $0x3ca8] sm:$0xff]  ;;  %v2239_v22 = vld [vmem:[%s5664_s10 + $0x3ca0] sm:$0xff] }
 0x240   : > { %3596 = vmatprep.subr.mxu1 %v2264_v40  ;;  %3526 = vmatpush1.msra.mxu0 %v2135_v42  ;;  %v2108_v24 = vld [vmem:[%s5664_s10 + $0x3888] sm:$0xff]  ;;  %v2107_v32 = vld [vmem:[%s5664_s10 + $0x3880] sm:$0xff] }
 0x241   : > { %3597 = vmatpush1.msra.mxu1 %v2263_v43  ;;  %3527 = vmatprep.subr.mxu0 %v2132_v46  ;;  %v2236_v26 = vld [vmem:[%s5664_s10 + $0x3c88] sm:$0xff]  ;;  %v2235_v33 = vld [vmem:[%s5664_s10 + $0x3c80] sm:$0xff] }
 0x242   : > { %3598 = vmatprep.subr.mxu1 %v2260_v47  ;;  %3528 = vmatpush1.msra.mxu0 %v2131_v48  ;;  %v2104_v35 = vld [vmem:[%s5664_s10 + $0x3868] sm:$0xff]  ;;  %v2103_v39 = vld [vmem:[%s5664_s10 + $0x3860] sm:$0xff] }
 0x243   : > { %3599 = vmatpush1.msra.mxu1 %v2259_v49  ;;  %3529 = vmatprep.subr.mxu0 %v2128_v52  ;;  %v2232_v36 = vld [vmem:[%s5664_s10 + $0x3c68] sm:$0xff]  ;;  %v2231_v40 = vld [vmem:[%s5664_s10 + $0x3c60] sm:$0xff] }
 0x244   : > { %3600 = vmatprep.subr.mxu1 %v2256_v53  ;;  %3530 = vmatpush1.msra.mxu0 %v2127_v55  ;;  %v2100_v42 = vld [vmem:[%s5664_s10 + $0x3848] sm:$0xff]  ;;  %v2099_v46 = vld [vmem:[%s5664_s10 + $0x3840] sm:$0xff] }
 0x245   : > { %3601 = vmatpush1.msra.mxu1 %v2255_v57  ;;  %3531 = vmatprep.subr.mxu0 %v2124_v60  ;;  %v2228_v43 = vld [vmem:[%s5664_s10 + $0x3c48] sm:$0xff]  ;;  %v2227_v47 = vld [vmem:[%s5664_s10 + $0x3c40] sm:$0xff] }
 0x246   : > { %3602 = vmatprep.subr.mxu1 %v2252_v61  ;;  %3532 = vmatpush1.msra.mxu0 %v2123_v62  ;;  %v2096_v48 = vld [vmem:[%s5664_s10 + $0x3828] sm:$0xff]  ;;  %v2095_v52 = vld [vmem:[%s5664_s10 + $0x3820] sm:$0xff] }
 0x247   : > { %3603 = vmatpush1.msra.mxu1 %v2251_v63  ;;  %3533 = vmatprep.subr.mxu0 %v2120_v2  ;;  %v2224_v49 = vld [vmem:[%s5664_s10 + $0x3c28] sm:$0xff]  ;;  %v2223_v53 = vld [vmem:[%s5664_s10 + $0x3c20] sm:$0xff] }
 0x248   : > { %3604 = vmatprep.subr.mxu1 %v2248_v4  ;;  %3534 = vmatpush1.msra.mxu0 %v2119_v6  ;;  %v2092_v55 = vld [vmem:[%s5664_s10 + $0x3808] sm:$0xff]  ;;  %v2091_v60 = vld [vmem:[%s5664_s10 + $0x3800] sm:$0xff] }
 0x249   : > { %3605 = vmatpush1.msra.mxu1 %v2247_v7  ;;  %3535 = vmatprep.subr.mxu0 %v2116_v8  ;;  %v2220_v57 = vld [vmem:[%s5664_s10 + $0x3c08] sm:$0xff]  ;;  %v2219_v61 = vld [vmem:[%s5664_s10 + $0x3c00] sm:$0xff] }
 0x24a   : > { %3606 = vmatprep.subr.mxu1 %v2244_v9  ;;  %3536 = vmatpush1.msra.mxu0 %v2115_v13  ;;  %v2216_v62 = vld [vmem:[%s5664_s10 + $0x3be8] sm:$0xff]  ;;  %v2215_v2 = vld [vmem:[%s5664_s10 + $0x3be0] sm:$0xff] }
 0x24b   : > { %3607 = vmatpush1.msra.mxu1 %v2243_v14  ;;  %3537 = vmatprep.subr.mxu0 %v2112_v15  ;;  %v2344_v63 = vld [vmem:[%s5664_s10 + $0x3fe8] sm:$0xff]  ;;  %v2343_v4 = vld [vmem:[%s5664_s10 + $0x3fe0] sm:$0xff] }
 0x24c   : > { %3608 = vmatprep.subr.mxu1 %v2240_v16  ;;  %3538 = vmatpush1.msra.mxu0 %v2111_v20  ;;  %v2212_v6 = vld [vmem:[%s5664_s10 + $0x3bc8] sm:$0xff]  ;;  %v2211_v8 = vld [vmem:[%s5664_s10 + $0x3bc0] sm:$0xff] }
 0x24d   : > { %3609 = vmatpush1.msra.mxu1 %v2239_v22  ;;  %3539 = vmatprep.subr.mxu0 %v2108_v24  ;;  %v2340_v7 = vld [vmem:[%s5664_s10 + $0x3fc8] sm:$0xff]  ;;  %v2339_v9 = vld [vmem:[%s5664_s10 + $0x3fc0] sm:$0xff] }
 0x24e   : > { %3610 = vmatprep.subr.mxu1 %v2236_v26  ;;  %3540 = vmatpush1.msra.mxu0 %v2107_v32  ;;  %v2208_v13 = vld [vmem:[%s5664_s10 + $0x3ba8] sm:$0xff]  ;;  %v2207_v15 = vld [vmem:[%s5664_s10 + $0x3ba0] sm:$0xff] }
 0x24f   : > { %3611 = vmatpush1.msra.mxu1 %v2235_v33  ;;  %3541 = vmatprep.subr.mxu0 %v2104_v35  ;;  %v2336_v14 = vld [vmem:[%s5664_s10 + $0x3fa8] sm:$0xff]  ;;  %v2335_v16 = vld [vmem:[%s5664_s10 + $0x3fa0] sm:$0xff] }
 0x250   : > { %3612 = vmatprep.subr.mxu1 %v2232_v36  ;;  %3542 = vmatpush1.msra.mxu0 %v2103_v39  ;;  %v2204_v20 = vld [vmem:[%s5664_s10 + $0x3b88] sm:$0xff]  ;;  %v2203_v24 = vld [vmem:[%s5664_s10 + $0x3b80] sm:$0xff] }
 0x251   : > { %3613 = vmatpush1.msra.mxu1 %v2231_v40  ;;  %3543 = vmatprep.subr.mxu0 %v2100_v42  ;;  %v2332_v22 = vld [vmem:[%s5664_s10 + $0x3f88] sm:$0xff]  ;;  %v2331_v26 = vld [vmem:[%s5664_s10 + $0x3f80] sm:$0xff] }
 0x252   : > { %3614 = vmatprep.subr.mxu1 %v2228_v43  ;;  %3544 = vmatpush1.msra.mxu0 %v2099_v46  ;;  %v2200_v32 = vld [vmem:[%s5664_s10 + $0x3b68] sm:$0xff]  ;;  %v2199_v35 = vld [vmem:[%s5664_s10 + $0x3b60] sm:$0xff] }
 0x253   : > { %3615 = vmatpush1.msra.mxu1 %v2227_v47  ;;  %3545 = vmatprep.subr.mxu0 %v2096_v48  ;;  %v2328_v33 = vld [vmem:[%s5664_s10 + $0x3f68] sm:$0xff]  ;;  %v2327_v36 = vld [vmem:[%s5664_s10 + $0x3f60] sm:$0xff] }
 0x254   : > { %3616 = vmatprep.subr.mxu1 %v2224_v49  ;;  %3546 = vmatpush1.msra.mxu0 %v2095_v52  ;;  %v2196_v39 = vld [vmem:[%s5664_s10 + $0x3b48] sm:$0xff]  ;;  %v2195_v42 = vld [vmem:[%s5664_s10 + $0x3b40] sm:$0xff] }
 0x255   : > { %3617 = vmatpush1.msra.mxu1 %v2223_v53  ;;  %3547 = vmatprep.subr.mxu0 %v2092_v55  ;;  %v2324_v40 = vld [vmem:[%s5664_s10 + $0x3f48] sm:$0xff]  ;;  %v2323_v43 = vld [vmem:[%s5664_s10 + $0x3f40] sm:$0xff] }
 0x256   : > { %3618 = vmatprep.subr.mxu1 %v2220_v57  ;;  %3548 = vmatpush1.msra.mxu0 %v2091_v60  ;;  %v2192_v46 = vld [vmem:[%s5664_s10 + $0x3b28] sm:$0xff]  ;;  %v2191_v48 = vld [vmem:[%s5664_s10 + $0x3b20] sm:$0xff] }
 0x257   : > { %3619 = vmatpush1.msra.mxu1 %v2219_v61  ;;  %3549 = vmatprep.subr.mxu0 %v2216_v62  ;;  %v2320_v47 = vld [vmem:[%s5664_s10 + $0x3f28] sm:$0xff]  ;;  %v2319_v49 = vld [vmem:[%s5664_s10 + $0x3f20] sm:$0xff] }
 0x258   : > { %3620 = vmatprep.subr.mxu1 %v2344_v63  ;;  %3550 = vmatpush2.msra.mxu0 %v2215_v2  ;;  %v2188_v52 = vld [vmem:[%s5664_s10 + $0x3b08] sm:$0xff]  ;;  %v2187_v55 = vld [vmem:[%s5664_s10 + $0x3b00] sm:$0xff] }
 0x259   : > { %3621 = vmatpush2.msra.mxu1 %v2343_v4  ;;  %3551 = vmatprep.subr.mxu0 %v2212_v6  ;;  %v2316_v53 = vld [vmem:[%s5664_s10 + $0x3f08] sm:$0xff]  ;;  %v2315_v57 = vld [vmem:[%s5664_s10 + $0x3f00] sm:$0xff] }
 0x25a   : > { %3622 = vmatprep.subr.mxu1 %v2340_v7  ;;  %3552 = vmatpush2.msra.mxu0 %v2211_v8  ;;  %v2184_v60 = vld [vmem:[%s5664_s10 + $0x3ae8] sm:$0xff]  ;;  %v2183_v62 = vld [vmem:[%s5664_s10 + $0x3ae0] sm:$0xff] }
 0x25b   : > { %3623 = vmatpush2.msra.mxu1 %v2339_v9  ;;  %3553 = vmatprep.subr.mxu0 %v2208_v13  ;;  %v2312_v61 = vld [vmem:[%s5664_s10 + $0x3ee8] sm:$0xff]  ;;  %v2311_v63 = vld [vmem:[%s5664_s10 + $0x3ee0] sm:$0xff] }
 0x25c   : > { %3624 = vmatprep.subr.mxu1 %v2336_v14  ;;  %3554 = vmatpush2.msra.mxu0 %v2207_v15  ;;  %v2180_v2 = vld [vmem:[%s5664_s10 + $0x3ac8] sm:$0xff]  ;;  %v2179_v6 = vld [vmem:[%s5664_s10 + $0x3ac0] sm:$0xff]  ;;  %v298_v15 = vld [vmem:[%s5657_s12 + $0x38] sm:$0xff] }
 0x25d   : > { %3625 = vmatpush2.msra.mxu1 %v2335_v16  ;;  %3555 = vmatprep.subr.mxu0 %v2204_v20  ;;  %v2308_v4 = vld [vmem:[%s5664_s10 + $0x3ec8] sm:$0xff]  ;;  %v2307_v7 = vld [vmem:[%s5664_s10 + $0x3ec0] sm:$0xff] }
 0x25e   : > { %3626 = vmatprep.subr.mxu1 %v2332_v22  ;;  %3556 = vmatpush2.msra.mxu0 %v2203_v24  ;;  %v2176_v8 = vld [vmem:[%s5664_s10 + $0x3aa8] sm:$0xff]  ;;  %v2175_v13 = vld [vmem:[%s5664_s10 + $0x3aa0] sm:$0xff] }
 0x25f   : > { %3627 = vmatpush2.msra.mxu1 %v2331_v26  ;;  %3557 = vmatprep.subr.mxu0 %v2200_v32  ;;  %v2304_v9 = vld [vmem:[%s5664_s10 + $0x3ea8] sm:$0xff]  ;;  %v2303_v14 = vld [vmem:[%s5664_s10 + $0x3ea0] sm:$0xff] }
 0x260   : > { %3628 = vmatprep.subr.mxu1 %v2328_v33  ;;  %3558 = vmatpush2.msra.mxu0 %v2199_v35  ;;  %v2172_v16 = vld [vmem:[%s5664_s10 + $0x3a88] sm:$0xff]  ;;  %v2171_v22 = vld [vmem:[%s5664_s10 + $0x3a80] sm:$0xff]  ;;  %v2474_v33 = vcombine.high %v298_v15, %v298_v15 }
 0x261   : > { %3629 = vmatpush2.msra.mxu1 %v2327_v36  ;;  %3559 = vmatprep.subr.mxu0 %v2196_v39  ;;  %v2300_v20 = vld [vmem:[%s5664_s10 + $0x3e88] sm:$0xff]  ;;  %v2299_v24 = vld [vmem:[%s5664_s10 + $0x3e80] sm:$0xff] }
 0x262   : > { %3630 = vmatprep.subr.mxu1 %v2324_v40  ;;  %3560 = vmatpush2.msra.mxu0 %v2195_v42  ;;  %v2168_v26 = vld [vmem:[%s5664_s10 + $0x3a68] sm:$0xff]  ;;  %v2167_v35 = vld [vmem:[%s5664_s10 + $0x3a60] sm:$0xff]  ;;  %v6830_v42 = vrot.slane %v298_v15, %v5790_v54  ;;  %v354_v15 = vld [vmem:[%s5664_s10 + $0x1b8] sm:$0xff] }
 0x263   : > { %3631 = vmatpush2.msra.mxu1 %v2323_v43  ;;  %3561 = vmatprep.subr.mxu0 %v2192_v46  ;;  %v2296_v32 = vld [vmem:[%s5664_s10 + $0x3e68] sm:$0xff]  ;;  %v2295_v36 = vld [vmem:[%s5664_s10 + $0x3e60] sm:$0xff] }
 0x264   : > { %3632 = vmatprep.subr.mxu1 %v2320_v47  ;;  %3562 = vmatpush2.msra.mxu0 %v2191_v48  ;;  %v2164_v39 = vld [vmem:[%s5664_s10 + $0x3a48] sm:$0xff]  ;;  %v2163_v43 = vld [vmem:[%s5664_s10 + $0x3a40] sm:$0xff] }
 0x265   : > { %3633 = vmatpush2.msra.mxu1 %v2319_v49  ;;  %3563 = vmatprep.subr.mxu0 %v2188_v52  ;;  %v2292_v40 = vld [vmem:[%s5664_s10 + $0x3e48] sm:$0xff]  ;;  %v2291_v46 = vld [vmem:[%s5664_s10 + $0x3e40] sm:$0xff]  ;;  %v6837_v49 = vrot.slane %v2474_v33, %v5790_v54  ;;  %v477_v33 = vld [vmem:[%s5664_s10 + $0x590] sm:$0xff] }
 0x266   : > { %3634 = vmatprep.subr.mxu1 %v2316_v53  ;;  %3564 = vmatpush2.msra.mxu0 %v2187_v55  ;;  %v2160_v47 = vld [vmem:[%s5664_s10 + $0x3a28] sm:$0xff]  ;;  %v2159_v52 = vld [vmem:[%s5664_s10 + $0x3a20] sm:$0xff] }
 0x267   : > { %3635 = vmatpush2.msra.mxu1 %v2315_v57  ;;  %3565 = vmatprep.subr.mxu0 %v2184_v60  ;;  %v2288_v48 = vld [vmem:[%s5664_s10 + $0x3e28] sm:$0xff]  ;;  %v2287_v53 = vld [vmem:[%s5664_s10 + $0x3e20] sm:$0xff]  ;;  %v6845_v60 = vcombine.high %v6830_v42, %v6830_v42 }
 0x268   : > { %3636 = vmatprep.subr.mxu1 %v2312_v61  ;;  %3566 = vmatpush2.msra.mxu0 %v2183_v62  ;;  %v2156_v55 = vld [vmem:[%s5664_s10 + $0x3a08] sm:$0xff]  ;;  %v2155_v61 = vld [vmem:[%s5664_s10 + $0x3a00] sm:$0xff] }
 0x269   : > { %3637 = vmatpush2.msra.mxu1 %v2311_v63  ;;  %3567 = vmatprep.subr.mxu0 %v2180_v2  ;;  %v2284_v57 = vld [vmem:[%s5664_s10 + $0x3e08] sm:$0xff]  ;;  %v2283_v62 = vld [vmem:[%s5664_s10 + $0x3e00] sm:$0xff]  ;;  %v6851_v63 = vcombine.high %v6837_v49, %v6837_v49  ;;  %v362_v2 = vld [vmem:[%s5664_s10 + $0x1f8] sm:$0xff] }
 0x26a   : > { %3638 = vmatprep.subr.mxu1 %v2308_v4  ;;  %3568 = vmatpush2.msra.mxu0 %v2179_v6  ;;  %v490_v4 = vld [vmem:[%s5664_s10 + $0x5f8] sm:$0xff]  ;;  %v361_v6 = vld [vmem:[%s5664_s10 + $0x1f0] sm:$0xff] }
 0x26b   : > { %3639 = vmatpush2.msra.mxu1 %v2307_v7  ;;  %3569 = vmatprep.subr.mxu0 %v2176_v8  ;;  %v489_v7 = vld [vmem:[%s5664_s10 + $0x5f0] sm:$0xff]  ;;  %v358_v8 = vld [vmem:[%s5664_s10 + $0x1d8] sm:$0xff] }
 0x26c   : > { %3640 = vmatprep.subr.mxu1 %v2304_v9  ;;  %3570 = vmatpush2.msra.mxu0 %v2175_v13  ;;  %v486_v9 = vld [vmem:[%s5664_s10 + $0x5d8] sm:$0xff]  ;;  %v357_v13 = vld [vmem:[%s5664_s10 + $0x1d0] sm:$0xff] }
 0x26d   : > { %3641 = vmatpush2.msra.mxu1 %v2303_v14  ;;  %3571 = vmatprep.subr.mxu0 %v2172_v16  ;;  %v485_v14 = vld [vmem:[%s5664_s10 + $0x5d0] sm:$0xff]  ;;  %v482_v16 = vld [vmem:[%s5664_s10 + $0x5b8] sm:$0xff] }
 0x26e   : > { %3642 = vmatprep.subr.mxu1 %v2300_v20  ;;  %3572 = vmatpush2.msra.mxu0 %v2171_v22  ;;  %v353_v20 = vld [vmem:[%s5664_s10 + $0x1b0] sm:$0xff] }
 0x26f   : > { %3643 = vmatpush2.msra.mxu1 %v2299_v24  ;;  %3573 = vmatprep.subr.mxu0 %v2168_v26  ;;  %v481_v22 = vld [vmem:[%s5664_s10 + $0x5b0] sm:$0xff]  ;;  %v350_v24 = vld [vmem:[%s5664_s10 + $0x198] sm:$0xff] }
 0x270   : > { %3644 = vmatprep.subr.mxu1 %v2296_v32  ;;  %3574 = vmatpush2.msra.mxu0 %v2167_v35  ;;  %v478_v26 = vld [vmem:[%s5664_s10 + $0x598] sm:$0xff]  ;;  %v349_v32 = vld [vmem:[%s5664_s10 + $0x190] sm:$0xff] }
 0x271   : > { %3645 = vmatpush2.msra.mxu1 %v2295_v36  ;;  %3575 = vmatprep.subr.mxu0 %v2164_v39  ;;  %v346_v35 = vld [vmem:[%s5664_s10 + $0x178] sm:$0xff]  ;;  %v345_v39 = vld [vmem:[%s5664_s10 + $0x170] sm:$0xff] }
 0x272   : > { %3646 = vmatprep.subr.mxu1 %v2292_v40  ;;  %3576 = vmatpush2.msra.mxu0 %v2163_v43  ;;  %v474_v36 = vld [vmem:[%s5664_s10 + $0x578] sm:$0xff]  ;;  %v473_v40 = vld [vmem:[%s5664_s10 + $0x570] sm:$0xff] }
 0x273   : > { %3647 = vmatpush2.msra.mxu1 %v2291_v46  ;;  %3577 = vmatprep.subr.mxu0 %v2160_v47  ;;  %v342_v43 = vld [vmem:[%s5664_s10 + $0x158] sm:$0xff]  ;;  %v341_v47 = vld [vmem:[%s5664_s10 + $0x150] sm:$0xff] }
 0x274   : > { %3648 = vmatprep.subr.mxu1 %v2288_v48  ;;  %3578 = vmatpush2.msra.mxu0 %v2159_v52  ;;  %v470_v46 = vld [vmem:[%s5664_s10 + $0x558] sm:$0xff]  ;;  %v469_v48 = vld [vmem:[%s5664_s10 + $0x550] sm:$0xff] }
 0x275   : > { %3649 = vmatpush2.msra.mxu1 %v2287_v53  ;;  %3579 = vmatprep.subr.mxu0 %v2156_v55  ;;  %v338_v52 = vld [vmem:[%s5664_s10 + $0x138] sm:$0xff]  ;;  %v337_v55 = vld [vmem:[%s5664_s10 + $0x130] sm:$0xff] }
 0x276   : > { %3650 = vmatprep.subr.mxu1 %v2284_v57  ;;  %3580 = vmatpush2.msra.mxu0 %v2155_v61  ;;  %v466_v53 = vld [vmem:[%s5664_s10 + $0x538] sm:$0xff]  ;;  %v465_v57 = vld [vmem:[%s5664_s10 + $0x530] sm:$0xff] }
 0x277   : > { %3581 = vmatprep.mubr.f32.mxu0 %v6845_v60  ;;  %3651 = vmatpush2.msra.mxu1 %v2283_v62  ;;  %v334_v61 = vld [vmem:[%s5664_s10 + $0x118] sm:$0xff] }
 0x278   : > { %3582 = vmatmul.mubr.f32.vlgmr.msra.gmra.mxu0 %v6830_v42  ;;  %3652 = vmatprep.mubr.f32.mxu1 %v6851_v63  ;;  %v462_v62 = vld [vmem:[%s5664_s10 + $0x518] sm:$0xff] }
 0x279   : > { %3659 = vmatprep.subr.mxu0 %v362_v2  ;;  %3730 = vmatprep.subr.mxu1 %v490_v4  ;;  %v333_v2 = vld [vmem:[%s5664_s10 + $0x110] sm:$0xff] }
 0x27a   : > { %3653 = vmatmul.mubr.f32.vlgmr.msra.gmra.mxu1 %v6837_v49  ;;  %3660 = vmatpush1.msra.mxu0 %v361_v6  ;;  %v461_v4 = vld [vmem:[%s5664_s10 + $0x510] sm:$0xff]  ;;  %v330_v6 = vld [vmem:[%s5664_s10 + $0xf8] sm:$0xff] }
 0x27b   : > { %3731 = vmatpush1.msra.mxu1 %v489_v7  ;;  %3661 = vmatprep.subr.mxu0 %v358_v8  ;;  %v458_v7 = vld [vmem:[%s5664_s10 + $0x4f8] sm:$0xff]  ;;  %v329_v8 = vld [vmem:[%s5664_s10 + $0xf0] sm:$0xff] }
 0x27c   : > { %3732 = vmatprep.subr.mxu1 %v486_v9  ;;  %3662 = vmatpush1.msra.mxu0 %v357_v13  ;;  %v457_v9 = vld [vmem:[%s5664_s10 + $0x4f0] sm:$0xff]  ;;  %v326_v13 = vld [vmem:[%s5664_s10 + $0xd8] sm:$0xff] }
 0x27d   : > { %3733 = vmatpush1.msra.mxu1 %v485_v14  ;;  %3663 = vmatprep.subr.mxu0 %v354_v15  ;;  %v454_v14 = vld [vmem:[%s5664_s10 + $0x4d8] sm:$0xff]  ;;  %v325_v15 = vld [vmem:[%s5664_s10 + $0xd0] sm:$0xff] }
 0x27e   : > { %3734 = vmatprep.subr.mxu1 %v482_v16  ;;  %3664 = vmatpush1.msra.mxu0 %v353_v20  ;;  %v453_v16 = vld [vmem:[%s5664_s10 + $0x4d0] sm:$0xff]  ;;  %v322_v20 = vld [vmem:[%s5664_s10 + $0xb8] sm:$0xff] }
 0x27f   : > { %3735 = vmatpush1.msra.mxu1 %v481_v22  ;;  %3665 = vmatprep.subr.mxu0 %v350_v24  ;;  %v450_v22 = vld [vmem:[%s5664_s10 + $0x4b8] sm:$0xff]  ;;  %v321_v24 = vld [vmem:[%s5664_s10 + $0xb0] sm:$0xff] }
 0x280   : > { %3736 = vmatprep.subr.mxu1 %v478_v26  ;;  %3666 = vmatpush1.msra.mxu0 %v349_v32  ;;  %v449_v26 = vld [vmem:[%s5664_s10 + $0x4b0] sm:$0xff]  ;;  %v318_v32 = vld [vmem:[%s5664_s10 + $0x98] sm:$0xff] }
 0x281   : > { %3737 = vmatpush1.msra.mxu1 %v477_v33  ;;  %3667 = vmatprep.subr.mxu0 %v346_v35  ;;  %v446_v33 = vld [vmem:[%s5664_s10 + $0x498] sm:$0xff]  ;;  %v317_v35 = vld [vmem:[%s5664_s10 + $0x90] sm:$0xff] }
 0x282   : > { %3738 = vmatprep.subr.mxu1 %v474_v36  ;;  %3668 = vmatpush1.msra.mxu0 %v345_v39  ;;  %v445_v36 = vld [vmem:[%s5664_s10 + $0x490] sm:$0xff]  ;;  %v314_v39 = vld [vmem:[%s5664_s10 + $0x78] sm:$0xff] }
 0x283   : > { %3739 = vmatpush1.msra.mxu1 %v473_v40  ;;  %3669 = vmatprep.subr.mxu0 %v342_v43  ;;  %v442_v40 = vld [vmem:[%s5664_s10 + $0x478] sm:$0xff]  ;;  %v313_v43 = vld [vmem:[%s5664_s10 + $0x70] sm:$0xff] }
 0x284   : > { %3740 = vmatprep.subr.mxu1 %v470_v46  ;;  %3670 = vmatpush1.msra.mxu0 %v341_v47  ;;  %v441_v46 = vld [vmem:[%s5664_s10 + $0x470] sm:$0xff]  ;;  %v310_v47 = vld [vmem:[%s5664_s10 + $0x58] sm:$0xff] }
 0x285   : > { %3741 = vmatpush1.msra.mxu1 %v469_v48  ;;  %3671 = vmatprep.subr.mxu0 %v338_v52  ;;  %v438_v48 = vld [vmem:[%s5664_s10 + $0x458] sm:$0xff]  ;;  %v309_v52 = vld [vmem:[%s5664_s10 + $0x50] sm:$0xff] }
 0x286   : > { %3742 = vmatprep.subr.mxu1 %v466_v53  ;;  %3672 = vmatpush1.msra.mxu0 %v337_v55  ;;  %v437_v53 = vld [vmem:[%s5664_s10 + $0x450] sm:$0xff]  ;;  %v306_v55 = vld [vmem:[%s5664_s10 + $0x38] sm:$0xff] }
 0x287   : > { %3743 = vmatpush1.msra.mxu1 %v465_v57  ;;  %3673 = vmatprep.subr.mxu0 %v334_v61  ;;  %v434_v57 = vld [vmem:[%s5664_s10 + $0x438] sm:$0xff]  ;;  %v305_v61 = vld [vmem:[%s5664_s10 + $0x30] sm:$0xff] }
 0x288   : > { %3744 = vmatprep.subr.mxu1 %v462_v62  ;;  %3674 = vmatpush1.msra.mxu0 %v333_v2  ;;  %v433_v62 = vld [vmem:[%s5664_s10 + $0x430] sm:$0xff]  ;;  %v302_v2 = vld [vmem:[%s5664_s10 + $0x18] sm:$0xff] }
 0x289   : > { %3745 = vmatpush1.msra.mxu1 %v461_v4  ;;  %3675 = vmatprep.subr.mxu0 %v330_v6  ;;  %v430_v4 = vld [vmem:[%s5664_s10 + $0x418] sm:$0xff]  ;;  %v301_v6 = vld [vmem:[%s5664_s10 + $0x10] sm:$0xff] }
 0x28a   : > { %3746 = vmatprep.subr.mxu1 %v458_v7  ;;  %3676 = vmatpush1.msra.mxu0 %v329_v8  ;;  %v429_v7 = vld [vmem:[%s5664_s10 + $0x410] sm:$0xff]  ;;  %v426_v8 = vld [vmem:[%s5664_s10 + $0x3f8] sm:$0xff] }
 0x28b   : > { %3747 = vmatpush1.msra.mxu1 %v457_v9  ;;  %3677 = vmatprep.subr.mxu0 %v326_v13  ;;  %v554_v9 = vld [vmem:[%s5664_s10 + $0x7f8] sm:$0xff]  ;;  %v425_v13 = vld [vmem:[%s5664_s10 + $0x3f0] sm:$0xff] }
 0x28c   : > { %3748 = vmatprep.subr.mxu1 %v454_v14  ;;  %3678 = vmatpush1.msra.mxu0 %v325_v15  ;;  %v553_v14 = vld [vmem:[%s5664_s10 + $0x7f0] sm:$0xff]  ;;  %v422_v15 = vld [vmem:[%s5664_s10 + $0x3d8] sm:$0xff] }
 0x28d   : > { %3749 = vmatpush1.msra.mxu1 %v453_v16  ;;  %3679 = vmatprep.subr.mxu0 %v322_v20  ;;  %v550_v16 = vld [vmem:[%s5664_s10 + $0x7d8] sm:$0xff]  ;;  %v421_v20 = vld [vmem:[%s5664_s10 + $0x3d0] sm:$0xff] }
 0x28e   : > { %3750 = vmatprep.subr.mxu1 %v450_v22  ;;  %3680 = vmatpush1.msra.mxu0 %v321_v24  ;;  %v549_v22 = vld [vmem:[%s5664_s10 + $0x7d0] sm:$0xff]  ;;  %v418_v24 = vld [vmem:[%s5664_s10 + $0x3b8] sm:$0xff] }
 0x28f   : > { %3751 = vmatpush1.msra.mxu1 %v449_v26  ;;  %3681 = vmatprep.subr.mxu0 %v318_v32  ;;  %v546_v26 = vld [vmem:[%s5664_s10 + $0x7b8] sm:$0xff]  ;;  %v417_v32 = vld [vmem:[%s5664_s10 + $0x3b0] sm:$0xff] }
 0x290   : > { %3752 = vmatprep.subr.mxu1 %v446_v33  ;;  %3682 = vmatpush1.msra.mxu0 %v317_v35  ;;  %v545_v33 = vld [vmem:[%s5664_s10 + $0x7b0] sm:$0xff]  ;;  %v414_v35 = vld [vmem:[%s5664_s10 + $0x398] sm:$0xff] }
 0x291   : > { %3753 = vmatpush1.msra.mxu1 %v445_v36  ;;  %3683 = vmatprep.subr.mxu0 %v314_v39  ;;  %v542_v36 = vld [vmem:[%s5664_s10 + $0x798] sm:$0xff]  ;;  %v413_v39 = vld [vmem:[%s5664_s10 + $0x390] sm:$0xff] }
 0x292   : > { %3754 = vmatprep.subr.mxu1 %v442_v40  ;;  %3684 = vmatpush1.msra.mxu0 %v313_v43  ;;  %v541_v40 = vld [vmem:[%s5664_s10 + $0x790] sm:$0xff]  ;;  %v410_v43 = vld [vmem:[%s5664_s10 + $0x378] sm:$0xff] }
 0x293   : > { %3755 = vmatpush1.msra.mxu1 %v441_v46  ;;  %3685 = vmatprep.subr.mxu0 %v310_v47  ;;  %v538_v46 = vld [vmem:[%s5664_s10 + $0x778] sm:$0xff]  ;;  %v409_v47 = vld [vmem:[%s5664_s10 + $0x370] sm:$0xff] }
 0x294   : > { %3756 = vmatprep.subr.mxu1 %v438_v48  ;;  %3686 = vmatpush1.msra.mxu0 %v309_v52  ;;  %v537_v48 = vld [vmem:[%s5664_s10 + $0x770] sm:$0xff]  ;;  %v406_v52 = vld [vmem:[%s5664_s10 + $0x358] sm:$0xff] }
 0x295   : > { %3757 = vmatpush1.msra.mxu1 %v437_v53  ;;  %3687 = vmatprep.subr.mxu0 %v306_v55  ;;  %v534_v53 = vld [vmem:[%s5664_s10 + $0x758] sm:$0xff]  ;;  %v405_v55 = vld [vmem:[%s5664_s10 + $0x350] sm:$0xff] }
 0x296   : > { %3758 = vmatprep.subr.mxu1 %v434_v57  ;;  %3688 = vmatpush1.msra.mxu0 %v305_v61  ;;  %v533_v57 = vld [vmem:[%s5664_s10 + $0x750] sm:$0xff]  ;;  %v402_v61 = vld [vmem:[%s5664_s10 + $0x338] sm:$0xff] }
 0x297   : > { %3759 = vmatpush1.msra.mxu1 %v433_v62  ;;  %3689 = vmatprep.subr.mxu0 %v302_v2  ;;  %v530_v62 = vld [vmem:[%s5664_s10 + $0x738] sm:$0xff]  ;;  %v401_v2 = vld [vmem:[%s5664_s10 + $0x330] sm:$0xff] }
 0x298   : > { %3760 = vmatprep.subr.mxu1 %v430_v4  ;;  %3690 = vmatpush1.msra.mxu0 %v301_v6  ;;  %v529_v4 = vld [vmem:[%s5664_s10 + $0x730] sm:$0xff]  ;;  %v398_v6 = vld [vmem:[%s5664_s10 + $0x318] sm:$0xff] }
 0x299   : > { %3761 = vmatpush1.msra.mxu1 %v429_v7  ;;  %3691 = vmatprep.subr.mxu0 %v426_v8  ;;  %v526_v7 = vld [vmem:[%s5664_s10 + $0x718] sm:$0xff]  ;;  %v397_v8 = vld [vmem:[%s5664_s10 + $0x310] sm:$0xff] }
 0x29a   : > { %3762 = vmatprep.subr.mxu1 %v554_v9  ;;  %3692 = vmatpush2.msra.mxu0 %v425_v13  ;;  %v525_v9 = vld [vmem:[%s5664_s10 + $0x710] sm:$0xff]  ;;  %v394_v13 = vld [vmem:[%s5664_s10 + $0x2f8] sm:$0xff] }
 0x29b   : > { %3763 = vmatpush2.msra.mxu1 %v553_v14  ;;  %3693 = vmatprep.subr.mxu0 %v422_v15  ;;  %v522_v14 = vld [vmem:[%s5664_s10 + $0x6f8] sm:$0xff]  ;;  %v393_v15 = vld [vmem:[%s5664_s10 + $0x2f0] sm:$0xff] }
 0x29c   : > { %3764 = vmatprep.subr.mxu1 %v550_v16  ;;  %3694 = vmatpush2.msra.mxu0 %v421_v20  ;;  %v521_v16 = vld [vmem:[%s5664_s10 + $0x6f0] sm:$0xff]  ;;  %v390_v20 = vld [vmem:[%s5664_s10 + $0x2d8] sm:$0xff] }
 0x29d   : > { %3765 = vmatpush2.msra.mxu1 %v549_v22  ;;  %3695 = vmatprep.subr.mxu0 %v418_v24  ;;  %v518_v22 = vld [vmem:[%s5664_s10 + $0x6d8] sm:$0xff]  ;;  %v389_v24 = vld [vmem:[%s5664_s10 + $0x2d0] sm:$0xff] }
 0x29e   : > { %3766 = vmatprep.subr.mxu1 %v546_v26  ;;  %3696 = vmatpush2.msra.mxu0 %v417_v32  ;;  %v517_v26 = vld [vmem:[%s5664_s10 + $0x6d0] sm:$0xff]  ;;  %v386_v32 = vld [vmem:[%s5664_s10 + $0x2b8] sm:$0xff] }
 0x29f   : > { %3767 = vmatpush2.msra.mxu1 %v545_v33  ;;  %3697 = vmatprep.subr.mxu0 %v414_v35  ;;  %v514_v33 = vld [vmem:[%s5664_s10 + $0x6b8] sm:$0xff]  ;;  %v385_v35 = vld [vmem:[%s5664_s10 + $0x2b0] sm:$0xff] }
 0x2a0   : > { %3768 = vmatprep.subr.mxu1 %v542_v36  ;;  %3698 = vmatpush2.msra.mxu0 %v413_v39  ;;  %v513_v36 = vld [vmem:[%s5664_s10 + $0x6b0] sm:$0xff]  ;;  %v382_v39 = vld [vmem:[%s5664_s10 + $0x298] sm:$0xff] }
 0x2a1   : > { %3769 = vmatpush2.msra.mxu1 %v541_v40  ;;  %3699 = vmatprep.subr.mxu0 %v410_v43  ;;  %v510_v40 = vld [vmem:[%s5664_s10 + $0x698] sm:$0xff]  ;;  %v381_v43 = vld [vmem:[%s5664_s10 + $0x290] sm:$0xff] }
 0x2a2   : > { %3770 = vmatprep.subr.mxu1 %v538_v46  ;;  %3700 = vmatpush2.msra.mxu0 %v409_v47  ;;  %v509_v46 = vld [vmem:[%s5664_s10 + $0x690] sm:$0xff]  ;;  %v378_v47 = vld [vmem:[%s5664_s10 + $0x278] sm:$0xff] }
 0x2a3   : > { %3771 = vmatpush2.msra.mxu1 %v537_v48  ;;  %3701 = vmatprep.subr.mxu0 %v406_v52  ;;  %v506_v48 = vld [vmem:[%s5664_s10 + $0x678] sm:$0xff]  ;;  %v377_v52 = vld [vmem:[%s5664_s10 + $0x270] sm:$0xff] }
 0x2a4   : > { %3772 = vmatprep.subr.mxu1 %v534_v53  ;;  %3702 = vmatpush2.msra.mxu0 %v405_v55  ;;  %v505_v53 = vld [vmem:[%s5664_s10 + $0x670] sm:$0xff]  ;;  %v374_v55 = vld [vmem:[%s5664_s10 + $0x258] sm:$0xff] }
 0x2a5   : > { %3773 = vmatpush2.msra.mxu1 %v533_v57  ;;  %3703 = vmatprep.subr.mxu0 %v402_v61  ;;  %v502_v57 = vld [vmem:[%s5664_s10 + $0x658] sm:$0xff]  ;;  %v373_v61 = vld [vmem:[%s5664_s10 + $0x250] sm:$0xff] }
 0x2a6   : > { %3774 = vmatprep.subr.mxu1 %v530_v62  ;;  %3704 = vmatpush2.msra.mxu0 %v401_v2  ;;  %v501_v62 = vld [vmem:[%s5664_s10 + $0x650] sm:$0xff]  ;;  %v370_v2 = vld [vmem:[%s5664_s10 + $0x238] sm:$0xff] }
 0x2a7   : > { %3775 = vmatpush2.msra.mxu1 %v529_v4  ;;  %3705 = vmatprep.subr.mxu0 %v398_v6  ;;  %v498_v4 = vld [vmem:[%s5664_s10 + $0x638] sm:$0xff]  ;;  %v369_v6 = vld [vmem:[%s5664_s10 + $0x230] sm:$0xff] }
 0x2a8   : > { %3776 = vmatprep.subr.mxu1 %v526_v7  ;;  %3706 = vmatpush2.msra.mxu0 %v397_v8  ;;  %v497_v7 = vld [vmem:[%s5664_s10 + $0x630] sm:$0xff]  ;;  %v366_v8 = vld [vmem:[%s5664_s10 + $0x218] sm:$0xff] }
 0x2a9   : > { %3777 = vmatpush2.msra.mxu1 %v525_v9  ;;  %3707 = vmatprep.subr.mxu0 %v394_v13  ;;  %v494_v9 = vld [vmem:[%s5664_s10 + $0x618] sm:$0xff]  ;;  %v365_v13 = vld [vmem:[%s5664_s10 + $0x210] sm:$0xff] }
 0x2aa   : > { %3778 = vmatprep.subr.mxu1 %v522_v14  ;;  %3708 = vmatpush2.msra.mxu0 %v393_v15  ;;  %v493_v14 = vld [vmem:[%s5664_s10 + $0x610] sm:$0xff]  ;;  %v618_v15 = vld [vmem:[%s5664_s10 + $0x9f8] sm:$0xff] }
 0x2ab   : > { %3779 = vmatpush2.msra.mxu1 %v521_v16  ;;  %3709 = vmatprep.subr.mxu0 %v390_v20  ;;  %v746_v16 = vld [vmem:[%s5664_s10 + $0xdf8] sm:$0xff]  ;;  %v617_v20 = vld [vmem:[%s5664_s10 + $0x9f0] sm:$0xff] }
 0x2ac   : > { %3780 = vmatprep.subr.mxu1 %v518_v22  ;;  %3710 = vmatpush2.msra.mxu0 %v389_v24  ;;  %v745_v22 = vld [vmem:[%s5664_s10 + $0xdf0] sm:$0xff]  ;;  %v614_v24 = vld [vmem:[%s5664_s10 + $0x9d8] sm:$0xff] }
 0x2ad   : > { %3781 = vmatpush2.msra.mxu1 %v517_v26  ;;  %3711 = vmatprep.subr.mxu0 %v386_v32  ;;  %v742_v26 = vld [vmem:[%s5664_s10 + $0xdd8] sm:$0xff]  ;;  %v741_v32 = vld [vmem:[%s5664_s10 + $0xdd0] sm:$0xff] }
 0x2ae   : > { %3782 = vmatprep.subr.mxu1 %v514_v33  ;;  %3712 = vmatpush2.msra.mxu0 %v385_v35  ;;  %v738_v33 = vld [vmem:[%s5664_s10 + $0xdb8] sm:$0xff] }
 0x2af   : > { %3783 = vmatpush2.msra.mxu1 %v513_v36  ;;  %3713 = vmatprep.subr.mxu0 %v382_v39  ;;  %v606_v35 = vld [vmem:[%s5664_s10 + $0x998] sm:$0xff]  ;;  %v605_v39 = vld [vmem:[%s5664_s10 + $0x990] sm:$0xff] }
 0x2b0   : > { %3784 = vmatprep.subr.mxu1 %v510_v40  ;;  %3714 = vmatpush2.msra.mxu0 %v381_v43  ;;  %v734_v36 = vld [vmem:[%s5664_s10 + $0xd98] sm:$0xff]  ;;  %v733_v40 = vld [vmem:[%s5664_s10 + $0xd90] sm:$0xff] }
 0x2b1   : > { %3785 = vmatpush2.msra.mxu1 %v509_v46  ;;  %3715 = vmatprep.subr.mxu0 %v378_v47  ;;  %v602_v43 = vld [vmem:[%s5664_s10 + $0x978] sm:$0xff]  ;;  %v601_v47 = vld [vmem:[%s5664_s10 + $0x970] sm:$0xff] }
 0x2b2   : > { %3786 = vmatprep.subr.mxu1 %v506_v48  ;;  %3716 = vmatpush2.msra.mxu0 %v377_v52  ;;  %v730_v46 = vld [vmem:[%s5664_s10 + $0xd78] sm:$0xff]  ;;  %v729_v48 = vld [vmem:[%s5664_s10 + $0xd70] sm:$0xff] }
 0x2b3   : > { %3787 = vmatpush2.msra.mxu1 %v505_v53  ;;  %3717 = vmatprep.subr.mxu0 %v374_v55  ;;  %v598_v52 = vld [vmem:[%s5664_s10 + $0x958] sm:$0xff]  ;;  %v597_v55 = vld [vmem:[%s5664_s10 + $0x950] sm:$0xff] }
 0x2b4   : > { %3788 = vmatprep.subr.mxu1 %v502_v57  ;;  %3718 = vmatpush2.msra.mxu0 %v373_v61  ;;  %v726_v53 = vld [vmem:[%s5664_s10 + $0xd58] sm:$0xff]  ;;  %v725_v57 = vld [vmem:[%s5664_s10 + $0xd50] sm:$0xff] }
 0x2b5   : > { %3789 = vmatpush2.msra.mxu1 %v501_v62  ;;  %3719 = vmatprep.subr.mxu0 %v370_v2  ;;  %v594_v61 = vld [vmem:[%s5664_s10 + $0x938] sm:$0xff]  ;;  %v593_v2 = vld [vmem:[%s5664_s10 + $0x930] sm:$0xff] }
 0x2b6   : > { %3790 = vmatprep.subr.mxu1 %v498_v4  ;;  %3720 = vmatpush2.msra.mxu0 %v369_v6  ;;  %v722_v62 = vld [vmem:[%s5664_s10 + $0xd38] sm:$0xff]  ;;  %v721_v4 = vld [vmem:[%s5664_s10 + $0xd30] sm:$0xff] }
 0x2b7   : > { %3791 = vmatpush2.msra.mxu1 %v497_v7  ;;  %3721 = vmatprep.subr.mxu0 %v366_v8  ;;  %v590_v6 = vld [vmem:[%s5664_s10 + $0x918] sm:$0xff]  ;;  %v589_v8 = vld [vmem:[%s5664_s10 + $0x910] sm:$0xff] }
 0x2b8   : > { %3792 = vmatprep.subr.mxu1 %v494_v9  ;;  %3722 = vmatpush2.msra.mxu0 %v365_v13  ;;  %v718_v7 = vld [vmem:[%s5664_s10 + $0xd18] sm:$0xff]  ;;  %v717_v9 = vld [vmem:[%s5664_s10 + $0xd10] sm:$0xff] }
 0x2b9   : > { %3723 = vmatprep.mubr.f32.mxu0 %v5816_v10  ;;  %3793 = vmatpush2.msra.mxu1 %v493_v14  ;;  %v613_v10 = vld [vmem:[%s5664_s10 + $0x9d0] sm:$0xff]  ;;  %v586_v13 = vld [vmem:[%s5664_s10 + $0x8f8] sm:$0xff] }
 0x2ba   : > { %3794 = vmatprep.mubr.f32.mxu1 %v5821_v12  ;;  %3724 = vmatmul.mubr.f32.vlgmr.msra.gmra.mxu0 %v5801_v0  ;;  %v610_v12 = vld [vmem:[%s5664_s10 + $0x9b8] sm:$0xff]  ;;  %v609_v0 = vld [vmem:[%s5664_s10 + $0x9b0] sm:$0xff] }
 0x2bb   : > { %3795 = vmatmul.mubr.f32.vlgmr.msra.gmra.mxu1 %v5806_v3  ;;  %3801 = vmatprep.subr.mxu0 %v618_v15  ;;  %v737_v3 = vld [vmem:[%s5664_s10 + $0xdb0] sm:$0xff]  ;;  %v714_v14 = vld [vmem:[%s5664_s10 + $0xcf8] sm:$0xff] }
 0x2bc   : > { %3872 = vmatprep.subr.mxu1 %v746_v16  ;;  %3802 = vmatpush1.msra.mxu0 %v617_v20  ;;  %v585_v15 = vld [vmem:[%s5664_s10 + $0x8f0] sm:$0xff]  ;;  %v582_v20 = vld [vmem:[%s5664_s10 + $0x8d8] sm:$0xff] }
 0x2bd   : > { %3873 = vmatpush1.msra.mxu1 %v745_v22  ;;  %3803 = vmatprep.subr.mxu0 %v614_v24  ;;  %v713_v16 = vld [vmem:[%s5664_s10 + $0xcf0] sm:$0xff]  ;;  %v710_v22 = vld [vmem:[%s5664_s10 + $0xcd8] sm:$0xff] }
 0x2be   : > { %3874 = vmatprep.subr.mxu1 %v742_v26  ;;  %3804 = vmatpush1.msra.mxu0 %v613_v10  ;;  %v581_v24 = vld [vmem:[%s5664_s10 + $0x8d0] sm:$0xff]  ;;  %v578_v10 = vld [vmem:[%s5664_s10 + $0x8b8] sm:$0xff] }
 0x2bf   : > { %3875 = vmatpush1.msra.mxu1 %v741_v32  ;;  %3805 = vmatprep.subr.mxu0 %v610_v12  ;;  %v709_v26 = vld [vmem:[%s5664_s10 + $0xcd0] sm:$0xff]  ;;  %v706_v32 = vld [vmem:[%s5664_s10 + $0xcb8] sm:$0xff] }
 0x2c0   : > { %3876 = vmatprep.subr.mxu1 %v738_v33  ;;  %3806 = vmatpush1.msra.mxu0 %v609_v0  ;;  %v577_v12 = vld [vmem:[%s5664_s10 + $0x8b0] sm:$0xff]  ;;  %v574_v0 = vld [vmem:[%s5664_s10 + $0x898] sm:$0xff] }
 0x2c1   : > { %3877 = vmatpush1.msra.mxu1 %v737_v3  ;;  %3807 = vmatprep.subr.mxu0 %v606_v35  ;;  %v705_v33 = vld [vmem:[%s5664_s10 + $0xcb0] sm:$0xff]  ;;  %v702_v3 = vld [vmem:[%s5664_s10 + $0xc98] sm:$0xff] }
 0x2c2   : > { %3878 = vmatprep.subr.mxu1 %v734_v36  ;;  %3808 = vmatpush1.msra.mxu0 %v605_v39  ;;  %v573_v35 = vld [vmem:[%s5664_s10 + $0x890] sm:$0xff]  ;;  %v570_v39 = vld [vmem:[%s5664_s10 + $0x878] sm:$0xff] }
 0x2c3   : > { %3879 = vmatpush1.msra.mxu1 %v733_v40  ;;  %3809 = vmatprep.subr.mxu0 %v602_v43  ;;  %v701_v36 = vld [vmem:[%s5664_s10 + $0xc90] sm:$0xff]  ;;  %v698_v40 = vld [vmem:[%s5664_s10 + $0xc78] sm:$0xff] }
 0x2c4   : > { %3880 = vmatprep.subr.mxu1 %v730_v46  ;;  %3810 = vmatpush1.msra.mxu0 %v601_v47  ;;  %v569_v43 = vld [vmem:[%s5664_s10 + $0x870] sm:$0xff]  ;;  %v566_v47 = vld [vmem:[%s5664_s10 + $0x858] sm:$0xff] }
 0x2c5   : > { %3881 = vmatpush1.msra.mxu1 %v729_v48  ;;  %3811 = vmatprep.subr.mxu0 %v598_v52  ;;  %v697_v46 = vld [vmem:[%s5664_s10 + $0xc70] sm:$0xff]  ;;  %v694_v48 = vld [vmem:[%s5664_s10 + $0xc58] sm:$0xff] }
 0x2c6   : > { %3882 = vmatprep.subr.mxu1 %v726_v53  ;;  %3812 = vmatpush1.msra.mxu0 %v597_v55  ;;  %v565_v52 = vld [vmem:[%s5664_s10 + $0x850] sm:$0xff]  ;;  %v562_v55 = vld [vmem:[%s5664_s10 + $0x838] sm:$0xff] }
 0x2c7   : > { %3883 = vmatpush1.msra.mxu1 %v725_v57  ;;  %3813 = vmatprep.subr.mxu0 %v594_v61  ;;  %v693_v53 = vld [vmem:[%s5664_s10 + $0xc50] sm:$0xff]  ;;  %v690_v57 = vld [vmem:[%s5664_s10 + $0xc38] sm:$0xff] }
 0x2c8   : > { %3884 = vmatprep.subr.mxu1 %v722_v62  ;;  %3814 = vmatpush1.msra.mxu0 %v593_v2  ;;  %v561_v61 = vld [vmem:[%s5664_s10 + $0x830] sm:$0xff]  ;;  %v558_v2 = vld [vmem:[%s5664_s10 + $0x818] sm:$0xff] }
 0x2c9   : > { %3885 = vmatpush1.msra.mxu1 %v721_v4  ;;  %3815 = vmatprep.subr.mxu0 %v590_v6  ;;  %v689_v62 = vld [vmem:[%s5664_s10 + $0xc30] sm:$0xff]  ;;  %v686_v4 = vld [vmem:[%s5664_s10 + $0xc18] sm:$0xff] }
 0x2ca   : > { %3886 = vmatprep.subr.mxu1 %v718_v7  ;;  %3816 = vmatpush1.msra.mxu0 %v589_v8  ;;  %v557_v6 = vld [vmem:[%s5664_s10 + $0x810] sm:$0xff]  ;;  %v682_v8 = vld [vmem:[%s5664_s10 + $0xbf8] sm:$0xff] }
 0x2cb   : > { %3887 = vmatpush1.msra.mxu1 %v717_v9  ;;  %3817 = vmatprep.subr.mxu0 %v586_v13  ;;  %v685_v7 = vld [vmem:[%s5664_s10 + $0xc10] sm:$0xff]  ;;  %v810_v9 = vld [vmem:[%s5664_s10 + $0xff8] sm:$0xff] }
 0x2cc   : > { %3888 = vmatprep.subr.mxu1 %v714_v14  ;;  %3818 = vmatpush1.msra.mxu0 %v585_v15  ;;  %v681_v13 = vld [vmem:[%s5664_s10 + $0xbf0] sm:$0xff]  ;;  %v678_v15 = vld [vmem:[%s5664_s10 + $0xbd8] sm:$0xff] }
 0x2cd   : > { %3889 = vmatpush1.msra.mxu1 %v713_v16  ;;  %3819 = vmatprep.subr.mxu0 %v582_v20  ;;  %v809_v14 = vld [vmem:[%s5664_s10 + $0xff0] sm:$0xff]  ;;  %v806_v16 = vld [vmem:[%s5664_s10 + $0xfd8] sm:$0xff] }
 0x2ce   : > { %3890 = vmatprep.subr.mxu1 %v710_v22  ;;  %3820 = vmatpush1.msra.mxu0 %v581_v24  ;;  %v677_v20 = vld [vmem:[%s5664_s10 + $0xbd0] sm:$0xff]  ;;  %v674_v24 = vld [vmem:[%s5664_s10 + $0xbb8] sm:$0xff] }
 0x2cf   : > { %3891 = vmatpush1.msra.mxu1 %v709_v26  ;;  %3821 = vmatprep.subr.mxu0 %v578_v10  ;;  %v805_v22 = vld [vmem:[%s5664_s10 + $0xfd0] sm:$0xff]  ;;  %v802_v26 = vld [vmem:[%s5664_s10 + $0xfb8] sm:$0xff] }
 0x2d0   : > { %3892 = vmatprep.subr.mxu1 %v706_v32  ;;  %3822 = vmatpush1.msra.mxu0 %v577_v12  ;;  %v673_v10 = vld [vmem:[%s5664_s10 + $0xbb0] sm:$0xff]  ;;  %v670_v12 = vld [vmem:[%s5664_s10 + $0xb98] sm:$0xff] }
 0x2d1   : > { %3893 = vmatpush1.msra.mxu1 %v705_v33  ;;  %3823 = vmatprep.subr.mxu0 %v574_v0  ;;  %v801_v32 = vld [vmem:[%s5664_s10 + $0xfb0] sm:$0xff]  ;;  %v798_v33 = vld [vmem:[%s5664_s10 + $0xf98] sm:$0xff] }
 0x2d2   : > { %3894 = vmatprep.subr.mxu1 %v702_v3  ;;  %3824 = vmatpush1.msra.mxu0 %v573_v35  ;;  %v669_v0 = vld [vmem:[%s5664_s10 + $0xb90] sm:$0xff]  ;;  %v666_v35 = vld [vmem:[%s5664_s10 + $0xb78] sm:$0xff] }
 0x2d3   : > { %3895 = vmatpush1.msra.mxu1 %v701_v36  ;;  %3825 = vmatprep.subr.mxu0 %v570_v39  ;;  %v797_v3 = vld [vmem:[%s5664_s10 + $0xf90] sm:$0xff]  ;;  %v794_v36 = vld [vmem:[%s5664_s10 + $0xf78] sm:$0xff] }
 0x2d4   : > { %3896 = vmatprep.subr.mxu1 %v698_v40  ;;  %3826 = vmatpush1.msra.mxu0 %v569_v43  ;;  %v665_v39 = vld [vmem:[%s5664_s10 + $0xb70] sm:$0xff]  ;;  %v662_v43 = vld [vmem:[%s5664_s10 + $0xb58] sm:$0xff] }
 0x2d5   : > { %3897 = vmatpush1.msra.mxu1 %v697_v46  ;;  %3827 = vmatprep.subr.mxu0 %v566_v47  ;;  %v793_v40 = vld [vmem:[%s5664_s10 + $0xf70] sm:$0xff]  ;;  %v790_v46 = vld [vmem:[%s5664_s10 + $0xf58] sm:$0xff] }
 0x2d6   : > { %3898 = vmatprep.subr.mxu1 %v694_v48  ;;  %3828 = vmatpush1.msra.mxu0 %v565_v52  ;;  %v661_v47 = vld [vmem:[%s5664_s10 + $0xb50] sm:$0xff]  ;;  %v658_v52 = vld [vmem:[%s5664_s10 + $0xb38] sm:$0xff] }
 0x2d7   : > { %3899 = vmatpush1.msra.mxu1 %v693_v53  ;;  %3829 = vmatprep.subr.mxu0 %v562_v55  ;;  %v789_v48 = vld [vmem:[%s5664_s10 + $0xf50] sm:$0xff]  ;;  %v786_v53 = vld [vmem:[%s5664_s10 + $0xf38] sm:$0xff] }
 0x2d8   : > { %3900 = vmatprep.subr.mxu1 %v690_v57  ;;  %3830 = vmatpush1.msra.mxu0 %v561_v61  ;;  %v657_v55 = vld [vmem:[%s5664_s10 + $0xb30] sm:$0xff]  ;;  %v654_v61 = vld [vmem:[%s5664_s10 + $0xb18] sm:$0xff] }
 0x2d9   : > { %3901 = vmatpush1.msra.mxu1 %v689_v62  ;;  %3831 = vmatprep.subr.mxu0 %v558_v2  ;;  %v785_v57 = vld [vmem:[%s5664_s10 + $0xf30] sm:$0xff]  ;;  %v782_v62 = vld [vmem:[%s5664_s10 + $0xf18] sm:$0xff] }
 0x2da   : > { %3902 = vmatprep.subr.mxu1 %v686_v4  ;;  %3832 = vmatpush1.msra.mxu0 %v557_v6  ;;  %v653_v2 = vld [vmem:[%s5664_s10 + $0xb10] sm:$0xff]  ;;  %v650_v6 = vld [vmem:[%s5664_s10 + $0xaf8] sm:$0xff] }
 0x2db   : > { %3903 = vmatpush1.msra.mxu1 %v685_v7  ;;  %3833 = vmatprep.subr.mxu0 %v682_v8  ;;  %v781_v4 = vld [vmem:[%s5664_s10 + $0xf10] sm:$0xff]  ;;  %v778_v7 = vld [vmem:[%s5664_s10 + $0xef8] sm:$0xff] }
 0x2dc   : > { %3904 = vmatprep.subr.mxu1 %v810_v9  ;;  %3834 = vmatpush2.msra.mxu0 %v681_v13  ;;  %v649_v8 = vld [vmem:[%s5664_s10 + $0xaf0] sm:$0xff]  ;;  %v646_v13 = vld [vmem:[%s5664_s10 + $0xad8] sm:$0xff] }
 0x2dd   : > { %3905 = vmatpush2.msra.mxu1 %v809_v14  ;;  %3835 = vmatprep.subr.mxu0 %v678_v15  ;;  %v777_v9 = vld [vmem:[%s5664_s10 + $0xef0] sm:$0xff]  ;;  %v774_v14 = vld [vmem:[%s5664_s10 + $0xed8] sm:$0xff] }
 0x2de   : > { %3906 = vmatprep.subr.mxu1 %v806_v16  ;;  %3836 = vmatpush2.msra.mxu0 %v677_v20  ;;  %v645_v15 = vld [vmem:[%s5664_s10 + $0xad0] sm:$0xff]  ;;  %v642_v20 = vld [vmem:[%s5664_s10 + $0xab8] sm:$0xff] }
 0x2df   : > { %3907 = vmatpush2.msra.mxu1 %v805_v22  ;;  %3837 = vmatprep.subr.mxu0 %v674_v24  ;;  %v773_v16 = vld [vmem:[%s5664_s10 + $0xed0] sm:$0xff]  ;;  %v770_v22 = vld [vmem:[%s5664_s10 + $0xeb8] sm:$0xff] }
 0x2e0   : > { %3908 = vmatprep.subr.mxu1 %v802_v26  ;;  %3838 = vmatpush2.msra.mxu0 %v673_v10  ;;  %v641_v24 = vld [vmem:[%s5664_s10 + $0xab0] sm:$0xff]  ;;  %v638_v10 = vld [vmem:[%s5664_s10 + $0xa98] sm:$0xff] }
 0x2e1   : > { %3909 = vmatpush2.msra.mxu1 %v801_v32  ;;  %3839 = vmatprep.subr.mxu0 %v670_v12  ;;  %v769_v26 = vld [vmem:[%s5664_s10 + $0xeb0] sm:$0xff]  ;;  %v766_v32 = vld [vmem:[%s5664_s10 + $0xe98] sm:$0xff] }
 0x2e2   : > { %3910 = vmatprep.subr.mxu1 %v798_v33  ;;  %3840 = vmatpush2.msra.mxu0 %v669_v0  ;;  %v637_v12 = vld [vmem:[%s5664_s10 + $0xa90] sm:$0xff]  ;;  %v634_v0 = vld [vmem:[%s5664_s10 + $0xa78] sm:$0xff] }
 0x2e3   : > { %3911 = vmatpush2.msra.mxu1 %v797_v3  ;;  %3841 = vmatprep.subr.mxu0 %v666_v35  ;;  %v765_v33 = vld [vmem:[%s5664_s10 + $0xe90] sm:$0xff]  ;;  %v762_v3 = vld [vmem:[%s5664_s10 + $0xe78] sm:$0xff] }
 0x2e4   : > { %3912 = vmatprep.subr.mxu1 %v794_v36  ;;  %3842 = vmatpush2.msra.mxu0 %v665_v39  ;;  %v633_v35 = vld [vmem:[%s5664_s10 + $0xa70] sm:$0xff]  ;;  %v630_v39 = vld [vmem:[%s5664_s10 + $0xa58] sm:$0xff] }
 0x2e5   : > { %3913 = vmatpush2.msra.mxu1 %v793_v40  ;;  %3843 = vmatprep.subr.mxu0 %v662_v43  ;;  %v761_v36 = vld [vmem:[%s5664_s10 + $0xe70] sm:$0xff]  ;;  %v758_v40 = vld [vmem:[%s5664_s10 + $0xe58] sm:$0xff] }
 0x2e6   : > { %3914 = vmatprep.subr.mxu1 %v790_v46  ;;  %3844 = vmatpush2.msra.mxu0 %v661_v47  ;;  %v629_v43 = vld [vmem:[%s5664_s10 + $0xa50] sm:$0xff]  ;;  %v626_v47 = vld [vmem:[%s5664_s10 + $0xa38] sm:$0xff] }
 0x2e7   : > { %3915 = vmatpush2.msra.mxu1 %v789_v48  ;;  %3845 = vmatprep.subr.mxu0 %v658_v52  ;;  %v757_v46 = vld [vmem:[%s5664_s10 + $0xe50] sm:$0xff]  ;;  %v754_v48 = vld [vmem:[%s5664_s10 + $0xe38] sm:$0xff] }
 0x2e8   : > { %3916 = vmatprep.subr.mxu1 %v786_v53  ;;  %3846 = vmatpush2.msra.mxu0 %v657_v55  ;;  %v625_v52 = vld [vmem:[%s5664_s10 + $0xa30] sm:$0xff]  ;;  %v622_v55 = vld [vmem:[%s5664_s10 + $0xa18] sm:$0xff] }
 0x2e9   : > { %3917 = vmatpush2.msra.mxu1 %v785_v57  ;;  %3847 = vmatprep.subr.mxu0 %v654_v61  ;;  %v753_v53 = vld [vmem:[%s5664_s10 + $0xe30] sm:$0xff]  ;;  %v750_v57 = vld [vmem:[%s5664_s10 + $0xe18] sm:$0xff] }
 0x2ea   : > { %3918 = vmatprep.subr.mxu1 %v782_v62  ;;  %3848 = vmatpush2.msra.mxu0 %v653_v2  ;;  %v621_v61 = vld [vmem:[%s5664_s10 + $0xa10] sm:$0xff]  ;;  %v874_v2 = vld [vmem:[%s5664_s10 + $0x11f8] sm:$0xff] }
 0x2eb   : > { %3919 = vmatpush2.msra.mxu1 %v781_v4  ;;  %3849 = vmatprep.subr.mxu0 %v650_v6  ;;  %v749_v62 = vld [vmem:[%s5664_s10 + $0xe10] sm:$0xff]  ;;  %v1002_v4 = vld [vmem:[%s5664_s10 + $0x15f8] sm:$0xff] }
 0x2ec   : > { %3920 = vmatprep.subr.mxu1 %v778_v7  ;;  %3850 = vmatpush2.msra.mxu0 %v649_v8  ;;  %v873_v6 = vld [vmem:[%s5664_s10 + $0x11f0] sm:$0xff]  ;;  %v870_v8 = vld [vmem:[%s5664_s10 + $0x11d8] sm:$0xff] }
 0x2ed   : > { %3921 = vmatpush2.msra.mxu1 %v777_v9  ;;  %3851 = vmatprep.subr.mxu0 %v646_v13  ;;  %v1001_v7 = vld [vmem:[%s5664_s10 + $0x15f0] sm:$0xff]  ;;  %v998_v9 = vld [vmem:[%s5664_s10 + $0x15d8] sm:$0xff] }
 0x2ee   : > { %3922 = vmatprep.subr.mxu1 %v774_v14  ;;  %3852 = vmatpush2.msra.mxu0 %v645_v15  ;;  %v997_v13 = vld [vmem:[%s5664_s10 + $0x15d0] sm:$0xff]  ;;  %v994_v14 = vld [vmem:[%s5664_s10 + $0x15b8] sm:$0xff] }
 0x2ef   : > { %3923 = vmatpush2.msra.mxu1 %v773_v16  ;;  %3853 = vmatprep.subr.mxu0 %v642_v20  ;;  %v993_v15 = vld [vmem:[%s5664_s10 + $0x15b0] sm:$0xff]  ;;  %v862_v16 = vld [vmem:[%s5664_s10 + $0x1198] sm:$0xff] }
 0x2f0   : > { %3924 = vmatprep.subr.mxu1 %v770_v22  ;;  %3854 = vmatpush2.msra.mxu0 %v641_v24  ;;  %v861_v20 = vld [vmem:[%s5664_s10 + $0x1190] sm:$0xff]  ;;  %v858_v24 = vld [vmem:[%s5664_s10 + $0x1178] sm:$0xff] }
 0x2f1   : > { %3925 = vmatpush2.msra.mxu1 %v769_v26  ;;  %3855 = vmatprep.subr.mxu0 %v638_v10  ;;  %v989_v22 = vld [vmem:[%s5664_s10 + $0x1590] sm:$0xff]  ;;  %v986_v26 = vld [vmem:[%s5664_s10 + $0x1578] sm:$0xff] }
 0x2f2   : > { %3926 = vmatprep.subr.mxu1 %v766_v32  ;;  %3856 = vmatpush2.msra.mxu0 %v637_v12  ;;  %v857_v10 = vld [vmem:[%s5664_s10 + $0x1170] sm:$0xff]  ;;  %v854_v12 = vld [vmem:[%s5664_s10 + $0x1158] sm:$0xff] }
 0x2f3   : > { %3927 = vmatpush2.msra.mxu1 %v765_v33  ;;  %3857 = vmatprep.subr.mxu0 %v634_v0  ;;  %v985_v32 = vld [vmem:[%s5664_s10 + $0x1570] sm:$0xff]  ;;  %v982_v33 = vld [vmem:[%s5664_s10 + $0x1558] sm:$0xff] }
 0x2f4   : > { %3928 = vmatprep.subr.mxu1 %v762_v3  ;;  %3858 = vmatpush2.msra.mxu0 %v633_v35  ;;  %v853_v0 = vld [vmem:[%s5664_s10 + $0x1150] sm:$0xff]  ;;  %v850_v35 = vld [vmem:[%s5664_s10 + $0x1138] sm:$0xff] }
 0x2f5   : > { %3929 = vmatpush2.msra.mxu1 %v761_v36  ;;  %3859 = vmatprep.subr.mxu0 %v630_v39  ;;  %v981_v3 = vld [vmem:[%s5664_s10 + $0x1550] sm:$0xff]  ;;  %v978_v36 = vld [vmem:[%s5664_s10 + $0x1538] sm:$0xff] }
 0x2f6   : > { %3930 = vmatprep.subr.mxu1 %v758_v40  ;;  %3860 = vmatpush2.msra.mxu0 %v629_v43  ;;  %v849_v39 = vld [vmem:[%s5664_s10 + $0x1130] sm:$0xff]  ;;  %v846_v43 = vld [vmem:[%s5664_s10 + $0x1118] sm:$0xff] }
 0x2f7   : > { %3931 = vmatpush2.msra.mxu1 %v757_v46  ;;  %3861 = vmatprep.subr.mxu0 %v626_v47  ;;  %v977_v40 = vld [vmem:[%s5664_s10 + $0x1530] sm:$0xff]  ;;  %v974_v46 = vld [vmem:[%s5664_s10 + $0x1518] sm:$0xff] }
 0x2f8   : > { %3932 = vmatprep.subr.mxu1 %v754_v48  ;;  %3862 = vmatpush2.msra.mxu0 %v625_v52  ;;  %v845_v47 = vld [vmem:[%s5664_s10 + $0x1110] sm:$0xff]  ;;  %v842_v52 = vld [vmem:[%s5664_s10 + $0x10f8] sm:$0xff] }
 0x2f9   : > { %3933 = vmatpush2.msra.mxu1 %v753_v53  ;;  %3863 = vmatprep.subr.mxu0 %v622_v55  ;;  %v973_v48 = vld [vmem:[%s5664_s10 + $0x1510] sm:$0xff]  ;;  %v970_v53 = vld [vmem:[%s5664_s10 + $0x14f8] sm:$0xff] }
 0x2fa   : > { %3934 = vmatprep.subr.mxu1 %v750_v57  ;;  %3864 = vmatpush2.msra.mxu0 %v621_v61  ;;  %v841_v55 = vld [vmem:[%s5664_s10 + $0x10f0] sm:$0xff]  ;;  %v838_v61 = vld [vmem:[%s5664_s10 + $0x10d8] sm:$0xff] }
 0x2fb   : > { %3865 = vmatprep.mubr.f32.mxu0 %v5963_v28  ;;  %3935 = vmatpush2.msra.mxu1 %v749_v62  ;;  %v869_v28 = vld [vmem:[%s5664_s10 + $0x11d0] sm:$0xff]  ;;  %v966_v62 = vld [vmem:[%s5664_s10 + $0x14d8] sm:$0xff] }
 0x2fc   : > { %3866 = vmatmul.mubr.f32.vlgmr.msra.gmra.mxu0 %v5948_v18  ;;  %3936 = vmatprep.mubr.f32.mxu1 %v5969_v31  ;;  %v866_v18 = vld [vmem:[%s5664_s10 + $0x11b8] sm:$0xff]  ;;  %v865_v31 = vld [vmem:[%s5664_s10 + $0x11b0] sm:$0xff] }
 0x2fd   : > { %3943 = vmatprep.subr.mxu0 %v874_v2  ;;  %4014 = vmatprep.subr.mxu1 %v1002_v4  ;;  %v969_v57 = vld [vmem:[%s5664_s10 + $0x14f0] sm:$0xff] }
 0x2fe   : > { %3937 = vmatmul.mubr.f32.vlgmr.msra.gmra.mxu1 %v5955_v23  ;;  %3944 = vmatpush1.msra.mxu0 %v873_v6  ;;  %v990_v23 = vld [vmem:[%s5664_s10 + $0x1598] sm:$0xff]  ;;  %v837_v2 = vld [vmem:[%s5664_s10 + $0x10d0] sm:$0xff] }
 0x2ff   : > { %4015 = vmatpush1.msra.mxu1 %v1001_v7  ;;  %3945 = vmatprep.subr.mxu0 %v870_v8  ;;  %v965_v4 = vld [vmem:[%s5664_s10 + $0x14d0] sm:$0xff]  ;;  %v834_v6 = vld [vmem:[%s5664_s10 + $0x10b8] sm:$0xff] }
 0x300   : > { %4016 = vmatprep.subr.mxu1 %v998_v9  ;;  %3946 = vmatpush1.msra.mxu0 %v869_v28  ;;  %v962_v7 = vld [vmem:[%s5664_s10 + $0x14b8] sm:$0xff]  ;;  %v833_v8 = vld [vmem:[%s5664_s10 + $0x10b0] sm:$0xff] }
 0x301   : > { %4017 = vmatpush1.msra.mxu1 %v997_v13  ;;  %3947 = vmatprep.subr.mxu0 %v866_v18  ;;  %v961_v9 = vld [vmem:[%s5664_s10 + $0x14b0] sm:$0xff]  ;;  %v830_v28 = vld [vmem:[%s5664_s10 + $0x1098] sm:$0xff] }
 0x302   : > { %4018 = vmatprep.subr.mxu1 %v994_v14  ;;  %3948 = vmatpush1.msra.mxu0 %v865_v31  ;;  %v958_v13 = vld [vmem:[%s5664_s10 + $0x1498] sm:$0xff]  ;;  %v829_v18 = vld [vmem:[%s5664_s10 + $0x1090] sm:$0xff] }
 0x303   : > { %4019 = vmatpush1.msra.mxu1 %v993_v15  ;;  %3949 = vmatprep.subr.mxu0 %v862_v16  ;;  %v957_v14 = vld [vmem:[%s5664_s10 + $0x1490] sm:$0xff]  ;;  %v826_v31 = vld [vmem:[%s5664_s10 + $0x1078] sm:$0xff] }
 0x304   : > { %4020 = vmatprep.subr.mxu1 %v990_v23  ;;  %3950 = vmatpush1.msra.mxu0 %v861_v20  ;;  %v954_v15 = vld [vmem:[%s5664_s10 + $0x1478] sm:$0xff]  ;;  %v825_v16 = vld [vmem:[%s5664_s10 + $0x1070] sm:$0xff] }
 0x305   : > { %4021 = vmatpush1.msra.mxu1 %v989_v22  ;;  %3951 = vmatprep.subr.mxu0 %v858_v24  ;;  %v953_v23 = vld [vmem:[%s5664_s10 + $0x1470] sm:$0xff]  ;;  %v822_v20 = vld [vmem:[%s5664_s10 + $0x1058] sm:$0xff] }
 0x306   : > { %4022 = vmatprep.subr.mxu1 %v986_v26  ;;  %3952 = vmatpush1.msra.mxu0 %v857_v10  ;;  %v950_v22 = vld [vmem:[%s5664_s10 + $0x1458] sm:$0xff]  ;;  %v821_v24 = vld [vmem:[%s5664_s10 + $0x1050] sm:$0xff] }
 0x307   : > { %4023 = vmatpush1.msra.mxu1 %v985_v32  ;;  %3953 = vmatprep.subr.mxu0 %v854_v12  ;;  %v949_v26 = vld [vmem:[%s5664_s10 + $0x1450] sm:$0xff]  ;;  %v818_v10 = vld [vmem:[%s5664_s10 + $0x1038] sm:$0xff] }
 0x308   : > { %4024 = vmatprep.subr.mxu1 %v982_v33  ;;  %3954 = vmatpush1.msra.mxu0 %v853_v0  ;;  %v946_v32 = vld [vmem:[%s5664_s10 + $0x1438] sm:$0xff]  ;;  %v817_v12 = vld [vmem:[%s5664_s10 + $0x1030] sm:$0xff] }
 0x309   : > { %4025 = vmatpush1.msra.mxu1 %v981_v3  ;;  %3955 = vmatprep.subr.mxu0 %v850_v35  ;;  %v945_v33 = vld [vmem:[%s5664_s10 + $0x1430] sm:$0xff]  ;;  %v814_v0 = vld [vmem:[%s5664_s10 + $0x1018] sm:$0xff] }
 0x30a   : > { %4026 = vmatprep.subr.mxu1 %v978_v36  ;;  %3956 = vmatpush1.msra.mxu0 %v849_v39  ;;  %v942_v3 = vld [vmem:[%s5664_s10 + $0x1418] sm:$0xff]  ;;  %v813_v35 = vld [vmem:[%s5664_s10 + $0x1010] sm:$0xff] }
 0x30b   : > { %4027 = vmatpush1.msra.mxu1 %v977_v40  ;;  %3957 = vmatprep.subr.mxu0 %v846_v43  ;;  %v941_v36 = vld [vmem:[%s5664_s10 + $0x1410] sm:$0xff]  ;;  %v938_v39 = vld [vmem:[%s5664_s10 + $0x13f8] sm:$0xff] }
 0x30c   : > { %4028 = vmatprep.subr.mxu1 %v974_v46  ;;  %3958 = vmatpush1.msra.mxu0 %v845_v47  ;;  %v1066_v40 = vld [vmem:[%s5664_s10 + $0x17f8] sm:$0xff]  ;;  %v937_v43 = vld [vmem:[%s5664_s10 + $0x13f0] sm:$0xff] }
 0x30d   : > { %4029 = vmatpush1.msra.mxu1 %v973_v48  ;;  %3959 = vmatprep.subr.mxu0 %v842_v52  ;;  %v1065_v46 = vld [vmem:[%s5664_s10 + $0x17f0] sm:$0xff]  ;;  %v934_v47 = vld [vmem:[%s5664_s10 + $0x13d8] sm:$0xff] }
 0x30e   : > { %4030 = vmatprep.subr.mxu1 %v970_v53  ;;  %3960 = vmatpush1.msra.mxu0 %v841_v55  ;;  %v1062_v48 = vld [vmem:[%s5664_s10 + $0x17d8] sm:$0xff]  ;;  %v933_v52 = vld [vmem:[%s5664_s10 + $0x13d0] sm:$0xff] }
 0x30f   : > { %4031 = vmatpush1.msra.mxu1 %v969_v57  ;;  %3961 = vmatprep.subr.mxu0 %v838_v61  ;;  %v1061_v53 = vld [vmem:[%s5664_s10 + $0x17d0] sm:$0xff]  ;;  %v930_v55 = vld [vmem:[%s5664_s10 + $0x13b8] sm:$0xff] }
 0x310   : > { %4032 = vmatprep.subr.mxu1 %v966_v62  ;;  %3962 = vmatpush1.msra.mxu0 %v837_v2  ;;  %v1058_v57 = vld [vmem:[%s5664_s10 + $0x17b8] sm:$0xff]  ;;  %v929_v61 = vld [vmem:[%s5664_s10 + $0x13b0] sm:$0xff] }
 0x311   : > { %4033 = vmatpush1.msra.mxu1 %v965_v4  ;;  %3963 = vmatprep.subr.mxu0 %v834_v6  ;;  %v1057_v62 = vld [vmem:[%s5664_s10 + $0x17b0] sm:$0xff]  ;;  %v926_v2 = vld [vmem:[%s5664_s10 + $0x1398] sm:$0xff] }
 0x312   : > { %4034 = vmatprep.subr.mxu1 %v962_v7  ;;  %3964 = vmatpush1.msra.mxu0 %v833_v8  ;;  %v1054_v4 = vld [vmem:[%s5664_s10 + $0x1798] sm:$0xff]  ;;  %v925_v6 = vld [vmem:[%s5664_s10 + $0x1390] sm:$0xff] }
 0x313   : > { %4035 = vmatpush1.msra.mxu1 %v961_v9  ;;  %3965 = vmatprep.subr.mxu0 %v830_v28  ;;  %v1053_v7 = vld [vmem:[%s5664_s10 + $0x1790] sm:$0xff]  ;;  %v922_v8 = vld [vmem:[%s5664_s10 + $0x1378] sm:$0xff] }
 0x314   : > { %4036 = vmatprep.subr.mxu1 %v958_v13  ;;  %3966 = vmatpush1.msra.mxu0 %v829_v18  ;;  %v1050_v9 = vld [vmem:[%s5664_s10 + $0x1778] sm:$0xff]  ;;  %v921_v28 = vld [vmem:[%s5664_s10 + $0x1370] sm:$0xff] }
 0x315   : > { %4037 = vmatpush1.msra.mxu1 %v957_v14  ;;  %3967 = vmatprep.subr.mxu0 %v826_v31  ;;  %v1049_v13 = vld [vmem:[%s5664_s10 + $0x1770] sm:$0xff]  ;;  %v918_v18 = vld [vmem:[%s5664_s10 + $0x1358] sm:$0xff] }
 0x316   : > { %4038 = vmatprep.subr.mxu1 %v954_v15  ;;  %3968 = vmatpush1.msra.mxu0 %v825_v16  ;;  %v1046_v14 = vld [vmem:[%s5664_s10 + $0x1758] sm:$0xff]  ;;  %v917_v31 = vld [vmem:[%s5664_s10 + $0x1350] sm:$0xff] }
 0x317   : > { %4039 = vmatpush1.msra.mxu1 %v953_v23  ;;  %3969 = vmatprep.subr.mxu0 %v822_v20  ;;  %v1045_v15 = vld [vmem:[%s5664_s10 + $0x1750] sm:$0xff]  ;;  %v914_v16 = vld [vmem:[%s5664_s10 + $0x1338] sm:$0xff] }
 0x318   : > { %4040 = vmatprep.subr.mxu1 %v950_v22  ;;  %3970 = vmatpush1.msra.mxu0 %v821_v24  ;;  %v1042_v23 = vld [vmem:[%s5664_s10 + $0x1738] sm:$0xff]  ;;  %v913_v20 = vld [vmem:[%s5664_s10 + $0x1330] sm:$0xff] }
 0x319   : > { %4041 = vmatpush1.msra.mxu1 %v949_v26  ;;  %3971 = vmatprep.subr.mxu0 %v818_v10  ;;  %v1041_v22 = vld [vmem:[%s5664_s10 + $0x1730] sm:$0xff]  ;;  %v910_v24 = vld [vmem:[%s5664_s10 + $0x1318] sm:$0xff] }
 0x31a   : > { %4042 = vmatprep.subr.mxu1 %v946_v32  ;;  %3972 = vmatpush1.msra.mxu0 %v817_v12  ;;  %v1038_v26 = vld [vmem:[%s5664_s10 + $0x1718] sm:$0xff]  ;;  %v909_v10 = vld [vmem:[%s5664_s10 + $0x1310] sm:$0xff] }
 0x31b   : > { %4043 = vmatpush1.msra.mxu1 %v945_v33  ;;  %3973 = vmatprep.subr.mxu0 %v814_v0  ;;  %v1037_v32 = vld [vmem:[%s5664_s10 + $0x1710] sm:$0xff]  ;;  %v906_v12 = vld [vmem:[%s5664_s10 + $0x12f8] sm:$0xff] }
 0x31c   : > { %4044 = vmatprep.subr.mxu1 %v942_v3  ;;  %3974 = vmatpush1.msra.mxu0 %v813_v35  ;;  %v1034_v33 = vld [vmem:[%s5664_s10 + $0x16f8] sm:$0xff]  ;;  %v905_v0 = vld [vmem:[%s5664_s10 + $0x12f0] sm:$0xff] }
 0x31d   : > { %4045 = vmatpush1.msra.mxu1 %v941_v36  ;;  %3975 = vmatprep.subr.mxu0 %v938_v39  ;;  %v1033_v3 = vld [vmem:[%s5664_s10 + $0x16f0] sm:$0xff]  ;;  %v902_v35 = vld [vmem:[%s5664_s10 + $0x12d8] sm:$0xff] }
 0x31e   : > { %4046 = vmatprep.subr.mxu1 %v1066_v40  ;;  %3976 = vmatpush2.msra.mxu0 %v937_v43  ;;  %v1030_v36 = vld [vmem:[%s5664_s10 + $0x16d8] sm:$0xff]  ;;  %v901_v39 = vld [vmem:[%s5664_s10 + $0x12d0] sm:$0xff] }
 0x31f   : > { %4047 = vmatpush2.msra.mxu1 %v1065_v46  ;;  %3977 = vmatprep.subr.mxu0 %v934_v47  ;;  %v1029_v40 = vld [vmem:[%s5664_s10 + $0x16d0] sm:$0xff]  ;;  %v898_v43 = vld [vmem:[%s5664_s10 + $0x12b8] sm:$0xff] }
 0x320   : > { %4048 = vmatprep.subr.mxu1 %v1062_v48  ;;  %3978 = vmatpush2.msra.mxu0 %v933_v52  ;;  %v1026_v46 = vld [vmem:[%s5664_s10 + $0x16b8] sm:$0xff]  ;;  %v897_v47 = vld [vmem:[%s5664_s10 + $0x12b0] sm:$0xff] }
 0x321   : > { %4049 = vmatpush2.msra.mxu1 %v1061_v53  ;;  %3979 = vmatprep.subr.mxu0 %v930_v55  ;;  %v1025_v48 = vld [vmem:[%s5664_s10 + $0x16b0] sm:$0xff]  ;;  %v894_v52 = vld [vmem:[%s5664_s10 + $0x1298] sm:$0xff] }
 0x322   : > { %4050 = vmatprep.subr.mxu1 %v1058_v57  ;;  %3980 = vmatpush2.msra.mxu0 %v929_v61  ;;  %v1022_v53 = vld [vmem:[%s5664_s10 + $0x1698] sm:$0xff]  ;;  %v893_v55 = vld [vmem:[%s5664_s10 + $0x1290] sm:$0xff] }
 0x323   : > { %4051 = vmatpush2.msra.mxu1 %v1057_v62  ;;  %3981 = vmatprep.subr.mxu0 %v926_v2  ;;  %v1021_v57 = vld [vmem:[%s5664_s10 + $0x1690] sm:$0xff]  ;;  %v890_v61 = vld [vmem:[%s5664_s10 + $0x1278] sm:$0xff] }
 0x324   : > { %4052 = vmatprep.subr.mxu1 %v1054_v4  ;;  %3982 = vmatpush2.msra.mxu0 %v925_v6  ;;  %v1018_v62 = vld [vmem:[%s5664_s10 + $0x1678] sm:$0xff]  ;;  %v889_v2 = vld [vmem:[%s5664_s10 + $0x1270] sm:$0xff] }
 0x325   : > { %4053 = vmatpush2.msra.mxu1 %v1053_v7  ;;  %3983 = vmatprep.subr.mxu0 %v922_v8  ;;  %v1017_v4 = vld [vmem:[%s5664_s10 + $0x1670] sm:$0xff]  ;;  %v886_v6 = vld [vmem:[%s5664_s10 + $0x1258] sm:$0xff] }
 0x326   : > { %4054 = vmatprep.subr.mxu1 %v1050_v9  ;;  %3984 = vmatpush2.msra.mxu0 %v921_v28  ;;  %v1014_v7 = vld [vmem:[%s5664_s10 + $0x1658] sm:$0xff]  ;;  %v885_v8 = vld [vmem:[%s5664_s10 + $0x1250] sm:$0xff] }
 0x327   : > { %4055 = vmatpush2.msra.mxu1 %v1049_v13  ;;  %3985 = vmatprep.subr.mxu0 %v918_v18  ;;  %v1013_v9 = vld [vmem:[%s5664_s10 + $0x1650] sm:$0xff]  ;;  %v882_v28 = vld [vmem:[%s5664_s10 + $0x1238] sm:$0xff] }
 0x328   : > { %4056 = vmatprep.subr.mxu1 %v1046_v14  ;;  %3986 = vmatpush2.msra.mxu0 %v917_v31  ;;  %v1010_v13 = vld [vmem:[%s5664_s10 + $0x1638] sm:$0xff]  ;;  %v881_v18 = vld [vmem:[%s5664_s10 + $0x1230] sm:$0xff] }
 0x329   : > { %4057 = vmatpush2.msra.mxu1 %v1045_v15  ;;  %3987 = vmatprep.subr.mxu0 %v914_v16  ;;  %v1009_v14 = vld [vmem:[%s5664_s10 + $0x1630] sm:$0xff]  ;;  %v878_v31 = vld [vmem:[%s5664_s10 + $0x1218] sm:$0xff] }
 0x32a   : > { %4058 = vmatprep.subr.mxu1 %v1042_v23  ;;  %3988 = vmatpush2.msra.mxu0 %v913_v20  ;;  %v1006_v15 = vld [vmem:[%s5664_s10 + $0x1618] sm:$0xff]  ;;  %v877_v16 = vld [vmem:[%s5664_s10 + $0x1210] sm:$0xff] }
 0x32b   : > { %4059 = vmatpush2.msra.mxu1 %v1041_v22  ;;  %3989 = vmatprep.subr.mxu0 %v910_v24  ;;  %v1005_v23 = vld [vmem:[%s5664_s10 + $0x1610] sm:$0xff]  ;;  %v1130_v20 = vld [vmem:[%s5664_s10 + $0x19f8] sm:$0xff] }
 0x32c   : > { %4060 = vmatprep.subr.mxu1 %v1038_v26  ;;  %3990 = vmatpush2.msra.mxu0 %v909_v10  ;;  %v1258_v22 = vld [vmem:[%s5664_s10 + $0x1df8] sm:$0xff]  ;;  %v1129_v24 = vld [vmem:[%s5664_s10 + $0x19f0] sm:$0xff] }
 0x32d   : > { %4061 = vmatpush2.msra.mxu1 %v1037_v32  ;;  %3991 = vmatprep.subr.mxu0 %v906_v12  ;;  %v1257_v26 = vld [vmem:[%s5664_s10 + $0x1df0] sm:$0xff]  ;;  %v1126_v10 = vld [vmem:[%s5664_s10 + $0x19d8] sm:$0xff] }
 0x32e   : > { %4062 = vmatprep.subr.mxu1 %v1034_v33  ;;  %3992 = vmatpush2.msra.mxu0 %v905_v0  ;;  %v1254_v32 = vld [vmem:[%s5664_s10 + $0x1dd8] sm:$0xff]  ;;  %v1253_v12 = vld [vmem:[%s5664_s10 + $0x1dd0] sm:$0xff] }
 0x32f   : > { %4063 = vmatpush2.msra.mxu1 %v1033_v3  ;;  %3993 = vmatprep.subr.mxu0 %v902_v35  ;;  %v1250_v33 = vld [vmem:[%s5664_s10 + $0x1db8] sm:$0xff]  ;;  %v1249_v0 = vld [vmem:[%s5664_s10 + $0x1db0] sm:$0xff] }
 0x330   : > { %4064 = vmatprep.subr.mxu1 %v1030_v36  ;;  %3994 = vmatpush2.msra.mxu0 %v901_v39  ;;  %v1118_v3 = vld [vmem:[%s5664_s10 + $0x1998] sm:$0xff]  ;;  %v1117_v35 = vld [vmem:[%s5664_s10 + $0x1990] sm:$0xff] }
 0x331   : > { %4065 = vmatpush2.msra.mxu1 %v1029_v40  ;;  %3995 = vmatprep.subr.mxu0 %v898_v43  ;;  %v1245_v36 = vld [vmem:[%s5664_s10 + $0x1d90] sm:$0xff]  ;;  %v1114_v39 = vld [vmem:[%s5664_s10 + $0x1978] sm:$0xff] }
 0x332   : > { %4066 = vmatprep.subr.mxu1 %v1026_v46  ;;  %3996 = vmatpush2.msra.mxu0 %v897_v47  ;;  %v1242_v40 = vld [vmem:[%s5664_s10 + $0x1d78] sm:$0xff]  ;;  %v1113_v43 = vld [vmem:[%s5664_s10 + $0x1970] sm:$0xff] }
 0x333   : > { %4067 = vmatpush2.msra.mxu1 %v1025_v48  ;;  %3997 = vmatprep.subr.mxu0 %v894_v52  ;;  %v1241_v46 = vld [vmem:[%s5664_s10 + $0x1d70] sm:$0xff]  ;;  %v1110_v47 = vld [vmem:[%s5664_s10 + $0x1958] sm:$0xff] }
 0x334   : > { %4068 = vmatprep.subr.mxu1 %v1022_v53  ;;  %3998 = vmatpush2.msra.mxu0 %v893_v55  ;;  %v1238_v48 = vld [vmem:[%s5664_s10 + $0x1d58] sm:$0xff]  ;;  %v1109_v52 = vld [vmem:[%s5664_s10 + $0x1950] sm:$0xff] }
 0x335   : > { %4069 = vmatpush2.msra.mxu1 %v1021_v57  ;;  %3999 = vmatprep.subr.mxu0 %v890_v61  ;;  %v1237_v53 = vld [vmem:[%s5664_s10 + $0x1d50] sm:$0xff]  ;;  %v1106_v55 = vld [vmem:[%s5664_s10 + $0x1938] sm:$0xff] }
 0x336   : > { %4070 = vmatprep.subr.mxu1 %v1018_v62  ;;  %4000 = vmatpush2.msra.mxu0 %v889_v2  ;;  %v1234_v57 = vld [vmem:[%s5664_s10 + $0x1d38] sm:$0xff]  ;;  %v1105_v61 = vld [vmem:[%s5664_s10 + $0x1930] sm:$0xff] }
 0x337   : > { %4071 = vmatpush2.msra.mxu1 %v1017_v4  ;;  %4001 = vmatprep.subr.mxu0 %v886_v6  ;;  %v1233_v62 = vld [vmem:[%s5664_s10 + $0x1d30] sm:$0xff]  ;;  %v1102_v2 = vld [vmem:[%s5664_s10 + $0x1918] sm:$0xff] }
 0x338   : > { %4072 = vmatprep.subr.mxu1 %v1014_v7  ;;  %4002 = vmatpush2.msra.mxu0 %v885_v8  ;;  %v1230_v4 = vld [vmem:[%s5664_s10 + $0x1d18] sm:$0xff]  ;;  %v1101_v6 = vld [vmem:[%s5664_s10 + $0x1910] sm:$0xff] }
 0x339   : > { %4073 = vmatpush2.msra.mxu1 %v1013_v9  ;;  %4003 = vmatprep.subr.mxu0 %v882_v28  ;;  %v1229_v7 = vld [vmem:[%s5664_s10 + $0x1d10] sm:$0xff]  ;;  %v1098_v8 = vld [vmem:[%s5664_s10 + $0x18f8] sm:$0xff] }
 0x33a   : > { %4074 = vmatprep.subr.mxu1 %v1010_v13  ;;  %4004 = vmatpush2.msra.mxu0 %v881_v18  ;;  %v1226_v9 = vld [vmem:[%s5664_s10 + $0x1cf8] sm:$0xff]  ;;  %v1097_v28 = vld [vmem:[%s5664_s10 + $0x18f0] sm:$0xff] }
 0x33b   : > { %4075 = vmatpush2.msra.mxu1 %v1009_v14  ;;  %4005 = vmatprep.subr.mxu0 %v878_v31  ;;  %v1225_v13 = vld [vmem:[%s5664_s10 + $0x1cf0] sm:$0xff]  ;;  %v1094_v18 = vld [vmem:[%s5664_s10 + $0x18d8] sm:$0xff] }
 0x33c   : > { %4076 = vmatprep.subr.mxu1 %v1006_v15  ;;  %4006 = vmatpush2.msra.mxu0 %v877_v16  ;;  %v1222_v14 = vld [vmem:[%s5664_s10 + $0x1cd8] sm:$0xff]  ;;  %v1093_v31 = vld [vmem:[%s5664_s10 + $0x18d0] sm:$0xff] }
 0x33d   : > { %4007 = vmatprep.mubr.f32.mxu0 %v6110_v56  ;;  %4077 = vmatpush2.msra.mxu1 %v1005_v23  ;;  %v1125_v56 = vld [vmem:[%s5664_s10 + $0x19d0] sm:$0xff]  ;;  %v1090_v16 = vld [vmem:[%s5664_s10 + $0x18b8] sm:$0xff] }
 0x33e   : > { %4008 = vmatmul.mubr.f32.vlgmr.msra.gmra.mxu0 %v6095_v45  ;;  %4078 = vmatprep.mubr.f32.mxu1 %v6116_v59  ;;  %v1122_v45 = vld [vmem:[%s5664_s10 + $0x19b8] sm:$0xff]  ;;  %v1121_v59 = vld [vmem:[%s5664_s10 + $0x19b0] sm:$0xff] }
 0x33f   : > { %4085 = vmatprep.subr.mxu0 %v1130_v20  ;;  %4156 = vmatprep.subr.mxu1 %v1258_v22  ;;  %v1221_v15 = vld [vmem:[%s5664_s10 + $0x1cd0] sm:$0xff]  ;;  %v1218_v23 = vld [vmem:[%s5664_s10 + $0x1cb8] sm:$0xff] }
 0x340   : > { %4079 = vmatmul.mubr.f32.vlgmr.msra.gmra.mxu1 %v6102_v50  ;;  %4086 = vmatpush1.msra.mxu0 %v1129_v24  ;;  %v1246_v50 = vld [vmem:[%s5664_s10 + $0x1d98] sm:$0xff]  ;;  %v1089_v20 = vld [vmem:[%s5664_s10 + $0x18b0] sm:$0xff] }
 0x341   : > { %4157 = vmatpush1.msra.mxu1 %v1257_v26  ;;  %4087 = vmatprep.subr.mxu0 %v1126_v10  ;;  %v1217_v22 = vld [vmem:[%s5664_s10 + $0x1cb0] sm:$0xff]  ;;  %v1086_v24 = vld [vmem:[%s5664_s10 + $0x1898] sm:$0xff] }
 0x342   : > { %4158 = vmatprep.subr.mxu1 %v1254_v32  ;;  %4088 = vmatpush1.msra.mxu0 %v1125_v56  ;;  %v1214_v26 = vld [vmem:[%s5664_s10 + $0x1c98] sm:$0xff]  ;;  %v1085_v10 = vld [vmem:[%s5664_s10 + $0x1890] sm:$0xff] }
 0x343   : > { %4159 = vmatpush1.msra.mxu1 %v1253_v12  ;;  %4089 = vmatprep.subr.mxu0 %v1122_v45  ;;  %v1213_v32 = vld [vmem:[%s5664_s10 + $0x1c90] sm:$0xff]  ;;  %v1082_v56 = vld [vmem:[%s5664_s10 + $0x1878] sm:$0xff] }
 0x344   : > { %4160 = vmatprep.subr.mxu1 %v1250_v33  ;;  %4090 = vmatpush1.msra.mxu0 %v1121_v59  ;;  %v1210_v12 = vld [vmem:[%s5664_s10 + $0x1c78] sm:$0xff]  ;;  %v1081_v45 = vld [vmem:[%s5664_s10 + $0x1870] sm:$0xff] }
 0x345   : > { %4161 = vmatpush1.msra.mxu1 %v1249_v0  ;;  %4091 = vmatprep.subr.mxu0 %v1118_v3  ;;  %v1209_v33 = vld [vmem:[%s5664_s10 + $0x1c70] sm:$0xff]  ;;  %v1078_v59 = vld [vmem:[%s5664_s10 + $0x1858] sm:$0xff] }
 0x346   : > { %4162 = vmatprep.subr.mxu1 %v1246_v50  ;;  %4092 = vmatpush1.msra.mxu0 %v1117_v35  ;;  %v1206_v0 = vld [vmem:[%s5664_s10 + $0x1c58] sm:$0xff]  ;;  %v1077_v3 = vld [vmem:[%s5664_s10 + $0x1850] sm:$0xff] }
 0x347   : > { %4163 = vmatpush1.msra.mxu1 %v1245_v36  ;;  %4093 = vmatprep.subr.mxu0 %v1114_v39  ;;  %v1205_v50 = vld [vmem:[%s5664_s10 + $0x1c50] sm:$0xff]  ;;  %v1074_v35 = vld [vmem:[%s5664_s10 + $0x1838] sm:$0xff] }
 0x348   : > { %4164 = vmatprep.subr.mxu1 %v1242_v40  ;;  %4094 = vmatpush1.msra.mxu0 %v1113_v43  ;;  %v1202_v36 = vld [vmem:[%s5664_s10 + $0x1c38] sm:$0xff]  ;;  %v1073_v39 = vld [vmem:[%s5664_s10 + $0x1830] sm:$0xff] }
 0x349   : > { %4165 = vmatpush1.msra.mxu1 %v1241_v46  ;;  %4095 = vmatprep.subr.mxu0 %v1110_v47  ;;  %v1201_v40 = vld [vmem:[%s5664_s10 + $0x1c30] sm:$0xff]  ;;  %v1070_v43 = vld [vmem:[%s5664_s10 + $0x1818] sm:$0xff] }
 0x34a   : > { %4166 = vmatprep.subr.mxu1 %v1238_v48  ;;  %4096 = vmatpush1.msra.mxu0 %v1109_v52  ;;  %v1198_v46 = vld [vmem:[%s5664_s10 + $0x1c18] sm:$0xff]  ;;  %v1069_v47 = vld [vmem:[%s5664_s10 + $0x1810] sm:$0xff] }
 0x34b   : > { %4167 = vmatpush1.msra.mxu1 %v1237_v53  ;;  %4097 = vmatprep.subr.mxu0 %v1106_v55  ;;  %v1197_v48 = vld [vmem:[%s5664_s10 + $0x1c10] sm:$0xff]  ;;  %v1194_v52 = vld [vmem:[%s5664_s10 + $0x1bf8] sm:$0xff] }
 0x34c   : > { %4168 = vmatprep.subr.mxu1 %v1234_v57  ;;  %4098 = vmatpush1.msra.mxu0 %v1105_v61  ;;  %v1322_v53 = vld [vmem:[%s5664_s10 + $0x1ff8] sm:$0xff]  ;;  %v1193_v55 = vld [vmem:[%s5664_s10 + $0x1bf0] sm:$0xff] }
 0x34d   : > { %4169 = vmatpush1.msra.mxu1 %v1233_v62  ;;  %4099 = vmatprep.subr.mxu0 %v1102_v2  ;;  %v1321_v57 = vld [vmem:[%s5664_s10 + $0x1ff0] sm:$0xff]  ;;  %v1190_v61 = vld [vmem:[%s5664_s10 + $0x1bd8] sm:$0xff] }
 0x34e   : > { %4170 = vmatprep.subr.mxu1 %v1230_v4  ;;  %4100 = vmatpush1.msra.mxu0 %v1101_v6  ;;  %v1318_v62 = vld [vmem:[%s5664_s10 + $0x1fd8] sm:$0xff]  ;;  %v1189_v2 = vld [vmem:[%s5664_s10 + $0x1bd0] sm:$0xff] }
 0x34f   : > { %4171 = vmatpush1.msra.mxu1 %v1229_v7  ;;  %4101 = vmatprep.subr.mxu0 %v1098_v8  ;;  %v1317_v4 = vld [vmem:[%s5664_s10 + $0x1fd0] sm:$0xff]  ;;  %v1186_v6 = vld [vmem:[%s5664_s10 + $0x1bb8] sm:$0xff] }
 0x350   : > { %4172 = vmatprep.subr.mxu1 %v1226_v9  ;;  %4102 = vmatpush1.msra.mxu0 %v1097_v28  ;;  %v1314_v7 = vld [vmem:[%s5664_s10 + $0x1fb8] sm:$0xff]  ;;  %v1185_v8 = vld [vmem:[%s5664_s10 + $0x1bb0] sm:$0xff] }
 0x351   : > { %4173 = vmatpush1.msra.mxu1 %v1225_v13  ;;  %4103 = vmatprep.subr.mxu0 %v1094_v18  ;;  %v1313_v9 = vld [vmem:[%s5664_s10 + $0x1fb0] sm:$0xff]  ;;  %v1182_v28 = vld [vmem:[%s5664_s10 + $0x1b98] sm:$0xff] }
 0x352   : > { %4174 = vmatprep.subr.mxu1 %v1222_v14  ;;  %4104 = vmatpush1.msra.mxu0 %v1093_v31  ;;  %v1310_v13 = vld [vmem:[%s5664_s10 + $0x1f98] sm:$0xff]  ;;  %v1181_v18 = vld [vmem:[%s5664_s10 + $0x1b90] sm:$0xff] }
 0x353   : > { %4175 = vmatpush1.msra.mxu1 %v1221_v15  ;;  %4105 = vmatprep.subr.mxu0 %v1090_v16  ;;  %v1309_v14 = vld [vmem:[%s5664_s10 + $0x1f90] sm:$0xff]  ;;  %v1178_v31 = vld [vmem:[%s5664_s10 + $0x1b78] sm:$0xff] }
 0x354   : > { %4176 = vmatprep.subr.mxu1 %v1218_v23  ;;  %4106 = vmatpush1.msra.mxu0 %v1089_v20  ;;  %v1306_v15 = vld [vmem:[%s5664_s10 + $0x1f78] sm:$0xff]  ;;  %v1177_v16 = vld [vmem:[%s5664_s10 + $0x1b70] sm:$0xff] }
 0x355   : > { %4177 = vmatpush1.msra.mxu1 %v1217_v22  ;;  %4107 = vmatprep.subr.mxu0 %v1086_v24  ;;  %v1305_v23 = vld [vmem:[%s5664_s10 + $0x1f70] sm:$0xff]  ;;  %v1174_v20 = vld [vmem:[%s5664_s10 + $0x1b58] sm:$0xff] }
 0x356   : > { %4178 = vmatprep.subr.mxu1 %v1214_v26  ;;  %4108 = vmatpush1.msra.mxu0 %v1085_v10  ;;  %v1302_v22 = vld [vmem:[%s5664_s10 + $0x1f58] sm:$0xff]  ;;  %v1173_v24 = vld [vmem:[%s5664_s10 + $0x1b50] sm:$0xff] }
 0x357   : > { %4179 = vmatpush1.msra.mxu1 %v1213_v32  ;;  %4109 = vmatprep.subr.mxu0 %v1082_v56  ;;  %v1301_v26 = vld [vmem:[%s5664_s10 + $0x1f50] sm:$0xff]  ;;  %v1170_v10 = vld [vmem:[%s5664_s10 + $0x1b38] sm:$0xff] }
 0x358   : > { %4180 = vmatprep.subr.mxu1 %v1210_v12  ;;  %4110 = vmatpush1.msra.mxu0 %v1081_v45  ;;  %v1298_v32 = vld [vmem:[%s5664_s10 + $0x1f38] sm:$0xff]  ;;  %v1169_v56 = vld [vmem:[%s5664_s10 + $0x1b30] sm:$0xff] }
 0x359   : > { %4181 = vmatpush1.msra.mxu1 %v1209_v33  ;;  %4111 = vmatprep.subr.mxu0 %v1078_v59  ;;  %v1297_v12 = vld [vmem:[%s5664_s10 + $0x1f30] sm:$0xff]  ;;  %v1166_v45 = vld [vmem:[%s5664_s10 + $0x1b18] sm:$0xff] }
 0x35a   : > { %4182 = vmatprep.subr.mxu1 %v1206_v0  ;;  %4112 = vmatpush1.msra.mxu0 %v1077_v3  ;;  %v1294_v33 = vld [vmem:[%s5664_s10 + $0x1f18] sm:$0xff]  ;;  %v1165_v59 = vld [vmem:[%s5664_s10 + $0x1b10] sm:$0xff] }
 0x35b   : > { %4183 = vmatpush1.msra.mxu1 %v1205_v50  ;;  %4113 = vmatprep.subr.mxu0 %v1074_v35  ;;  %v1293_v0 = vld [vmem:[%s5664_s10 + $0x1f10] sm:$0xff]  ;;  %v1162_v3 = vld [vmem:[%s5664_s10 + $0x1af8] sm:$0xff] }
 0x35c   : > { %4184 = vmatprep.subr.mxu1 %v1202_v36  ;;  %4114 = vmatpush1.msra.mxu0 %v1073_v39  ;;  %v1290_v50 = vld [vmem:[%s5664_s10 + $0x1ef8] sm:$0xff]  ;;  %v1161_v35 = vld [vmem:[%s5664_s10 + $0x1af0] sm:$0xff] }
 0x35d   : > { %4185 = vmatpush1.msra.mxu1 %v1201_v40  ;;  %4115 = vmatprep.subr.mxu0 %v1070_v43  ;;  %v1289_v36 = vld [vmem:[%s5664_s10 + $0x1ef0] sm:$0xff]  ;;  %v1158_v39 = vld [vmem:[%s5664_s10 + $0x1ad8] sm:$0xff] }
 0x35e   : > { %4186 = vmatprep.subr.mxu1 %v1198_v46  ;;  %4116 = vmatpush1.msra.mxu0 %v1069_v47  ;;  %v1286_v40 = vld [vmem:[%s5664_s10 + $0x1ed8] sm:$0xff]  ;;  %v1157_v43 = vld [vmem:[%s5664_s10 + $0x1ad0] sm:$0xff] }
 0x35f   : > { %4187 = vmatpush1.msra.mxu1 %v1197_v48  ;;  %4117 = vmatprep.subr.mxu0 %v1194_v52  ;;  %v1285_v46 = vld [vmem:[%s5664_s10 + $0x1ed0] sm:$0xff]  ;;  %v1154_v47 = vld [vmem:[%s5664_s10 + $0x1ab8] sm:$0xff] }
 0x360   : > { %4188 = vmatprep.subr.mxu1 %v1322_v53  ;;  %4118 = vmatpush2.msra.mxu0 %v1193_v55  ;;  %v1282_v48 = vld [vmem:[%s5664_s10 + $0x1eb8] sm:$0xff]  ;;  %v1153_v52 = vld [vmem:[%s5664_s10 + $0x1ab0] sm:$0xff] }
 0x361   : > { %4189 = vmatpush2.msra.mxu1 %v1321_v57  ;;  %4119 = vmatprep.subr.mxu0 %v1190_v61  ;;  %v1281_v53 = vld [vmem:[%s5664_s10 + $0x1eb0] sm:$0xff]  ;;  %v1150_v55 = vld [vmem:[%s5664_s10 + $0x1a98] sm:$0xff] }
 0x362   : > { %4190 = vmatprep.subr.mxu1 %v1318_v62  ;;  %4120 = vmatpush2.msra.mxu0 %v1189_v2  ;;  %v1278_v57 = vld [vmem:[%s5664_s10 + $0x1e98] sm:$0xff]  ;;  %v1149_v61 = vld [vmem:[%s5664_s10 + $0x1a90] sm:$0xff] }
 0x363   : > { %4191 = vmatpush2.msra.mxu1 %v1317_v4  ;;  %4121 = vmatprep.subr.mxu0 %v1186_v6  ;;  %v1277_v62 = vld [vmem:[%s5664_s10 + $0x1e90] sm:$0xff]  ;;  %v1146_v2 = vld [vmem:[%s5664_s10 + $0x1a78] sm:$0xff] }
 0x364   : > { %4192 = vmatprep.subr.mxu1 %v1314_v7  ;;  %4122 = vmatpush2.msra.mxu0 %v1185_v8  ;;  %v1274_v4 = vld [vmem:[%s5664_s10 + $0x1e78] sm:$0xff]  ;;  %v1145_v6 = vld [vmem:[%s5664_s10 + $0x1a70] sm:$0xff] }
 0x365   : > { %4193 = vmatpush2.msra.mxu1 %v1313_v9  ;;  %4123 = vmatprep.subr.mxu0 %v1182_v28  ;;  %v1273_v7 = vld [vmem:[%s5664_s10 + $0x1e70] sm:$0xff]  ;;  %v1142_v8 = vld [vmem:[%s5664_s10 + $0x1a58] sm:$0xff] }
 0x366   : > { %4194 = vmatprep.subr.mxu1 %v1310_v13  ;;  %4124 = vmatpush2.msra.mxu0 %v1181_v18  ;;  %v1270_v9 = vld [vmem:[%s5664_s10 + $0x1e58] sm:$0xff]  ;;  %v1141_v28 = vld [vmem:[%s5664_s10 + $0x1a50] sm:$0xff] }
 0x367   : > { %4195 = vmatpush2.msra.mxu1 %v1309_v14  ;;  %4125 = vmatprep.subr.mxu0 %v1178_v31  ;;  %v1269_v13 = vld [vmem:[%s5664_s10 + $0x1e50] sm:$0xff]  ;;  %v1138_v18 = vld [vmem:[%s5664_s10 + $0x1a38] sm:$0xff] }
 0x368   : > { %4196 = vmatprep.subr.mxu1 %v1306_v15  ;;  %4126 = vmatpush2.msra.mxu0 %v1177_v16  ;;  %v1266_v14 = vld [vmem:[%s5664_s10 + $0x1e38] sm:$0xff]  ;;  %v1137_v31 = vld [vmem:[%s5664_s10 + $0x1a30] sm:$0xff] }
 0x369   : > { %4197 = vmatpush2.msra.mxu1 %v1305_v23  ;;  %4127 = vmatprep.subr.mxu0 %v1174_v20  ;;  %v1265_v15 = vld [vmem:[%s5664_s10 + $0x1e30] sm:$0xff]  ;;  %v1134_v16 = vld [vmem:[%s5664_s10 + $0x1a18] sm:$0xff] }
 0x36a   : > { %4198 = vmatprep.subr.mxu1 %v1302_v22  ;;  %4128 = vmatpush2.msra.mxu0 %v1173_v24  ;;  %v1262_v23 = vld [vmem:[%s5664_s10 + $0x1e18] sm:$0xff]  ;;  %v1133_v20 = vld [vmem:[%s5664_s10 + $0x1a10] sm:$0xff] }
 0x36b   : > { %4199 = vmatpush2.msra.mxu1 %v1301_v26  ;;  %4129 = vmatprep.subr.mxu0 %v1170_v10  ;;  %v1261_v22 = vld [vmem:[%s5664_s10 + $0x1e10] sm:$0xff]  ;;  %v1386_v24 = vld [vmem:[%s5664_s10 + $0x21f8] sm:$0xff] }
 0x36c   : > { %4200 = vmatprep.subr.mxu1 %v1298_v32  ;;  %4130 = vmatpush2.msra.mxu0 %v1169_v56  ;;  %v1514_v26 = vld [vmem:[%s5664_s10 + $0x25f8] sm:$0xff]  ;;  %v1385_v10 = vld [vmem:[%s5664_s10 + $0x21f0] sm:$0xff] }
 0x36d   : > { %4201 = vmatpush2.msra.mxu1 %v1297_v12  ;;  %4131 = vmatprep.subr.mxu0 %v1166_v45  ;;  %v1513_v32 = vld [vmem:[%s5664_s10 + $0x25f0] sm:$0xff]  ;;  %v1382_v56 = vld [vmem:[%s5664_s10 + $0x21d8] sm:$0xff] }
 0x36e   : > { %4202 = vmatprep.subr.mxu1 %v1294_v33  ;;  %4132 = vmatpush2.msra.mxu0 %v1165_v59  ;;  %v1510_v12 = vld [vmem:[%s5664_s10 + $0x25d8] sm:$0xff]  ;;  %v1509_v45 = vld [vmem:[%s5664_s10 + $0x25d0] sm:$0xff] }
 0x36f   : > { %4203 = vmatpush2.msra.mxu1 %v1293_v0  ;;  %4133 = vmatprep.subr.mxu0 %v1162_v3  ;;  %v1506_v33 = vld [vmem:[%s5664_s10 + $0x25b8] sm:$0xff]  ;;  %v1505_v59 = vld [vmem:[%s5664_s10 + $0x25b0] sm:$0xff] }
 0x370   : > { %4204 = vmatprep.subr.mxu1 %v1290_v50  ;;  %4134 = vmatpush2.msra.mxu0 %v1161_v35  ;;  %v1374_v0 = vld [vmem:[%s5664_s10 + $0x2198] sm:$0xff]  ;;  %v1373_v3 = vld [vmem:[%s5664_s10 + $0x2190] sm:$0xff] }
 0x371   : > { %4205 = vmatpush2.msra.mxu1 %v1289_v36  ;;  %4135 = vmatprep.subr.mxu0 %v1158_v39  ;;  %v1501_v50 = vld [vmem:[%s5664_s10 + $0x2590] sm:$0xff]  ;;  %v1370_v35 = vld [vmem:[%s5664_s10 + $0x2178] sm:$0xff] }
 0x372   : > { %4206 = vmatprep.subr.mxu1 %v1286_v40  ;;  %4136 = vmatpush2.msra.mxu0 %v1157_v43  ;;  %v1498_v36 = vld [vmem:[%s5664_s10 + $0x2578] sm:$0xff]  ;;  %v1369_v39 = vld [vmem:[%s5664_s10 + $0x2170] sm:$0xff] }
 0x373   : > { %4207 = vmatpush2.msra.mxu1 %v1285_v46  ;;  %4137 = vmatprep.subr.mxu0 %v1154_v47  ;;  %v1497_v40 = vld [vmem:[%s5664_s10 + $0x2570] sm:$0xff]  ;;  %v1366_v43 = vld [vmem:[%s5664_s10 + $0x2158] sm:$0xff] }
 0x374   : > { %4208 = vmatprep.subr.mxu1 %v1282_v48  ;;  %4138 = vmatpush2.msra.mxu0 %v1153_v52  ;;  %v1494_v46 = vld [vmem:[%s5664_s10 + $0x2558] sm:$0xff]  ;;  %v1365_v47 = vld [vmem:[%s5664_s10 + $0x2150] sm:$0xff] }
 0x375   : > { %4209 = vmatpush2.msra.mxu1 %v1281_v53  ;;  %4139 = vmatprep.subr.mxu0 %v1150_v55  ;;  %v1493_v48 = vld [vmem:[%s5664_s10 + $0x2550] sm:$0xff]  ;;  %v1362_v52 = vld [vmem:[%s5664_s10 + $0x2138] sm:$0xff] }
 0x376   : > { %4210 = vmatprep.subr.mxu1 %v1278_v57  ;;  %4140 = vmatpush2.msra.mxu0 %v1149_v61  ;;  %v1490_v53 = vld [vmem:[%s5664_s10 + $0x2538] sm:$0xff]  ;;  %v1361_v55 = vld [vmem:[%s5664_s10 + $0x2130] sm:$0xff] }
 0x377   : > { %4211 = vmatpush2.msra.mxu1 %v1277_v62  ;;  %4141 = vmatprep.subr.mxu0 %v1146_v2  ;;  %v1489_v57 = vld [vmem:[%s5664_s10 + $0x2530] sm:$0xff]  ;;  %v1358_v61 = vld [vmem:[%s5664_s10 + $0x2118] sm:$0xff] }
 0x378   : > { %4212 = vmatprep.subr.mxu1 %v1274_v4  ;;  %4142 = vmatpush2.msra.mxu0 %v1145_v6  ;;  %v1486_v62 = vld [vmem:[%s5664_s10 + $0x2518] sm:$0xff]  ;;  %v1357_v2 = vld [vmem:[%s5664_s10 + $0x2110] sm:$0xff] }
 0x379   : > { %4213 = vmatpush2.msra.mxu1 %v1273_v7  ;;  %4143 = vmatprep.subr.mxu0 %v1142_v8  ;;  %v1485_v4 = vld [vmem:[%s5664_s10 + $0x2510] sm:$0xff]  ;;  %v1354_v6 = vld [vmem:[%s5664_s10 + $0x20f8] sm:$0xff] }
 0x37a   : > { %4214 = vmatprep.subr.mxu1 %v1270_v9  ;;  %4144 = vmatpush2.msra.mxu0 %v1141_v28  ;;  %v1482_v7 = vld [vmem:[%s5664_s10 + $0x24f8] sm:$0xff]  ;;  %v1353_v8 = vld [vmem:[%s5664_s10 + $0x20f0] sm:$0xff] }
 0x37b   : > { %4215 = vmatpush2.msra.mxu1 %v1269_v13  ;;  %4145 = vmatprep.subr.mxu0 %v1138_v18  ;;  %v1481_v9 = vld [vmem:[%s5664_s10 + $0x24f0] sm:$0xff]  ;;  %v1350_v28 = vld [vmem:[%s5664_s10 + $0x20d8] sm:$0xff] }
 0x37c   : > { %4216 = vmatprep.subr.mxu1 %v1266_v14  ;;  %4146 = vmatpush2.msra.mxu0 %v1137_v31  ;;  %v1478_v13 = vld [vmem:[%s5664_s10 + $0x24d8] sm:$0xff]  ;;  %v1349_v18 = vld [vmem:[%s5664_s10 + $0x20d0] sm:$0xff] }
 0x37d   : > { %4217 = vmatpush2.msra.mxu1 %v1265_v15  ;;  %4147 = vmatprep.subr.mxu0 %v1134_v16  ;;  %v1477_v14 = vld [vmem:[%s5664_s10 + $0x24d0] sm:$0xff]  ;;  %v1346_v31 = vld [vmem:[%s5664_s10 + $0x20b8] sm:$0xff] }
 0x37e   : > { %4218 = vmatprep.subr.mxu1 %v1262_v23  ;;  %4148 = vmatpush2.msra.mxu0 %v1133_v20  ;;  %v1474_v15 = vld [vmem:[%s5664_s10 + $0x24b8] sm:$0xff]  ;;  %v1345_v16 = vld [vmem:[%s5664_s10 + $0x20b0] sm:$0xff] }
 0x37f   : > { %4149 = vmatprep.mubr.f32.mxu0 %v6257_v34  ;;  %4219 = vmatpush2.msra.mxu1 %v1261_v22  ;;  %v1381_v34 = vld [vmem:[%s5664_s10 + $0x21d0] sm:$0xff]  ;;  %v1342_v20 = vld [vmem:[%s5664_s10 + $0x2098] sm:$0xff] }
 0x380   : > { %4150 = vmatmul.mubr.f32.vlgmr.msra.gmra.mxu0 %v6242_v21  ;;  %4220 = vmatprep.mubr.f32.mxu1 %v6263_v37  ;;  %v1378_v21 = vld [vmem:[%s5664_s10 + $0x21b8] sm:$0xff]  ;;  %v1377_v37 = vld [vmem:[%s5664_s10 + $0x21b0] sm:$0xff] }
 0x381   : > { %4227 = vmatprep.subr.mxu0 %v1386_v24  ;;  %4298 = vmatprep.subr.mxu1 %v1514_v26  ;;  %v1473_v23 = vld [vmem:[%s5664_s10 + $0x24b0] sm:$0xff]  ;;  %v1470_v22 = vld [vmem:[%s5664_s10 + $0x2498] sm:$0xff] }
 0x382   : > { %4221 = vmatmul.mubr.f32.vlgmr.msra.gmra.mxu1 %v6249_v27  ;;  %4228 = vmatpush1.msra.mxu0 %v1385_v10  ;;  %v1502_v27 = vld [vmem:[%s5664_s10 + $0x2598] sm:$0xff]  ;;  %v1341_v24 = vld [vmem:[%s5664_s10 + $0x2090] sm:$0xff] }
 0x383   : > { %4299 = vmatpush1.msra.mxu1 %v1513_v32  ;;  %4229 = vmatprep.subr.mxu0 %v1382_v56  ;;  %v1469_v26 = vld [vmem:[%s5664_s10 + $0x2490] sm:$0xff]  ;;  %v1338_v10 = vld [vmem:[%s5664_s10 + $0x2078] sm:$0xff] }
 0x384   : > { %4300 = vmatprep.subr.mxu1 %v1510_v12  ;;  %4230 = vmatpush1.msra.mxu0 %v1381_v34  ;;  %v1466_v32 = vld [vmem:[%s5664_s10 + $0x2478] sm:$0xff]  ;;  %v1337_v56 = vld [vmem:[%s5664_s10 + $0x2070] sm:$0xff] }
 0x385   : > { %4301 = vmatpush1.msra.mxu1 %v1509_v45  ;;  %4231 = vmatprep.subr.mxu0 %v1378_v21  ;;  %v1465_v12 = vld [vmem:[%s5664_s10 + $0x2470] sm:$0xff]  ;;  %v1334_v34 = vld [vmem:[%s5664_s10 + $0x2058] sm:$0xff] }
 0x386   : > { %4302 = vmatprep.subr.mxu1 %v1506_v33  ;;  %4232 = vmatpush1.msra.mxu0 %v1377_v37  ;;  %v1462_v45 = vld [vmem:[%s5664_s10 + $0x2458] sm:$0xff]  ;;  %v1333_v21 = vld [vmem:[%s5664_s10 + $0x2050] sm:$0xff] }
 0x387   : > { %4303 = vmatpush1.msra.mxu1 %v1505_v59  ;;  %4233 = vmatprep.subr.mxu0 %v1374_v0  ;;  %v1461_v33 = vld [vmem:[%s5664_s10 + $0x2450] sm:$0xff]  ;;  %v1330_v37 = vld [vmem:[%s5664_s10 + $0x2038] sm:$0xff] }
 0x388   : > { %4304 = vmatprep.subr.mxu1 %v1502_v27  ;;  %4234 = vmatpush1.msra.mxu0 %v1373_v3  ;;  %v1458_v59 = vld [vmem:[%s5664_s10 + $0x2438] sm:$0xff]  ;;  %v1329_v0 = vld [vmem:[%s5664_s10 + $0x2030] sm:$0xff] }
 0x389   : > { %4305 = vmatpush1.msra.mxu1 %v1501_v50  ;;  %4235 = vmatprep.subr.mxu0 %v1370_v35  ;;  %v1457_v27 = vld [vmem:[%s5664_s10 + $0x2430] sm:$0xff]  ;;  %v1326_v3 = vld [vmem:[%s5664_s10 + $0x2018] sm:$0xff] }
 0x38a   : > { %4306 = vmatprep.subr.mxu1 %v1498_v36  ;;  %4236 = vmatpush1.msra.mxu0 %v1369_v39  ;;  %v1454_v50 = vld [vmem:[%s5664_s10 + $0x2418] sm:$0xff]  ;;  %v1325_v35 = vld [vmem:[%s5664_s10 + $0x2010] sm:$0xff] }
 0x38b   : > { %4307 = vmatpush1.msra.mxu1 %v1497_v40  ;;  %4237 = vmatprep.subr.mxu0 %v1366_v43  ;;  %v1453_v36 = vld [vmem:[%s5664_s10 + $0x2410] sm:$0xff]  ;;  %v1450_v39 = vld [vmem:[%s5664_s10 + $0x23f8] sm:$0xff] }
 0x38c   : > { %4308 = vmatprep.subr.mxu1 %v1494_v46  ;;  %4238 = vmatpush1.msra.mxu0 %v1365_v47  ;;  %v1578_v40 = vld [vmem:[%s5664_s10 + $0x27f8] sm:$0xff]  ;;  %v1449_v43 = vld [vmem:[%s5664_s10 + $0x23f0] sm:$0xff] }
 0x38d   : > { %4309 = vmatpush1.msra.mxu1 %v1493_v48  ;;  %4239 = vmatprep.subr.mxu0 %v1362_v52  ;;  %v1577_v46 = vld [vmem:[%s5664_s10 + $0x27f0] sm:$0xff]  ;;  %v1446_v47 = vld [vmem:[%s5664_s10 + $0x23d8] sm:$0xff] }
 0x38e   : > { %4310 = vmatprep.subr.mxu1 %v1490_v53  ;;  %4240 = vmatpush1.msra.mxu0 %v1361_v55  ;;  %v1574_v48 = vld [vmem:[%s5664_s10 + $0x27d8] sm:$0xff]  ;;  %v1445_v52 = vld [vmem:[%s5664_s10 + $0x23d0] sm:$0xff] }
 0x38f   : > { %4311 = vmatpush1.msra.mxu1 %v1489_v57  ;;  %4241 = vmatprep.subr.mxu0 %v1358_v61  ;;  %v1573_v53 = vld [vmem:[%s5664_s10 + $0x27d0] sm:$0xff]  ;;  %v1442_v55 = vld [vmem:[%s5664_s10 + $0x23b8] sm:$0xff] }
 0x390   : > { %4312 = vmatprep.subr.mxu1 %v1486_v62  ;;  %4242 = vmatpush1.msra.mxu0 %v1357_v2  ;;  %v1570_v57 = vld [vmem:[%s5664_s10 + $0x27b8] sm:$0xff]  ;;  %v1441_v61 = vld [vmem:[%s5664_s10 + $0x23b0] sm:$0xff] }
 0x391   : > { %4313 = vmatpush1.msra.mxu1 %v1485_v4  ;;  %4243 = vmatprep.subr.mxu0 %v1354_v6  ;;  %v1569_v62 = vld [vmem:[%s5664_s10 + $0x27b0] sm:$0xff]  ;;  %v1438_v2 = vld [vmem:[%s5664_s10 + $0x2398] sm:$0xff] }
 0x392   : > { %4314 = vmatprep.subr.mxu1 %v1482_v7  ;;  %4244 = vmatpush1.msra.mxu0 %v1353_v8  ;;  %v1566_v4 = vld [vmem:[%s5664_s10 + $0x2798] sm:$0xff]  ;;  %v1437_v6 = vld [vmem:[%s5664_s10 + $0x2390] sm:$0xff] }
 0x393   : > { %4315 = vmatpush1.msra.mxu1 %v1481_v9  ;;  %4245 = vmatprep.subr.mxu0 %v1350_v28  ;;  %v1565_v7 = vld [vmem:[%s5664_s10 + $0x2790] sm:$0xff]  ;;  %v1434_v8 = vld [vmem:[%s5664_s10 + $0x2378] sm:$0xff] }
 0x394   : > { %4316 = vmatprep.subr.mxu1 %v1478_v13  ;;  %4246 = vmatpush1.msra.mxu0 %v1349_v18  ;;  %v1562_v9 = vld [vmem:[%s5664_s10 + $0x2778] sm:$0xff]  ;;  %v1433_v28 = vld [vmem:[%s5664_s10 + $0x2370] sm:$0xff] }
 0x395   : > { %4317 = vmatpush1.msra.mxu1 %v1477_v14  ;;  %4247 = vmatprep.subr.mxu0 %v1346_v31  ;;  %v1561_v13 = vld [vmem:[%s5664_s10 + $0x2770] sm:$0xff]  ;;  %v1430_v18 = vld [vmem:[%s5664_s10 + $0x2358] sm:$0xff] }
 0x396   : > { %4318 = vmatprep.subr.mxu1 %v1474_v15  ;;  %4248 = vmatpush1.msra.mxu0 %v1345_v16  ;;  %v1558_v14 = vld [vmem:[%s5664_s10 + $0x2758] sm:$0xff]  ;;  %v1429_v31 = vld [vmem:[%s5664_s10 + $0x2350] sm:$0xff] }
 0x397   : > { %4319 = vmatpush1.msra.mxu1 %v1473_v23  ;;  %4249 = vmatprep.subr.mxu0 %v1342_v20  ;;  %v1557_v15 = vld [vmem:[%s5664_s10 + $0x2750] sm:$0xff]  ;;  %v1426_v16 = vld [vmem:[%s5664_s10 + $0x2338] sm:$0xff] }
 0x398   : > { %4320 = vmatprep.subr.mxu1 %v1470_v22  ;;  %4250 = vmatpush1.msra.mxu0 %v1341_v24  ;;  %v1554_v23 = vld [vmem:[%s5664_s10 + $0x2738] sm:$0xff]  ;;  %v1425_v20 = vld [vmem:[%s5664_s10 + $0x2330] sm:$0xff] }
 0x399   : > { %4321 = vmatpush1.msra.mxu1 %v1469_v26  ;;  %4251 = vmatprep.subr.mxu0 %v1338_v10  ;;  %v1553_v22 = vld [vmem:[%s5664_s10 + $0x2730] sm:$0xff]  ;;  %v1422_v24 = vld [vmem:[%s5664_s10 + $0x2318] sm:$0xff] }
 0x39a   : > { %4322 = vmatprep.subr.mxu1 %v1466_v32  ;;  %4252 = vmatpush1.msra.mxu0 %v1337_v56  ;;  %v1550_v26 = vld [vmem:[%s5664_s10 + $0x2718] sm:$0xff]  ;;  %v1421_v10 = vld [vmem:[%s5664_s10 + $0x2310] sm:$0xff] }
 0x39b   : > { %4323 = vmatpush1.msra.mxu1 %v1465_v12  ;;  %4253 = vmatprep.subr.mxu0 %v1334_v34  ;;  %v1549_v32 = vld [vmem:[%s5664_s10 + $0x2710] sm:$0xff]  ;;  %v1418_v56 = vld [vmem:[%s5664_s10 + $0x22f8] sm:$0xff] }
 0x39c   : > { %4324 = vmatprep.subr.mxu1 %v1462_v45  ;;  %4254 = vmatpush1.msra.mxu0 %v1333_v21  ;;  %v1546_v12 = vld [vmem:[%s5664_s10 + $0x26f8] sm:$0xff]  ;;  %v1417_v34 = vld [vmem:[%s5664_s10 + $0x22f0] sm:$0xff] }
 0x39d   : > { %4325 = vmatpush1.msra.mxu1 %v1461_v33  ;;  %4255 = vmatprep.subr.mxu0 %v1330_v37  ;;  %v1545_v45 = vld [vmem:[%s5664_s10 + $0x26f0] sm:$0xff]  ;;  %v1414_v21 = vld [vmem:[%s5664_s10 + $0x22d8] sm:$0xff] }
 0x39e   : > { %4326 = vmatprep.subr.mxu1 %v1458_v59  ;;  %4256 = vmatpush1.msra.mxu0 %v1329_v0  ;;  %v1542_v33 = vld [vmem:[%s5664_s10 + $0x26d8] sm:$0xff]  ;;  %v1413_v37 = vld [vmem:[%s5664_s10 + $0x22d0] sm:$0xff] }
 0x39f   : > { %4327 = vmatpush1.msra.mxu1 %v1457_v27  ;;  %4257 = vmatprep.subr.mxu0 %v1326_v3  ;;  %v1541_v59 = vld [vmem:[%s5664_s10 + $0x26d0] sm:$0xff]  ;;  %v1410_v0 = vld [vmem:[%s5664_s10 + $0x22b8] sm:$0xff] }
 0x3a0   : > { %4328 = vmatprep.subr.mxu1 %v1454_v50  ;;  %4258 = vmatpush1.msra.mxu0 %v1325_v35  ;;  %v1538_v27 = vld [vmem:[%s5664_s10 + $0x26b8] sm:$0xff]  ;;  %v1409_v3 = vld [vmem:[%s5664_s10 + $0x22b0] sm:$0xff] }
 0x3a1   : > { %4329 = vmatpush1.msra.mxu1 %v1453_v36  ;;  %4259 = vmatprep.subr.mxu0 %v1450_v39  ;;  %v1537_v50 = vld [vmem:[%s5664_s10 + $0x26b0] sm:$0xff]  ;;  %v1406_v35 = vld [vmem:[%s5664_s10 + $0x2298] sm:$0xff] }
 0x3a2   : > { %4330 = vmatprep.subr.mxu1 %v1578_v40  ;;  %4260 = vmatpush2.msra.mxu0 %v1449_v43  ;;  %v1534_v36 = vld [vmem:[%s5664_s10 + $0x2698] sm:$0xff]  ;;  %v1405_v39 = vld [vmem:[%s5664_s10 + $0x2290] sm:$0xff] }
 0x3a3   : > { %4331 = vmatpush2.msra.mxu1 %v1577_v46  ;;  %4261 = vmatprep.subr.mxu0 %v1446_v47  ;;  %v1533_v40 = vld [vmem:[%s5664_s10 + $0x2690] sm:$0xff]  ;;  %v1402_v43 = vld [vmem:[%s5664_s10 + $0x2278] sm:$0xff] }
 0x3a4   : > { %4332 = vmatprep.subr.mxu1 %v1574_v48  ;;  %4262 = vmatpush2.msra.mxu0 %v1445_v52  ;;  %v1530_v46 = vld [vmem:[%s5664_s10 + $0x2678] sm:$0xff]  ;;  %v1401_v47 = vld [vmem:[%s5664_s10 + $0x2270] sm:$0xff] }
 0x3a5   : > { %4333 = vmatpush2.msra.mxu1 %v1573_v53  ;;  %4263 = vmatprep.subr.mxu0 %v1442_v55  ;;  %v1529_v48 = vld [vmem:[%s5664_s10 + $0x2670] sm:$0xff]  ;;  %v1398_v52 = vld [vmem:[%s5664_s10 + $0x2258] sm:$0xff] }
 0x3a6   : > { %4334 = vmatprep.subr.mxu1 %v1570_v57  ;;  %4264 = vmatpush2.msra.mxu0 %v1441_v61  ;;  %v1526_v53 = vld [vmem:[%s5664_s10 + $0x2658] sm:$0xff]  ;;  %v1397_v55 = vld [vmem:[%s5664_s10 + $0x2250] sm:$0xff] }
 0x3a7   : > { %4335 = vmatpush2.msra.mxu1 %v1569_v62  ;;  %4265 = vmatprep.subr.mxu0 %v1438_v2  ;;  %v1525_v57 = vld [vmem:[%s5664_s10 + $0x2650] sm:$0xff]  ;;  %v1394_v61 = vld [vmem:[%s5664_s10 + $0x2238] sm:$0xff] }
 0x3a8   : > { %4336 = vmatprep.subr.mxu1 %v1566_v4  ;;  %4266 = vmatpush2.msra.mxu0 %v1437_v6  ;;  %v1522_v62 = vld [vmem:[%s5664_s10 + $0x2638] sm:$0xff]  ;;  %v1393_v2 = vld [vmem:[%s5664_s10 + $0x2230] sm:$0xff] }
 0x3a9   : > { %4337 = vmatpush2.msra.mxu1 %v1565_v7  ;;  %4267 = vmatprep.subr.mxu0 %v1434_v8  ;;  %v1521_v4 = vld [vmem:[%s5664_s10 + $0x2630] sm:$0xff]  ;;  %v1390_v6 = vld [vmem:[%s5664_s10 + $0x2218] sm:$0xff] }
 0x3aa   : > { %4338 = vmatprep.subr.mxu1 %v1562_v9  ;;  %4268 = vmatpush2.msra.mxu0 %v1433_v28  ;;  %v1518_v7 = vld [vmem:[%s5664_s10 + $0x2618] sm:$0xff]  ;;  %v1389_v8 = vld [vmem:[%s5664_s10 + $0x2210] sm:$0xff] }
 0x3ab   : > { %4339 = vmatpush2.msra.mxu1 %v1561_v13  ;;  %4269 = vmatprep.subr.mxu0 %v1430_v18  ;;  %v1517_v9 = vld [vmem:[%s5664_s10 + $0x2610] sm:$0xff]  ;;  %v1642_v28 = vld [vmem:[%s5664_s10 + $0x29f8] sm:$0xff] }
 0x3ac   : > { %4340 = vmatprep.subr.mxu1 %v1558_v14  ;;  %4270 = vmatpush2.msra.mxu0 %v1429_v31  ;;  %v1770_v13 = vld [vmem:[%s5664_s10 + $0x2df8] sm:$0xff]  ;;  %v1641_v18 = vld [vmem:[%s5664_s10 + $0x29f0] sm:$0xff] }
 0x3ad   : > { %4341 = vmatpush2.msra.mxu1 %v1557_v15  ;;  %4271 = vmatprep.subr.mxu0 %v1426_v16  ;;  %v1769_v14 = vld [vmem:[%s5664_s10 + $0x2df0] sm:$0xff]  ;;  %v1638_v31 = vld [vmem:[%s5664_s10 + $0x29d8] sm:$0xff] }
 0x3ae   : > { %4342 = vmatprep.subr.mxu1 %v1554_v23  ;;  %4272 = vmatpush2.msra.mxu0 %v1425_v20  ;;  %v1766_v15 = vld [vmem:[%s5664_s10 + $0x2dd8] sm:$0xff]  ;;  %v1765_v16 = vld [vmem:[%s5664_s10 + $0x2dd0] sm:$0xff] }
 0x3af   : > { %4343 = vmatpush2.msra.mxu1 %v1553_v22  ;;  %4273 = vmatprep.subr.mxu0 %v1422_v24  ;;  %v1762_v23 = vld [vmem:[%s5664_s10 + $0x2db8] sm:$0xff]  ;;  %v1761_v20 = vld [vmem:[%s5664_s10 + $0x2db0] sm:$0xff] }
 0x3b0   : > { %4344 = vmatprep.subr.mxu1 %v1550_v26  ;;  %4274 = vmatpush2.msra.mxu0 %v1421_v10  ;;  %v1630_v22 = vld [vmem:[%s5664_s10 + $0x2998] sm:$0xff]  ;;  %v1629_v24 = vld [vmem:[%s5664_s10 + $0x2990] sm:$0xff] }
 0x3b1   : > { %4345 = vmatpush2.msra.mxu1 %v1549_v32  ;;  %4275 = vmatprep.subr.mxu0 %v1418_v56  ;;  %v1757_v26 = vld [vmem:[%s5664_s10 + $0x2d90] sm:$0xff]  ;;  %v1626_v10 = vld [vmem:[%s5664_s10 + $0x2978] sm:$0xff] }
 0x3b2   : > { %4346 = vmatprep.subr.mxu1 %v1546_v12  ;;  %4276 = vmatpush2.msra.mxu0 %v1417_v34  ;;  %v1754_v32 = vld [vmem:[%s5664_s10 + $0x2d78] sm:$0xff]  ;;  %v1625_v56 = vld [vmem:[%s5664_s10 + $0x2970] sm:$0xff] }
 0x3b3   : > { %4347 = vmatpush2.msra.mxu1 %v1545_v45  ;;  %4277 = vmatprep.subr.mxu0 %v1414_v21  ;;  %v1753_v12 = vld [vmem:[%s5664_s10 + $0x2d70] sm:$0xff]  ;;  %v1622_v34 = vld [vmem:[%s5664_s10 + $0x2958] sm:$0xff] }
 0x3b4   : > { %4348 = vmatprep.subr.mxu1 %v1542_v33  ;;  %4278 = vmatpush2.msra.mxu0 %v1413_v37  ;;  %v1750_v45 = vld [vmem:[%s5664_s10 + $0x2d58] sm:$0xff]  ;;  %v1621_v21 = vld [vmem:[%s5664_s10 + $0x2950] sm:$0xff] }
 0x3b5   : > { %4349 = vmatpush2.msra.mxu1 %v1541_v59  ;;  %4279 = vmatprep.subr.mxu0 %v1410_v0  ;;  %v1749_v33 = vld [vmem:[%s5664_s10 + $0x2d50] sm:$0xff]  ;;  %v1618_v37 = vld [vmem:[%s5664_s10 + $0x2938] sm:$0xff] }
 0x3b6   : > { %4350 = vmatprep.subr.mxu1 %v1538_v27  ;;  %4280 = vmatpush2.msra.mxu0 %v1409_v3  ;;  %v1746_v59 = vld [vmem:[%s5664_s10 + $0x2d38] sm:$0xff]  ;;  %v1617_v0 = vld [vmem:[%s5664_s10 + $0x2930] sm:$0xff] }
 0x3b7   : > { %4351 = vmatpush2.msra.mxu1 %v1537_v50  ;;  %4281 = vmatprep.subr.mxu0 %v1406_v35  ;;  %v1745_v27 = vld [vmem:[%s5664_s10 + $0x2d30] sm:$0xff]  ;;  %v1614_v3 = vld [vmem:[%s5664_s10 + $0x2918] sm:$0xff] }
 0x3b8   : > { %4352 = vmatprep.subr.mxu1 %v1534_v36  ;;  %4282 = vmatpush2.msra.mxu0 %v1405_v39  ;;  %v1742_v50 = vld [vmem:[%s5664_s10 + $0x2d18] sm:$0xff]  ;;  %v1613_v35 = vld [vmem:[%s5664_s10 + $0x2910] sm:$0xff] }
 0x3b9   : > { %4353 = vmatpush2.msra.mxu1 %v1533_v40  ;;  %4283 = vmatprep.subr.mxu0 %v1402_v43  ;;  %v1741_v36 = vld [vmem:[%s5664_s10 + $0x2d10] sm:$0xff]  ;;  %v1610_v39 = vld [vmem:[%s5664_s10 + $0x28f8] sm:$0xff] }
 0x3ba   : > { %4354 = vmatprep.subr.mxu1 %v1530_v46  ;;  %4284 = vmatpush2.msra.mxu0 %v1401_v47  ;;  %v1738_v40 = vld [vmem:[%s5664_s10 + $0x2cf8] sm:$0xff]  ;;  %v1609_v43 = vld [vmem:[%s5664_s10 + $0x28f0] sm:$0xff] }
 0x3bb   : > { %4355 = vmatpush2.msra.mxu1 %v1529_v48  ;;  %4285 = vmatprep.subr.mxu0 %v1398_v52  ;;  %v1737_v46 = vld [vmem:[%s5664_s10 + $0x2cf0] sm:$0xff]  ;;  %v1606_v47 = vld [vmem:[%s5664_s10 + $0x28d8] sm:$0xff] }
 0x3bc   : > { %4356 = vmatprep.subr.mxu1 %v1526_v53  ;;  %4286 = vmatpush2.msra.mxu0 %v1397_v55  ;;  %v1734_v48 = vld [vmem:[%s5664_s10 + $0x2cd8] sm:$0xff]  ;;  %v1605_v52 = vld [vmem:[%s5664_s10 + $0x28d0] sm:$0xff] }
 0x3bd   : > { %4357 = vmatpush2.msra.mxu1 %v1525_v57  ;;  %4287 = vmatprep.subr.mxu0 %v1394_v61  ;;  %v1733_v53 = vld [vmem:[%s5664_s10 + $0x2cd0] sm:$0xff]  ;;  %v1602_v55 = vld [vmem:[%s5664_s10 + $0x28b8] sm:$0xff] }
 0x3be   : > { %4358 = vmatprep.subr.mxu1 %v1522_v62  ;;  %4288 = vmatpush2.msra.mxu0 %v1393_v2  ;;  %v1730_v57 = vld [vmem:[%s5664_s10 + $0x2cb8] sm:$0xff]  ;;  %v1601_v61 = vld [vmem:[%s5664_s10 + $0x28b0] sm:$0xff] }
 0x3bf   : > { %4359 = vmatpush2.msra.mxu1 %v1521_v4  ;;  %4289 = vmatprep.subr.mxu0 %v1390_v6  ;;  %v1729_v62 = vld [vmem:[%s5664_s10 + $0x2cb0] sm:$0xff]  ;;  %v1598_v2 = vld [vmem:[%s5664_s10 + $0x2898] sm:$0xff] }
 0x3c0   : > { %4360 = vmatprep.subr.mxu1 %v1518_v7  ;;  %4290 = vmatpush2.msra.mxu0 %v1389_v8  ;;  %v1726_v4 = vld [vmem:[%s5664_s10 + $0x2c98] sm:$0xff]  ;;  %v1597_v6 = vld [vmem:[%s5664_s10 + $0x2890] sm:$0xff] }
 0x3c1   : > { %4291 = vmatprep.mubr.f32.mxu0 %v6404_v25  ;;  %4361 = vmatpush2.msra.mxu1 %v1517_v9  ;;  %v1637_v25 = vld [vmem:[%s5664_s10 + $0x29d0] sm:$0xff]  ;;  %v1594_v8 = vld [vmem:[%s5664_s10 + $0x2878] sm:$0xff] }
 0x3c2   : > { %4292 = vmatmul.mubr.f32.vlgmr.msra.gmra.mxu0 %v6389_v11  ;;  %4362 = vmatprep.mubr.f32.mxu1 %v6410_v30  ;;  %v1634_v11 = vld [vmem:[%s5664_s10 + $0x29b8] sm:$0xff]  ;;  %v1633_v30 = vld [vmem:[%s5664_s10 + $0x29b0] sm:$0xff] }
 0x3c3   : > { %4369 = vmatprep.subr.mxu0 %v1642_v28  ;;  %4440 = vmatprep.subr.mxu1 %v1770_v13  ;;  %v1725_v7 = vld [vmem:[%s5664_s10 + $0x2c90] sm:$0xff]  ;;  %v1722_v9 = vld [vmem:[%s5664_s10 + $0x2c78] sm:$0xff] }
 0x3c4   : > { %4363 = vmatmul.mubr.f32.vlgmr.msra.gmra.mxu1 %v6396_v17  ;;  %4370 = vmatpush1.msra.mxu0 %v1641_v18  ;;  %v1758_v17 = vld [vmem:[%s5664_s10 + $0x2d98] sm:$0xff]  ;;  %v1593_v28 = vld [vmem:[%s5664_s10 + $0x2870] sm:$0xff] }
 0x3c5   : > { %4441 = vmatpush1.msra.mxu1 %v1769_v14  ;;  %4371 = vmatprep.subr.mxu0 %v1638_v31  ;;  %v1721_v13 = vld [vmem:[%s5664_s10 + $0x2c70] sm:$0xff]  ;;  %v1590_v18 = vld [vmem:[%s5664_s10 + $0x2858] sm:$0xff] }
 0x3c6   : > { %4442 = vmatprep.subr.mxu1 %v1766_v15  ;;  %4372 = vmatpush1.msra.mxu0 %v1637_v25  ;;  %v1718_v14 = vld [vmem:[%s5664_s10 + $0x2c58] sm:$0xff]  ;;  %v1589_v31 = vld [vmem:[%s5664_s10 + $0x2850] sm:$0xff] }
 0x3c7   : > { %4443 = vmatpush1.msra.mxu1 %v1765_v16  ;;  %4373 = vmatprep.subr.mxu0 %v1634_v11  ;;  %v1717_v15 = vld [vmem:[%s5664_s10 + $0x2c50] sm:$0xff]  ;;  %v1586_v25 = vld [vmem:[%s5664_s10 + $0x2838] sm:$0xff] }
 0x3c8   : > { %4444 = vmatprep.subr.mxu1 %v1762_v23  ;;  %4374 = vmatpush1.msra.mxu0 %v1633_v30  ;;  %v1714_v16 = vld [vmem:[%s5664_s10 + $0x2c38] sm:$0xff]  ;;  %v1585_v11 = vld [vmem:[%s5664_s10 + $0x2830] sm:$0xff] }
 0x3c9   : > { %4445 = vmatpush1.msra.mxu1 %v1761_v20  ;;  %4375 = vmatprep.subr.mxu0 %v1630_v22  ;;  %v1713_v23 = vld [vmem:[%s5664_s10 + $0x2c30] sm:$0xff]  ;;  %v1582_v30 = vld [vmem:[%s5664_s10 + $0x2818] sm:$0xff] }
 0x3ca   : > { %4446 = vmatprep.subr.mxu1 %v1758_v17  ;;  %4376 = vmatpush1.msra.mxu0 %v1629_v24  ;;  %v1710_v20 = vld [vmem:[%s5664_s10 + $0x2c18] sm:$0xff]  ;;  %v1581_v22 = vld [vmem:[%s5664_s10 + $0x2810] sm:$0xff] }
 0x3cb   : > { %4447 = vmatpush1.msra.mxu1 %v1757_v26  ;;  %4377 = vmatprep.subr.mxu0 %v1626_v10  ;;  %v1709_v17 = vld [vmem:[%s5664_s10 + $0x2c10] sm:$0xff]  ;;  %v1706_v24 = vld [vmem:[%s5664_s10 + $0x2bf8] sm:$0xff] }
 0x3cc   : > { %4448 = vmatprep.subr.mxu1 %v1754_v32  ;;  %4378 = vmatpush1.msra.mxu0 %v1625_v56  ;;  %v1834_v26 = vld [vmem:[%s5664_s10 + $0x2ff8] sm:$0xff]  ;;  %v1705_v10 = vld [vmem:[%s5664_s10 + $0x2bf0] sm:$0xff] }
 0x3cd   : > { %4449 = vmatpush1.msra.mxu1 %v1753_v12  ;;  %4379 = vmatprep.subr.mxu0 %v1622_v34  ;;  %v1833_v32 = vld [vmem:[%s5664_s10 + $0x2ff0] sm:$0xff]  ;;  %v1702_v56 = vld [vmem:[%s5664_s10 + $0x2bd8] sm:$0xff] }
 0x3ce   : > { %4450 = vmatprep.subr.mxu1 %v1750_v45  ;;  %4380 = vmatpush1.msra.mxu0 %v1621_v21  ;;  %v1830_v12 = vld [vmem:[%s5664_s10 + $0x2fd8] sm:$0xff]  ;;  %v1701_v34 = vld [vmem:[%s5664_s10 + $0x2bd0] sm:$0xff] }
 0x3cf   : > { %4451 = vmatpush1.msra.mxu1 %v1749_v33  ;;  %4381 = vmatprep.subr.mxu0 %v1618_v37  ;;  %v1829_v45 = vld [vmem:[%s5664_s10 + $0x2fd0] sm:$0xff]  ;;  %v1698_v21 = vld [vmem:[%s5664_s10 + $0x2bb8] sm:$0xff] }
 0x3d0   : > { %4452 = vmatprep.subr.mxu1 %v1746_v59  ;;  %4382 = vmatpush1.msra.mxu0 %v1617_v0  ;;  %v1826_v33 = vld [vmem:[%s5664_s10 + $0x2fb8] sm:$0xff]  ;;  %v1697_v37 = vld [vmem:[%s5664_s10 + $0x2bb0] sm:$0xff] }
 0x3d1   : > { %4453 = vmatpush1.msra.mxu1 %v1745_v27  ;;  %4383 = vmatprep.subr.mxu0 %v1614_v3  ;;  %v1825_v59 = vld [vmem:[%s5664_s10 + $0x2fb0] sm:$0xff]  ;;  %v1694_v0 = vld [vmem:[%s5664_s10 + $0x2b98] sm:$0xff] }
 0x3d2   : > { %4454 = vmatprep.subr.mxu1 %v1742_v50  ;;  %4384 = vmatpush1.msra.mxu0 %v1613_v35  ;;  %v1822_v27 = vld [vmem:[%s5664_s10 + $0x2f98] sm:$0xff]  ;;  %v1693_v3 = vld [vmem:[%s5664_s10 + $0x2b90] sm:$0xff] }
 0x3d3   : > { %4455 = vmatpush1.msra.mxu1 %v1741_v36  ;;  %4385 = vmatprep.subr.mxu0 %v1610_v39  ;;  %v1821_v50 = vld [vmem:[%s5664_s10 + $0x2f90] sm:$0xff]  ;;  %v1690_v35 = vld [vmem:[%s5664_s10 + $0x2b78] sm:$0xff] }
 0x3d4   : > { %4456 = vmatprep.subr.mxu1 %v1738_v40  ;;  %4386 = vmatpush1.msra.mxu0 %v1609_v43  ;;  %v1818_v36 = vld [vmem:[%s5664_s10 + $0x2f78] sm:$0xff]  ;;  %v1689_v39 = vld [vmem:[%s5664_s10 + $0x2b70] sm:$0xff] }
 0x3d5   : > { %4457 = vmatpush1.msra.mxu1 %v1737_v46  ;;  %4387 = vmatprep.subr.mxu0 %v1606_v47  ;;  %v1817_v40 = vld [vmem:[%s5664_s10 + $0x2f70] sm:$0xff]  ;;  %v1686_v43 = vld [vmem:[%s5664_s10 + $0x2b58] sm:$0xff] }
 0x3d6   : > { %4458 = vmatprep.subr.mxu1 %v1734_v48  ;;  %4388 = vmatpush1.msra.mxu0 %v1605_v52  ;;  %v1814_v46 = vld [vmem:[%s5664_s10 + $0x2f58] sm:$0xff]  ;;  %v1685_v47 = vld [vmem:[%s5664_s10 + $0x2b50] sm:$0xff] }
 0x3d7   : > { %4459 = vmatpush1.msra.mxu1 %v1733_v53  ;;  %4389 = vmatprep.subr.mxu0 %v1602_v55  ;;  %v1813_v48 = vld [vmem:[%s5664_s10 + $0x2f50] sm:$0xff]  ;;  %v1682_v52 = vld [vmem:[%s5664_s10 + $0x2b38] sm:$0xff] }
 0x3d8   : > { %4460 = vmatprep.subr.mxu1 %v1730_v57  ;;  %4390 = vmatpush1.msra.mxu0 %v1601_v61  ;;  %v1810_v53 = vld [vmem:[%s5664_s10 + $0x2f38] sm:$0xff]  ;;  %v1681_v55 = vld [vmem:[%s5664_s10 + $0x2b30] sm:$0xff] }
 0x3d9   : > { %4461 = vmatpush1.msra.mxu1 %v1729_v62  ;;  %4391 = vmatprep.subr.mxu0 %v1598_v2  ;;  %v1809_v57 = vld [vmem:[%s5664_s10 + $0x2f30] sm:$0xff]  ;;  %v1678_v61 = vld [vmem:[%s5664_s10 + $0x2b18] sm:$0xff] }
 0x3da   : > { %4462 = vmatprep.subr.mxu1 %v1726_v4  ;;  %4392 = vmatpush1.msra.mxu0 %v1597_v6  ;;  %v1806_v62 = vld [vmem:[%s5664_s10 + $0x2f18] sm:$0xff]  ;;  %v1677_v2 = vld [vmem:[%s5664_s10 + $0x2b10] sm:$0xff] }
 0x3db   : > { %4463 = vmatpush1.msra.mxu1 %v1725_v7  ;;  %4393 = vmatprep.subr.mxu0 %v1594_v8  ;;  %v1805_v4 = vld [vmem:[%s5664_s10 + $0x2f10] sm:$0xff]  ;;  %v1674_v6 = vld [vmem:[%s5664_s10 + $0x2af8] sm:$0xff] }
 0x3dc   : > { %4464 = vmatprep.subr.mxu1 %v1722_v9  ;;  %4394 = vmatpush1.msra.mxu0 %v1593_v28  ;;  %v1802_v7 = vld [vmem:[%s5664_s10 + $0x2ef8] sm:$0xff]  ;;  %v1673_v8 = vld [vmem:[%s5664_s10 + $0x2af0] sm:$0xff] }
 0x3dd   : > { %4465 = vmatpush1.msra.mxu1 %v1721_v13  ;;  %4395 = vmatprep.subr.mxu0 %v1590_v18  ;;  %v1801_v9 = vld [vmem:[%s5664_s10 + $0x2ef0] sm:$0xff]  ;;  %v1670_v28 = vld [vmem:[%s5664_s10 + $0x2ad8] sm:$0xff] }
 0x3de   : > { %4466 = vmatprep.subr.mxu1 %v1718_v14  ;;  %4396 = vmatpush1.msra.mxu0 %v1589_v31  ;;  %v1798_v13 = vld [vmem:[%s5664_s10 + $0x2ed8] sm:$0xff]  ;;  %v1669_v18 = vld [vmem:[%s5664_s10 + $0x2ad0] sm:$0xff] }
 0x3df   : > { %4467 = vmatpush1.msra.mxu1 %v1717_v15  ;;  %4397 = vmatprep.subr.mxu0 %v1586_v25  ;;  %v1797_v14 = vld [vmem:[%s5664_s10 + $0x2ed0] sm:$0xff]  ;;  %v1666_v31 = vld [vmem:[%s5664_s10 + $0x2ab8] sm:$0xff] }
 0x3e0   : > { %4468 = vmatprep.subr.mxu1 %v1714_v16  ;;  %4398 = vmatpush1.msra.mxu0 %v1585_v11  ;;  %v1794_v15 = vld [vmem:[%s5664_s10 + $0x2eb8] sm:$0xff]  ;;  %v1665_v25 = vld [vmem:[%s5664_s10 + $0x2ab0] sm:$0xff] }
 0x3e1   : > { %4469 = vmatpush1.msra.mxu1 %v1713_v23  ;;  %4399 = vmatprep.subr.mxu0 %v1582_v30  ;;  %v1793_v16 = vld [vmem:[%s5664_s10 + $0x2eb0] sm:$0xff]  ;;  %v1662_v11 = vld [vmem:[%s5664_s10 + $0x2a98] sm:$0xff] }
 0x3e2   : > { %4470 = vmatprep.subr.mxu1 %v1710_v20  ;;  %4400 = vmatpush1.msra.mxu0 %v1581_v22  ;;  %v1790_v23 = vld [vmem:[%s5664_s10 + $0x2e98] sm:$0xff]  ;;  %v1661_v30 = vld [vmem:[%s5664_s10 + $0x2a90] sm:$0xff] }
 0x3e3   : > { %4471 = vmatpush1.msra.mxu1 %v1709_v17  ;;  %4401 = vmatprep.subr.mxu0 %v1706_v24  ;;  %v1789_v20 = vld [vmem:[%s5664_s10 + $0x2e90] sm:$0xff]  ;;  %v1658_v22 = vld [vmem:[%s5664_s10 + $0x2a78] sm:$0xff] }
 0x3e4   : > { %4472 = vmatprep.subr.mxu1 %v1834_v26  ;;  %4402 = vmatpush2.msra.mxu0 %v1705_v10  ;;  %v1786_v17 = vld [vmem:[%s5664_s10 + $0x2e78] sm:$0xff]  ;;  %v1657_v24 = vld [vmem:[%s5664_s10 + $0x2a70] sm:$0xff] }
 0x3e5   : > { %4473 = vmatpush2.msra.mxu1 %v1833_v32  ;;  %4403 = vmatprep.subr.mxu0 %v1702_v56  ;;  %v1785_v26 = vld [vmem:[%s5664_s10 + $0x2e70] sm:$0xff]  ;;  %v1654_v10 = vld [vmem:[%s5664_s10 + $0x2a58] sm:$0xff] }
 0x3e6   : > { %4474 = vmatprep.subr.mxu1 %v1830_v12  ;;  %4404 = vmatpush2.msra.mxu0 %v1701_v34  ;;  %v1782_v32 = vld [vmem:[%s5664_s10 + $0x2e58] sm:$0xff]  ;;  %v1653_v56 = vld [vmem:[%s5664_s10 + $0x2a50] sm:$0xff] }
 0x3e7   : > { %4475 = vmatpush2.msra.mxu1 %v1829_v45  ;;  %4405 = vmatprep.subr.mxu0 %v1698_v21  ;;  %v1781_v12 = vld [vmem:[%s5664_s10 + $0x2e50] sm:$0xff]  ;;  %v1650_v34 = vld [vmem:[%s5664_s10 + $0x2a38] sm:$0xff] }
 0x3e8   : > { %4476 = vmatprep.subr.mxu1 %v1826_v33  ;;  %4406 = vmatpush2.msra.mxu0 %v1697_v37  ;;  %v1778_v45 = vld [vmem:[%s5664_s10 + $0x2e38] sm:$0xff]  ;;  %v1649_v21 = vld [vmem:[%s5664_s10 + $0x2a30] sm:$0xff] }
 0x3e9   : > { %4477 = vmatpush2.msra.mxu1 %v1825_v59  ;;  %4407 = vmatprep.subr.mxu0 %v1694_v0  ;;  %v1777_v33 = vld [vmem:[%s5664_s10 + $0x2e30] sm:$0xff]  ;;  %v1646_v37 = vld [vmem:[%s5664_s10 + $0x2a18] sm:$0xff] }
 0x3ea   : > { %4478 = vmatprep.subr.mxu1 %v1822_v27  ;;  %4408 = vmatpush2.msra.mxu0 %v1693_v3  ;;  %v1774_v59 = vld [vmem:[%s5664_s10 + $0x2e18] sm:$0xff]  ;;  %v1645_v0 = vld [vmem:[%s5664_s10 + $0x2a10] sm:$0xff] }
 0x3eb   : > { %4479 = vmatpush2.msra.mxu1 %v1821_v50  ;;  %4409 = vmatprep.subr.mxu0 %v1690_v35  ;;  %v1773_v27 = vld [vmem:[%s5664_s10 + $0x2e10] sm:$0xff]  ;;  %v1898_v3 = vld [vmem:[%s5664_s10 + $0x31f8] sm:$0xff] }
 0x3ec   : > { %4480 = vmatprep.subr.mxu1 %v1818_v36  ;;  %4410 = vmatpush2.msra.mxu0 %v1689_v39  ;;  %v2026_v50 = vld [vmem:[%s5664_s10 + $0x35f8] sm:$0xff]  ;;  %v1897_v35 = vld [vmem:[%s5664_s10 + $0x31f0] sm:$0xff] }
 0x3ed   : > { %4481 = vmatpush2.msra.mxu1 %v1817_v40  ;;  %4411 = vmatprep.subr.mxu0 %v1686_v43  ;;  %v2025_v36 = vld [vmem:[%s5664_s10 + $0x35f0] sm:$0xff]  ;;  %v1894_v39 = vld [vmem:[%s5664_s10 + $0x31d8] sm:$0xff] }
 0x3ee   : > { %4482 = vmatprep.subr.mxu1 %v1814_v46  ;;  %4412 = vmatpush2.msra.mxu0 %v1685_v47  ;;  %v2022_v40 = vld [vmem:[%s5664_s10 + $0x35d8] sm:$0xff]  ;;  %v2021_v43 = vld [vmem:[%s5664_s10 + $0x35d0] sm:$0xff] }
 0x3ef   : > { %4483 = vmatpush2.msra.mxu1 %v1813_v48  ;;  %4413 = vmatprep.subr.mxu0 %v1682_v52  ;;  %v2018_v46 = vld [vmem:[%s5664_s10 + $0x35b8] sm:$0xff]  ;;  %v2017_v47 = vld [vmem:[%s5664_s10 + $0x35b0] sm:$0xff] }
 0x3f0   : > { %4484 = vmatprep.subr.mxu1 %v1810_v53  ;;  %4414 = vmatpush2.msra.mxu0 %v1681_v55  ;;  %v1886_v48 = vld [vmem:[%s5664_s10 + $0x3198] sm:$0xff]  ;;  %v1885_v52 = vld [vmem:[%s5664_s10 + $0x3190] sm:$0xff] }
 0x3f1   : > { %4485 = vmatpush2.msra.mxu1 %v1809_v57  ;;  %4415 = vmatprep.subr.mxu0 %v1678_v61  ;;  %v2013_v53 = vld [vmem:[%s5664_s10 + $0x3590] sm:$0xff]  ;;  %v1882_v55 = vld [vmem:[%s5664_s10 + $0x3178] sm:$0xff] }
 0x3f2   : > { %4486 = vmatprep.subr.mxu1 %v1806_v62  ;;  %4416 = vmatpush2.msra.mxu0 %v1677_v2  ;;  %v2010_v57 = vld [vmem:[%s5664_s10 + $0x3578] sm:$0xff]  ;;  %v1881_v61 = vld [vmem:[%s5664_s10 + $0x3170] sm:$0xff] }
 0x3f3   : > { %4487 = vmatpush2.msra.mxu1 %v1805_v4  ;;  %4417 = vmatprep.subr.mxu0 %v1674_v6  ;;  %v2009_v62 = vld [vmem:[%s5664_s10 + $0x3570] sm:$0xff]  ;;  %v1878_v2 = vld [vmem:[%s5664_s10 + $0x3158] sm:$0xff] }
 0x3f4   : > { %4488 = vmatprep.subr.mxu1 %v1802_v7  ;;  %4418 = vmatpush2.msra.mxu0 %v1673_v8  ;;  %v2006_v4 = vld [vmem:[%s5664_s10 + $0x3558] sm:$0xff]  ;;  %v1877_v6 = vld [vmem:[%s5664_s10 + $0x3150] sm:$0xff] }
 0x3f5   : > { %4489 = vmatpush2.msra.mxu1 %v1801_v9  ;;  %4419 = vmatprep.subr.mxu0 %v1670_v28  ;;  %v2005_v7 = vld [vmem:[%s5664_s10 + $0x3550] sm:$0xff]  ;;  %v1874_v8 = vld [vmem:[%s5664_s10 + $0x3138] sm:$0xff] }
 0x3f6   : > { %4490 = vmatprep.subr.mxu1 %v1798_v13  ;;  %4420 = vmatpush2.msra.mxu0 %v1669_v18  ;;  %v2002_v9 = vld [vmem:[%s5664_s10 + $0x3538] sm:$0xff]  ;;  %v1873_v28 = vld [vmem:[%s5664_s10 + $0x3130] sm:$0xff] }
 0x3f7   : > { %4491 = vmatpush2.msra.mxu1 %v1797_v14  ;;  %4421 = vmatprep.subr.mxu0 %v1666_v31  ;;  %v2001_v13 = vld [vmem:[%s5664_s10 + $0x3530] sm:$0xff]  ;;  %v1870_v18 = vld [vmem:[%s5664_s10 + $0x3118] sm:$0xff] }
 0x3f8   : > { %4492 = vmatprep.subr.mxu1 %v1794_v15  ;;  %4422 = vmatpush2.msra.mxu0 %v1665_v25  ;;  %v1998_v14 = vld [vmem:[%s5664_s10 + $0x3518] sm:$0xff]  ;;  %v1869_v31 = vld [vmem:[%s5664_s10 + $0x3110] sm:$0xff] }
 0x3f9   : > { %4493 = vmatpush2.msra.mxu1 %v1793_v16  ;;  %4423 = vmatprep.subr.mxu0 %v1662_v11  ;;  %v1997_v15 = vld [vmem:[%s5664_s10 + $0x3510] sm:$0xff]  ;;  %v1866_v25 = vld [vmem:[%s5664_s10 + $0x30f8] sm:$0xff] }
 0x3fa   : > { %4494 = vmatprep.subr.mxu1 %v1790_v23  ;;  %4424 = vmatpush2.msra.mxu0 %v1661_v30  ;;  %v1994_v16 = vld [vmem:[%s5664_s10 + $0x34f8] sm:$0xff]  ;;  %v1865_v11 = vld [vmem:[%s5664_s10 + $0x30f0] sm:$0xff] }
 0x3fb   : > { %4495 = vmatpush2.msra.mxu1 %v1789_v20  ;;  %4425 = vmatprep.subr.mxu0 %v1658_v22  ;;  %v1993_v23 = vld [vmem:[%s5664_s10 + $0x34f0] sm:$0xff]  ;;  %v1862_v30 = vld [vmem:[%s5664_s10 + $0x30d8] sm:$0xff] }
 0x3fc   : > { %4496 = vmatprep.subr.mxu1 %v1786_v17  ;;  %4426 = vmatpush2.msra.mxu0 %v1657_v24  ;;  %v1990_v20 = vld [vmem:[%s5664_s10 + $0x34d8] sm:$0xff]  ;;  %v1861_v22 = vld [vmem:[%s5664_s10 + $0x30d0] sm:$0xff] }
 0x3fd   : > { %4497 = vmatpush2.msra.mxu1 %v1785_v26  ;;  %4427 = vmatprep.subr.mxu0 %v1654_v10  ;;  %v1989_v17 = vld [vmem:[%s5664_s10 + $0x34d0] sm:$0xff]  ;;  %v1858_v24 = vld [vmem:[%s5664_s10 + $0x30b8] sm:$0xff] }
 0x3fe   : > { %4498 = vmatprep.subr.mxu1 %v1782_v32  ;;  %4428 = vmatpush2.msra.mxu0 %v1653_v56  ;;  %v1986_v26 = vld [vmem:[%s5664_s10 + $0x34b8] sm:$0xff]  ;;  %v1857_v10 = vld [vmem:[%s5664_s10 + $0x30b0] sm:$0xff] }
 0x3ff   : > { %4499 = vmatpush2.msra.mxu1 %v1781_v12  ;;  %4429 = vmatprep.subr.mxu0 %v1650_v34  ;;  %v1985_v32 = vld [vmem:[%s5664_s10 + $0x34b0] sm:$0xff]  ;;  %v1854_v56 = vld [vmem:[%s5664_s10 + $0x3098] sm:$0xff] }
 0x400   : > { %4500 = vmatprep.subr.mxu1 %v1778_v45  ;;  %4430 = vmatpush2.msra.mxu0 %v1649_v21  ;;  %v1982_v12 = vld [vmem:[%s5664_s10 + $0x3498] sm:$0xff]  ;;  %v1853_v34 = vld [vmem:[%s5664_s10 + $0x3090] sm:$0xff] }
 0x401   : > { %4501 = vmatpush2.msra.mxu1 %v1777_v33  ;;  %4431 = vmatprep.subr.mxu0 %v1646_v37  ;;  %v1981_v45 = vld [vmem:[%s5664_s10 + $0x3490] sm:$0xff]  ;;  %v1850_v21 = vld [vmem:[%s5664_s10 + $0x3078] sm:$0xff] }
 0x402   : > { %4502 = vmatprep.subr.mxu1 %v1774_v59  ;;  %4432 = vmatpush2.msra.mxu0 %v1645_v0  ;;  %v1978_v33 = vld [vmem:[%s5664_s10 + $0x3478] sm:$0xff]  ;;  %v1849_v37 = vld [vmem:[%s5664_s10 + $0x3070] sm:$0xff] }
 0x403   : > { %4433 = vmatprep.mubr.f32.mxu0 %v6551_v38  ;;  %4503 = vmatpush2.msra.mxu1 %v1773_v27  ;;  %v1893_v38 = vld [vmem:[%s5664_s10 + $0x31d0] sm:$0xff]  ;;  %v1846_v0 = vld [vmem:[%s5664_s10 + $0x3058] sm:$0xff] }
 0x404   : > { %4434 = vmatmul.mubr.f32.vlgmr.msra.gmra.mxu0 %v6536_v19  ;;  %4504 = vmatprep.mubr.f32.mxu1 %v6557_v41  ;;  %v1890_v19 = vld [vmem:[%s5664_s10 + $0x31b8] sm:$0xff]  ;;  %v1889_v41 = vld [vmem:[%s5664_s10 + $0x31b0] sm:$0xff] }
 0x405   : > { %4511 = vmatprep.subr.mxu0 %v1898_v3  ;;  %4582 = vmatprep.subr.mxu1 %v2026_v50  ;;  %v1977_v59 = vld [vmem:[%s5664_s10 + $0x3470] sm:$0xff]  ;;  %v1974_v27 = vld [vmem:[%s5664_s10 + $0x3458] sm:$0xff] }
 0x406   : > { %4505 = vmatmul.mubr.f32.vlgmr.msra.gmra.mxu1 %v6543_v29  ;;  %4512 = vmatpush1.msra.mxu0 %v1897_v35  ;;  %v2014_v29 = vld [vmem:[%s5664_s10 + $0x3598] sm:$0xff]  ;;  %v1845_v3 = vld [vmem:[%s5664_s10 + $0x3050] sm:$0xff] }
 0x407   : > { %4583 = vmatpush1.msra.mxu1 %v2025_v36  ;;  %4513 = vmatprep.subr.mxu0 %v1894_v39  ;;  %v1973_v50 = vld [vmem:[%s5664_s10 + $0x3450] sm:$0xff]  ;;  %v1842_v35 = vld [vmem:[%s5664_s10 + $0x3038] sm:$0xff] }
 0x408   : > { %4584 = vmatprep.subr.mxu1 %v2022_v40  ;;  %4514 = vmatpush1.msra.mxu0 %v1893_v38  ;;  %v1970_v36 = vld [vmem:[%s5664_s10 + $0x3438] sm:$0xff]  ;;  %v1841_v39 = vld [vmem:[%s5664_s10 + $0x3030] sm:$0xff] }
 0x409   : > { %4585 = vmatpush1.msra.mxu1 %v2021_v43  ;;  %4515 = vmatprep.subr.mxu0 %v1890_v19  ;;  %v1969_v40 = vld [vmem:[%s5664_s10 + $0x3430] sm:$0xff]  ;;  %v1838_v38 = vld [vmem:[%s5664_s10 + $0x3018] sm:$0xff] }
 0x40a   : > { %4586 = vmatprep.subr.mxu1 %v2018_v46  ;;  %4516 = vmatpush1.msra.mxu0 %v1889_v41  ;;  %v1966_v43 = vld [vmem:[%s5664_s10 + $0x3418] sm:$0xff]  ;;  %v1837_v19 = vld [vmem:[%s5664_s10 + $0x3010] sm:$0xff] }
 0x40b   : > { %4587 = vmatpush1.msra.mxu1 %v2017_v47  ;;  %4517 = vmatprep.subr.mxu0 %v1886_v48  ;;  %v1965_v46 = vld [vmem:[%s5664_s10 + $0x3410] sm:$0xff]  ;;  %v1962_v41 = vld [vmem:[%s5664_s10 + $0x33f8] sm:$0xff] }
 0x40c   : > { %4588 = vmatprep.subr.mxu1 %v2014_v29  ;;  %4518 = vmatpush1.msra.mxu0 %v1885_v52  ;;  %v2090_v47 = vld [vmem:[%s5664_s10 + $0x37f8] sm:$0xff]  ;;  %v1961_v48 = vld [vmem:[%s5664_s10 + $0x33f0] sm:$0xff] }
 0x40d   : > { %4589 = vmatpush1.msra.mxu1 %v2013_v53  ;;  %4519 = vmatprep.subr.mxu0 %v1882_v55  ;;  %v2089_v29 = vld [vmem:[%s5664_s10 + $0x37f0] sm:$0xff]  ;;  %v1958_v52 = vld [vmem:[%s5664_s10 + $0x33d8] sm:$0xff] }
 0x40e   : > { %4590 = vmatprep.subr.mxu1 %v2010_v57  ;;  %4520 = vmatpush1.msra.mxu0 %v1881_v61  ;;  %v2086_v53 = vld [vmem:[%s5664_s10 + $0x37d8] sm:$0xff]  ;;  %v1957_v55 = vld [vmem:[%s5664_s10 + $0x33d0] sm:$0xff] }
 0x40f   : > { %4591 = vmatpush1.msra.mxu1 %v2009_v62  ;;  %4521 = vmatprep.subr.mxu0 %v1878_v2  ;;  %v2085_v57 = vld [vmem:[%s5664_s10 + $0x37d0] sm:$0xff]  ;;  %v1954_v61 = vld [vmem:[%s5664_s10 + $0x33b8] sm:$0xff] }
 0x410   : > { %4592 = vmatprep.subr.mxu1 %v2006_v4  ;;  %4522 = vmatpush1.msra.mxu0 %v1877_v6  ;;  %v2082_v62 = vld [vmem:[%s5664_s10 + $0x37b8] sm:$0xff]  ;;  %v1953_v2 = vld [vmem:[%s5664_s10 + $0x33b0] sm:$0xff] }
 0x411   : > { %4593 = vmatpush1.msra.mxu1 %v2005_v7  ;;  %4523 = vmatprep.subr.mxu0 %v1874_v8  ;;  %v2081_v4 = vld [vmem:[%s5664_s10 + $0x37b0] sm:$0xff]  ;;  %v1950_v6 = vld [vmem:[%s5664_s10 + $0x3398] sm:$0xff] }
 0x412   : > { %4594 = vmatprep.subr.mxu1 %v2002_v9  ;;  %4524 = vmatpush1.msra.mxu0 %v1873_v28  ;;  %v2078_v7 = vld [vmem:[%s5664_s10 + $0x3798] sm:$0xff]  ;;  %v1949_v8 = vld [vmem:[%s5664_s10 + $0x3390] sm:$0xff] }
 0x413   : > { %4595 = vmatpush1.msra.mxu1 %v2001_v13  ;;  %4525 = vmatprep.subr.mxu0 %v1870_v18  ;;  %v2077_v9 = vld [vmem:[%s5664_s10 + $0x3790] sm:$0xff]  ;;  %v1946_v28 = vld [vmem:[%s5664_s10 + $0x3378] sm:$0xff] }
 0x414   : > { %4596 = vmatprep.subr.mxu1 %v1998_v14  ;;  %4526 = vmatpush1.msra.mxu0 %v1869_v31  ;;  %v2074_v13 = vld [vmem:[%s5664_s10 + $0x3778] sm:$0xff]  ;;  %v1945_v18 = vld [vmem:[%s5664_s10 + $0x3370] sm:$0xff] }
 0x415   : > { %4597 = vmatpush1.msra.mxu1 %v1997_v15  ;;  %4527 = vmatprep.subr.mxu0 %v1866_v25  ;;  %v2073_v14 = vld [vmem:[%s5664_s10 + $0x3770] sm:$0xff]  ;;  %v1942_v31 = vld [vmem:[%s5664_s10 + $0x3358] sm:$0xff] }
 0x416   : > { %4598 = vmatprep.subr.mxu1 %v1994_v16  ;;  %4528 = vmatpush1.msra.mxu0 %v1865_v11  ;;  %v2070_v15 = vld [vmem:[%s5664_s10 + $0x3758] sm:$0xff]  ;;  %v1941_v25 = vld [vmem:[%s5664_s10 + $0x3350] sm:$0xff] }
 0x417   : > { %4599 = vmatpush1.msra.mxu1 %v1993_v23  ;;  %4529 = vmatprep.subr.mxu0 %v1862_v30  ;;  %v2069_v16 = vld [vmem:[%s5664_s10 + $0x3750] sm:$0xff]  ;;  %v1938_v11 = vld [vmem:[%s5664_s10 + $0x3338] sm:$0xff] }
 0x418   : > { %4600 = vmatprep.subr.mxu1 %v1990_v20  ;;  %4530 = vmatpush1.msra.mxu0 %v1861_v22  ;;  %v2066_v23 = vld [vmem:[%s5664_s10 + $0x3738] sm:$0xff]  ;;  %v1937_v30 = vld [vmem:[%s5664_s10 + $0x3330] sm:$0xff] }
 0x419   : > { %4601 = vmatpush1.msra.mxu1 %v1989_v17  ;;  %4531 = vmatprep.subr.mxu0 %v1858_v24  ;;  %v2065_v20 = vld [vmem:[%s5664_s10 + $0x3730] sm:$0xff]  ;;  %v1934_v22 = vld [vmem:[%s5664_s10 + $0x3318] sm:$0xff] }
 0x41a   : > { %4602 = vmatprep.subr.mxu1 %v1986_v26  ;;  %4532 = vmatpush1.msra.mxu0 %v1857_v10  ;;  %v2062_v17 = vld [vmem:[%s5664_s10 + $0x3718] sm:$0xff]  ;;  %v1933_v24 = vld [vmem:[%s5664_s10 + $0x3310] sm:$0xff] }
 0x41b   : > { %4603 = vmatpush1.msra.mxu1 %v1985_v32  ;;  %4533 = vmatprep.subr.mxu0 %v1854_v56  ;;  %v2061_v26 = vld [vmem:[%s5664_s10 + $0x3710] sm:$0xff]  ;;  %v1930_v10 = vld [vmem:[%s5664_s10 + $0x32f8] sm:$0xff] }
 0x41c   : > { %4604 = vmatprep.subr.mxu1 %v1982_v12  ;;  %4534 = vmatpush1.msra.mxu0 %v1853_v34  ;;  %v2058_v32 = vld [vmem:[%s5664_s10 + $0x36f8] sm:$0xff]  ;;  %v1929_v56 = vld [vmem:[%s5664_s10 + $0x32f0] sm:$0xff] }
 0x41d   : > { %4605 = vmatpush1.msra.mxu1 %v1981_v45  ;;  %4535 = vmatprep.subr.mxu0 %v1850_v21  ;;  %v2057_v12 = vld [vmem:[%s5664_s10 + $0x36f0] sm:$0xff]  ;;  %v1926_v34 = vld [vmem:[%s5664_s10 + $0x32d8] sm:$0xff] }
 0x41e   : > { %4606 = vmatprep.subr.mxu1 %v1978_v33  ;;  %4536 = vmatpush1.msra.mxu0 %v1849_v37  ;;  %v2054_v45 = vld [vmem:[%s5664_s10 + $0x36d8] sm:$0xff]  ;;  %v1925_v21 = vld [vmem:[%s5664_s10 + $0x32d0] sm:$0xff] }
 0x41f   : > { %4607 = vmatpush1.msra.mxu1 %v1977_v59  ;;  %4537 = vmatprep.subr.mxu0 %v1846_v0  ;;  %v2053_v33 = vld [vmem:[%s5664_s10 + $0x36d0] sm:$0xff]  ;;  %v1922_v37 = vld [vmem:[%s5664_s10 + $0x32b8] sm:$0xff] }
 0x420   : > { %4608 = vmatprep.subr.mxu1 %v1974_v27  ;;  %4538 = vmatpush1.msra.mxu0 %v1845_v3  ;;  %v2050_v59 = vld [vmem:[%s5664_s10 + $0x36b8] sm:$0xff]  ;;  %v1921_v0 = vld [vmem:[%s5664_s10 + $0x32b0] sm:$0xff] }
 0x421   : > { %4609 = vmatpush1.msra.mxu1 %v1973_v50  ;;  %4539 = vmatprep.subr.mxu0 %v1842_v35  ;;  %v2049_v27 = vld [vmem:[%s5664_s10 + $0x36b0] sm:$0xff]  ;;  %v1918_v3 = vld [vmem:[%s5664_s10 + $0x3298] sm:$0xff] }
 0x422   : > { %4610 = vmatprep.subr.mxu1 %v1970_v36  ;;  %4540 = vmatpush1.msra.mxu0 %v1841_v39  ;;  %v2046_v50 = vld [vmem:[%s5664_s10 + $0x3698] sm:$0xff]  ;;  %v1917_v35 = vld [vmem:[%s5664_s10 + $0x3290] sm:$0xff] }
 0x423   : > { %4611 = vmatpush1.msra.mxu1 %v1969_v40  ;;  %4541 = vmatprep.subr.mxu0 %v1838_v38  ;;  %v2045_v36 = vld [vmem:[%s5664_s10 + $0x3690] sm:$0xff]  ;;  %v1914_v39 = vld [vmem:[%s5664_s10 + $0x3278] sm:$0xff] }
 0x424   : > { %4612 = vmatprep.subr.mxu1 %v1966_v43  ;;  %4542 = vmatpush1.msra.mxu0 %v1837_v19  ;;  %v2042_v40 = vld [vmem:[%s5664_s10 + $0x3678] sm:$0xff]  ;;  %v1913_v38 = vld [vmem:[%s5664_s10 + $0x3270] sm:$0xff] }
 0x425   : > { %4613 = vmatpush1.msra.mxu1 %v1965_v46  ;;  %4543 = vmatprep.subr.mxu0 %v1962_v41  ;;  %v2041_v43 = vld [vmem:[%s5664_s10 + $0x3670] sm:$0xff]  ;;  %v1910_v19 = vld [vmem:[%s5664_s10 + $0x3258] sm:$0xff] }
 0x426   : > { %4614 = vmatprep.subr.mxu1 %v2090_v47  ;;  %4544 = vmatpush2.msra.mxu0 %v1961_v48  ;;  %v2038_v46 = vld [vmem:[%s5664_s10 + $0x3658] sm:$0xff]  ;;  %v1909_v41 = vld [vmem:[%s5664_s10 + $0x3250] sm:$0xff] }
 0x427   : > { %4615 = vmatpush2.msra.mxu1 %v2089_v29  ;;  %4545 = vmatprep.subr.mxu0 %v1958_v52  ;;  %v2037_v47 = vld [vmem:[%s5664_s10 + $0x3650] sm:$0xff]  ;;  %v1906_v48 = vld [vmem:[%s5664_s10 + $0x3238] sm:$0xff] }
 0x428   : > { %4616 = vmatprep.subr.mxu1 %v2086_v53  ;;  %4546 = vmatpush2.msra.mxu0 %v1957_v55  ;;  %v2034_v29 = vld [vmem:[%s5664_s10 + $0x3638] sm:$0xff]  ;;  %v1905_v52 = vld [vmem:[%s5664_s10 + $0x3230] sm:$0xff] }
 0x429   : > { %4617 = vmatpush2.msra.mxu1 %v2085_v57  ;;  %4547 = vmatprep.subr.mxu0 %v1954_v61  ;;  %v2033_v53 = vld [vmem:[%s5664_s10 + $0x3630] sm:$0xff]  ;;  %v1902_v55 = vld [vmem:[%s5664_s10 + $0x3218] sm:$0xff] }
 0x42a   : > { %4618 = vmatprep.subr.mxu1 %v2082_v62  ;;  %4548 = vmatpush2.msra.mxu0 %v1953_v2  ;;  %v2030_v57 = vld [vmem:[%s5664_s10 + $0x3618] sm:$0xff]  ;;  %v1901_v61 = vld [vmem:[%s5664_s10 + $0x3210] sm:$0xff] }
 0x42b   : > { %4619 = vmatpush2.msra.mxu1 %v2081_v4  ;;  %4549 = vmatprep.subr.mxu0 %v1950_v6  ;;  %v2029_v62 = vld [vmem:[%s5664_s10 + $0x3610] sm:$0xff]  ;;  %v2154_v2 = vld [vmem:[%s5664_s10 + $0x39f8] sm:$0xff] }
 0x42c   : > { %4620 = vmatprep.subr.mxu1 %v2078_v7  ;;  %4550 = vmatpush2.msra.mxu0 %v1949_v8  ;;  %v2282_v4 = vld [vmem:[%s5664_s10 + $0x3df8] sm:$0xff]  ;;  %v2153_v6 = vld [vmem:[%s5664_s10 + $0x39f0] sm:$0xff] }
 0x42d   : > { %4621 = vmatpush2.msra.mxu1 %v2077_v9  ;;  %4551 = vmatprep.subr.mxu0 %v1946_v28  ;;  %v2281_v7 = vld [vmem:[%s5664_s10 + $0x3df0] sm:$0xff]  ;;  %v2150_v8 = vld [vmem:[%s5664_s10 + $0x39d8] sm:$0xff] }
 0x42e   : > { %4622 = vmatprep.subr.mxu1 %v2074_v13  ;;  %4552 = vmatpush2.msra.mxu0 %v1945_v18  ;;  %v2278_v9 = vld [vmem:[%s5664_s10 + $0x3dd8] sm:$0xff]  ;;  %v2277_v28 = vld [vmem:[%s5664_s10 + $0x3dd0] sm:$0xff] }
 0x42f   : > { %4623 = vmatpush2.msra.mxu1 %v2073_v14  ;;  %4553 = vmatprep.subr.mxu0 %v1942_v31  ;;  %v2274_v13 = vld [vmem:[%s5664_s10 + $0x3db8] sm:$0xff]  ;;  %v2273_v18 = vld [vmem:[%s5664_s10 + $0x3db0] sm:$0xff] }
 0x430   : > { %4624 = vmatprep.subr.mxu1 %v2070_v15  ;;  %4554 = vmatpush2.msra.mxu0 %v1941_v25  ;;  %v2142_v14 = vld [vmem:[%s5664_s10 + $0x3998] sm:$0xff]  ;;  %v2141_v31 = vld [vmem:[%s5664_s10 + $0x3990] sm:$0xff] }
 0x431   : > { %4625 = vmatpush2.msra.mxu1 %v2069_v16  ;;  %4555 = vmatprep.subr.mxu0 %v1938_v11  ;;  %v2269_v15 = vld [vmem:[%s5664_s10 + $0x3d90] sm:$0xff]  ;;  %v2138_v25 = vld [vmem:[%s5664_s10 + $0x3978] sm:$0xff] }
 0x432   : > { %4626 = vmatprep.subr.mxu1 %v2066_v23  ;;  %4556 = vmatpush2.msra.mxu0 %v1937_v30  ;;  %v2266_v16 = vld [vmem:[%s5664_s10 + $0x3d78] sm:$0xff]  ;;  %v2137_v11 = vld [vmem:[%s5664_s10 + $0x3970] sm:$0xff] }
 0x433   : > { %4627 = vmatpush2.msra.mxu1 %v2065_v20  ;;  %4557 = vmatprep.subr.mxu0 %v1934_v22  ;;  %v2265_v23 = vld [vmem:[%s5664_s10 + $0x3d70] sm:$0xff]  ;;  %v2134_v30 = vld [vmem:[%s5664_s10 + $0x3958] sm:$0xff] }
 0x434   : > { %4628 = vmatprep.subr.mxu1 %v2062_v17  ;;  %4558 = vmatpush2.msra.mxu0 %v1933_v24  ;;  %v2262_v20 = vld [vmem:[%s5664_s10 + $0x3d58] sm:$0xff]  ;;  %v2133_v22 = vld [vmem:[%s5664_s10 + $0x3950] sm:$0xff] }
 0x435   : > { %4629 = vmatpush2.msra.mxu1 %v2061_v26  ;;  %4559 = vmatprep.subr.mxu0 %v1930_v10  ;;  %v2261_v17 = vld [vmem:[%s5664_s10 + $0x3d50] sm:$0xff]  ;;  %v2130_v24 = vld [vmem:[%s5664_s10 + $0x3938] sm:$0xff] }
 0x436   : > { %4630 = vmatprep.subr.mxu1 %v2058_v32  ;;  %4560 = vmatpush2.msra.mxu0 %v1929_v56  ;;  %v2258_v26 = vld [vmem:[%s5664_s10 + $0x3d38] sm:$0xff]  ;;  %v2129_v10 = vld [vmem:[%s5664_s10 + $0x3930] sm:$0xff] }
 0x437   : > { %4631 = vmatpush2.msra.mxu1 %v2057_v12  ;;  %4561 = vmatprep.subr.mxu0 %v1926_v34  ;;  %v2257_v32 = vld [vmem:[%s5664_s10 + $0x3d30] sm:$0xff]  ;;  %v2126_v56 = vld [vmem:[%s5664_s10 + $0x3918] sm:$0xff] }
 0x438   : > { %4632 = vmatprep.subr.mxu1 %v2054_v45  ;;  %4562 = vmatpush2.msra.mxu0 %v1925_v21  ;;  %v2254_v12 = vld [vmem:[%s5664_s10 + $0x3d18] sm:$0xff]  ;;  %v2125_v34 = vld [vmem:[%s5664_s10 + $0x3910] sm:$0xff] }
 0x439   : > { %4633 = vmatpush2.msra.mxu1 %v2053_v33  ;;  %4563 = vmatprep.subr.mxu0 %v1922_v37  ;;  %v2253_v45 = vld [vmem:[%s5664_s10 + $0x3d10] sm:$0xff]  ;;  %v2122_v21 = vld [vmem:[%s5664_s10 + $0x38f8] sm:$0xff] }
 0x43a   : > { %4634 = vmatprep.subr.mxu1 %v2050_v59  ;;  %4564 = vmatpush2.msra.mxu0 %v1921_v0  ;;  %v2250_v33 = vld [vmem:[%s5664_s10 + $0x3cf8] sm:$0xff]  ;;  %v2121_v37 = vld [vmem:[%s5664_s10 + $0x38f0] sm:$0xff] }
 0x43b   : > { %4635 = vmatpush2.msra.mxu1 %v2049_v27  ;;  %4565 = vmatprep.subr.mxu0 %v1918_v3  ;;  %v2249_v59 = vld [vmem:[%s5664_s10 + $0x3cf0] sm:$0xff]  ;;  %v2118_v0 = vld [vmem:[%s5664_s10 + $0x38d8] sm:$0xff] }
 0x43c   : > { %4636 = vmatprep.subr.mxu1 %v2046_v50  ;;  %4566 = vmatpush2.msra.mxu0 %v1917_v35  ;;  %v2246_v27 = vld [vmem:[%s5664_s10 + $0x3cd8] sm:$0xff]  ;;  %v2117_v3 = vld [vmem:[%s5664_s10 + $0x38d0] sm:$0xff] }
 0x43d   : > { %4637 = vmatpush2.msra.mxu1 %v2045_v36  ;;  %4567 = vmatprep.subr.mxu0 %v1914_v39  ;;  %v2245_v50 = vld [vmem:[%s5664_s10 + $0x3cd0] sm:$0xff]  ;;  %v2114_v35 = vld [vmem:[%s5664_s10 + $0x38b8] sm:$0xff] }
 0x43e   : > { %4638 = vmatprep.subr.mxu1 %v2042_v40  ;;  %4568 = vmatpush2.msra.mxu0 %v1913_v38  ;;  %v2242_v36 = vld [vmem:[%s5664_s10 + $0x3cb8] sm:$0xff]  ;;  %v2113_v39 = vld [vmem:[%s5664_s10 + $0x38b0] sm:$0xff] }
 0x43f   : > { %4639 = vmatpush2.msra.mxu1 %v2041_v43  ;;  %4569 = vmatprep.subr.mxu0 %v1910_v19  ;;  %v2241_v40 = vld [vmem:[%s5664_s10 + $0x3cb0] sm:$0xff]  ;;  %v2110_v38 = vld [vmem:[%s5664_s10 + $0x3898] sm:$0xff] }
 0x440   : > { %4640 = vmatprep.subr.mxu1 %v2038_v46  ;;  %4570 = vmatpush2.msra.mxu0 %v1909_v41  ;;  %v2238_v43 = vld [vmem:[%s5664_s10 + $0x3c98] sm:$0xff]  ;;  %v2109_v19 = vld [vmem:[%s5664_s10 + $0x3890] sm:$0xff] }
 0x441   : > { %4641 = vmatpush2.msra.mxu1 %v2037_v47  ;;  %4571 = vmatprep.subr.mxu0 %v1906_v48  ;;  %v2237_v46 = vld [vmem:[%s5664_s10 + $0x3c90] sm:$0xff]  ;;  %v2106_v41 = vld [vmem:[%s5664_s10 + $0x3878] sm:$0xff] }
 0x442   : > { %4642 = vmatprep.subr.mxu1 %v2034_v29  ;;  %4572 = vmatpush2.msra.mxu0 %v1905_v52  ;;  %v2234_v47 = vld [vmem:[%s5664_s10 + $0x3c78] sm:$0xff]  ;;  %v2105_v48 = vld [vmem:[%s5664_s10 + $0x3870] sm:$0xff] }
 0x443   : > { %4643 = vmatpush2.msra.mxu1 %v2033_v53  ;;  %4573 = vmatprep.subr.mxu0 %v1902_v55  ;;  %v2233_v29 = vld [vmem:[%s5664_s10 + $0x3c70] sm:$0xff]  ;;  %v2102_v52 = vld [vmem:[%s5664_s10 + $0x3858] sm:$0xff] }
 0x444   : > { %4644 = vmatprep.subr.mxu1 %v2030_v57  ;;  %4574 = vmatpush2.msra.mxu0 %v1901_v61  ;;  %v2230_v53 = vld [vmem:[%s5664_s10 + $0x3c58] sm:$0xff]  ;;  %v2101_v55 = vld [vmem:[%s5664_s10 + $0x3850] sm:$0xff] }
 0x445   : > { %4575 = vmatprep.mubr.f32.mxu0 %v6698_v1  ;;  %4645 = vmatpush2.msra.mxu1 %v2029_v62  ;;  %v2149_v1 = vld [vmem:[%s5664_s10 + $0x39d0] sm:$0xff]  ;;  %v2098_v61 = vld [vmem:[%s5664_s10 + $0x3838] sm:$0xff] }
 0x446   : > { %4576 = vmatmul.mubr.f32.vlgmr.msra.gmra.mxu0 %v6683_v51  ;;  %4646 = vmatprep.mubr.f32.mxu1 %v6704_v5  ;;  %v2146_v51 = vld [vmem:[%s5664_s10 + $0x39b8] sm:$0xff]  ;;  %v2145_v5 = vld [vmem:[%s5664_s10 + $0x39b0] sm:$0xff] }
 0x447   : > { %4653 = vmatprep.subr.mxu0 %v2154_v2  ;;  %4724 = vmatprep.subr.mxu1 %v2282_v4  ;;  %v2229_v57 = vld [vmem:[%s5664_s10 + $0x3c50] sm:$0xff]  ;;  %v2226_v62 = vld [vmem:[%s5664_s10 + $0x3c38] sm:$0xff] }
 0x448   : > { %4647 = vmatmul.mubr.f32.vlgmr.msra.gmra.mxu1 %v6690_v58  ;;  %4654 = vmatpush1.msra.mxu0 %v2153_v6  ;;  %v2270_v58 = vld [vmem:[%s5664_s10 + $0x3d98] sm:$0xff]  ;;  %v2097_v2 = vld [vmem:[%s5664_s10 + $0x3830] sm:$0xff] }
 0x449   : > { %4725 = vmatpush1.msra.mxu1 %v2281_v7  ;;  %4655 = vmatprep.subr.mxu0 %v2150_v8  ;;  %v2225_v4 = vld [vmem:[%s5664_s10 + $0x3c30] sm:$0xff]  ;;  %v2094_v6 = vld [vmem:[%s5664_s10 + $0x3818] sm:$0xff] }
 0x44a   : > { %4726 = vmatprep.subr.mxu1 %v2278_v9  ;;  %4656 = vmatpush1.msra.mxu0 %v2149_v1  ;;  %v2222_v7 = vld [vmem:[%s5664_s10 + $0x3c18] sm:$0xff]  ;;  %v2093_v8 = vld [vmem:[%s5664_s10 + $0x3810] sm:$0xff] }
 0x44b   : > { %4727 = vmatpush1.msra.mxu1 %v2277_v28  ;;  %4657 = vmatprep.subr.mxu0 %v2146_v51  ;;  %v2221_v9 = vld [vmem:[%s5664_s10 + $0x3c10] sm:$0xff]  ;;  %v2218_v1 = vld [vmem:[%s5664_s10 + $0x3bf8] sm:$0xff] }
 0x44c   : > { %4728 = vmatprep.subr.mxu1 %v2274_v13  ;;  %4658 = vmatpush1.msra.mxu0 %v2145_v5  ;;  %v2346_v28 = vld [vmem:[%s5664_s10 + $0x3ff8] sm:$0xff]  ;;  %v2217_v51 = vld [vmem:[%s5664_s10 + $0x3bf0] sm:$0xff] }
 0x44d   : > { %4729 = vmatpush1.msra.mxu1 %v2273_v18  ;;  %4659 = vmatprep.subr.mxu0 %v2142_v14  ;;  %v2345_v13 = vld [vmem:[%s5664_s10 + $0x3ff0] sm:$0xff]  ;;  %v2214_v5 = vld [vmem:[%s5664_s10 + $0x3bd8] sm:$0xff] }
 0x44e   : > { %4730 = vmatprep.subr.mxu1 %v2270_v58  ;;  %4660 = vmatpush1.msra.mxu0 %v2141_v31  ;;  %v2342_v18 = vld [vmem:[%s5664_s10 + $0x3fd8] sm:$0xff]  ;;  %v2213_v14 = vld [vmem:[%s5664_s10 + $0x3bd0] sm:$0xff] }
 0x44f   : > { %4731 = vmatpush1.msra.mxu1 %v2269_v15  ;;  %4661 = vmatprep.subr.mxu0 %v2138_v25  ;;  %v2341_v58 = vld [vmem:[%s5664_s10 + $0x3fd0] sm:$0xff]  ;;  %v2210_v31 = vld [vmem:[%s5664_s10 + $0x3bb8] sm:$0xff] }
 0x450   : > { %4732 = vmatprep.subr.mxu1 %v2266_v16  ;;  %4662 = vmatpush1.msra.mxu0 %v2137_v11  ;;  %v2338_v15 = vld [vmem:[%s5664_s10 + $0x3fb8] sm:$0xff]  ;;  %v2209_v25 = vld [vmem:[%s5664_s10 + $0x3bb0] sm:$0xff] }
 0x451   : > { %4733 = vmatpush1.msra.mxu1 %v2265_v23  ;;  %4663 = vmatprep.subr.mxu0 %v2134_v30  ;;  %v2337_v16 = vld [vmem:[%s5664_s10 + $0x3fb0] sm:$0xff]  ;;  %v2206_v11 = vld [vmem:[%s5664_s10 + $0x3b98] sm:$0xff] }
 0x452   : > { %4734 = vmatprep.subr.mxu1 %v2262_v20  ;;  %4664 = vmatpush1.msra.mxu0 %v2133_v22  ;;  %v2334_v23 = vld [vmem:[%s5664_s10 + $0x3f98] sm:$0xff]  ;;  %v2205_v30 = vld [vmem:[%s5664_s10 + $0x3b90] sm:$0xff] }
 0x453   : > { %4735 = vmatpush1.msra.mxu1 %v2261_v17  ;;  %4665 = vmatprep.subr.mxu0 %v2130_v24  ;;  %v2333_v20 = vld [vmem:[%s5664_s10 + $0x3f90] sm:$0xff]  ;;  %v2202_v22 = vld [vmem:[%s5664_s10 + $0x3b78] sm:$0xff] }
 0x454   : > { %4736 = vmatprep.subr.mxu1 %v2258_v26  ;;  %4666 = vmatpush1.msra.mxu0 %v2129_v10  ;;  %v2330_v17 = vld [vmem:[%s5664_s10 + $0x3f78] sm:$0xff]  ;;  %v2201_v24 = vld [vmem:[%s5664_s10 + $0x3b70] sm:$0xff] }
 0x455   : > { %4737 = vmatpush1.msra.mxu1 %v2257_v32  ;;  %4667 = vmatprep.subr.mxu0 %v2126_v56  ;;  %v2329_v26 = vld [vmem:[%s5664_s10 + $0x3f70] sm:$0xff]  ;;  %v2198_v10 = vld [vmem:[%s5664_s10 + $0x3b58] sm:$0xff] }
 0x456   : > { %4738 = vmatprep.subr.mxu1 %v2254_v12  ;;  %4668 = vmatpush1.msra.mxu0 %v2125_v34  ;;  %v2326_v32 = vld [vmem:[%s5664_s10 + $0x3f58] sm:$0xff]  ;;  %v2197_v56 = vld [vmem:[%s5664_s10 + $0x3b50] sm:$0xff] }
 0x457   : > { %4739 = vmatpush1.msra.mxu1 %v2253_v45  ;;  %4669 = vmatprep.subr.mxu0 %v2122_v21  ;;  %v2325_v12 = vld [vmem:[%s5664_s10 + $0x3f50] sm:$0xff]  ;;  %v2194_v34 = vld [vmem:[%s5664_s10 + $0x3b38] sm:$0xff] }
 0x458   : > { %4740 = vmatprep.subr.mxu1 %v2250_v33  ;;  %4670 = vmatpush1.msra.mxu0 %v2121_v37  ;;  %v2322_v45 = vld [vmem:[%s5664_s10 + $0x3f38] sm:$0xff]  ;;  %v2193_v21 = vld [vmem:[%s5664_s10 + $0x3b30] sm:$0xff] }
 0x459   : > { %4741 = vmatpush1.msra.mxu1 %v2249_v59  ;;  %4671 = vmatprep.subr.mxu0 %v2118_v0  ;;  %v2321_v33 = vld [vmem:[%s5664_s10 + $0x3f30] sm:$0xff]  ;;  %v2190_v37 = vld [vmem:[%s5664_s10 + $0x3b18] sm:$0xff] }
 0x45a   : > { %4742 = vmatprep.subr.mxu1 %v2246_v27  ;;  %4672 = vmatpush1.msra.mxu0 %v2117_v3  ;;  %v2318_v59 = vld [vmem:[%s5664_s10 + $0x3f18] sm:$0xff]  ;;  %v2189_v0 = vld [vmem:[%s5664_s10 + $0x3b10] sm:$0xff] }
 0x45b   : > { %4743 = vmatpush1.msra.mxu1 %v2245_v50  ;;  %4673 = vmatprep.subr.mxu0 %v2114_v35  ;;  %v2317_v27 = vld [vmem:[%s5664_s10 + $0x3f10] sm:$0xff]  ;;  %v2186_v3 = vld [vmem:[%s5664_s10 + $0x3af8] sm:$0xff] }
 0x45c   : > { %4744 = vmatprep.subr.mxu1 %v2242_v36  ;;  %4674 = vmatpush1.msra.mxu0 %v2113_v39  ;;  %v2314_v50 = vld [vmem:[%s5664_s10 + $0x3ef8] sm:$0xff]  ;;  %v2185_v35 = vld [vmem:[%s5664_s10 + $0x3af0] sm:$0xff] }
 0x45d   : > { %4745 = vmatpush1.msra.mxu1 %v2241_v40  ;;  %4675 = vmatprep.subr.mxu0 %v2110_v38  ;;  %v2313_v36 = vld [vmem:[%s5664_s10 + $0x3ef0] sm:$0xff]  ;;  %v2182_v39 = vld [vmem:[%s5664_s10 + $0x3ad8] sm:$0xff] }
 0x45e   : > { %4746 = vmatprep.subr.mxu1 %v2238_v43  ;;  %4676 = vmatpush1.msra.mxu0 %v2109_v19  ;;  %v2310_v40 = vld [vmem:[%s5664_s10 + $0x3ed8] sm:$0xff]  ;;  %v2181_v38 = vld [vmem:[%s5664_s10 + $0x3ad0] sm:$0xff] }
 0x45f   : > { %4747 = vmatpush1.msra.mxu1 %v2237_v46  ;;  %4677 = vmatprep.subr.mxu0 %v2106_v41  ;;  %v2309_v43 = vld [vmem:[%s5664_s10 + $0x3ed0] sm:$0xff]  ;;  %v2178_v19 = vld [vmem:[%s5664_s10 + $0x3ab8] sm:$0xff] }
 0x460   : > { %4748 = vmatprep.subr.mxu1 %v2234_v47  ;;  %4678 = vmatpush1.msra.mxu0 %v2105_v48  ;;  %v2306_v46 = vld [vmem:[%s5664_s10 + $0x3eb8] sm:$0xff]  ;;  %v2177_v41 = vld [vmem:[%s5664_s10 + $0x3ab0] sm:$0xff] }
 0x461   : > { %4749 = vmatpush1.msra.mxu1 %v2233_v29  ;;  %4679 = vmatprep.subr.mxu0 %v2102_v52  ;;  %v2305_v47 = vld [vmem:[%s5664_s10 + $0x3eb0] sm:$0xff]  ;;  %v2174_v48 = vld [vmem:[%s5664_s10 + $0x3a98] sm:$0xff] }
 0x462   : > { %4750 = vmatprep.subr.mxu1 %v2230_v53  ;;  %4680 = vmatpush1.msra.mxu0 %v2101_v55  ;;  %v2302_v29 = vld [vmem:[%s5664_s10 + $0x3e98] sm:$0xff]  ;;  %v2173_v52 = vld [vmem:[%s5664_s10 + $0x3a90] sm:$0xff] }
 0x463   : > { %4751 = vmatpush1.msra.mxu1 %v2229_v57  ;;  %4681 = vmatprep.subr.mxu0 %v2098_v61  ;;  %v2301_v53 = vld [vmem:[%s5664_s10 + $0x3e90] sm:$0xff]  ;;  %v2170_v55 = vld [vmem:[%s5664_s10 + $0x3a78] sm:$0xff] }
 0x464   : > { %4752 = vmatprep.subr.mxu1 %v2226_v62  ;;  %4682 = vmatpush1.msra.mxu0 %v2097_v2  ;;  %v2298_v57 = vld [vmem:[%s5664_s10 + $0x3e78] sm:$0xff]  ;;  %v2169_v61 = vld [vmem:[%s5664_s10 + $0x3a70] sm:$0xff] }
 0x465   : > { %4753 = vmatpush1.msra.mxu1 %v2225_v4  ;;  %4683 = vmatprep.subr.mxu0 %v2094_v6  ;;  %v2297_v62 = vld [vmem:[%s5664_s10 + $0x3e70] sm:$0xff]  ;;  %v2166_v2 = vld [vmem:[%s5664_s10 + $0x3a58] sm:$0xff] }
 0x466   : > { %4754 = vmatprep.subr.mxu1 %v2222_v7  ;;  %4684 = vmatpush1.msra.mxu0 %v2093_v8  ;;  %v2294_v4 = vld [vmem:[%s5664_s10 + $0x3e58] sm:$0xff]  ;;  %v2165_v6 = vld [vmem:[%s5664_s10 + $0x3a50] sm:$0xff] }
 0x467   : > { %4755 = vmatpush1.msra.mxu1 %v2221_v9  ;;  %4685 = vmatprep.subr.mxu0 %v2218_v1  ;;  %v2293_v7 = vld [vmem:[%s5664_s10 + $0x3e50] sm:$0xff]  ;;  %v2162_v8 = vld [vmem:[%s5664_s10 + $0x3a38] sm:$0xff] }
 0x468   : > { %4756 = vmatprep.subr.mxu1 %v2346_v28  ;;  %4686 = vmatpush2.msra.mxu0 %v2217_v51  ;;  %v2290_v9 = vld [vmem:[%s5664_s10 + $0x3e38] sm:$0xff]  ;;  %v2161_v1 = vld [vmem:[%s5664_s10 + $0x3a30] sm:$0xff] }
 0x469   : > { %4757 = vmatpush2.msra.mxu1 %v2345_v13  ;;  %4687 = vmatprep.subr.mxu0 %v2214_v5  ;;  %v2289_v28 = vld [vmem:[%s5664_s10 + $0x3e30] sm:$0xff]  ;;  %v2158_v51 = vld [vmem:[%s5664_s10 + $0x3a18] sm:$0xff] }
 0x46a   : > { %4758 = vmatprep.subr.mxu1 %v2342_v18  ;;  %4688 = vmatpush2.msra.mxu0 %v2213_v14  ;;  %v2286_v13 = vld [vmem:[%s5664_s10 + $0x3e18] sm:$0xff]  ;;  %v2157_v5 = vld [vmem:[%s5664_s10 + $0x3a10] sm:$0xff]  ;;  %v2589_v14 = vpop.f32.mrf.mxu0 }
 0x46b   : > { %4759 = vmatpush2.msra.mxu1 %v2341_v58  ;;  %4689 = vmatprep.subr.mxu0 %v2210_v31  ;;  %v2285_v18 = vld [vmem:[%s5664_s10 + $0x3e10] sm:$0xff]  ;;  %v2660_v58 = vpop.f32.mrf.mxu1 }
 0x46c   : > { %4760 = vmatprep.subr.mxu1 %v2338_v15  ;;  %4690 = vmatpush2.msra.mxu0 %v2209_v25  ;;  %v2591_v31 = vpop.f32.mrf.mxu0 }
 0x46d   : > { %4761 = vmatpush2.msra.mxu1 %v2337_v16  ;;  %4691 = vmatprep.subr.mxu0 %v2206_v11  ;;  %v2662_v25 = vpop.f32.mrf.mxu1 }
 0x46e   : > { %4762 = vmatprep.subr.mxu1 %v2334_v23  ;;  %4692 = vmatpush2.msra.mxu0 %v2205_v30  ;;  %v2731_v15 = vpop.f32.mrf.mxu0 }
 0x46f   : > { %4763 = vmatpush2.msra.mxu1 %v2333_v20  ;;  %4693 = vmatprep.subr.mxu0 %v2202_v22  ;;  %v2802_v16 = vpop.f32.mrf.mxu1 }
 0x470   : > { %4764 = vmatprep.subr.mxu1 %v2330_v17  ;;  %4694 = vmatpush2.msra.mxu0 %v2201_v24  ;;  %v2733_v11 = vpop.f32.mrf.mxu0 }
 0x471   : > { %4765 = vmatpush2.msra.mxu1 %v2329_v26  ;;  %4695 = vmatprep.subr.mxu0 %v2198_v10  ;;  %v2804_v30 = vpop.f32.mrf.mxu1 }
 0x472   : > { %4766 = vmatprep.subr.mxu1 %v2326_v32  ;;  %4696 = vmatpush2.msra.mxu0 %v2197_v56  ;;  %v2873_v23 = vpop.f32.mrf.mxu0 }
 0x473   : > { %4767 = vmatpush2.msra.mxu1 %v2325_v12  ;;  %4697 = vmatprep.subr.mxu0 %v2194_v34  ;;  %v2944_v20 = vpop.f32.mrf.mxu1 }
 0x474   : > { %4768 = vmatprep.subr.mxu1 %v2322_v45  ;;  %4698 = vmatpush2.msra.mxu0 %v2193_v21  ;;  %v2875_v22 = vpop.f32.mrf.mxu0 }
 0x475   : > { %4769 = vmatpush2.msra.mxu1 %v2321_v33  ;;  %4699 = vmatprep.subr.mxu0 %v2190_v37 }
 0x476   : > { %4770 = vmatprep.subr.mxu1 %v2318_v59  ;;  %4700 = vmatpush2.msra.mxu0 %v2189_v0  ;;  %v3015_v17 = vpop.f32.mrf.mxu0 }
 0x477   : > { %4771 = vmatpush2.msra.mxu1 %v2317_v27  ;;  %4701 = vmatprep.subr.mxu0 %v2186_v3 }
 0x478   : > { %4772 = vmatprep.subr.mxu1 %v2314_v50  ;;  %4702 = vmatpush2.msra.mxu0 %v2185_v35  ;;  %v3017_v26 = vpop.f32.mrf.mxu0 }
 0x479   : > { %4773 = vmatpush2.msra.mxu1 %v2313_v36  ;;  %4703 = vmatprep.subr.mxu0 %v2182_v39 }
 0x47a   : > { %4774 = vmatprep.subr.mxu1 %v2310_v40  ;;  %4704 = vmatpush2.msra.mxu0 %v2181_v38  ;;  %v2663_v40 = vadd.f32 %v2662_v25, %v2591_v31 }
 0x47b   : > { %4775 = vmatpush2.msra.mxu1 %v2309_v43  ;;  %4705 = vmatprep.subr.mxu0 %v2178_v19  ;;  %v2661_v43 = vadd.f32 %v2660_v58, %v2589_v14 }
 0x47c   : > { %4776 = vmatprep.subr.mxu1 %v2306_v46  ;;  %4706 = vmatpush2.msra.mxu0 %v2177_v41  ;;  %v2734_v19 = vadd.f32 %v2733_v11, %v2663_v40 }
 0x47d   : > { %4777 = vmatpush2.msra.mxu1 %v2305_v47  ;;  %4707 = vmatprep.subr.mxu0 %v2174_v48  ;;  %v2732_v41 = vadd.f32 %v2731_v15, %v2661_v43 }
 0x47e   : > { %4778 = vmatprep.subr.mxu1 %v2302_v29  ;;  %4708 = vmatpush2.msra.mxu0 %v2173_v52  ;;  %v2805_v52 = vadd.f32 %v2804_v30, %v2734_v19 }
 0x47f   : > { %4779 = vmatpush2.msra.mxu1 %v2301_v53  ;;  %4709 = vmatprep.subr.mxu0 %v2170_v55 }
 0x480   : > { %4780 = vmatprep.subr.mxu1 %v2298_v57  ;;  %4710 = vmatpush2.msra.mxu0 %v2169_v61  ;;  %v2803_v61 = vadd.f32 %v2802_v16, %v2732_v41 }
 0x481   : > { %4781 = vmatpush2.msra.mxu1 %v2297_v62  ;;  %4711 = vmatprep.subr.mxu0 %v2166_v2  ;;  %v2876_v62 = vadd.f32 %v2875_v22, %v2805_v52 }
 0x482   : > { %4782 = vmatprep.subr.mxu1 %v2294_v4  ;;  %4712 = vmatpush2.msra.mxu0 %v2165_v6  ;;  %v2874_v6 = vadd.f32 %v2873_v23, %v2803_v61 }
 0x483   : > { %4783 = vmatpush2.msra.mxu1 %v2293_v7  ;;  %4713 = vmatprep.subr.mxu0 %v2162_v8 }
 0x484   : > { %4784 = vmatprep.subr.mxu1 %v2290_v9  ;;  %4714 = vmatpush2.msra.mxu0 %v2161_v1 }
 0x485   : > { %4785 = vmatpush2.msra.mxu1 %v2289_v28  ;;  %4715 = vmatprep.subr.mxu0 %v2158_v51 }
 0x486   : > { %4786 = vmatprep.subr.mxu1 %v2286_v13  ;;  %4716 = vmatpush2.msra.mxu0 %v2157_v5  ;;  %v2945_v5 = vadd.f32 %v2944_v20, %v2874_v6 }
 0x487   : > { %4717 = vmatprep.mubr.f32.mxu0 %v6845_v60  ;;  %4787 = vmatpush2.msra.mxu1 %v2285_v18  ;;  %v2946_v60 = vpop.f32.mrf.mxu1 }
 0x488   : > { %4788 = vmatprep.mubr.f32.mxu1 %v6851_v63  ;;  %4718 = vmatmul.mubr.f32.vlgmr.msra.gmra.mxu0 %v6830_v42  ;;  %v3157_v63 = vpop.f32.mrf.mxu0  ;;  %v2947_v1 = vadd.f32 %v2946_v60, %v2876_v62  ;;  %v3016_v31 = vadd.f32 %v3015_v17, %v2945_v5 }
 0x489   : > { %4789 = vmatmul.mubr.f32.vlgmr.msra.gmra.mxu1 %v6837_v49  ;;  %v3086_v24 = vpop.f32.mrf.mxu1 }
 0x48a   : > { %v3159_v49 = vpop.f32.mrf.mxu0  ;;  %v3018_v18 = vadd.f32 %v3017_v26, %v2947_v1  ;;  %v3087_v23 = vadd.f32 %v3086_v24, %v3016_v31 }
 0x48b   : > { %v3088_v10 = vpop.f32.mrf.mxu1 }
 0x48c   : > { %v7915_v32 = vpop.f32.mrf.mxu0  ;;  %v3089_v16 = vadd.f32 %v3088_v10, %v3018_v18  ;;  %v3158_v60 = vadd.f32 %v3157_v63, %v3087_v23 }
 0x48d   : > { %v7913_v42 = vpop.f32.mrf.mxu1 }
 0x48e   : > { %v7919_v34 = vpop.f32.mrf.mxu0  ;;  %v3229_v17 = vadd.f32 %v7913_v42, %v3158_v60 }
 0x48f   : > { %v3230_v56 = vpop.f32.mrf.mxu1 }
 0x490   : > { %v7921_v45 = vpop.f32.mrf.mxu0 }
 0x491   : > { %v7917_v12 = vpop.f32.mrf.mxu1 }
 0x492   : > { %v7927_v37 = vpop.f32.mrf.mxu0 }
 0x493   : > { %v7923_v21 = vpop.f32.mrf.mxu1 }
 0x494   : > { %v7929_v59 = vpop.f32.mrf.mxu0 }
 0x495   : > { %v7925_v33 = vpop.f32.mrf.mxu1 }
 0x496   : > { %v7935_v3 = vpop.f32.mrf.mxu0 }
 0x497   : > { %v7931_v0 = vpop.f32.mrf.mxu1 }
 0x498   : > { %v3725_v50 = vpop.f32.mrf.mxu0 }
 0x499   : > { %v7933_v27 = vpop.f32.mrf.mxu1 }
 0x49a   : > { %v3727_v39 = vpop.f32.mrf.mxu0 }
 0x49b   : > { %v7937_v35 = vpop.f32.mrf.mxu1 }
 0x49c   : > { %v3867_v38 = vpop.f32.mrf.mxu0 }
 0x49d   : > { %v3796_v36 = vpop.f32.mrf.mxu1 }
 0x49e   : > { %v3797_v47 = vadd.f32 %v3796_v36, %v3725_v50  ;;  %v3869_v29 = vpop.f32.mrf.mxu0  ;;  %v3160_v36 = vadd.f32 %v3159_v49, %v3089_v16  ;;  %v290_v16 = vld [vmem:[#allocation2] sm:$0xff] }
 0x49f   : > { %v3798_v46 = vpop.f32.mrf.mxu1 }
 0x4a0   : > { %v3799_v53 = vadd.f32 %v3798_v46, %v3727_v39  ;;  %v3868_v55 = vadd.f32 %v3867_v38, %v3797_v47  ;;  %v4009_v57 = vpop.f32.mrf.mxu0  ;;  %v3231_v20 = vadd.f32 %v3230_v56, %v3160_v36 }
 0x4a1   : > { %v3938_v48 = vpop.f32.mrf.mxu1 }
 0x4a2   : > { %v3870_v2 = vadd.f32 %v3869_v29, %v3799_v53  ;;  %v3939_v7 = vadd.f32 %v3938_v48, %v3868_v55  ;;  %v4011_v9 = vpop.f32.mrf.mxu0  ;;  %v3302_v47 = vadd.f32 %v7919_v34, %v3231_v20  ;;  %v3300_v29 = vadd.f32 %v7915_v32, %v3229_v17 }
 0x4a3   : > { %v3940_v4 = vpop.f32.mrf.mxu1 }
 0x4a4   : > { %v3941_v28 = vadd.f32 %v3940_v4, %v3870_v2  ;;  %v4010_v51 = vadd.f32 %v4009_v57, %v3939_v7  ;;  %v4151_v13 = vpop.f32.mrf.mxu0  ;;  %v3373_v63 = vadd.f32 %v7923_v21, %v3302_v47  ;;  %v3371_v56 = vadd.f32 %v7917_v12, %v3300_v29 }
 0x4a5   : > { %v4080_v8 = vpop.f32.mrf.mxu1 }
 0x4a6   : > { %v4012_v14 = vadd.f32 %v4011_v9, %v3941_v28  ;;  %v4081_v15 = vadd.f32 %v4080_v8, %v4010_v51  ;;  %v4153_v11 = vpop.f32.mrf.mxu0  ;;  %v3444_v61 = vadd.f32 %v7927_v37, %v3373_v63  ;;  %v3442_v34 = vadd.f32 %v7921_v45, %v3371_v56 }
 0x4a7   : > { %v4082_v58 = vpop.f32.mrf.mxu1 }
 0x4a8   : > { %v4083_v30 = vadd.f32 %v4082_v58, %v4012_v14  ;;  %v4152_v22 = vadd.f32 %v4151_v13, %v4081_v15  ;;  %v4293_v50 = vpop.f32.mrf.mxu0  ;;  %v3515_v32 = vadd.f32 %v7931_v0, %v3444_v61  ;;  %v3513_v21 = vadd.f32 %v7925_v33, %v3442_v34 }
 0x4a9   : > { %v4222_v25 = vpop.f32.mrf.mxu1 }
 0x4aa   : > { %v4154_v39 = vadd.f32 %v4153_v11, %v4083_v30  ;;  %v4223_v38 = vadd.f32 %v4222_v25, %v4152_v22  ;;  %v4295_v19 = vpop.f32.mrf.mxu0  ;;  %v3586_v9 = vadd.f32 %v7935_v3, %v3515_v32  ;;  %v3584_v12 = vadd.f32 %v7929_v59, %v3513_v21 }
 0x4ab   : > { %v4224_v40 = vpop.f32.mrf.mxu1 }
 0x4ac   : > { %v4225_v26 = vadd.f32 %v4224_v40, %v4154_v39  ;;  %v4294_v46 = vadd.f32 %v4293_v50, %v4223_v38  ;;  %v3657_v45 = vadd.f32 %v7937_v35, %v3586_v9  ;;  %v3655_v0 = vadd.f32 %v7933_v27, %v3584_v12 }
 0x4ad   : > { %v4364_v43 = vpop.f32.mrf.mxu1 }
 0x4ae   : > { %v4296_v10 = vadd.f32 %v4295_v19, %v4225_v26  ;;  %v4365_v24 = vadd.f32 %v4364_v43, %v4294_v46  ;;  %v4799_v15 = vcombine.low %v3655_v0, %v3657_v45 }
 0x4af   : > { %v4366_v48 = vpop.f32.mrf.mxu1 }
 0x4b0   : > { %v4367_v53 = vadd.f32 %v4366_v48, %v4296_v10  ;;  %v4807_v11 = vrot.slane %v4799_v15, %v5790_v54 }
 0x4c4   : > { %v4435_v41 = vpop.f32.mrf.mxu0 }
 0x4c5   : > { %v4436_v55 = vadd.f32 %v4435_v41, %v4365_v24 }
 0x4c6   : > { %v4506_v49 = vpop.f32.mrf.mxu1  ;;  %v4437_v52 = vpop.f32.mrf.mxu0 }
 0x4c7   : > { %v4438_v62 = vadd.f32 %v4437_v52, %v4367_v53  ;;  %v4507_v2 = vadd.f32 %v4506_v49, %v4436_v55 }
 0x4c8   : > { %v4508_v42 = vpop.f32.mrf.mxu1 }
 0x4c9   : > { %v4509_v7 = vadd.f32 %v4508_v42, %v4438_v62 }
 0x506   : > { %v4577_v57 = vpop.f32.mrf.mxu0 }
 0x507   : > { %v4578_v8 = vadd.f32 %v4577_v57, %v4507_v2 }
 0x508   : > { %v4648_v4 = vpop.f32.mrf.mxu1  ;;  %v4579_v6 = vpop.f32.mrf.mxu0 }
 0x509   : > { %v4580_v1 = vadd.f32 %v4579_v6, %v4509_v7  ;;  %v4649_v37 = vadd.f32 %v4648_v4, %v4578_v8 }
 0x50a   : > { %v4650_v28 = vpop.f32.mrf.mxu1 }
 0x50b   : > { %v4651_v5 = vadd.f32 %v4650_v28, %v4580_v1 }
 0x548   : > { %v4719_v51 = vpop.f32.mrf.mxu0 }
 0x549   : > { %v4790_v13 = vpop.f32.mrf.mxu1  ;;  %v4720_v18 = vadd.f32 %v4719_v51, %v4649_v37 }
 0x54a   : > { %v4721_v14 = vpop.f32.mrf.mxu0 }
 0x54b   : > { %v4722_v58 = vadd.f32 %v4721_v14, %v4651_v5  ;;  %v4792_v31 = vpop.f32.mrf.mxu1  ;;  %v4791_v33 = vadd.f32 %v4790_v13, %v4720_v18 }
 0x54d   : > { %v4793_v25 = vadd.f32 %v4792_v31, %v4722_v58 }
 0x54f   : > { %v4800_v3 = vcombine.low %v4791_v33, %v4793_v25 }
 0x551   : > { %v4814_v59 = vrot.slane %v4800_v3, %v5790_v54 }
 0x553   : > { %v4815_v30 = vcombine.low %v4807_v11, %v4814_v59  ;;  %4822 = sbr.rel (%p5192_p3) target bundleno = 1638 (0x666), region = 60 }
 0x555   : > { %v4817_v22 = vadd.f32 %v4815_v30, %v290_v16 }
 0x557   : > { %4818 = vst [vmem:[#allocation2] sm:$0xff] %v4817_v22 }
 0x558   : > { %v4895_v27 = vld [vmem:[%s8174_s3 + $0xf8] sm:$0xff]  ;;  %v4894_v36 = vld [vmem:[%s8174_s3 + $0xf0] sm:$0xff]  ;;  %v4893_v38 = vld [vmem:[%s8174_s3 + $0xe8] sm:$0xff]  ;;  %v4828_v12 = vsub.s32 0, %v5778_v44  ;;  %v4832_v37 = vsub.s32 1, %v5778_v44  ;;  %v4836_v51 = vsub.s32 2, %v5778_v44 }
 0x559   : > { %v4927_v35 = vld [vmem:[%s8174_s3 + $0x1f8] sm:$0xff]  ;;  %5200 = vmatprep.subr.mxu0 %v4895_v27  ;;  %v4926_v39 = vld [vmem:[%s8174_s3 + $0x1f0] sm:$0xff]  ;;  %v4925_v43 = vld [vmem:[%s8174_s3 + $0x1e8] sm:$0xff]  ;;  %v4840_v5 = vsub.s32 3, %v5778_v44  ;;  %vm5103_vm1 = vcmask 1024  }
 0x55a   : > { %v4879_v50 = vld [vmem:[%s8174_s3 + $0x78] sm:$0xff]  ;;  %5235 = vmatprep.subr.mxu1 %v4927_v35  ;;  %v4878_v40 = vld [vmem:[%s8174_s3 + $0x70] sm:$0xff]  ;;  %v4877_v19 = vld [vmem:[%s8174_s3 + $0x68] sm:$0xff] }
 0x55b   : > { %v4911_v23 = vld [vmem:[%s8174_s3 + $0x178] sm:$0xff]  ;;  %5201 = vmatpush3.msra.mxu0 %v4879_v50  ;;  %v4910_v60 = vld [vmem:[%s8174_s3 + $0x170] sm:$0xff]  ;;  %v4909_v20 = vld [vmem:[%s8174_s3 + $0x168] sm:$0xff] }
 0x55c   : > { %5236 = vmatpush3.msra.mxu1 %v4911_v23  ;;  %5202 = vmatprep.subr.mxu0 %v4894_v36  ;;  %v4892_v26 = vld [vmem:[%s8174_s3 + $0xe0] sm:$0xff]  ;;  %v4891_v47 = vld [vmem:[%s8174_s3 + $0xd8] sm:$0xff]  ;;  %v4890_v24 = vld [vmem:[%s8174_s3 + $0xd0] sm:$0xff] }
 0x55d   : > { %5237 = vmatprep.subr.mxu1 %v4926_v39  ;;  %5203 = vmatpush3.msra.mxu0 %v4878_v40  ;;  %v4924_v46 = vld [vmem:[%s8174_s3 + $0x1e0] sm:$0xff]  ;;  %v4923_v10 = vld [vmem:[%s8174_s3 + $0x1d8] sm:$0xff]  ;;  %v4922_v49 = vld [vmem:[%s8174_s3 + $0x1d0] sm:$0xff] }
 0x55e   : > { %5238 = vmatpush3.msra.mxu1 %v4910_v60  ;;  %5204 = vmatprep.subr.mxu0 %v4893_v38  ;;  %v4876_v41 = vld [vmem:[%s8174_s3 + $0x60] sm:$0xff]  ;;  %v4875_v48 = vld [vmem:[%s8174_s3 + $0x58] sm:$0xff]  ;;  %v4874_v52 = vld [vmem:[%s8174_s3 + $0x50] sm:$0xff] }
 0x55f   : > { %5239 = vmatprep.subr.mxu1 %v4925_v43  ;;  %v4908_v17 = vld [vmem:[%s8174_s3 + $0x160] sm:$0xff]  ;;  %5205 = vmatpush3.msra.mxu0 %v4877_v19  ;;  %v4907_v29 = vld [vmem:[%s8174_s3 + $0x158] sm:$0xff]  ;;  %v4906_v63 = vld [vmem:[%s8174_s3 + $0x150] sm:$0xff] }
 0x560   : > { %5240 = vmatpush3.msra.mxu1 %v4909_v20  ;;  %5206 = vmatprep.subr.mxu0 %v4892_v26  ;;  %v4889_v53 = vld [vmem:[%s8174_s3 + $0xc8] sm:$0xff]  ;;  %v4888_v61 = vld [vmem:[%s8174_s3 + $0xc0] sm:$0xff]  ;;  %v4887_v2 = vld [vmem:[%s8174_s3 + $0xb8] sm:$0xff] }
 0x561   : > { %5241 = vmatprep.subr.mxu1 %v4924_v46  ;;  %5207 = vmatpush3.msra.mxu0 %v4876_v41  ;;  %v4921_v55 = vld [vmem:[%s8174_s3 + $0x1c8] sm:$0xff]  ;;  %v4920_v62 = vld [vmem:[%s8174_s3 + $0x1c0] sm:$0xff]  ;;  %v4919_v4 = vld [vmem:[%s8174_s3 + $0x1b8] sm:$0xff] }
 0x562   : > { %5242 = vmatpush3.msra.mxu1 %v4908_v17  ;;  %5208 = vmatprep.subr.mxu0 %v4891_v47  ;;  %v4873_v57 = vld [vmem:[%s8174_s3 + $0x48] sm:$0xff]  ;;  %v4872_v42 = vld [vmem:[%s8174_s3 + $0x40] sm:$0xff]  ;;  %v4871_v6 = vld [vmem:[%s8174_s3 + $0x38] sm:$0xff] }
 0x563   : > { %5243 = vmatprep.subr.mxu1 %v4923_v10  ;;  %5209 = vmatpush3.msra.mxu0 %v4875_v48  ;;  %v4905_v56 = vld [vmem:[%s8174_s3 + $0x148] sm:$0xff]  ;;  %v4904_v34 = vld [vmem:[%s8174_s3 + $0x140] sm:$0xff]  ;;  %v4903_v32 = vld [vmem:[%s8174_s3 + $0x138] sm:$0xff] }
 0x564   : > { %5244 = vmatpush3.msra.mxu1 %v4907_v29  ;;  %5210 = vmatprep.subr.mxu0 %v4890_v24  ;;  %v4886_v7 = vld [vmem:[%s8174_s3 + $0xb0] sm:$0xff]  ;;  %v4885_v1 = vld [vmem:[%s8174_s3 + $0xa8] sm:$0xff]  ;;  %v4884_v18 = vld [vmem:[%s8174_s3 + $0xa0] sm:$0xff] }
 0x565   : > { %5245 = vmatprep.subr.mxu1 %v4922_v49  ;;  %5211 = vmatpush3.msra.mxu0 %v4874_v52  ;;  %v4918_v8 = vld [vmem:[%s8174_s3 + $0x1b0] sm:$0xff]  ;;  %v4917_v28 = vld [vmem:[%s8174_s3 + $0x1a8] sm:$0xff]  ;;  %v4916_v14 = vld [vmem:[%s8174_s3 + $0x1a0] sm:$0xff] }
 0x566   : > { %5246 = vmatpush3.msra.mxu1 %v4906_v63  ;;  %5212 = vmatprep.subr.mxu0 %v4889_v53  ;;  %v4870_v21 = vld [vmem:[%s8174_s3 + $0x30] sm:$0xff]  ;;  %v4869_v13 = vld [vmem:[%s8174_s3 + $0x28] sm:$0xff]  ;;  %v4868_v0 = vld [vmem:[%s8174_s3 + $0x20] sm:$0xff] }
 0x567   : > { %5247 = vmatprep.subr.mxu1 %v4921_v55  ;;  %5213 = vmatpush3.msra.mxu0 %v4873_v57  ;;  %v4902_v9 = vld [vmem:[%s8174_s3 + $0x130] sm:$0xff]  ;;  %v4901_v45 = vld [vmem:[%s8174_s3 + $0x128] sm:$0xff]  ;;  %v4900_v44 = vld [vmem:[%s8174_s3 + $0x120] sm:$0xff] }
 0x568   : > { %5248 = vmatpush3.msra.mxu1 %v4905_v56  ;;  %5214 = vmatprep.subr.mxu0 %v4888_v61  ;;  %v4824_v58 = vld [vmem:[#allocation8] sm:$0xf]  ;;  %v4883_v31 = vld [vmem:[%s8174_s3 + $0x98] sm:$0xff]  ;;  %v4882_v30 = vld [vmem:[%s8174_s3 + $0x90] sm:$0xff] }
 0x569   : > { %5249 = vmatprep.subr.mxu1 %v4920_v62  ;;  %5215 = vmatpush3.msra.mxu0 %v4872_v42  ;;  %v4915_v15 = vld [vmem:[%s8174_s3 + $0x198] sm:$0xff]  ;;  %v4829_v33 = vrot.slane %v4824_v58, %v4828_v12  ;;  %v4833_v25 = vrot.slane %v4824_v58, %v4832_v37  ;;  %v4837_v3 = vrot.slane %v4824_v58, %v4836_v51  ;;  %v4914_v22 = vld [vmem:[%s8174_s3 + $0x190] sm:$0xff]  ;;  %v4881_v36 = vld [vmem:[%s8174_s3 + $0x88] sm:$0xff] }
 0x56a   : > { %5250 = vmatpush3.msra.mxu1 %v4904_v34  ;;  %5216 = vmatprep.subr.mxu0 %v4887_v2  ;;  %v4867_v11 = vld [vmem:[%s8174_s3 + $0x18] sm:$0xff]  ;;  %v4841_v16 = vrot.slane %v4824_v58, %v4840_v5  ;;  %v4866_v35 = vld [vmem:[%s8174_s3 + $0x10] sm:$0xff]  ;;  %v4913_v39 = vld [vmem:[%s8174_s3 + $0x188] sm:$0xff] }
 0x56b   : > { %5251 = vmatprep.subr.mxu1 %v4919_v4  ;;  %5217 = vmatpush3.msra.mxu0 %v4871_v6  ;;  %v4899_v59 = vld [vmem:[%s8174_s3 + $0x118] sm:$0xff]  ;;  %v4842_v27 = vcombine.low %v4829_v33, %v4833_v25  ;;  %v4898_v50 = vld [vmem:[%s8174_s3 + $0x110] sm:$0xff]  ;;  %v4865_v60 = vld [vmem:[%s8174_s3 + $0x8] sm:$0xff] }
 0x56c   : > { %5252 = vmatpush3.msra.mxu1 %v4903_v32  ;;  %5218 = vmatprep.subr.mxu0 %v4886_v7  ;;  %v4843_v23 = vcombine.low %v4837_v3, %v4841_v16  ;;  %v4897_v38 = vld [vmem:[%s8174_s3 + $0x108] sm:$0xff]  ;;  %v4880_v19 = vld [vmem:[%s8174_s3 + $0x80] sm:$0xff] }
 0x56d   : > { %5253 = vmatprep.subr.mxu1 %v4918_v8  ;;  %5219 = vmatpush3.msra.mxu0 %v4870_v21  ;;  %v4850_v40 = vrot.slane %v4842_v27, %v5790_v54  ;;  %v4912_v20 = vld [vmem:[%s8174_s3 + $0x180] sm:$0xff]  ;;  %v5193_v57 = vld [vmem:[#allocation3] ss:$0 sm:$0xff] }
 0x56e   : > { %5254 = vmatpush3.msra.mxu1 %v4902_v9  ;;  %5220 = vmatprep.subr.mxu0 %v4885_v1  ;;  %v4857_v43 = vrot.slane %v4843_v23, %v5790_v54  ;;  %v4823_v26 = vld [vmem:[#allocation2] sm:$0xff] }
 0x56f   : > { %5255 = vmatprep.subr.mxu1 %v4917_v28  ;;  %5221 = vmatpush3.msra.mxu0 %v4869_v13  ;;  %v4864_v46 = vld [vmem:[%s8174_s3] sm:$0xff] }
 0x570   : > { %5256 = vmatpush3.msra.mxu1 %v4901_v45  ;;  %5222 = vmatprep.subr.mxu0 %v4884_v18  ;;  %v4858_v41 = vcombine.low %v4850_v40, %v4857_v43  ;;  %v4896_v17 = vld [vmem:[%s8174_s3 + $0x100] sm:$0xff] }
 0x571   : > { %5257 = vmatprep.subr.mxu1 %v4916_v14  ;;  %5223 = vmatpush3.msra.mxu0 %v4868_v0 }
 0x572   : > { %5258 = vmatpush3.msra.mxu1 %v4900_v44  ;;  %5224 = vmatprep.subr.mxu0 %v4883_v31  ;;  %v4860_v47 = vadd.f32 %v4858_v41, %v4823_v26 }
 0x573   : > { %5259 = vmatprep.subr.mxu1 %v4915_v15  ;;  %5225 = vmatpush3.msra.mxu0 %v4867_v11 }
 0x574   : > { %5260 = vmatpush3.msra.mxu1 %v4899_v59  ;;  %5226 = vmatprep.subr.mxu0 %v4882_v30  ;;  %vm4861_vm0 = vcmp.gt.f32.partialorder %v4860_v47, 0.0  ;;  %v4862_v10 = vmul.f32 0.1, %v4860_v47 }
 0x575   : > { %5261 = vmatprep.subr.mxu1 %v4914_v22  ;;  %5227 = vmatpush3.msra.mxu0 %v4866_v35 }
 0x576   : > { %5262 = vmatpush3.msra.mxu1 %v4898_v50  ;;  %5228 = vmatprep.subr.mxu0 %v4881_v36  ;;  %v4863_v48 = vsel %vm4861_vm0, %v4860_v47, %v4862_v10 }
 0x577   : > { %5263 = vmatprep.subr.mxu1 %v4913_v39  ;;  %5229 = vmatpush3.msra.mxu0 %v4865_v60  ;;  %v4943_v29 = vrot.slane %v4863_v48, %v5790_v54  ;;  %v4936_v24 = vcombine.high %v4863_v48, %v4863_v48 }
 0x578   : > { %5264 = vmatpush3.msra.mxu1 %v4897_v38  ;;  %5230 = vmatprep.subr.mxu0 %v4880_v19 }
 0x579   : > { %5265 = vmatprep.subr.mxu1 %v4912_v20  ;;  %5231 = vmatpush3.msra.mxu0 %v4864_v46  ;;  %v4951_v49 = vcombine.high %v4943_v29, %v4943_v29  ;;  %v4950_v52 = vrot.slane %v4936_v24, %v5790_v54 }
 0x57a   : > { %5266 = vmatpush3.msra.mxu1 %v4896_v17 }
 0x57b   : > { %5021 = vmatprep.mubr.f32.mxu0 %v4951_v49  ;;  %v4952_v63 = vcombine.high %v4950_v52, %v4950_v52 }
 0x57c   : > { %5022 = vmatmul.mubr.f32.vlgmr.msra.gmra.mxu0 %v4943_v29 }
 0x57d   : > { %5091 = vmatprep.mubr.f32.mxu1 %v4952_v63 }
 0x57e   : > { %5092 = vmatmul.mubr.f32.vlgmr.msra.gmra.mxu1 %v4950_v52 }
 0x63c   : > { %v5232_v53 = vpop.f32.mrf.mxu0 }
 0x63e   : > { %v5267_v55 = vpop.f32.mrf.mxu1  ;;  %v5233_v56 = vpop.f32.mrf.mxu0 }
 0x63f   : > { %v5234_v61 = vadd.f32 %v5233_v56, %v5232_v53 }
 0x640   : > { %v5268_v62 = vpop.f32.mrf.mxu1 }
 0x641   : > { %v5024_v42 = vadd.f32 %v5234_v61, %v5193_v57  ;;  %v5269_v34 = vadd.f32 %v5268_v62, %v5267_v55 }
 0x643   : > { %v5094_v2 = vadd.f32 %v5269_v34, %v5024_v42 }
 0x645   : > { %v5194_v4 = vmul.f32 -1.442695, %v5094_v2 }
 0x647   : > { %5337 = vpow2.f32 %v5194_v4 }
 0x654   : > { %v5338_v6 = vpop.eup %5337 }
 0x655   : > { %v5100_v32 = vadd.f32 1.0, %v5338_v6 }
 0x657   : > { %5339 = vrcp.f32 %v5100_v32 }
 0x664   : > { %v5340_v54 = vpop.eup %5339 }
 0x665   : > { %5104 = vst.msk [vmem:[%s8176_s5] sm:$0x3] %vm5103_vm1, %v5340_v54 }
 0x666 PF: > { %p20_p2 = scmp.ge.s32.totalorder %s5529_s24, 5   ;;  %s8187_s20 = smov %s5457_s21 }
 0x667   : > { %s8188_s21 = smov %s5461_s22  ;;  %s8189_s22 = smov %s5539_s27 }
 0x668   : > { %s8190_s23 = smov %s5529_s24  ;;  %22 = sbr.rel (!%p20_p2) target bundleno = 8 (0x8), region = 101 }
 0x66d   :  { %5116 = vsyncpa [#allocation5], 1 }
 0x66e   :  { %5118 = vsyncpa [#allocation5 + $0x1], 1 }
 0x66f   :  { %5119 = vsyncpa [#allocation7], 1 }
 0x670   :  { %5121 = vsyncpa [#allocation7 + $0x1], 1 }

</bundles_post_ra>
